<compile_context>
chip_gen: v6e
topology: v6e:2x2x1
jax: 0.10.0
libtpu: 0.0.40
codegen_flags: <defaults>
</compile_context>

<pallas_src>
import functools
import math

import jax
import jax.numpy as jnp
from jax.experimental import pallas as pl
from jax.experimental.pallas import tpu as pltpu


# ----------------------------------------------------------------------------
# Shared layer-norm (used both in the plain-JAX reference and inside kernels).
# ----------------------------------------------------------------------------
def _layer_norm(x, g, b, eps=1e-5):
    mu = jnp.mean(x, axis=-1, keepdims=True)
    xc = x - mu
    var = jnp.mean(xc * xc, axis=-1, keepdims=True)
    return xc * jax.lax.rsqrt(var + eps) * g + b


# ----------------------------------------------------------------------------
# Pallas kernel 1: pairwise MLP kernel -> dro   (lane-packed along the i axis)
#   dro[b, i, j] = mlp(concat(Phi_A[b, i], Phi_B[b, j]))
#   mlp = Linear(2D->D) ReLU Linear(D->D) ReLU Linear(D->1)
#   The concat-Linear is split as A @ W1a + B @ W1b + b1; the B-half is
#   precomputed in the wrapper.  `pack` consecutive i-rows share one 128-lane
#   vreg, so every matmul runs with K = N = pack*D = 128 on the MXU.
# ----------------------------------------------------------------------------
def _dro_kernel(ap_ref, hbt_ref, w1_ref, b1_ref, w2_ref, b2_ref, w3_ref,
                b3_ref, o_ref):
    Ap = ap_ref[0]                       # (tA/pack, pack*D) bf16  packed Phi_A rows
    HBt = hbt_ref[0]                     # (M, pack*D)       f32   Phi_B @ W1b, tiled
    pack, D4 = w3_ref.shape              # (pack, pack*D)

    # layer 1 (A-half): packed rows @ block-diagonal W1a; bias folded here only.
    ha = jnp.dot(Ap, w1_ref[...],
                 preferred_element_type=jnp.float32) + b1_ref[...]   # (tq, pack*D) f32
    h1 = jnp.maximum(ha[:, None, :] + HBt[None, :, :], 0.0)          # (tq, M, pack*D)
    tq, M, _ = h1.shape

    # layer 2: one dense K=N=pack*D MXU matmul against block-diagonal W2.
    h2 = jnp.maximum(
        jnp.dot(h1.reshape(tq * M, D4).astype(jnp.bfloat16), w2_ref[...],
                preferred_element_type=jnp.float32) + b2_ref[...], 0.0)
    h2 = h2.reshape(tq, M, D4).astype(jnp.bfloat16)                  # (tq, M, pack*D)

    # layer 3: fold the w3 reduction into a batched MXU contraction whose
    # output is lane-dense along M; (tq, pack, M) -> (tA, M) is a free
    # leading-dim merge (no lane relayout, no masked stores).
    w3b = jnp.broadcast_to(w3_ref[...], (tq, pack, D4))              # bf16
    out = jnp.einsum('tpk,tmk->tpm', w3b, h2,
                     preferred_element_type=jnp.float32)             # (tq, pack, M)
    o_ref[0] = out.reshape(tq * pack, M) + b3_ref[...]


def pallas_pairwise_mlp(kp, Phi_A, Phi_B, tA=128):
    B, N, D = Phi_A.shape
    M = Phi_B.shape[1]
    pack = (128 // D) if (D <= 128 and 128 % D == 0) else 1
    tA = min(tA, N)
    assert N % tA == 0 and tA % pack == 0 and N % pack == 0
    tq = tA // pack
    D4 = pack * D

    eye = jnp.eye(pack, dtype=jnp.float32)
    W1a_bd = jnp.kron(eye, kp['W1a']).astype(jnp.bfloat16)      # (pack*D, pack*D)
    W2_bd = jnp.kron(eye, kp['W2']).astype(jnp.bfloat16)        # (pack*D, pack*D)
    w3_bd = jnp.kron(eye, kp['w3']).astype(jnp.bfloat16)        # (pack, pack*D)
    b1_t = jnp.tile(kp['b1'], (1, pack))                        # (1, pack*D) f32
    b2_t = jnp.tile(kp['b2'], (1, pack))                        # (1, pack*D) f32

    # Hoist the B-half of layer 1 out of the kernel (depends only on b/j),
    # pre-tiled so the kernel never touches W1b.
    HBt = jnp.tile(Phi_B @ kp['W1b'], (1, 1, pack))             # (B, M, pack*D) f32
    # Row-packing of Phi_A is a free row-major view.
    Ap = Phi_A.astype(jnp.bfloat16).reshape(B, N // pack, D4)

    out = pl.pallas_call(
        _dro_kernel,
        out_shape=jax.ShapeDtypeStruct((B, N, M), jnp.float32),
        grid=(B, N // tA),
        in_specs=[
            pl.BlockSpec((1, tq, D4), lambda b, i: (b, i, 0)),   # packed Phi_A tile
            pl.BlockSpec((1, M, D4), lambda b, i: (b, 0, 0)),    # tiled Phi_B @ W1b
            pl.BlockSpec((D4, D4), lambda b, i: (0, 0)),         # block-diag W1a
            pl.BlockSpec((1, D4), lambda b, i: (0, 0)),          # tiled b1
            pl.BlockSpec((D4, D4), lambda b, i: (0, 0)),         # block-diag W2
            pl.BlockSpec((1, D4), lambda b, i: (0, 0)),          # tiled b2
            pl.BlockSpec((pack, D4), lambda b, i: (0, 0)),       # block-struct w3
            pl.BlockSpec((1, 1), lambda b, i: (0, 0)),           # b3
        ],
        out_specs=pl.BlockSpec((1, tA, M), lambda b, i: (b, i, 0)),  # lane-dense
        compiler_params=pltpu.CompilerParams(
            dimension_semantics=("parallel", "parallel")),
    )(Ap, HBt, W1a_bd, b1_t, W2_bd, b2_t, w3_bd, kp['b3'])
    return out                                                   # (B, N, M)


def reference_pairwise_mlp(kp, Phi_A, Phi_B):
    ha = Phi_A @ kp['W1a'] + kp['b1']
    hb = Phi_B @ kp['W1b']
    h1 = jax.nn.relu(ha[:, :, None, :] + hb[:, None, :, :])
    h2 = jax.nn.relu(h1 @ kp['W2'] + kp['b2'])
    return jnp.sum(h2 * kp['w3'], axis=-1) + kp['b3'][0, 0]


# ----------------------------------------------------------------------------
# Pallas kernel 2: fused cross-attention transformer (all n_blocks in one call)
#   per block:  a = softmax((x Wq)(tgt Wk)^T) (tgt Wv) Wo
#               x = LN(x + a);  x = LN(x + FFN(x))
#   grid = (B, n_blocks); the running embedding lives in the output VMEM block
#   across the "arbitrary" block axis (standard accumulator pattern).
# ----------------------------------------------------------------------------
def _tf_kernel(src_ref, tgt_ref, wq_ref, wk_ref, wv_ref, wo_ref,
               g1_ref, b1_ref, wf1_ref, bf1_ref, wf2_ref, bf2_ref,
               g2_ref, b2_ref, o_ref, *, m_actual):
    kb = pl.program_id(1)

    @pl.when(kb == 0)
    def _():
        o_ref[0] = src_ref[0]

    x = o_ref[0]                                       # (N, D) f32 running embedding
    tgt = tgt_ref[0]                                   # (Mp, D) bf16 (padded)

    # projections (bf16 MXU, f32 accumulation); 1/sqrt(D) folded into Wq.
    q = jnp.dot(x.astype(jnp.bfloat16), wq_ref[0],
                preferred_element_type=jnp.float32)    # (N, D)
    k = jnp.dot(tgt, wk_ref[0], preferred_element_type=jnp.float32)
    v = jnp.dot(tgt, wv_ref[0], preferred_element_type=jnp.float32)

    s = jax.lax.dot_general(q.astype(jnp.bfloat16), k.astype(jnp.bfloat16),
                            (((1,), (1,)), ((), ())),
                            preferred_element_type=jnp.float32)      # (N, Mp)
    Mp = s.shape[-1]
    if m_actual != Mp:                                 # static: mask pad tokens
        col = jax.lax.broadcasted_iota(jnp.int32, s.shape, 1)
        s = jnp.where(col < m_actual, s, -1e30)

    mx = jnp.max(s, axis=-1, keepdims=True)
    p = jnp.exp(s - mx)
    attn = p * pl.reciprocal(jnp.sum(p, axis=-1, keepdims=True), approx=True)

    ao = jnp.dot(attn.astype(jnp.bfloat16), v.astype(jnp.bfloat16),
                 preferred_element_type=jnp.float32)                 # (N, D)
    a = jnp.dot(ao.astype(jnp.bfloat16), wo_ref[0],
                preferred_element_type=jnp.float32)

    x1 = _layer_norm(x + a, g1_ref[0], b1_ref[0])
    h = jnp.maximum(
        jnp.dot(x1.astype(jnp.bfloat16), wf1_ref[0],
                preferred_element_type=jnp.float32) + bf1_ref[0], 0.0)
    h = jnp.dot(h.astype(jnp.bfloat16), wf2_ref[0],
                preferred_element_type=jnp.float32) + bf2_ref[0]
    o_ref[0] = _layer_norm(x1 + h, g2_ref[0], b2_ref[0])


def pallas_transformer(tp, src, tgt):
    B, N, D = src.shape
    M = tgt.shape[1]
    Mp = ((M + 15) // 16) * 16          # multiple of 16 rows: full bf16 sublane pairs
    tgt16 = tgt.astype(jnp.bfloat16)
    if Mp != M:
        tgt16 = jnp.pad(tgt16, ((0, 0), (0, Mp - M), (0, 0)))

    nb = len(tp['blocks'])
    scale = 1.0 / math.sqrt(D)
    stack = lambda key: jnp.stack([blk[key] for blk in tp['blocks']])
    Wq = (stack('Wq') * scale).astype(jnp.bfloat16)     # (nb, D, D), scale folded in
    Wk = stack('Wk').astype(jnp.bfloat16)
    Wv = stack('Wv').astype(jnp.bfloat16)
    Wo = stack('Wo').astype(jnp.bfloat16)
    Wf1 = stack('Wf1').astype(jnp.bfloat16)             # (nb, D, 2D)
    Wf2 = stack('Wf2').astype(jnp.bfloat16)             # (nb, 2D, D)
    g1 = stack('ln1_g')[:, None, :]                     # (nb, 1, D) f32
    b1 = stack('ln1_b')[:, None, :]
    bf1 = stack('bf1')[:, None, :]                      # (nb, 1, 2D)
    bf2 = stack('bf2')[:, None, :]
    g2 = stack('ln2_g')[:, None, :]
    b2 = stack('ln2_b')[:, None, :]

    wspec = lambda a, c: pl.BlockSpec((1, a, c), lambda bb, kk: (kk, 0, 0))
    return pl.pallas_call(
        functools.partial(_tf_kernel, m_actual=M),
        out_shape=jax.ShapeDtypeStruct((B, N, D), jnp.float32),
        grid=(B, nb),
        in_specs=[
            pl.BlockSpec((1, N, D), lambda bb, kk: (bb, 0, 0)),   # src
            pl.BlockSpec((1, Mp, D), lambda bb, kk: (bb, 0, 0)),  # padded tgt (bf16)
            wspec(D, D), wspec(D, D), wspec(D, D), wspec(D, D),   # Wq Wk Wv Wo
            wspec(1, D), wspec(1, D),                              # ln1 g/b
            wspec(D, 2 * D), wspec(1, 2 * D),                      # Wf1 bf1
            wspec(2 * D, D), wspec(1, D),                          # Wf2 bf2
            wspec(1, D), wspec(1, D),                              # ln2 g/b
        ],
        out_specs=pl.BlockSpec((1, N, D), lambda bb, kk: (bb, 0, 0)),
        compiler_params=pltpu.CompilerParams(
            dimension_semantics=("parallel", "arbitrary")),
    )(src, tgt16, Wq, Wk, Wv, Wo, g1, b1, Wf1, bf1, Wf2, bf2, g2, b2)


def reference_transformer(tp, src, tgt):
    x = src
    scale = 1.0 / math.sqrt(src.shape[-1])
    for blk in tp['blocks']:
        q = x @ blk['Wq']
        k = tgt @ blk['Wk']
        v = tgt @ blk['Wv']
        s = jnp.einsum('bnd,bmd->bnm', q, k) * scale
        a = jnp.einsum('bnm,bmd->bnd', jax.nn.softmax(s, axis=-1), v) @ blk['Wo']
        x = _layer_norm(x + a, blk['ln1_g'], blk['ln1_b'])
        h = jax.nn.relu(x @ blk['Wf1'] + blk['bf1']) @ blk['Wf2'] + blk['bf2']
        x = _layer_norm(x + h, blk['ln2_g'], blk['ln2_b'])
    return x  # 'src_embedding'


# ----------------------------------------------------------------------------
# Plain-JAX glue: DGCNN-style encoder
# ----------------------------------------------------------------------------
def _knn_idx(x, k):
    # TODO(synk): for large N, move this O(N^2) distance/top_k into a tiled
    # Pallas kernel; at N=128 it is negligible and stays in XLA.
    d2 = jnp.sum((x[:, :, None, :] - x[:, None, :, :]) ** 2, axis=-1)  # (B,N,N)
    _, idx = jax.lax.top_k(-d2, k)
    return idx


def dgcnn_encoder(p, pc, k=8):
    # Single EdgeConv (concat(x_i, x_j - x_i) -> 64, LeakyReLU, max over k)
    # followed by a per-point linear to emb_dim (stand-in encoder).
    idx = _knn_idx(pc, k)                                           # (B,N,k)
    nbr = jax.vmap(lambda pts, ind: pts[ind])(pc, idx)              # (B,N,k,3)
    center = jnp.broadcast_to(pc[:, :, None, :], nbr.shape)
    edge = jnp.concatenate([center, nbr - center], axis=-1)         # (B,N,k,6)
    h = jax.nn.leaky_relu(edge @ p['W_e'] + p['b_e'], 0.2)          # (B,N,k,64)
    f = jnp.max(h, axis=2)                                          # (B,N,64)
    return f @ p['W_o'] + p['b_o']                                  # (B,N,D)


# ----------------------------------------------------------------------------
# Full forward (mirrors Network_clip_attn_dgcnn.forward)
# ----------------------------------------------------------------------------
def forward(params, robot_pc, object_pc, language_emb, use_pallas=True):
    # cfg.center_pc = True
    robot_pc = robot_pc - robot_pc.mean(axis=1, keepdims=True)
    robot_embedding = dgcnn_encoder(params['enc_robot'], robot_pc)
    object_embedding = dgcnn_encoder(params['enc_object'], object_pc)
    # cfg.pretrain is not None -> detach
    robot_embedding = jax.lax.stop_gradient(robot_embedding)
    # cfg.use_language = True
    z = language_emb[:, None, :]
    robot_embedding_z = jnp.concatenate([robot_embedding, z], axis=1)
    object_embedding_z = jnp.concatenate([object_embedding, z], axis=1)

    tf_fn = pallas_transformer if use_pallas else reference_transformer
    tf_r = tf_fn(params['tf_robot'], robot_embedding, object_embedding_z)
    tf_o = tf_fn(params['tf_object'], object_embedding, robot_embedding_z)
    Phi_A = robot_embedding + tf_r
    Phi_B = object_embedding + tf_o

    dro_fn = pallas_pairwise_mlp if use_pallas else reference_pairwise_mlp
    dro = dro_fn(params['kernel'], Phi_A, Phi_B)
    return {'dro': dro, 'mu': None, 'logvar': None}


# ----------------------------------------------------------------------------
# Deterministic parameter initialization
# ----------------------------------------------------------------------------
def _dense(key, shape, fan_in):
    return jax.random.normal(key, shape, jnp.float32) / jnp.sqrt(fan_in)


def init_params(key, emb_dim):
    D = emb_dim
    keys = iter(jax.random.split(key, 64))
    nk = lambda: next(keys)

    def enc():
        return dict(W_e=_dense(nk(), (6, 64), 6.0),
                    b_e=jnp.zeros((64,), jnp.float32),
                    W_o=_dense(nk(), (64, D), 64.0),
                    b_o=jnp.zeros((D,), jnp.float32))

    def tf():
        blocks = []
        for _ in range(4):
            blocks.append(dict(
                Wq=_dense(nk(), (D, D), D), Wk=_dense(nk(), (D, D), D),
                Wv=_dense(nk(), (D, D), D), Wo=_dense(nk(), (D, D), D),
                ln1_g=jnp.ones((D,), jnp.float32), ln1_b=jnp.zeros((D,), jnp.float32),
                Wf1=_dense(nk(), (D, 2 * D), D), bf1=jnp.zeros((2 * D,), jnp.float32),
                Wf2=_dense(nk(), (2 * D, D), 2 * D), bf2=jnp.zeros((D,), jnp.float32),
                ln2_g=jnp.ones((D,), jnp.float32), ln2_b=jnp.zeros((D,), jnp.float32)))
        return dict(blocks=blocks)

    kernel = dict(W1a=_dense(nk(), (D, D), 2 * D),
                  W1b=_dense(nk(), (D, D), 2 * D),
                  b1=jnp.zeros((1, D), jnp.float32),
                  W2=_dense(nk(), (D, D), D),
                  b2=jnp.zeros((1, D), jnp.float32),
                  w3=_dense(nk(), (1, D), D),
                  b3=jnp.zeros((1, 1), jnp.float32))
    return dict(enc_robot=enc(), enc_object=enc(),
                tf_robot=tf(), tf_object=tf(), kernel=kernel)


# ----------------------------------------------------------------------------
if __name__ == "__main__":
    B, N, EMB = 2, 128, 32
    root = jax.random.PRNGKey(0)
    k_par, k_r, k_o, k_l, k_a, k_b, k_s, k_t = jax.random.split(root, 8)

    params = init_params(k_par, EMB)
    robot_pc = jax.random.normal(k_r, (B, N, 3), jnp.float32)
    object_pc = jax.random.normal(k_o, (B, N, 3), jnp.float32)
    language_emb = jax.random.normal(k_l, (B, EMB), jnp.float32)

    # --- unit check 1: lane-packed pairwise MLP kernel vs jnp reference ---
    Phi_A = jax.random.normal(k_a, (B, N, EMB), jnp.float32)
    Phi_B = jax.random.normal(k_b, (B, N, EMB), jnp.float32)
    dro_p = jax.block_until_ready(pallas_pairwise_mlp(params['kernel'], Phi_A, Phi_B))
    dro_r = jax.block_until_ready(reference_pairwise_mlp(params['kernel'], Phi_A, Phi_B))
    err1 = float(jnp.max(jnp.abs(dro_p - dro_r)) / (jnp.max(jnp.abs(dro_r)) + 1e-6))
    assert err1 < 3e-2, f"pairwise kernel mismatch: {err1}"

    # --- unit check 2: fused 4-block transformer kernel vs jnp reference ---
    src = jax.random.normal(k_s, (B, N, EMB), jnp.float32)
    tgt = jax.random.normal(k_t, (B, N + 1, EMB), jnp.float32)   # +1 language token
    tf_p = jax.block_until_ready(pallas_transformer(params['tf_robot'], src, tgt))
    tf_r = jax.block_until_ready(reference_transformer(params['tf_robot'], src, tgt))
    err2 = float(jnp.max(jnp.abs(tf_p - tf_r)) / (jnp.max(jnp.abs(tf_r)) + 1e-6))
    assert err2 < 5e-2, f"transformer kernel mismatch: {err2}"

    # --- full forward pass ---
    fwd = jax.jit(functools.partial(forward, use_pallas=True))
    out = fwd(params, robot_pc, object_pc, language_emb)
    dro = jax.block_until_ready(out['dro'])
    assert dro.shape == (B, N, N)
    assert bool(jnp.all(jnp.isfinite(dro)))
    assert out['mu'] is None and out['logvar'] is None

    print("KERNEL_OK")
</pallas_src>

<mosaic_0001>
module attributes {stable_mosaic.version = 11 : i64} {
  func.func @_dro_kernel(%arg0: i32, %arg1: i32, %arg2: memref<1x32x128xbf16, #tpu.memory_space<vmem>>, %arg3: memref<1x128x128xf32, #tpu.memory_space<vmem>>, %arg4: memref<128x128xbf16, #tpu.memory_space<vmem>>, %arg5: memref<1x128xf32, #tpu.memory_space<vmem>>, %arg6: memref<128x128xbf16, #tpu.memory_space<vmem>>, %arg7: memref<1x128xf32, #tpu.memory_space<vmem>>, %arg8: memref<4x128xbf16, #tpu.memory_space<vmem>>, %arg9: memref<1x1xf32, #tpu.memory_space<vmem>>, %arg10: memref<1x128x128xf32, #tpu.memory_space<vmem>>) attributes {dimension_semantics = [#tpu.dimension_semantics<parallel>, #tpu.dimension_semantics<parallel>], iteration_bounds = array<i64: 2, 1>, scalar_prefetch = 0 : i64, scratch_operands = 0 : i64, tpu.core_type = #tpu.core_type<tc>, window_params = [{transform_indices = @transform_0, window_bounds = array<i64: 1, 32, 128>}, {transform_indices = @transform_1, window_bounds = array<i64: 1, 128, 128>}, {pipeline_mode = #tpu.pipeline_mode<synchronous>, transform_indices = @transform_2, window_bounds = array<i64: 128, 128>}, {pipeline_mode = #tpu.pipeline_mode<synchronous>, transform_indices = @transform_3, window_bounds = array<i64: 1, 128>}, {pipeline_mode = #tpu.pipeline_mode<synchronous>, transform_indices = @transform_4, window_bounds = array<i64: 128, 128>}, {pipeline_mode = #tpu.pipeline_mode<synchronous>, transform_indices = @transform_5, window_bounds = array<i64: 1, 128>}, {pipeline_mode = #tpu.pipeline_mode<synchronous>, transform_indices = @transform_6, window_bounds = array<i64: 4, 128>}, {pipeline_mode = #tpu.pipeline_mode<synchronous>, transform_indices = @transform_7, window_bounds = array<i64: 1, 1>}, {transform_indices = @transform_8, window_bounds = array<i64: 1, 128, 128>}]} {
    %c0 = arith.constant 0 : index
    %c0_0 = arith.constant 0 : index
    %c0_1 = arith.constant 0 : index
    %0 = vector.load %arg2[%c0, %c0_0, %c0_1] : memref<1x32x128xbf16, #tpu.memory_space<vmem>>, vector<1x32x128xbf16>
    %1 = vector.shape_cast %0 : vector<1x32x128xbf16> to vector<32x128xbf16>
    %c0_2 = arith.constant 0 : index
    %c0_3 = arith.constant 0 : index
    %c0_4 = arith.constant 0 : index
    %2 = vector.load %arg3[%c0_2, %c0_3, %c0_4] : memref<1x128x128xf32, #tpu.memory_space<vmem>>, vector<1x128x128xf32>
    %3 = vector.shape_cast %2 : vector<1x128x128xf32> to vector<128x128xf32>
    %c0_5 = arith.constant 0 : index
    %c0_6 = arith.constant 0 : index
    %4 = vector.load %arg4[%c0_5, %c0_6] : memref<128x128xbf16, #tpu.memory_space<vmem>>, vector<128x128xbf16>
    %cst = arith.constant dense<0.000000e+00> : vector<32x128xf32>
    %5 = tpu.matmul %1, %4, %cst {dimension_numbers = #tpu.dot_dimension_numbers<[1], [0], [0], [1], [0, 0, 1, 1], [], []>} : vector<32x128xbf16>, vector<128x128xbf16>, vector<32x128xf32> -> vector<32x128xf32>
    %c0_7 = arith.constant 0 : index
    %c0_8 = arith.constant 0 : index
    %6 = vector.load %arg5[%c0_7, %c0_8] : memref<1x128xf32, #tpu.memory_space<vmem>>, vector<1x128xf32>
    %7 = vector.broadcast %6 : vector<1x128xf32> to vector<32x128xf32>
    %8 = arith.addf %5, %7 : vector<32x128xf32>
    %9 = vector.shape_cast %8 : vector<32x128xf32> to vector<32x1x128xf32>
    %10 = vector.shape_cast %3 : vector<128x128xf32> to vector<1x128x128xf32>
    %11 = vector.broadcast %9 : vector<32x1x128xf32> to vector<32x128x128xf32>
    %12 = vector.broadcast %10 : vector<1x128x128xf32> to vector<32x128x128xf32>
    %13 = arith.addf %11, %12 : vector<32x128x128xf32>
    %cst_9 = arith.constant 0.000000e+00 : f32
    %14 = vector.broadcast %cst_9 : f32 to vector<32x128x128xf32>
    %15 = arith.maximumf %13, %14 : vector<32x128x128xf32>
    %16 = vector.shape_cast %15 : vector<32x128x128xf32> to vector<4096x128xf32>
    %17 = arith.truncf %16 : vector<4096x128xf32> to vector<4096x128xbf16>
    %c0_10 = arith.constant 0 : index
    %c0_11 = arith.constant 0 : index
    %18 = vector.load %arg6[%c0_10, %c0_11] : memref<128x128xbf16, #tpu.memory_space<vmem>>, vector<128x128xbf16>
    %cst_12 = arith.constant dense<0.000000e+00> : vector<4096x128xf32>
    %19 = tpu.matmul %17, %18, %cst_12 {dimension_numbers = #tpu.dot_dimension_numbers<[1], [0], [0], [1], [0, 0, 1, 1], [], []>} : vector<4096x128xbf16>, vector<128x128xbf16>, vector<4096x128xf32> -> vector<4096x128xf32>
    %c0_13 = arith.constant 0 : index
    %c0_14 = arith.constant 0 : index
    %20 = vector.load %arg7[%c0_13, %c0_14] : memref<1x128xf32, #tpu.memory_space<vmem>>, vector<1x128xf32>
    %21 = vector.broadcast %20 : vector<1x128xf32> to vector<4096x128xf32>
    %22 = arith.addf %19, %21 : vector<4096x128xf32>
    %cst_15 = arith.constant 0.000000e+00 : f32
    %23 = vector.broadcast %cst_15 : f32 to vector<4096x128xf32>
    %24 = arith.maximumf %22, %23 : vector<4096x128xf32>
    %25 = vector.shape_cast %24 : vector<4096x128xf32> to vector<32x128x128xf32>
    %26 = arith.truncf %25 : vector<32x128x128xf32> to vector<32x128x128xbf16>
    %c0_16 = arith.constant 0 : index
    %c0_17 = arith.constant 0 : index
    %27 = vector.load %arg8[%c0_16, %c0_17] : memref<4x128xbf16, #tpu.memory_space<vmem>>, vector<4x128xbf16>
    %28 = vector.shape_cast %27 : vector<4x128xbf16> to vector<1x4x128xbf16>
    %29 = vector.broadcast %28 : vector<1x4x128xbf16> to vector<32x4x128xbf16>
    "tpu.trace_start"() <{level = 10 : i32, message = "tpk,tmk->tpm"}> : () -> ()
    %cst_18 = arith.constant dense<0.000000e+00> : vector<32x4x128xf32>
    %30 = tpu.matmul %29, %26, %cst_18 {dimension_numbers = #tpu.dot_dimension_numbers<[2], [2], [1], [1], [0, 0, 0, 1, 1, 1], [0], [0]>} : vector<32x4x128xbf16>, vector<32x128x128xbf16>, vector<32x4x128xf32> -> vector<32x4x128xf32>
    "tpu.trace_stop"() : () -> ()
    %31 = vector.shape_cast %30 : vector<32x4x128xf32> to vector<128x128xf32>
    %c0_19 = arith.constant 0 : index
    %c0_20 = arith.constant 0 : index
    %32 = vector.load %arg9[%c0_19, %c0_20] : memref<1x1xf32, #tpu.memory_space<vmem>>, vector<1x1xf32>
    %33 = vector.broadcast %32 : vector<1x1xf32> to vector<128x128xf32>
    %34 = arith.addf %31, %33 : vector<128x128xf32>
    %c0_21 = arith.constant 0 : index
    %c0_22 = arith.constant 0 : index
    %c0_23 = arith.constant 0 : index
    %35 = vector.load %arg10[%c0_21, %c0_22, %c0_23] : memref<1x128x128xf32, #tpu.memory_space<vmem>>, vector<1x128x128xf32>
    %36 = vector.shape_cast %35 : vector<1x128x128xf32> to vector<128x128xf32>
    %37 = vector.shape_cast %34 : vector<128x128xf32> to vector<1x128x128xf32>
    tpu.vector_store %arg10[%c0_21, %c0_22, %c0_23], %37 {strides = array<i32>} : memref<1x128x128xf32, #tpu.memory_space<vmem>>, vector<1x128x128xf32>,
    return
  }
  func.func @transform_0(%arg0: i32, %arg1: i32) -> (i32, i32, i32) {
    %c0_i32 = arith.constant 0 : i32
    %c0_i32_0 = arith.constant 0 : i32
    return %arg0, %arg1, %c0_i32 : i32, i32, i32
  }
  func.func @transform_1(%arg0: i32, %arg1: i32) -> (i32, i32, i32) {
    %c0_i32 = arith.constant 0 : i32
    %c0_i32_0 = arith.constant 0 : i32
    %c0_i32_1 = arith.constant 0 : i32
    return %arg0, %c0_i32, %c0_i32_0 : i32, i32, i32
  }
  func.func @transform_2(%arg0: i32, %arg1: i32) -> (i32, i32) {
    %c0_i32 = arith.constant 0 : i32
    %c0_i32_0 = arith.constant 0 : i32
    %c0_i32_1 = arith.constant 0 : i32
    return %c0_i32, %c0_i32_0 : i32, i32
  }
  func.func @transform_3(%arg0: i32, %arg1: i32) -> (i32, i32) {
    %c0_i32 = arith.constant 0 : i32
    %c0_i32_0 = arith.constant 0 : i32
    %c0_i32_1 = arith.constant 0 : i32
    return %c0_i32, %c0_i32_0 : i32, i32
  }
  func.func @transform_4(%arg0: i32, %arg1: i32) -> (i32, i32) {
    %c0_i32 = arith.constant 0 : i32
    %c0_i32_0 = arith.constant 0 : i32
    %c0_i32_1 = arith.constant 0 : i32
    return %c0_i32, %c0_i32_0 : i32, i32
  }
  func.func @transform_5(%arg0: i32, %arg1: i32) -> (i32, i32) {
    %c0_i32 = arith.constant 0 : i32
    %c0_i32_0 = arith.constant 0 : i32
    %c0_i32_1 = arith.constant 0 : i32
    return %c0_i32, %c0_i32_0 : i32, i32
  }
  func.func @transform_6(%arg0: i32, %arg1: i32) -> (i32, i32) {
    %c0_i32 = arith.constant 0 : i32
    %c0_i32_0 = arith.constant 0 : i32
    %c0_i32_1 = arith.constant 0 : i32
    return %c0_i32, %c0_i32_0 : i32, i32
  }
  func.func @transform_7(%arg0: i32, %arg1: i32) -> (i32, i32) {
    %c0_i32 = arith.constant 0 : i32
    %c0_i32_0 = arith.constant 0 : i32
    %c0_i32_1 = arith.constant 0 : i32
    return %c0_i32, %c0_i32_0 : i32, i32
  }
  func.func @transform_8(%arg0: i32, %arg1: i32) -> (i32, i32, i32) {
    %c0_i32 = arith.constant 0 : i32
    %c0_i32_0 = arith.constant 0 : i32
    return %arg0, %arg1, %c0_i32 : i32, i32, i32
  }
}

</mosaic_0001>

<bundles_post_ra>
// kernel: tpu_custom_call.1
= control target key start
LH: loop header
LB: loop body
LE: loop exit
PB: predicated region body
PF: predicated region fallthrough
CT: control target
= control target key end

     0   :  { %s12441_s0 = inlined_call_operand.hbm [shape: bf16[2,32,128], index: 0, kind: input, shape index: {}]   ;;  %s12442_s1 = inlined_call_operand.hbm [shape: f32[2,128,128], index: 1, kind: input, shape index: {}]   ;;  %s12443_s2 = inlined_call_operand.hbm [shape: bf16[128,128], index: 2, kind: input, shape index: {}]   ;;  %s12444_s3 = inlined_call_operand.vmem [shape: f32[1,128], index: 3, kind: input, shape index: {}]   ;;  %s12445_s4 = inlined_call_operand.hbm [shape: bf16[128,128], index: 4, kind: input, shape index: {}]   ;;  %s12446_s5 = inlined_call_operand.vmem [shape: f32[1,128], index: 5, kind: input, shape index: {}]   ;;  %s12447_s6 = inlined_call_operand.vmem [shape: bf16[4,128], index: 6, kind: input, shape index: {}]   ;;  %s12448_s7 = inlined_call_operand.<no memory space> [shape: f32[1,1], index: 7, kind: input, shape index: {}]   ;;  %s12449_s8 = inlined_call_operand.hbm [shape: f32[2,128,128], index: 8, kind: output, shape index: {}]  }
   0x1   :  { %12478 = sst [smem:[#allocation105_spill]] %s12441_s0  ;;  %v13_v0 = vstv %s12448_s7 }
   0x2   :  { %12479 = sst [smem:[#allocation106_spill]] %s12443_s2  ;;  %14 = vst [vmem:[#allocation2] sm:$0x1] %v13_v0 }
   0x3   :  { %12480 = sst [smem:[#allocation107_spill]] %s12445_s4 }
   0x4   :  { %15 = vsyncpa [#allocation4], 0 }
   0x5   :  { %17 = vsyncpa [#allocation4 + $0x1], 0 }
   0x6   :  { %18 = vsyncpa [#allocation7], 0 }
   0x7   :  { %20 = vsyncpa [#allocation7 + $0x1], 0 }
   0x8   :  { %21 = vsyncpa [#allocation10], 0 }
   0x9   :  { %22 = vsyncpa [#allocation5], 0 }
   0xa   :  { %24 = vsyncpa [#allocation5 + $0x1], 0  ;;  %s8947_s29 = smov 0   ;;  %s8949_s30 = smov 0  }
   0xb   :  { %s8951_s9 = smov 0   ;;  %s8953_s10 = smov 0  }
   0xc   :  { %s8955_s11 = smov 0   ;;  %s8957_s12 = smov 0  }
   0xd LB: > { %12481 = sst [smem:[#allocation17_spill]] %s8862_s29  ;;  %s8978_s7 = sadd.s32 4294967295, %s8882_s12   ;;  %s8882_s12 = sphi %s8957_s12, %s30_s12   ;;  %s8878_s11 = sphi %s8955_s11, %s12837_s11   ;;  %s8874_s10 = sphi %s8953_s10, %s12836_s10   ;;  %s8870_s9 = sphi %s8951_s9, %s12832_s9   ;;  %s8866_s30 = sphi %s8949_s30, %s12835_s30   ;;  %s8862_s29 = sphi %s8947_s29, %s12834_s29  }
   0xe   : > { %12482 = sst [smem:[#allocation18_spill]] %s8870_s9  ;;  %s6677_s13 = sadd.s32 4294967294, %s8882_s12  }
   0xf   : > { %12483 = sst [smem:[#allocation19_spill]] %s8882_s12  ;;  %p64_p0 = scmp.ne.s32.totalorder %s8866_s30, %s8862_s29 }
  0x10   : > { %p65_p1 = scmp.eq.s32.totalorder %s8978_s7, 0  ;;  %p242_p2 = scmp.eq.s32.totalorder %s8978_s7, 1 }
  0x11   : > { %p248_p3 = scmp.eq.s32.totalorder %s6677_s13, 1  ;;  %p6678_p5 = scmp.ge.s32.totalorder %s8882_s12, 1 }
  0x12   : > { %p8987_p4 = por %p65_p1, %p64_p0  ;;  %p255_p7 = scmp.lt.s32.totalorder %s8882_s12, 3 }
  0x13   : > { %p8992_p6 = por %p248_p3, %p64_p0  ;;  %s8884_s17 = smov [#allocation8]  }
  0x14   : > { %p8997_p8 = pnand %p6678_p5, %p255_p7  ;;  %s267_s18 = sshll.u32 %s8884_s17, 4  ;;  %s268_s18 = int_to_ptr.vmem [resolvable:$true] %s267_s18 }
  0x15   : > { %s12485_s15 = scalar_select %p8992_p6, 1, 0 }
  0x16   : > { %p8487_p9 = pneg %p8997_p8  ;;  %s8885_s20 = smov [#allocation9]  }
  0x17   : > { %12486 = sst [smem:[#allocation20_spill]] %s12485_s15  ;;  %s283_s21 = sshll.u32 %s8885_s20, 4  ;;  %s284_s21 = int_to_ptr.vmem [resolvable:$true] %s283_s21 }
  0x18   : > { %p9006_p11 = pnand %p8487_p9, %p65_p1  ;;  %s8693_s22 = scalar_lea.vmem %s268_s18, 1024 }
  0x19   : > { %p8694_p13 = scmp.ne.s32.totalorder %s268_s18, %s8693_s22  ;;  %p8701_p5 = scmp.lt.s32.totalorder %s268_s18, %s268_s18 }
  0x1a   : > { %p8684_p12 = pneg %p9006_p11  ;;  %p8702_p7 = scmp.lt.s32.totalorder %s8693_s22, %s8693_s22 }
  0x1c   : > { %p8696_p0 = pnand %p8694_p13, %p8684_p12  ;;  %p8703_p10 = por %p8702_p7, %p8701_p5 }
  0x1e   : > { %p8697_p3 = pneg %p8696_p0 }
  0x20   : > { %p8704_p9 = pnand %p8703_p10, %p8697_p3 }
  0x22   : > { %8707 = shalt.err (!%p8704_p9)
}
  0x23   : > { %s12450_s23 = smov 64   ;;  %s12451_s24 = smov 4  }
  0x24   : > { %s12489_s2 = sld [smem:[#allocation106_spill]]  ;;  %s8719_s27 = scalar_lea.vmem %s284_s21, 1024 }
  0x25   : > { %p8720_p13 = scmp.ne.s32.totalorder %s284_s21, %s8719_s27  ;;  %p8727_p10 = scmp.lt.s32.totalorder %s284_s21, %s284_s21 }
  0x26   : > { %p8728_p3 = scmp.lt.s32.totalorder %s8719_s27, %s8719_s27 }
  0x27   : > { %p8722_p0 = pnand %p8720_p13, %p8684_p12 }
  0x28   : > { %p8729_p7 = por %p8728_p3, %p8727_p10 }
  0x29   : > { %p8723_p5 = pneg %p8722_p0 }
  0x2a   : > { %8490 = dma.hbm_to_vmem [thread:$0]  (!%p9006_p11), %s12489_s2, 1024, %s268_s18, [#allocation7], %s12450_s23, %s12450_s23, %s12451_s24  }
  0x2b   : > { %p8730_p9 = pnand %p8729_p7, %p8723_p5 }
  0x2d   : > { %8733 = shalt.err (!%p8730_p9)
}
  0x2e   : > { %s12490_s4 = sld [smem:[#allocation107_spill]]  ;;  %s42_s17 = sadd.s32 1, %s8878_s11 }
  0x2f   : > { %s51_s18 = sadd.s32 1, %s8870_s9  ;;  %p44_p12 = scmp.ge.s32.totalorder %s42_s17, 2 }
  0x30   : > { %p58_p13 = scmp.ne.s32.totalorder %s8870_s9, %s8866_s30  ;;  %p59_p0 = scmp.eq.s32.totalorder %s8882_s12, 0 }
  0x31   : > { %p8507_p5 = scmp.lt.s32.totalorder %s8882_s12, 2  ;;  %s12839_s17 = smov (%p44_p12, %s42_s17), 0 }
  0x32   : > { %12491 = sst [smem:[#allocation21_spill]] %s12839_s17  ;;  %p60_p10 = por %p59_p0, %p58_p13 }
  0x33   : > { %p9044_p3 = por %p242_p2, %p58_p13  ;;  %s46_s20 = ssub.s32 %s8878_s11, %s12839_s17 }
  0x34   : > { %8493 = dma.hbm_to_vmem [thread:$0]  (!%p9006_p11), %s12490_s4, 1024, %s284_s21, [#allocation10], %s12450_s23, %s12450_s23, %s12451_s24  }
  0x35   : > { %s9051_s22 = sand.u32 1, %s8870_s9   ;;  %p49_p11 = scmp.eq.s32.totalorder %s46_s20, 0 }
  0x36   : > { %s6682_s21 = sshll.u32 %s9051_s22, 4  ;;  %s6720_s25 = sshll.u32 %s8878_s11, 8 }
  0x37   : > { %s9056_s26 = scalar_select %p49_p11, %s8870_s9, %s51_s18  }
  0x38   : > { %s12494_s0 = sld [smem:[#allocation105_spill]]  ;;  %s310_s23 = scalar_lea.vmem [#allocation3], %s6682_s21 }
  0x39   : > { %12493 = sst [smem:[#allocation22_spill]] %s9056_s26  ;;  %s319_s24 = sshll.u32 %s310_s23, 4  ;;  %s320_s24 = int_to_ptr.vmem [resolvable:$true] %s319_s24 }
  0x3a   : > { %p9063_p2 = pnand %p8507_p5, %p60_p10  ;;  %s329_s4 = sand.u32 1, %s8882_s12  }
  0x3b   : > { %s307_s20 = scalar_lea.sflag [#allocation4], %s9051_s22  ;;  %s8747_s18 = scalar_lea.vmem %s320_s24, 256 }
  0x3c   : > { %p8736_p7 = pneg %p9063_p2  ;;  %p8748_p9 = scmp.ne.s32.totalorder %s320_s24, %s8747_s18 }
  0x3d   : > { %s8888_s21 = smov [#allocation3]  }
  0x3e   : > { %s318_s13 = scalar_lea.hbm %s12494_s0, %s6720_s25  ;;  %p8750_p12 = pnand %p8748_p9, %p8736_p7 }
  0x3f   : > { %s8752_s23 = sshll.u32 %s8888_s21, 4  ;;  %s8753_s23 = int_to_ptr.vmem [resolvable:$false] %s8752_s23 }
  0x40   : > { %p8751_p13 = pneg %p8750_p12  ;;  %s8754_s25 = scalar_lea.vmem %s8753_s23, 512 }
  0x41   : > { %p8755_p0 = scmp.lt.s32.totalorder %s320_s24, %s8753_s23  ;;  %p8756_p5 = scmp.lt.s32.totalorder %s8754_s25, %s8747_s18 }
  0x43   : > { %p8757_p10 = por %p8756_p5, %p8755_p0 }
  0x45   : > { %p8758_p11 = pnand %p8757_p10, %p8751_p13 }
  0x47   : > { %8761 = shalt.err (!%p8758_p11)
}
  0x48   : > { %s12496_s27 = smov 4   ;;  %s12497_s28 = smov 64  }
  0x49   : > { %8497 = dma.hbm_to_vmem [thread:$0]  (!%p9063_p2), %s318_s13, 256, %s320_s24, %s307_s20, %s12497_s28, %s12497_s28, %s12496_s27  }
  0x4a   : > { %s6685_s0 = sshll.u32 %s9051_s22, 7  ;;  %s6721_s17 = sshll.u32 %s8878_s11, 11 }
  0x4b   : > { %s339_s9 = scalar_lea.hbm %s12442_s1, %s6721_s17  ;;  %s333_s23 = scalar_lea.vmem [#allocation6], %s6685_s0 }
  0x4c   : > { %s340_s18 = sshll.u32 %s333_s23, 4  ;;  %s330_s25 = scalar_lea.sflag [#allocation7], %s329_s4  ;;  %s341_s18 = int_to_ptr.vmem [resolvable:$true] %s340_s18 }
  0x4d   : > { %s8775_s12 = scalar_lea.vmem %s341_s18, 2048  ;;  %s8889_s15 = smov [#allocation6]  }
  0x4e   : > { %p8776_p9 = scmp.ne.s32.totalorder %s341_s18, %s8775_s12  ;;  %s8780_s29 = sshll.u32 %s8889_s15, 4  ;;  %s8781_s29 = int_to_ptr.vmem [resolvable:$false] %s8780_s29 }
  0x4f   : > { %s8782_s24 = scalar_lea.vmem %s8781_s29, 4096  ;;  %p8783_p0 = scmp.lt.s32.totalorder %s341_s18, %s8781_s29 }
  0x50   : > { %p8778_p12 = pnand %p8776_p9, %p8736_p7  ;;  %p8784_p5 = scmp.lt.s32.totalorder %s8782_s24, %s8775_s12 }
  0x52   : > { %p8779_p13 = pneg %p8778_p12  ;;  %p8785_p10 = por %p8784_p5, %p8783_p0 }
  0x54   : > { %p8786_p11 = pnand %p8785_p10, %p8779_p13 }
  0x56   : > { %8789 = shalt.err (!%p8786_p11)
}
  0x57   : > { %s8890_s17 = smov 128   ;;  %s8891_s0 = smov 8  }
  0x58   : > { %8500 = dma.hbm_to_vmem [thread:$0]  (!%p9063_p2), %s339_s9, 2048, %s341_s18, %s330_s25, %s8890_s17, %s8890_s17, %s8891_s0  }
  0x59   : > { %352 = sbr.rel (%p8997_p8) target bundleno = 2337 (0x921), region = 52 }
  0x5e   : > { %s9092_s4 = sand.u32 1, %s8866_s30  }
  0x5f   : > { %s6689_s15 = sshll.u32 %s9092_s4, 4  ;;  %s355_s29 = scalar_lea.sflag [#allocation4], %s9092_s4 }
  0x60   : > { %s9096_s12 = scalar_lea.vmem [#allocation3], %s6689_s15 }
  0x61   : > { %8841 = dma.done.wait (%p8987_p4), %s355_s29, 256  }
  0x62   : > { %8843 = vsyncadd (%p8987_p4), %s355_s29, 4294967040  ;;  %s363_s2 = sand.u32 1, %s8978_s7   ;;  %s6690_s9 = sshll.u32 %s9092_s4, 7 }
  0x63   : > { %s364_s16 = scalar_lea.sflag [#allocation7], %s363_s2  ;;  %s9106_s22 = scalar_lea.vmem [#allocation6], %s6690_s9 }
  0x64   : > { %8845 = dma.done.wait (%p8987_p4), %s364_s16, 2048  }
  0x65   : > { %8847 = vsyncadd (%p8987_p4), %s364_s16, 4294965248 }
  0x66   : > { %8849 = dma.done.wait (%p65_p1), [#allocation7], 1024  }
  0x67   : > { %8851 = vsyncadd (%p65_p1), [#allocation7], 4294966272 }
  0x68   : > { %8853 = dma.done.wait (%p65_p1), [#allocation10], 1024  }
  0x69   : > { %8855 = vsyncadd (%p65_p1), [#allocation10], 4294966272  ;;  %v8572_v1 = vld [vmem:[#allocation8 + $0x38] sm:$0xff]   ;;  %v8573_v2 = vld [vmem:[#allocation8 + $0x30] sm:$0xff]   ;;  %v8892_v19 = vmov 1966171168   ;;  %v576_v21 = vlaneseq }
  0x6a   : > { %7285 = vmatprep.subr.bf16.mxu1 %v8572_v1  ;;  %v8574_v3 = vld [vmem:[#allocation8 + $0x28] sm:$0xff]   ;;  %v8575_v4 = vld [vmem:[#allocation8 + $0x20] sm:$0xff]   ;;  %v8576_v6 = vld [vmem:[#allocation8 + $0x18] sm:$0xff]   ;;  %v574_v20 = vunpack.c.l.s4 %v8892_v19  ;;  %vm8894_vm0 = vmmov 0   ;;  %s6722_s25 = sshll.u32 %s8874_s10, 11  ;;  %s6532_s10 = scalar_lea.sflag [#allocation5], %s9092_s4 }
  0x6b   : > { %7286 = vmatpush3.bf16.msra.mxu1 %v8572_v1  ;;  %v8580_v5 = vld [vmem:[%s9096_s12] sm:$0xff]   ;;  %v8578_v8 = vld [vmem:[#allocation8 + $0x8] sm:$0xff]   ;;  %v8582_v10 = vld [vmem:[#allocation9 + $0x38] sm:$0xff]   ;;  %v577_v23 = vshrl.u32 %v576_v21, 7  ;;  %s12390_s15 = scalar_lea.hbm %s12449_s8, %s6722_s25  ;;  %s8896_s2 = smov [#allocation11]  }
  0x6c   : > { %7287 = vmatprep.subr.bf16.mxu1 %v8573_v2  ;;  %7301 = vmatprep.mubr.bf16.mxu1 %v8580_v5  ;;  %v8577_v7 = vld [vmem:[#allocation8 + $0x10] sm:$0xff]   ;;  %v8579_v9 = vld [vmem:[#allocation8] sm:$0xff]   ;;  %v8581_v11 = vld [vmem:[%s9096_s12 + $0x8] sm:$0xff]   ;;  %v575_v22 = vunpack.c.0.s8 %v574_v20  ;;  %s10967_s12 = scalar_lea.vmem [#allocation11], %s6690_s9  ;;  %s8794_s9 = sshll.u32 %s8896_s2, 4  ;;  %s8795_s9 = int_to_ptr.vmem [resolvable:$false] %s8794_s9 }
  0x6d   : > { %v8583_v12 = vld [vmem:[#allocation9 + $0x30] sm:$0xff]   ;;  %v8584_v13 = vld [vmem:[#allocation9 + $0x28] sm:$0xff]   ;;  %v8585_v14 = vld [vmem:[#allocation9 + $0x20] sm:$0xff]   ;;  %v9128_v32 = vsub.s32 0, %v577_v23  ;;  %s6547_s24 = sshll.u32 %s10967_s12, 4  ;;  %s8796_s16 = scalar_lea.vmem %s8795_s9, 4096  ;;  %s12392_s24 = int_to_ptr.vmem [resolvable:$true] %s6547_s24 }
  0x6e   : > { %v8586_v15 = vld [vmem:[#allocation9 + $0x18] sm:$0xff]   ;;  %v8587_v16 = vld [vmem:[#allocation9 + $0x10] sm:$0xff]   ;;  %v8588_v17 = vld [vmem:[#allocation9 + $0x8] sm:$0xff]   ;;  %v9125_v25 = vsub.s32 %v575_v22, %v577_v23  ;;  %s8790_s29 = scalar_lea.vmem %s12392_s24, 2048  ;;  %p8797_p2 = scmp.lt.s32.totalorder %s12392_s24, %s8795_s9 }
  0x6f   : > { %7288 = vmatpush3.bf16.msra.mxu1 %v8573_v2  ;;  %v8589_v18 = vld [vmem:[#allocation9] sm:$0xff]   ;;  %v6694_v24 = vld [vmem:[%s12444_s3] ss:$0 sm:$0xff]  ;;  %p8791_p1 = scmp.ne.s32.totalorder %s12392_s24, %s8790_s29  ;;  %p8798_p7 = scmp.lt.s32.totalorder %s8796_s16, %s8790_s29 }
  0x70   : > { %7289 = vmatprep.subr.bf16.mxu1 %v8574_v3 }
  0x71   : > { %p8792_p4 = pnand %p8791_p1, %p9044_p3  ;;  %p8799_p9 = por %p8798_p7, %p8797_p2 }
  0x73   : > { %7290 = vmatpush3.bf16.msra.mxu1 %v8574_v3  ;;  %p8793_p8 = pneg %p8792_p4 }
  0x74   : > { %7291 = vmatprep.subr.bf16.mxu1 %v8575_v4 }
  0x75   : > { %p8800_p12 = pnand %p8799_p9, %p8793_p8 }
  0x77   : > { %7292 = vmatpush3.bf16.msra.mxu1 %v8575_v4 }
  0x78   : > { %7293 = vmatprep.subr.bf16.mxu1 %v8576_v6 }
  0x7b   : > { %7294 = vmatpush3.bf16.msra.mxu1 %v8576_v6 }
  0x7c   : > { %7295 = vmatprep.subr.bf16.mxu1 %v8577_v7 }
  0x7f   : > { %7296 = vmatpush3.bf16.msra.mxu1 %v8577_v7  ;;  %v9185_v7 = vld [vmem:[%s9106_s22] sm:$0xff] }
  0x80   : > { %7297 = vmatprep.subr.bf16.mxu1 %v8578_v8 }
  0x83   : > { %7298 = vmatpush3.bf16.msra.mxu1 %v8578_v8 }
  0x84   : > { %7299 = vmatprep.subr.bf16.mxu1 %v8579_v9 }
  0x87   : > { %7300 = vmatpush3.bf16.msra.mxu1 %v8579_v9 }
  0x88   : > { %7305 = vmatprep.subr.bf16.mxu1 %v8582_v10 }
  0x8a   : > { %7302 = vmatmul.mubr.bf16.vlgmr.msra.gmra.mxu1 %v8581_v11 }
  0x8b   : > { %7306 = vmatpush3.bf16.msra.mxu1 %v8582_v10 }
  0x8c   : > { %7307 = vmatprep.subr.bf16.mxu1 %v8583_v12 }
  0x8f   : > { %7308 = vmatpush3.bf16.msra.mxu1 %v8583_v12 }
  0x90   : > { %7309 = vmatprep.subr.bf16.mxu1 %v8584_v13 }
  0x93   : > { %7310 = vmatpush3.bf16.msra.mxu1 %v8584_v13 }
  0x94   : > { %7311 = vmatprep.subr.bf16.mxu1 %v8585_v14 }
  0x97   : > { %7312 = vmatpush3.bf16.msra.mxu1 %v8585_v14 }
  0x98   : > { %7313 = vmatprep.subr.bf16.mxu1 %v8586_v15 }
  0x9b   : > { %7314 = vmatpush3.bf16.msra.mxu1 %v8586_v15  ;;  %v9195_v15 = vld [vmem:[%s9106_s22 + $0x8] sm:$0xff] }
  0x9c   : > { %7315 = vmatprep.subr.bf16.mxu1 %v8587_v16 }
  0x9f   : > { %7316 = vmatpush3.bf16.msra.mxu1 %v8587_v16 }
  0xa0   : > { %7317 = vmatprep.subr.bf16.mxu1 %v8588_v17 }
  0xa3   : > { %7318 = vmatpush3.bf16.msra.mxu1 %v8588_v17 }
  0xa4   : > { %7319 = vmatprep.subr.bf16.mxu1 %v8589_v18 }
  0xa7   : > { %7320 = vmatpush3.bf16.msra.mxu1 %v8589_v18 }
 0x14a   : > { %v7303_v26 = vpop.f32.mrf.mxu1 }
 0x14b   : > { %v562_v27 = vadd.f32 %v7303_v26, %v6694_v24 }
 0x14c   : > { %v553_v28 = vpop.f32.mrf.mxu1 }
 0x14d   : > { %v670_v29 = vcombine.high %v562_v27, %v562_v27  ;;  %v677_v30 = vrot.slane %v562_v27, %v9125_v25  ;;  %v554_v31 = vadd.f32 %v6694_v24, %v553_v28 }
 0x14e   : > { %v7304_v33 = vpop.f32.mrf.mxu1 }
 0x14f   : > { %v684_v34 = vrot.slane %v670_v29, %v9125_v25  ;;  %v685_v35 = vcombine.high %v677_v30, %v677_v30  ;;  %v693_v36 = vrot.slane %v677_v30, %v9125_v25  ;;  %v572_v37 = vcombine.high %v554_v31, %v554_v31 }
 0x150   : > { %v9133_v38 = vrot.slane %v554_v31, %v9125_v25  ;;  %v565_v39 = vadd.f32 %v7304_v33, %v6694_v24  ;;  %v556_v1 = vpop.f32.mrf.mxu1 }
 0x151   : > { %v686_v40 = vcombine.high %v684_v34, %v684_v34  ;;  %v700_v41 = vrot.slane %v684_v34, %v9125_v25  ;;  %v707_v42 = vrot.slane %v685_v35, %v9125_v25  ;;  %v715_v43 = vcombine.high %v693_v36, %v693_v36 }
 0x152   : > { %v9138_v44 = vrot.slane %v693_v36, %v9128_v32  ;;  %v586_v45 = vrot.slane %v572_v37, %v9125_v25  ;;  %v9143_v46 = vrot.slane %v9133_v38, %v9125_v25  ;;  %v719_v0 = vcombine.high %v565_v39, %v565_v39 }
 0x153   : > { %v714_v47 = vrot.slane %v686_v40, %v9125_v25  ;;  %v716_v48 = vcombine.high %v700_v41, %v700_v41  ;;  %v717_v49 = vcombine.high %v707_v42, %v707_v42  ;;  %v9147_v50 = vrot.slane %v707_v42, %v9128_v32 }
 0x154   : > { %12498 = vst [vmem:[#allocation23_spill] sm:$0xff] %v9138_v44  ;;  %v9150_v51 = vrot.slane %v715_v43, %v9128_v32  ;;  %v9153_v52 = vrot.slane %v700_v41, %v9128_v32  ;;  %v588_v53 = vcombine.high %v586_v45, %v586_v45  ;;  %v602_v54 = vrot.slane %v586_v45, %v9125_v25 }
 0x155   : > { %12499 = vst [vmem:[#allocation24_spill] sm:$0xff] %v9147_v50  ;;  %v718_v55 = vcombine.high %v714_v47, %v714_v47  ;;  %v9157_v56 = vrot.slane %v717_v49, %v9128_v32  ;;  %v9160_v57 = vrot.slane %v714_v47, %v9128_v32  ;;  %v9163_v58 = vrot.slane %v716_v48, %v9128_v32 }
 0x156   : > { %12500 = vst [vmem:[#allocation25_spill] sm:$0xff] %v9150_v51  ;;  %12501 = vst [vmem:[#allocation26_spill] sm:$0xff] %v9153_v52  ;;  %v616_v59 = vrot.slane %v588_v53, %v9125_v25  ;;  %v618_v60 = vcombine.high %v602_v54, %v602_v54  ;;  %v9171_v62 = vrot.slane %v9143_v46, %v9128_v32 }
 0x157   : > { %12502 = vst [vmem:[#allocation27_spill] sm:$0xff] %v9157_v56  ;;  %12503 = vst [vmem:[#allocation28_spill] sm:$0xff] %v9160_v57  ;;  %v9167_v61 = vrot.slane %v718_v55, %v9128_v32  ;;  %v9174_v63 = vrot.slane %v602_v54, %v9128_v32  ;;  %v726_v5 = vrot.slane %v565_v39, %v9125_v25 }
 0x158   : > { %12504 = vst [vmem:[#allocation29_spill] sm:$0xff] %v9163_v58  ;;  %v620_v2 = vcombine.high %v616_v59, %v616_v59  ;;  %v9177_v3 = vrot.slane %v616_v59, %v9128_v32  ;;  %v9180_v4 = vrot.slane %v618_v60, %v9128_v32  ;;  %v733_v6 = vrot.slane %v719_v0, %v9125_v25 }
 0x159   : > { %12505 = vst [vmem:[#allocation30_spill] sm:$0xff] %v9167_v61  ;;  %v557_v9 = vadd.f32 %v6694_v24, %v556_v1  ;;  %v928_v10 = vadd.f32 %v9171_v62, %v9185_v7  ;;  %v734_v11 = vcombine.high %v726_v5, %v726_v5  ;;  %v742_v13 = vrot.slane %v726_v5, %v9125_v25  ;;  %v9250_v5 = vld [vmem:[%s9106_s22 + $0x18] sm:$0xff] }
 0x15a   : > { %v9188_v8 = vrot.slane %v620_v2, %v9128_v32  ;;  %v735_v12 = vcombine.high %v733_v6, %v733_v6  ;;  %v749_v14 = vrot.slane %v733_v6, %v9125_v25  ;;  %v929_v18 = vadd.f32 %v9171_v62, %v9195_v15  ;;  %v9247_v2 = vld [vmem:[%s9106_s22 + $0x10] sm:$0xff] }
 0x15b   : > { %v621_v16 = vcombine.high %v557_v9, %v557_v9  ;;  %v628_v17 = vrot.slane %v557_v9, %v9125_v25  ;;  %v1440_v19 = vmax.f32 %v928_v10, 0.0  ;;  %v756_v20 = vrot.slane %v734_v11, %v9125_v25 }
 0x15c   : > { %v763_v21 = vrot.slane %v735_v12, %v9125_v25  ;;  %v764_v22 = vcombine.high %v742_v13, %v742_v13  ;;  %v765_v23 = vcombine.high %v749_v14, %v749_v14  ;;  %v9203_v24 = vrot.slane %v742_v13, %v9128_v32  ;;  %v9263_v12 = vld [vmem:[%s9106_s22 + $0x20] sm:$0xff]  ;;  %v9266_v13 = vld [vmem:[%s9106_s22 + $0x28] sm:$0xff] }
 0x15d   : > { %v9206_v26 = vrot.slane %v749_v14, %v9128_v32  ;;  %v635_v27 = vrot.slane %v621_v16, %v9125_v25  ;;  %v636_v28 = vcombine.high %v628_v17, %v628_v17  ;;  %v766_v29 = vcombine.high %v756_v20, %v756_v20 }
 0x15e   : > { %12506 = vst [vmem:[#allocation31_spill] sm:$0xff] %v9203_v24  ;;  %v767_v30 = vcombine.high %v763_v21, %v763_v21  ;;  %v9210_v31 = vrot.slane %v756_v20, %v9128_v32  ;;  %v9213_v33 = vrot.slane %v764_v22, %v9128_v32  ;;  %v9216_v34 = vrot.slane %v763_v21, %v9128_v32  ;;  %v9276_v22 = vld [vmem:[%s9106_s22 + $0x30] sm:$0xff] }
 0x15f   : > { %12507 = vst [vmem:[#allocation32_spill] sm:$0xff] %v9206_v26  ;;  %v9219_v35 = vrot.slane %v765_v23, %v9128_v32  ;;  %v637_v36 = vcombine.high %v635_v27, %v635_v27  ;;  %v644_v37 = vrot.slane %v628_v17, %v9125_v25  ;;  %v9223_v39 = vrot.slane %v766_v29, %v9128_v32  ;;  %v9279_v23 = vld [vmem:[%s9106_s22 + $0x38] sm:$0xff] }
 0x160   : > { %12508 = vst [vmem:[#allocation33_spill] sm:$0xff] %v9210_v31  ;;  %12509 = vst [vmem:[#allocation34_spill] sm:$0xff] %v9213_v33  ;;  %v9226_v40 = vrot.slane %v767_v30, %v9128_v32  ;;  %v651_v41 = vrot.slane %v635_v27, %v9125_v25  ;;  %v658_v42 = vrot.slane %v636_v28, %v9125_v25  ;;  %v1441_v48 = vmax.f32 %v929_v18, 0.0  ;;  %v9286_v30 = vld [vmem:[%s9106_s22 + $0x40] sm:$0xff] }
 0x161   : > { %12510 = vst [vmem:[#allocation35_spill] sm:$0xff] %v9216_v34  ;;  %12511 = vst [vmem:[#allocation36_spill] sm:$0xff] %v9219_v35  ;;  %v665_v43 = vrot.slane %v637_v36, %v9125_v25  ;;  %v666_v45 = vcombine.high %v644_v37, %v644_v37  ;;  %v9232_v47 = vrot.slane %v644_v37, %v9128_v32  ;;  %v9289_v36 = vld [vmem:[%s9106_s22 + $0x48] sm:$0xff] }
 0x162   : > { %12512 = vst [vmem:[#allocation37_spill] sm:$0xff] %v9223_v39  ;;  %12513 = vst [vmem:[#allocation38_spill] sm:$0xff] %v9226_v40  ;;  %v667_v49 = vcombine.high %v651_v41, %v651_v41  ;;  %v668_v53 = vcombine.high %v658_v42, %v658_v42  ;;  %v9235_v54 = vrot.slane %v658_v42, %v9128_v32 }
 0x163   : > { %v9238_v55 = vrot.slane %v651_v41, %v9128_v32  ;;  %v669_v59 = vcombine.high %v665_v43, %v665_v43  ;;  %v9241_v60 = vrot.slane %v666_v45, %v9128_v32  ;;  %v9244_v0 = vrot.slane %v665_v43, %v9128_v32 }
 0x164   : > { %v1952_v1 = vpack.c.bf16 %v1441_v48, %v1440_v19  ;;  %v9253_v6 = vrot.slane %v668_v53, %v9128_v32  ;;  %v9256_v9 = vrot.slane %v667_v49, %v9128_v32  ;;  %v930_v10 = vadd.f32 %v9171_v62, %v9247_v2 }
 0x165   : > { %v931_v11 = vadd.f32 %v9171_v62, %v9250_v5  ;;  %v9269_v14 = vrot.slane %v669_v59, %v9128_v32  ;;  %v932_v16 = vadd.f32 %v9171_v62, %v9263_v12  ;;  %v933_v17 = vadd.f32 %v9171_v62, %v9266_v13  ;;  %v9298_v59 = vld [vmem:[%s9106_s22 + $0x50] sm:$0xff] }
 0x166   : > { %12514 = vst [vmem:[#allocation39_spill] sm:$0xff] %v9256_v9  ;;  %7321 = vmatprep.mubr.bf16.mxu1 %v1952_v1  ;;  %v1442_v18 = vmax.f32 %v930_v10, 0.0  ;;  %v934_v28 = vadd.f32 %v9171_v62, %v9276_v22  ;;  %v935_v29 = vadd.f32 %v9171_v62, %v9279_v23  ;;  %v936_v41 = vadd.f32 %v9171_v62, %v9286_v30  ;;  %v9301_v1 = vld [vmem:[%s9106_s22 + $0x58] sm:$0xff] }
 0x167   : > { %12515 = vst [vmem:[#allocation40_spill] sm:$0xff] %v9269_v14  ;;  %v1443_v19 = vmax.f32 %v931_v11, 0.0  ;;  %v1444_v20 = vmax.f32 %v932_v16, 0.0  ;;  %v1445_v21 = vmax.f32 %v933_v17, 0.0  ;;  %v937_v42 = vadd.f32 %v9171_v62, %v9289_v36  ;;  %v9308_v17 = vld [vmem:[%s9106_s22 + $0x60] sm:$0xff] }
 0x168   : > { %v1446_v43 = vmax.f32 %v934_v28, 0.0  ;;  %v1447_v45 = vmax.f32 %v935_v29, 0.0  ;;  %v587_v48 = vcombine.high %v9133_v38, %v9133_v38  ;;  %v1448_v49 = vmax.f32 %v936_v41, 0.0 }
 0x169   : > { %v1953_v27 = vpack.c.bf16 %v1443_v19, %v1442_v18  ;;  %v1954_v37 = vpack.c.bf16 %v1445_v21, %v1444_v20  ;;  %v1449_v53 = vmax.f32 %v937_v42, 0.0  ;;  %v938_v11 = vadd.f32 %v9171_v62, %v9298_v59  ;;  %v9311_v18 = vld [vmem:[%s9106_s22 + $0x68] sm:$0xff]  ;;  %v9323_v42 = vld [vmem:[%s9106_s22 + $0x70] sm:$0xff] }
 0x16a   : > { %v1955_v10 = vpack.c.bf16 %v1447_v45, %v1446_v43  ;;  %v939_v16 = vadd.f32 %v9171_v62, %v9301_v1  ;;  %v9314_v38 = vrot.slane %v587_v48, %v9125_v25  ;;  %v940_v20 = vadd.f32 %v9171_v62, %v9308_v17  ;;  %v9326_v25 = vld [vmem:[%s9106_s22 + $0x78] sm:$0xff] }
 0x16b   : > { %7322 = vmatmul.mubr.bf16.vlgmr.msra.gmra.mxu1 %v1953_v27  ;;  %v1956_v19 = vpack.c.bf16 %v1449_v53, %v1448_v49  ;;  %v941_v21 = vadd.f32 %v9171_v62, %v9311_v18  ;;  %v1450_v27 = vmax.f32 %v938_v11, 0.0  ;;  %v942_v45 = vadd.f32 %v9171_v62, %v9323_v42 }
 0x16c   : > { %7325 = vmatprep.mubr.bf16.mxu1 %v1954_v37  ;;  %v1451_v28 = vmax.f32 %v939_v16, 0.0  ;;  %v775_v29 = vrot.slane %v9314_v38, %v9128_v32  ;;  %v1452_v37 = vmax.f32 %v940_v20, 0.0  ;;  %v943_v48 = vadd.f32 %v9171_v62, %v9326_v25 }
 0x16d   : > { %v1453_v41 = vmax.f32 %v941_v21, 0.0  ;;  %v1454_v11 = vmax.f32 %v942_v45, 0.0  ;;  %v1047_v33 = vadd.f32 %v9188_v8, %v9279_v23 }
 0x16e   : > { %v1957_v43 = vpack.c.bf16 %v1451_v28, %v1450_v27  ;;  %v944_v53 = vadd.f32 %v775_v29, %v9185_v7  ;;  %v1455_v16 = vmax.f32 %v943_v48, 0.0  ;;  %v946_v27 = vadd.f32 %v775_v29, %v9247_v2 }
 0x16f   : > { %v1958_v49 = vpack.c.bf16 %v1453_v41, %v1452_v37  ;;  %v947_v28 = vadd.f32 %v775_v29, %v9250_v5  ;;  %v948_v35 = vadd.f32 %v775_v29, %v9263_v12  ;;  %v949_v62 = vadd.f32 %v775_v29, %v9266_v13 }
 0x170   : > { %v1959_v21 = vpack.c.bf16 %v1455_v16, %v1454_v11  ;;  %v1458_v37 = vmax.f32 %v946_v27, 0.0  ;;  %v950_v48 = vadd.f32 %v775_v29, %v9276_v22  ;;  %v952_v11 = vadd.f32 %v775_v29, %v9286_v30 }
 0x171   : > { %v1459_v41 = vmax.f32 %v947_v28, 0.0  ;;  %v953_v16 = vadd.f32 %v775_v29, %v9289_v36  ;;  %v955_v28 = vadd.f32 %v775_v29, %v9301_v1 }
 0x173   : > { %7326 = vmatmul.mubr.bf16.gmra.mxu1 %v1955_v10  ;;  %v945_v10 = vadd.f32 %v775_v29, %v9195_v15  ;;  %v1961_v45 = vpack.c.bf16 %v1459_v41, %v1458_v37  ;;  %v956_v41 = vadd.f32 %v775_v29, %v9308_v17 }
 0x174   : > { %7329 = vmatprep.mubr.bf16.mxu1 %v1956_v19  ;;  %v1456_v19 = vmax.f32 %v944_v53, 0.0  ;;  %v951_v53 = vadd.f32 %v775_v29, %v9279_v23 }
 0x175   : > { %v1457_v20 = vmax.f32 %v945_v10, 0.0 }
 0x177   : > { %v1960_v40 = vpack.c.bf16 %v1457_v20, %v1456_v19  ;;  %v1462_v19 = vmax.f32 %v950_v48, 0.0  ;;  %v1463_v20 = vmax.f32 %v951_v53, 0.0  ;;  %v1468_v53 = vmax.f32 %v956_v41, 0.0 }
 0x179   : > { %v1963_v27 = vpack.c.bf16 %v1463_v20, %v1462_v19  ;;  %v959_v19 = vadd.f32 %v775_v29, %v9326_v25 }
 0x17b   : > { %7330 = vmatmul.mubr.bf16.gmra.mxu1 %v1957_v43  ;;  %v1460_v43 = vmax.f32 %v948_v35, 0.0  ;;  %v954_v35 = vadd.f32 %v775_v29, %v9298_v59 }
 0x17c   : > { %7333 = vmatprep.mubr.bf16.mxu1 %v1958_v49  ;;  %v1461_v49 = vmax.f32 %v949_v62, 0.0  ;;  %v617_v62 = vcombine.high %v9143_v46, %v9143_v46 }
 0x17e   : > { %v1962_v10 = vpack.c.bf16 %v1461_v49, %v1460_v43  ;;  %v957_v43 = vadd.f32 %v775_v29, %v9311_v18  ;;  %v1466_v49 = vmax.f32 %v954_v35, 0.0  ;;  %v779_v48 = vrot.slane %v617_v62, %v9128_v32 }
 0x180   : > { %v960_v46 = vadd.f32 %v779_v48, %v9185_v7  ;;  %v962_v62 = vadd.f32 %v779_v48, %v9247_v2  ;;  %v963_v41 = vadd.f32 %v779_v48, %v9250_v5 }
 0x182   : > { %v1472_v35 = vmax.f32 %v960_v46, 0.0 }
 0x183   : > { %7334 = vmatmul.mubr.bf16.gmra.mxu1 %v1959_v21  ;;  %v1464_v21 = vmax.f32 %v952_v11, 0.0 }
 0x184   : > { %7337 = vmatprep.mubr.bf16.mxu1 %v1960_v40  ;;  %v1465_v40 = vmax.f32 %v953_v16, 0.0  ;;  %v958_v16 = vadd.f32 %v775_v29, %v9323_v42  ;;  %v965_v29 = vadd.f32 %v779_v48, %v9266_v13 }
 0x186   : > { %v1964_v37 = vpack.c.bf16 %v1465_v40, %v1464_v21  ;;  %v961_v21 = vadd.f32 %v779_v48, %v9195_v15  ;;  %v1470_v40 = vmax.f32 %v958_v16, 0.0 }
 0x18b   : > { %7338 = vmatmul.mubr.bf16.gmra.mxu1 %v1961_v45  ;;  %v1467_v45 = vmax.f32 %v955_v28, 0.0  ;;  %v1473_v28 = vmax.f32 %v961_v21, 0.0  ;;  %v968_v21 = vadd.f32 %v779_v48, %v9286_v30 }
 0x18c   : > { %7341 = vmatprep.mubr.bf16.mxu1 %v1962_v10  ;;  %v1469_v10 = vmax.f32 %v957_v43, 0.0 }
 0x18d   : > { %v1965_v11 = vpack.c.bf16 %v1467_v45, %v1466_v49  ;;  %v1968_v43 = vpack.c.bf16 %v1473_v28, %v1472_v35  ;;  %v964_v49 = vadd.f32 %v779_v48, %v9263_v12  ;;  %v1474_v45 = vmax.f32 %v962_v62, 0.0 }
 0x18e   : > { %v1966_v20 = vpack.c.bf16 %v1469_v10, %v1468_v53  ;;  %v1475_v53 = vmax.f32 %v963_v41, 0.0  ;;  %v1480_v28 = vmax.f32 %v968_v21, 0.0  ;;  %v970_v41 = vadd.f32 %v779_v48, %v9298_v59 }
 0x18f   : > { %v1476_v10 = vmax.f32 %v964_v49, 0.0  ;;  %v619_v49 = vcombine.high %v9314_v38, %v9314_v38  ;;  %v974_v21 = vadd.f32 %v779_v48, %v9323_v42 }
 0x190   : > { %v1969_v16 = vpack.c.bf16 %v1475_v53, %v1474_v45  ;;  %v972_v45 = vadd.f32 %v779_v48, %v9308_v17  ;;  %v973_v53 = vadd.f32 %v779_v48, %v9311_v18 }
 0x193   : > { %7342 = vmatmul.mubr.bf16.gmra.mxu1 %v1963_v27  ;;  %v1471_v27 = vmax.f32 %v959_v19, 0.0  ;;  %v966_v19 = vadd.f32 %v779_v48, %v9276_v22 }
 0x194   : > { %7345 = vmatprep.mubr.bf16.mxu1 %v1964_v37 }
 0x195   : > { %v1967_v37 = vpack.c.bf16 %v1471_v27, %v1470_v40  ;;  %v969_v40 = vadd.f32 %v779_v48, %v9289_v36  ;;  %v1478_v27 = vmax.f32 %v966_v19, 0.0  ;;  %v1484_v19 = vmax.f32 %v972_v45, 0.0 }
 0x19b   : > { %7346 = vmatmul.mubr.bf16.gmra.mxu1 %v1965_v11  ;;  %v1477_v11 = vmax.f32 %v965_v29, 0.0 }
 0x19c   : > { %7349 = vmatprep.mubr.bf16.mxu1 %v1966_v20  ;;  %v967_v20 = vadd.f32 %v779_v48, %v9279_v23 }
 0x19d   : > { %v1970_v46 = vpack.c.bf16 %v1477_v11, %v1476_v10  ;;  %v1482_v10 = vmax.f32 %v970_v41, 0.0 }
 0x19e   : > { %v1479_v35 = vmax.f32 %v967_v20, 0.0  ;;  %v1485_v20 = vmax.f32 %v973_v53, 0.0 }
 0x1a0   : > { %v1971_v62 = vpack.c.bf16 %v1479_v35, %v1478_v27  ;;  %v1974_v27 = vpack.c.bf16 %v1485_v20, %v1484_v19 }
 0x1a3   : > { %7350 = vmatmul.mubr.bf16.gmra.mxu1 %v1967_v37  ;;  %v1481_v37 = vmax.f32 %v969_v40, 0.0  ;;  %v975_v40 = vadd.f32 %v779_v48, %v9326_v25 }
 0x1a4   : > { %7353 = vmatprep.mubr.bf16.mxu1 %v1968_v43  ;;  %v971_v43 = vadd.f32 %v779_v48, %v9301_v1 }
 0x1a5   : > { %v1972_v29 = vpack.c.bf16 %v1481_v37, %v1480_v28  ;;  %v1486_v28 = vmax.f32 %v974_v21, 0.0  ;;  %v1487_v37 = vmax.f32 %v975_v40, 0.0 }
 0x1a6   : > { %v1483_v11 = vmax.f32 %v971_v43, 0.0 }
 0x1a7   : > { %v1975_v43 = vpack.c.bf16 %v1487_v37, %v1486_v28 }
 0x1ab   : > { %7354 = vmatmul.mubr.bf16.gmra.mxu1 %v1969_v16  ;;  %v783_v16 = vrot.slane %v619_v49, %v9128_v32 }
 0x1ac   : > { %7357 = vmatprep.mubr.bf16.mxu1 %v1970_v46  ;;  %v1973_v46 = vpack.c.bf16 %v1483_v11, %v1482_v10 }
 0x1ad   : > { %v976_v38 = vadd.f32 %v783_v16, %v9185_v7  ;;  %v977_v35 = vadd.f32 %v783_v16, %v9195_v15  ;;  %v978_v32 = vadd.f32 %v783_v16, %v9247_v2  ;;  %v979_v49 = vadd.f32 %v783_v16, %v9250_v5 }
 0x1ae   : > { %v980_v45 = vadd.f32 %v783_v16, %v9263_v12  ;;  %v981_v48 = vadd.f32 %v783_v16, %v9266_v13  ;;  %v983_v21 = vadd.f32 %v783_v16, %v9279_v23 }
 0x1af   : > { %v1489_v41 = vmax.f32 %v977_v35, 0.0  ;;  %v1490_v53 = vmax.f32 %v978_v32, 0.0  ;;  %v1491_v10 = vmax.f32 %v979_v49, 0.0  ;;  %v987_v32 = vadd.f32 %v783_v16, %v9301_v1 }
 0x1b0   : > { %v1492_v11 = vmax.f32 %v980_v45, 0.0  ;;  %v1493_v19 = vmax.f32 %v981_v48, 0.0  ;;  %v1495_v28 = vmax.f32 %v983_v21, 0.0  ;;  %v12460_v49 = vmov 0.0  }
 0x1b1   : > { %v1977_v20 = vpack.c.bf16 %v1491_v10, %v1490_v53  ;;  %7833 = vmatprep.subr.bf16.mxu0 %v12460_v49  ;;  %8153 = vmatprep.subr.bf16.mxu1 %v12460_v49  ;;  %v988_v45 = vadd.f32 %v783_v16, %v9308_v17  ;;  %v989_v48 = vadd.f32 %v783_v16, %v9311_v18  ;;  %v1499_v10 = vmax.f32 %v987_v32, 0.0 }
 0x1b2   : > { %v1978_v40 = vpack.c.bf16 %v1493_v19, %v1492_v11  ;;  %v991_v21 = vadd.f32 %v783_v16, %v9326_v25  ;;  %7849 = vmatprep.mubr.msk.bf16.mxu0 %vm8894_vm0, %v12460_v49 }
 0x1b3   : > { %7358 = vmatmul.mubr.bf16.gmra.mxu1 %v1971_v62  ;;  %v1488_v62 = vmax.f32 %v976_v38, 0.0  ;;  %v985_v38 = vadd.f32 %v783_v16, %v9289_v36  ;;  %v1500_v11 = vmax.f32 %v988_v45, 0.0  ;;  %v1501_v19 = vmax.f32 %v989_v48, 0.0 }
 0x1b4   : > { %7361 = vmatprep.mubr.bf16.mxu1 %v1972_v29  ;;  %v997_v45 = vadd.f32 %v9174_v63, %v9266_v13 }
 0x1b5   : > { %v1976_v29 = vpack.c.bf16 %v1489_v41, %v1488_v62  ;;  %v1497_v62 = vmax.f32 %v985_v38, 0.0  ;;  %v993_v38 = vadd.f32 %v9174_v63, %v9195_v15 }
 0x1bb   : > { %7362 = vmatmul.mubr.bf16.gmra.mxu1 %v1973_v46  ;;  %v982_v46 = vadd.f32 %v783_v16, %v9276_v22 }
 0x1bc   : > { %7365 = vmatprep.mubr.bf16.mxu1 %v1974_v27  ;;  %v984_v27 = vadd.f32 %v783_v16, %v9286_v30 }
 0x1bd   : > { %v1494_v35 = vmax.f32 %v982_v46, 0.0  ;;  %v990_v46 = vadd.f32 %v783_v16, %v9323_v42 }
 0x1be   : > { %v1496_v37 = vmax.f32 %v984_v27, 0.0  ;;  %v992_v27 = vadd.f32 %v9174_v63, %v9185_v7 }
 0x1bf   : > { %v1979_v41 = vpack.c.bf16 %v1495_v28, %v1494_v35  ;;  %v1502_v35 = vmax.f32 %v990_v46, 0.0  ;;  %v1503_v28 = vmax.f32 %v991_v21, 0.0  ;;  %v999_v46 = vadd.f32 %v9174_v63, %v9279_v23 }
 0x1c3   : > { %7366 = vmatmul.mubr.bf16.gmra.mxu1 %v1975_v43  ;;  %v986_v43 = vadd.f32 %v783_v16, %v9298_v59  ;;  %v995_v16 = vadd.f32 %v9174_v63, %v9250_v5 }
 0x1c4   : > { %7369 = vmatprep.mubr.bf16.mxu1 %v1976_v29  ;;  %v1980_v29 = vpack.c.bf16 %v1497_v62, %v1496_v37  ;;  %v1504_v37 = vmax.f32 %v992_v27, 0.0  ;;  %v1505_v62 = vmax.f32 %v993_v38, 0.0  ;;  %v1001_v27 = vadd.f32 %v9174_v63, %v9289_v36 }
 0x1c5   : > { %v1498_v53 = vmax.f32 %v986_v43, 0.0  ;;  %v994_v43 = vadd.f32 %v9174_v63, %v9247_v2 }
 0x1c6   : > { %v1984_v32 = vpack.c.bf16 %v1505_v62, %v1504_v37  ;;  %v1513_v37 = vmax.f32 %v1001_v27, 0.0 }
 0x1c7   : > { %v1506_v48 = vmax.f32 %v994_v43, 0.0  ;;  %v1003_v43 = vadd.f32 %v9174_v63, %v9301_v1 }
 0x1cb   : > { %7370 = vmatmul.mubr.bf16.gmra.mxu1 %v1977_v20  ;;  %v1981_v20 = vpack.c.bf16 %v1499_v10, %v1498_v53  ;;  %v1507_v53 = vmax.f32 %v995_v16, 0.0 }
 0x1cc   : > { %7373 = vmatprep.mubr.bf16.mxu1 %v1978_v40  ;;  %v1982_v40 = vpack.c.bf16 %v1501_v19, %v1500_v11  ;;  %v1509_v11 = vmax.f32 %v997_v45, 0.0 }
 0x1cd   : > { %v1985_v19 = vpack.c.bf16 %v1507_v53, %v1506_v48  ;;  %v1515_v48 = vmax.f32 %v1003_v43, 0.0  ;;  %v1012_v43 = vadd.f32 %v9177_v3, %v9263_v12 }
 0x1d3   : > { %7374 = vmatmul.mubr.bf16.gmra.mxu1 %v1979_v41  ;;  %v1983_v41 = vpack.c.bf16 %v1503_v28, %v1502_v35  ;;  %v1511_v35 = vmax.f32 %v999_v46, 0.0 }
 0x1d4   : > { %7377 = vmatprep.mubr.bf16.mxu1 %v1980_v29  ;;  %v996_v29 = vadd.f32 %v9174_v63, %v9263_v12 }
 0x1d6   : > { %v1508_v10 = vmax.f32 %v996_v29, 0.0  ;;  %v1005_v29 = vadd.f32 %v9174_v63, %v9311_v18 }
 0x1d8   : > { %v1986_v21 = vpack.c.bf16 %v1509_v11, %v1508_v10  ;;  %v1517_v10 = vmax.f32 %v1005_v29, 0.0 }
 0x1db   : > { %7378 = vmatmul.mubr.bf16.gmra.mxu1 %v1981_v20  ;;  %v998_v20 = vadd.f32 %v9174_v63, %v9276_v22 }
 0x1dc   : > { %7381 = vmatprep.mubr.bf16.mxu1 %v1982_v40  ;;  %v1000_v40 = vadd.f32 %v9174_v63, %v9286_v30 }
 0x1dd   : > { %v1510_v38 = vmax.f32 %v998_v20, 0.0  ;;  %v1007_v20 = vadd.f32 %v9174_v63, %v9326_v25 }
 0x1de   : > { %v1512_v28 = vmax.f32 %v1000_v40, 0.0  ;;  %v1009_v40 = vadd.f32 %v9177_v3, %v9195_v15 }
 0x1df   : > { %v1987_v62 = vpack.c.bf16 %v1511_v35, %v1510_v38  ;;  %v1519_v38 = vmax.f32 %v1007_v20, 0.0  ;;  %v1016_v20 = vadd.f32 %v9177_v3, %v9286_v30 }
 0x1e0   : > { %v1988_v16 = vpack.c.bf16 %v1513_v37, %v1512_v28  ;;  %v1521_v28 = vmax.f32 %v1009_v40, 0.0 }
 0x1e3   : > { %7382 = vmatmul.mubr.bf16.gmra.mxu1 %v1983_v41  ;;  %v1002_v41 = vadd.f32 %v9174_v63, %v9298_v59 }
 0x1e4   : > { %7385 = vmatprep.mubr.bf16.mxu1 %v1984_v32  ;;  %v1004_v32 = vadd.f32 %v9174_v63, %v9308_v17 }
 0x1e5   : > { %v1514_v45 = vmax.f32 %v1002_v41, 0.0 }
 0x1e6   : > { %v1516_v53 = vmax.f32 %v1004_v32, 0.0 }
 0x1e7   : > { %v1989_v11 = vpack.c.bf16 %v1515_v48, %v1514_v45  ;;  %v1524_v45 = vmax.f32 %v1012_v43, 0.0 }
 0x1e8   : > { %v1990_v46 = vpack.c.bf16 %v1517_v10, %v1516_v53  ;;  %v1014_v10 = vadd.f32 %v9177_v3, %v9276_v22 }
 0x1eb   : > { %7386 = vmatmul.mubr.bf16.gmra.mxu1 %v1985_v19  ;;  %v1006_v19 = vadd.f32 %v9174_v63, %v9323_v42  ;;  %v1011_v63 = vadd.f32 %v9177_v3, %v9250_v5 }
 0x1ec   : > { %7389 = vmatprep.mubr.bf16.mxu1 %v1986_v21  ;;  %v1008_v21 = vadd.f32 %v9177_v3, %v9185_v7 }
 0x1ed   : > { %v1518_v27 = vmax.f32 %v1006_v19, 0.0  ;;  %v1523_v29 = vmax.f32 %v1011_v63, 0.0  ;;  %v1020_v63 = vadd.f32 %v9177_v3, %v9308_v17 }
 0x1ee   : > { %v1520_v35 = vmax.f32 %v1008_v21, 0.0  ;;  %v1526_v21 = vmax.f32 %v1014_v10, 0.0 }
 0x1ef   : > { %v1991_v37 = vpack.c.bf16 %v1519_v38, %v1518_v27  ;;  %v1528_v27 = vmax.f32 %v1016_v20, 0.0 }
 0x1f0   : > { %v1992_v41 = vpack.c.bf16 %v1521_v28, %v1520_v35  ;;  %v1018_v28 = vadd.f32 %v9177_v3, %v9298_v59 }
 0x1f2   : > { %v1530_v43 = vmax.f32 %v1018_v28, 0.0  ;;  %v1028_v28 = vadd.f32 %v9180_v4, %v9263_v12 }
 0x1f3   : > { %7390 = vmatmul.mubr.bf16.gmra.mxu1 %v1987_v62  ;;  %v1010_v62 = vadd.f32 %v9177_v3, %v9247_v2 }
 0x1f4   : > { %7393 = vmatprep.mubr.bf16.mxu1 %v1988_v16  ;;  %v1013_v16 = vadd.f32 %v9177_v3, %v9266_v13 }
 0x1f5   : > { %v1522_v32 = vmax.f32 %v1010_v62, 0.0 }
 0x1f6   : > { %v1525_v48 = vmax.f32 %v1013_v16, 0.0 }
 0x1f7   : > { %v1993_v53 = vpack.c.bf16 %v1523_v29, %v1522_v32  ;;  %v1532_v32 = vmax.f32 %v1020_v63, 0.0 }
 0x1f8   : > { %v1994_v19 = vpack.c.bf16 %v1525_v48, %v1524_v45  ;;  %v1022_v48 = vadd.f32 %v9177_v3, %v9323_v42 }
 0x1fa   : > { %v1534_v20 = vmax.f32 %v1022_v48, 0.0  ;;  %v1032_v48 = vadd.f32 %v9180_v4, %v9286_v30 }
 0x1fb   : > { %7394 = vmatmul.mubr.bf16.gmra.mxu1 %v1989_v11  ;;  %v1015_v11 = vadd.f32 %v9177_v3, %v9279_v23 }
 0x1fc   : > { %7397 = vmatprep.mubr.bf16.mxu1 %v1990_v46  ;;  %v1017_v46 = vadd.f32 %v9177_v3, %v9289_v36 }
 0x1fd   : > { %v1527_v40 = vmax.f32 %v1015_v11, 0.0  ;;  %v1024_v11 = vadd.f32 %v9180_v4, %v9185_v7 }
 0x1fe   : > { %v1529_v38 = vmax.f32 %v1017_v46, 0.0 }
 0x1ff   : > { %v1995_v35 = vpack.c.bf16 %v1527_v40, %v1526_v21  ;;  %v1536_v21 = vmax.f32 %v1024_v11, 0.0 }
 0x200   : > { %v1996_v62 = vpack.c.bf16 %v1529_v38, %v1528_v27  ;;  %v1026_v38 = vadd.f32 %v9180_v4, %v9247_v2 }
 0x203   : > { %7398 = vmatmul.mubr.bf16.gmra.mxu1 %v1991_v37  ;;  %v1019_v37 = vadd.f32 %v9177_v3, %v9301_v1 }
 0x204   : > { %7401 = vmatprep.mubr.bf16.mxu1 %v1992_v41  ;;  %v1021_v41 = vadd.f32 %v9177_v3, %v9311_v18 }
 0x205   : > { %v1531_v16 = vmax.f32 %v1019_v37, 0.0  ;;  %v1029_v37 = vadd.f32 %v9180_v4, %v9266_v13 }
 0x206   : > { %v1533_v29 = vmax.f32 %v1021_v41, 0.0  ;;  %v1540_v41 = vmax.f32 %v1028_v28, 0.0  ;;  %v1034_v28 = vadd.f32 %v9180_v4, %v9298_v59 }
 0x207   : > { %v1997_v45 = vpack.c.bf16 %v1531_v16, %v1530_v43  ;;  %v1541_v43 = vmax.f32 %v1029_v37, 0.0 }
 0x208   : > { %v1998_v10 = vpack.c.bf16 %v1533_v29, %v1532_v32  ;;  %v1030_v32 = vadd.f32 %v9180_v4, %v9276_v22  ;;  %v1031_v29 = vadd.f32 %v9180_v4, %v9279_v23 }
 0x20b   : > { %7402 = vmatmul.mubr.bf16.gmra.mxu1 %v1993_v53  ;;  %v1023_v53 = vadd.f32 %v9177_v3, %v9326_v25  ;;  %v1027_v3 = vadd.f32 %v9180_v4, %v9250_v5 }
 0x20c   : > { %7405 = vmatprep.mubr.bf16.mxu1 %v1994_v19  ;;  %v1025_v19 = vadd.f32 %v9180_v4, %v9195_v15 }
 0x20d   : > { %v1535_v46 = vmax.f32 %v1023_v53, 0.0  ;;  %v1539_v63 = vmax.f32 %v1027_v3, 0.0  ;;  %v1033_v53 = vadd.f32 %v9180_v4, %v9289_v36 }
 0x20e   : > { %v1537_v40 = vmax.f32 %v1025_v19, 0.0 }
 0x20f   : > { %v1999_v27 = vpack.c.bf16 %v1535_v46, %v1534_v20  ;;  %v1542_v20 = vmax.f32 %v1030_v32, 0.0  ;;  %v1543_v46 = vmax.f32 %v1031_v29, 0.0 }
 0x213   : > { %7406 = vmatmul.mubr.bf16.gmra.mxu1 %v1995_v35  ;;  %v2000_v35 = vpack.c.bf16 %v1537_v40, %v1536_v21  ;;  %v1544_v40 = vmax.f32 %v1032_v48, 0.0 }
 0x214   : > { %7409 = vmatprep.mubr.bf16.mxu1 %v1996_v62  ;;  %v1538_v62 = vmax.f32 %v1026_v38, 0.0 }
 0x216   : > { %v2001_v16 = vpack.c.bf16 %v1539_v63, %v1538_v62  ;;  %v2003_v62 = vpack.c.bf16 %v1543_v46, %v1542_v20  ;;  %v1035_v63 = vadd.f32 %v9180_v4, %v9301_v1  ;;  %v1546_v46 = vmax.f32 %v1034_v28, 0.0 }
 0x217   : > { %v1040_v28 = vadd.f32 %v9188_v8, %v9185_v7  ;;  %v1042_v7 = vadd.f32 %v9188_v8, %v9247_v2 }
 0x21b   : > { %7410 = vmatmul.mubr.bf16.gmra.mxu1 %v1997_v45  ;;  %v2002_v45 = vpack.c.bf16 %v1541_v43, %v1540_v41  ;;  %v1036_v41 = vadd.f32 %v9180_v4, %v9308_v17  ;;  %v1037_v43 = vadd.f32 %v9180_v4, %v9311_v18 }
 0x21c   : > { %7413 = vmatprep.mubr.bf16.mxu1 %v1998_v10  ;;  %v9477_v10 = vld [vmem:[%s12446_s5] ss:$0 sm:$0xff] }
 0x21d   : > { %v1548_v49 = vmax.f32 %v1036_v41, 0.0  ;;  %v1549_v34 = vmax.f32 %v1037_v43, 0.0 }
 0x223   : > { %7414 = vmatmul.mubr.bf16.gmra.mxu1 %v1999_v27  ;;  %v1545_v27 = vmax.f32 %v1033_v53, 0.0 }
 0x224   : > { %7417 = vmatprep.mubr.bf16.mxu1 %v2000_v35 }
 0x22b   : > { %v7323_v11 = vpop.f32.mrf.mxu1  ;;  %7418 = vmatmul.mubr.bf16.gmra.mxu1 %v2001_v16 }
 0x22c   : > { %7421 = vmatprep.mubr.bf16.mxu1 %v2002_v45  ;;  %v2322_v21 = vadd.f32 %v7323_v11, %v9477_v10  ;;  %v2004_v45 = vpack.c.bf16 %v1545_v27, %v1544_v40  ;;  %v1038_v27 = vadd.f32 %v9180_v4, %v9323_v42 }
 0x22d   : > { %v2313_v19 = vpop.f32.mrf.mxu1 }
 0x22e   : > { %v2314_v3 = vadd.f32 %v9477_v10, %v2313_v19  ;;  %v4362_v16 = vmax.f32 %v2322_v21, 0.0  ;;  %v1550_v43 = vmax.f32 %v1038_v27, 0.0  ;;  %v1554_v27 = vmax.f32 %v1042_v7, 0.0 }
 0x22f   : > { %v7324_v38 = vpop.f32.mrf.mxu1  ;;  %v1049_v7 = vadd.f32 %v9188_v8, %v9289_v36 }
 0x230   : > { %v2325_v35 = vadd.f32 %v7324_v38, %v9477_v10  ;;  %v4360_v53 = vmax.f32 %v2314_v3, 0.0  ;;  %v1547_v38 = vmax.f32 %v1035_v63, 0.0  ;;  %v1039_v3 = vadd.f32 %v9180_v4, %v9326_v25 }
 0x231   : > { %v2316_v37 = vpop.f32.mrf.mxu1  ;;  %v1561_v61 = vmax.f32 %v1049_v7, 0.0  ;;  %v1053_v7 = vadd.f32 %v9188_v8, %v9311_v18 }
 0x232   : > { %v4363_v32 = vmax.f32 %v2325_v35, 0.0  ;;  %v2317_v29 = vadd.f32 %v9477_v10, %v2316_v37  ;;  %v2005_v40 = vpack.c.bf16 %v1547_v38, %v1546_v46  ;;  %v2006_v37 = vpack.c.bf16 %v1549_v34, %v1548_v49 }
 0x233   : > { %v9491_v48 = vpop.f32.mrf.mxu1  ;;  %7422 = vmatmul.mubr.bf16.gmra.mxu1 %v2003_v62  ;;  %v1041_v62 = vadd.f32 %v9188_v8, %v9195_v15  ;;  %v1043_v34 = vadd.f32 %v9188_v8, %v9250_v5  ;;  %v1045_v46 = vadd.f32 %v9188_v8, %v9266_v13 }
 0x234   : > { %v9493_v11 = vpack.c.bf16 %v4363_v32, %v4362_v16  ;;  %v4361_v19 = vmax.f32 %v2317_v29, 0.0  ;;  %7425 = vmatprep.mubr.bf16.mxu1 %v2004_v45  ;;  %v1551_v16 = vmax.f32 %v1039_v3, 0.0  ;;  %v1552_v32 = vmax.f32 %v1040_v28, 0.0 }
 0x235   : > { %v9495_v20 = vpop.f32.mrf.mxu1  ;;  %v1553_v29 = vmax.f32 %v1041_v62, 0.0  ;;  %v1555_v3 = vmax.f32 %v1043_v34, 0.0  ;;  %v1557_v62 = vmax.f32 %v1045_v46, 0.0 }
 0x236   : > { %v9497_v26 = vpack.c.bf16 %v4361_v19, %v4360_v53  ;;  %v2007_v4 = vpack.c.bf16 %v1551_v16, %v1550_v43  ;;  %v1044_v19 = vadd.f32 %v9188_v8, %v9263_v12 }
 0x237   : > { %v9499_v21 = vpop.f32.mrf.mxu1  ;;  %v2008_v49 = vpack.c.bf16 %v1553_v29, %v1552_v32  ;;  %v1046_v32 = vadd.f32 %v9188_v8, %v9276_v22  ;;  %v2009_v39 = vpack.c.bf16 %v1555_v3, %v1554_v27  ;;  %v1559_v3 = vmax.f32 %v1047_v33, 0.0 }
 0x238   : > { %v1556_v28 = vmax.f32 %v1044_v19, 0.0  ;;  %v1051_v33 = vadd.f32 %v9188_v8, %v9301_v1 }
 0x239   : > { %v9501_v35 = vpop.f32.mrf.mxu1  ;;  %v1558_v27 = vmax.f32 %v1046_v32, 0.0 }
 0x23a   : > { %v2010_v19 = vpack.c.bf16 %v1557_v62, %v1556_v28  ;;  %v1563_v56 = vmax.f32 %v1051_v33, 0.0 }
 0x23b   : > { %v9511_v63 = vpop.f32.mrf.mxu1  ;;  %7426 = vmatmul.mubr.bf16.gmra.mxu1 %v2005_v40 }
 0x23c   : > { %7429 = vmatprep.mubr.bf16.mxu1 %v2006_v37 }
 0x23d   : > { %v9513_v41 = vpop.f32.mrf.mxu1 }
 0x23f   : > { %v7332_v45 = vpop.f32.mrf.mxu1 }
 0x241   : > { %v9515_v53 = vpop.f32.mrf.mxu1 }
 0x243   : > { %v7335_v38 = vpop.f32.mrf.mxu1  ;;  %7430 = vmatmul.mubr.bf16.gmra.mxu1 %v2007_v4  ;;  %v1048_v4 = vadd.f32 %v9188_v8, %v9286_v30 }
 0x244   : > { %7433 = vmatprep.mubr.bf16.mxu1 %v2008_v49  ;;  %v2370_v37 = vadd.f32 %v7335_v38, %v9477_v10 }
 0x245   : > { %v2361_v40 = vpop.f32.mrf.mxu1  ;;  %v1560_v24 = vmax.f32 %v1048_v4, 0.0  ;;  %v1052_v4 = vadd.f32 %v9188_v8, %v9308_v17 }
 0x246   : > { %v4374_v34 = vmax.f32 %v2370_v37, 0.0  ;;  %v2362_v58 = vadd.f32 %v9477_v10, %v2361_v40  ;;  %v12516_v37 = vmov 0.0  }
 0x247   : > { %v7336_v43 = vpop.f32.mrf.mxu1  ;;  %v2012_v40 = vpack.c.bf16 %v1561_v61, %v1560_v24  ;;  %v1564_v51 = vmax.f32 %v1052_v4, 0.0 }
 0x248   : > { %v2373_v16 = vadd.f32 %v7336_v43, %v9477_v10 }
 0x249   : > { %v2364_v29 = vpop.f32.mrf.mxu1 }
 0x24a   : > { %v4375_v49 = vmax.f32 %v2373_v16, 0.0  ;;  %v2365_v38 = vadd.f32 %v9477_v10, %v2364_v29  ;;  %v2011_v29 = vpack.c.bf16 %v1559_v3, %v1558_v27 }
 0x24b   : > { %v7339_v46 = vpop.f32.mrf.mxu1  ;;  %7434 = vmatmul.mubr.bf16.gmra.mxu1 %v2009_v39  ;;  %v1050_v39 = vadd.f32 %v9188_v8, %v9298_v59 }
 0x24c   : > { %7437 = vmatprep.mubr.bf16.mxu1 %v2010_v19  ;;  %v4879_v43 = vpack.c.bf16 %v4375_v49, %v4374_v34  ;;  %v2386_v57 = vadd.f32 %v7339_v46, %v9477_v10  ;;  %v4373_v28 = vmax.f32 %v2365_v38, 0.0  ;;  %v4372_v34 = vmax.f32 %v2362_v58, 0.0 }
 0x24d   : > { %v2377_v31 = vpop.f32.mrf.mxu1  ;;  %v1562_v3 = vmax.f32 %v1050_v39, 0.0  ;;  %v1565_v58 = vmax.f32 %v1053_v7, 0.0  ;;  %v9566_v7 = vld [vmem:[%s9106_s22] sm:$0xff] }
 0x24e   : > { %7834 = vmatpush3.bf16.xpose.msra.mxu0 %v4879_v43  ;;  %v2378_v62 = vadd.f32 %v9477_v10, %v2377_v31  ;;  %v4378_v49 = vmax.f32 %v2386_v57, 0.0  ;;  %v2357_v31 = vadd.f32 %v7332_v45, %v9477_v10  ;;  %v4878_v61 = vpack.c.bf16 %v4373_v28, %v4372_v34 }
 0x24f   : > { %v7340_v52 = vpop.f32.mrf.mxu1  ;;  %7835 = vmatprep.subr.bf16.mxu0 %v12516_v37  ;;  %v2354_v57 = vadd.f32 %v9511_v63, %v9477_v10  ;;  %v1054_v28 = vadd.f32 %v9188_v8, %v9323_v42  ;;  %v2014_v4 = vpack.c.bf16 %v1565_v58, %v1564_v51  ;;  %v1056_v34 = vadd.f32 %v9566_v7, %v9232_v47 }
 0x250   : > { %v2389_v16 = vadd.f32 %v7340_v52, %v9477_v10  ;;  %v4376_v38 = vmax.f32 %v2378_v62, 0.0 }
 0x251   : > { %v2380_v32 = vpop.f32.mrf.mxu1  ;;  %v4370_v42 = vmax.f32 %v2354_v57, 0.0 }
 0x252   : > { %v4379_v19 = vmax.f32 %v2389_v16, 0.0  ;;  %v2381_v46 = vadd.f32 %v9477_v10, %v2380_v32  ;;  %v4371_v32 = vmax.f32 %v2357_v31, 0.0 }
 0x253   : > { %v7343_v52 = vpop.f32.mrf.mxu1  ;;  %7438 = vmatmul.mubr.bf16.gmra.mxu1 %v2011_v29  ;;  %v1055_v29 = vadd.f32 %v9188_v8, %v9326_v25 }
 0x254   : > { %v9551_v43 = vpack.c.bf16 %v4379_v19, %v4378_v49  ;;  %v4377_v27 = vmax.f32 %v2381_v46, 0.0  ;;  %7441 = vmatprep.mubr.bf16.mxu1 %v2012_v40  ;;  %v2402_v45 = vadd.f32 %v7343_v52, %v9477_v10  ;;  %v2013_v40 = vpack.c.bf16 %v1563_v56, %v1562_v3 }
 0x255   : > { %v2393_v24 = vpop.f32.mrf.mxu1  ;;  %v1057_v49 = vadd.f32 %v9232_v47, %v9195_v15  ;;  %v2349_v52 = vadd.f32 %v9477_v10, %v9515_v53  ;;  %v4877_v51 = vpack.c.bf16 %v4371_v32, %v4370_v42  ;;  %v1566_v15 = vmax.f32 %v1054_v28, 0.0 }
 0x256   : > { %v9555_v16 = vpack.c.bf16 %v4377_v27, %v4376_v38  ;;  %7836 = vmatpush3.bf16.xpose.msra.mxu0 %v4878_v61  ;;  %v2394_v39 = vadd.f32 %v9477_v10, %v2393_v24  ;;  %v4382_v19 = vmax.f32 %v2402_v45, 0.0  ;;  %v1567_v61 = vmax.f32 %v1055_v29, 0.0 }
 0x257   : > { %v7344_v62 = vpop.f32.mrf.mxu1  ;;  %7837 = vmatprep.subr.bf16.mxu0 %v12516_v37  ;;  %v2346_v24 = vadd.f32 %v9477_v10, %v9513_v41  ;;  %v1568_v53 = vmax.f32 %v1056_v34, 0.0  ;;  %v1569_v58 = vmax.f32 %v1057_v49, 0.0  ;;  %v4369_v45 = vmax.f32 %v2349_v52, 0.0 }
 0x258   : > { %v2405_v33 = vadd.f32 %v7344_v62, %v9477_v10  ;;  %v4380_v56 = vmax.f32 %v2394_v39, 0.0  ;;  %v2015_v32 = vpack.c.bf16 %v1567_v61, %v1566_v15  ;;  %v1058_v28 = vadd.f32 %v9232_v47, %v9247_v2 }
 0x259   : > { %v2396_v63 = vpop.f32.mrf.mxu1  ;;  %v1059_v39 = vadd.f32 %v9232_v47, %v9250_v5  ;;  %v4368_v41 = vmax.f32 %v2346_v24, 0.0  ;;  %v1060_v29 = vadd.f32 %v9232_v47, %v9263_v12  ;;  %v2338_v42 = vadd.f32 %v9491_v48, %v9477_v10 }
 0x25a   : > { %v4383_v46 = vmax.f32 %v2405_v33, 0.0  ;;  %v2397_v31 = vadd.f32 %v9477_v10, %v2396_v63  ;;  %v2016_v33 = vpack.c.bf16 %v1569_v58, %v1568_v53  ;;  %v1061_v63 = vadd.f32 %v9232_v47, %v9266_v13 }
 0x25b   : > { %v9575_v8 = vpop.f32.mrf.mxu1  ;;  %7442 = vmatmul.mubr.bf16.gmra.mxu1 %v2013_v40  ;;  %v4876_v34 = vpack.c.bf16 %v4369_v45, %v4368_v41  ;;  %v1570_v49 = vmax.f32 %v1058_v28, 0.0  ;;  %v1571_v5 = vmax.f32 %v1059_v39, 0.0  ;;  %v1572_v12 = vmax.f32 %v1060_v29, 0.0 }
 0x25c   : > { %v9577_v25 = vpack.c.bf16 %v4383_v46, %v4382_v19  ;;  %v4381_v38 = vmax.f32 %v2397_v31, 0.0  ;;  %7445 = vmatprep.mubr.bf16.mxu1 %v2014_v4  ;;  %v2341_v4 = vadd.f32 %v9499_v21, %v9477_v10  ;;  %v1573_v19 = vmax.f32 %v1061_v63, 0.0 }
 0x25d   : > { %v9579_v27 = vpop.f32.mrf.mxu1  ;;  %v1062_v21 = vadd.f32 %v9232_v47, %v9276_v22  ;;  %v2017_v52 = vpack.c.bf16 %v1571_v5, %v1570_v49  ;;  %v1064_v48 = vadd.f32 %v9232_v47, %v9286_v30  ;;  %v2333_v22 = vadd.f32 %v9477_v10, %v9501_v35 }
 0x25e   : > { %v9583_v3 = vpack.c.bf16 %v4381_v38, %v4380_v56  ;;  %7838 = vmatpush3.bf16.xpose.msra.mxu0 %v4877_v51  ;;  %v4367_v13 = vmax.f32 %v2341_v4, 0.0  ;;  %v1063_v51 = vadd.f32 %v9232_v47, %v9279_v23  ;;  %v1065_v56 = vadd.f32 %v9232_v47, %v9289_v36 }
 0x25f   : > { %v9585_v57 = vpop.f32.mrf.mxu1  ;;  %7839 = vmatprep.subr.bf16.mxu0 %v12516_v37  ;;  %v4366_v38 = vmax.f32 %v2338_v42, 0.0  ;;  %v2018_v15 = vpack.c.bf16 %v1573_v19, %v1572_v12  ;;  %v1574_v58 = vmax.f32 %v1062_v21, 0.0  ;;  %v2330_v30 = vadd.f32 %v9477_v10, %v9495_v20 }
 0x260   : > { %v1575_v45 = vmax.f32 %v1063_v51, 0.0  ;;  %v1577_v23 = vmax.f32 %v1065_v56, 0.0  ;;  %v1066_v39 = vadd.f32 %v9232_v47, %v9298_v59  ;;  %v4365_v41 = vmax.f32 %v2333_v22, 0.0 }
 0x261   : > { %v9588_v62 = vpop.f32.mrf.mxu1  ;;  %v4875_v24 = vpack.c.bf16 %v4367_v13, %v4366_v38  ;;  %v1067_v29 = vadd.f32 %v9232_v47, %v9301_v1  ;;  %v1069_v49 = vadd.f32 %v9232_v47, %v9311_v18  ;;  %v4364_v5 = vmax.f32 %v2330_v30, 0.0 }
 0x262   : > { %v2019_v4 = vpack.c.bf16 %v1575_v45, %v1574_v58  ;;  %v2421_v50 = vadd.f32 %v9585_v57, %v9477_v10 }
 0x263   : > { %v9598_v40 = vpop.f32.mrf.mxu1  ;;  %7446 = vmatmul.mubr.bf16.gmra.mxu1 %v2015_v32  ;;  %v1576_v32 = vmax.f32 %v1064_v48, 0.0  ;;  %v1579_v48 = vmax.f32 %v1067_v29, 0.0 }
 0x264   : > { %7449 = vmatprep.mubr.bf16.mxu1 %v2016_v33 }
 0x265   : > { %v9602_v2 = vpop.f32.mrf.mxu1  ;;  %v2020_v20 = vpack.c.bf16 %v1577_v23, %v1576_v32  ;;  %v9650_v23 = vld [vmem:[%s9106_s22 + $0x78] sm:$0xff] }
 0x266   : > { %7840 = vmatpush3.bf16.xpose.msra.mxu0 %v4876_v34  ;;  %v1068_v34 = vadd.f32 %v9232_v47, %v9308_v17  ;;  %v1578_v17 = vmax.f32 %v1066_v39, 0.0  ;;  %v1071_v30 = vadd.f32 %v9650_v23, %v9232_v47 }
 0x267   : > { %v9606_v46 = vpop.f32.mrf.mxu1  ;;  %7841 = vmatprep.subr.bf16.mxu0 %v12516_v37 }
 0x268   : > { %v1580_v38 = vmax.f32 %v1068_v34, 0.0  ;;  %v2021_v32 = vpack.c.bf16 %v1579_v48, %v1578_v17 }
 0x269   : > { %v9611_v31 = vpop.f32.mrf.mxu1 }
 0x26b   : > { %v7355_v61 = vpop.f32.mrf.mxu1  ;;  %7450 = vmatmul.mubr.bf16.gmra.mxu1 %v2017_v52  ;;  %v4874_v52 = vpack.c.bf16 %v4365_v41, %v4364_v5  ;;  %v1583_v5 = vmax.f32 %v1071_v30, 0.0 }
 0x26c   : > { %7453 = vmatprep.mubr.bf16.mxu1 %v2018_v15  ;;  %v2450_v28 = vadd.f32 %v7355_v61, %v9477_v10  ;;  %v1581_v15 = vmax.f32 %v1069_v49, 0.0 }
 0x26d   : > { %v2441_v53 = vpop.f32.mrf.mxu1 }
 0x26e   : > { %7842 = vmatpush3.bf16.xpose.msra.mxu0 %v4875_v24  ;;  %v2442_v35 = vadd.f32 %v9477_v10, %v2441_v53  ;;  %v4394_v42 = vmax.f32 %v2450_v28, 0.0  ;;  %v9645_v53 = vld [vmem:[%s9106_s22 + $0x70] sm:$0xff]  ;;  %v1072_v28 = vadd.f32 %v9566_v7, %v9235_v54  ;;  %v2022_v29 = vpack.c.bf16 %v1581_v15, %v1580_v38  ;;  %v9677_v38 = vld [vmem:[%s9106_s22 + $0x18] sm:$0xff]  ;;  %v9682_v15 = vld [vmem:[%s9106_s22 + $0x20] sm:$0xff] }
 0x26f   : > { %v7356_v36 = vpop.f32.mrf.mxu1  ;;  %7843 = vmatprep.subr.bf16.mxu0 %v12516_v37  ;;  %v1070_v58 = vadd.f32 %v9645_v53, %v9232_v47 }
 0x270   : > { %v2453_v33 = vadd.f32 %v7356_v36, %v9477_v10  ;;  %v4392_v13 = vmax.f32 %v2442_v35, 0.0  ;;  %v9657_v36 = vld [vmem:[%s9106_s22 + $0x8] sm:$0xff] }
 0x271   : > { %v2444_v63 = vpop.f32.mrf.mxu1  ;;  %v1073_v39 = vadd.f32 %v9657_v36, %v9235_v54  ;;  %v1582_v49 = vmax.f32 %v1070_v58, 0.0 }
 0x272   : > { %v4395_v59 = vmax.f32 %v2453_v33, 0.0  ;;  %v2445_v12 = vadd.f32 %v9477_v10, %v2444_v63 }
 0x273   : > { %v7359_v19 = vpop.f32.mrf.mxu1  ;;  %7454 = vmatmul.mubr.bf16.gmra.mxu1 %v2019_v4 }
 0x274   : > { %v9636_v21 = vpack.c.bf16 %v4395_v59, %v4394_v42  ;;  %v4393_v1 = vmax.f32 %v2445_v12, 0.0  ;;  %7457 = vmatprep.mubr.bf16.mxu1 %v2020_v20  ;;  %v2466_v18 = vadd.f32 %v7359_v19, %v9477_v10  ;;  %v1584_v12 = vmax.f32 %v1072_v28, 0.0 }
 0x275   : > { %v2457_v51 = vpop.f32.mrf.mxu1  ;;  %v1585_v19 = vmax.f32 %v1073_v39, 0.0  ;;  %v2437_v39 = vadd.f32 %v9606_v46, %v9477_v10 }
 0x276   : > { %12517 = vst [vmem:[#allocation41_spill] sm:$0xff] %v9636_v21  ;;  %v9638_v56 = vpack.c.bf16 %v4393_v1, %v4392_v13  ;;  %7844 = vmatpush3.bf16.xpose.msra.mxu0 %v4874_v52  ;;  %v2458_v24 = vadd.f32 %v9477_v10, %v2457_v51  ;;  %v4398_v41 = vmax.f32 %v2466_v18, 0.0  ;;  %v9672_v51 = vld [vmem:[%s9106_s22 + $0x10] sm:$0xff]  ;;  %v2023_v18 = vpack.c.bf16 %v1583_v5, %v1582_v49 }
 0x277   : > { %v7360_v61 = vpop.f32.mrf.mxu1  ;;  %7845 = vmatprep.subr.bf16.mxu0 %v12516_v37  ;;  %v1074_v17 = vadd.f32 %v9672_v51, %v9235_v54  ;;  %v2024_v30 = vpack.c.bf16 %v1585_v19, %v1584_v12  ;;  %v2434_v49 = vadd.f32 %v9598_v40, %v9477_v10  ;;  %v9704_v12 = vld [vmem:[%s9106_s22 + $0x30] sm:$0xff] }
 0x278   : > { %12518 = vst [vmem:[#allocation42_spill] sm:$0xff] %v9638_v56  ;;  %v2469_v22 = vadd.f32 %v7360_v61, %v9477_v10  ;;  %v4396_v4 = vmax.f32 %v2458_v24, 0.0  ;;  %v1076_v61 = vadd.f32 %v9682_v15, %v9235_v54  ;;  %v9687_v24 = vld [vmem:[%s9106_s22 + $0x28] sm:$0xff]  ;;  %v1078_v19 = vadd.f32 %v9704_v12, %v9235_v54 }
 0x279   : > { %v2460_v45 = vpop.f32.mrf.mxu1 }
 0x27a   : > { %v4399_v35 = vmax.f32 %v2469_v22, 0.0  ;;  %v2461_v33 = vadd.f32 %v9477_v10, %v2460_v45  ;;  %v1077_v22 = vadd.f32 %v9687_v24, %v9235_v54 }
 0x27b   : > { %v7363_v63 = vpop.f32.mrf.mxu1  ;;  %7458 = vmatmul.mubr.bf16.gmra.mxu1 %v2021_v32 }
 0x27c   : > { %v9662_v20 = vpack.c.bf16 %v4399_v35, %v4398_v41  ;;  %v4397_v47 = vmax.f32 %v2461_v33, 0.0  ;;  %7461 = vmatprep.mubr.bf16.mxu1 %v2022_v29  ;;  %v2482_v59 = vadd.f32 %v7363_v63, %v9477_v10  ;;  %v1586_v63 = vmax.f32 %v1074_v17, 0.0 }
 0x27d   : > { %v2473_v34 = vpop.f32.mrf.mxu1 }
 0x27e   : > { %v9664_v42 = vpack.c.bf16 %v4397_v47, %v4396_v4  ;;  %7846 = vmatpush3.bf16.xpose.msra.mxu0 %v9493_v11  ;;  %v2474_v1 = vadd.f32 %v9477_v10, %v2473_v34  ;;  %v1075_v11 = vadd.f32 %v9677_v38, %v9235_v54  ;;  %v4402_v58 = vmax.f32 %v2482_v59, 0.0 }
 0x27f   : > { %v7364_v13 = vpop.f32.mrf.mxu1  ;;  %7847 = vmatprep.subr.bf16.mxu0 %v12516_v37  ;;  %v1588_v47 = vmax.f32 %v1076_v61, 0.0  ;;  %v1589_v34 = vmax.f32 %v1077_v22, 0.0  ;;  %v9721_v22 = vld [vmem:[%s9106_s22 + $0x48] sm:$0xff] }
 0x280   : > { %v2485_v52 = vadd.f32 %v7364_v13, %v9477_v10  ;;  %v4400_v41 = vmax.f32 %v2474_v1, 0.0  ;;  %v1587_v4 = vmax.f32 %v1075_v11, 0.0  ;;  %v4391_v13 = vmax.f32 %v2437_v39, 0.0  ;;  %v9716_v11 = vld [vmem:[%s9106_s22 + $0x40] sm:$0xff] }
 0x281   : > { %v2476_v48 = vpop.f32.mrf.mxu1  ;;  %v1080_v61 = vadd.f32 %v9716_v11, %v9235_v54  ;;  %v9729_v39 = vld [vmem:[%s12447_s6] sm:$0x3] }
 0x282   : > { %v4403_v45 = vmax.f32 %v2485_v52, 0.0  ;;  %v2477_v32 = vadd.f32 %v9477_v10, %v2476_v48  ;;  %v9711_v52 = vld [vmem:[%s9106_s22 + $0x38] sm:$0xff] }
 0x283   : > { %v7367_v28 = vpop.f32.mrf.mxu1  ;;  %7462 = vmatmul.mubr.bf16.gmra.mxu1 %v2023_v18  ;;  %v1079_v17 = vadd.f32 %v9711_v52, %v9235_v54  ;;  %v2026_v18 = vpack.c.bf16 %v1589_v34, %v1588_v47 }
 0x284   : > { %v9694_v35 = vpack.c.bf16 %v4403_v45, %v4402_v58  ;;  %v4401_v33 = vmax.f32 %v2477_v32, 0.0  ;;  %7465 = vmatprep.mubr.bf16.mxu1 %v2024_v30  ;;  %v2498_v46 = vadd.f32 %v7367_v28, %v9477_v10  ;;  %v1081_v58 = vadd.f32 %v9721_v22, %v9235_v54 }
 0x285   : > { %v2489_v29 = vpop.f32.mrf.mxu1  ;;  %v4390_v45 = vmax.f32 %v2434_v49, 0.0  ;;  %v1590_v49 = vmax.f32 %v1078_v19, 0.0  ;;  %v9745_v19 = vld [vmem:[%s9106_s22 + $0x50] sm:$0xff] }
 0x286   : > { %v9698_v5 = vpack.c.bf16 %v4401_v33, %v4400_v41  ;;  %7848 = vmatpush3.bf16.xpose.msra.mxu0 %v9497_v26  ;;  %v2490_v1 = vadd.f32 %v9477_v10, %v2489_v29  ;;  %v2025_v26 = vpack.c.bf16 %v1587_v4, %v1586_v63  ;;  %v4406_v32 = vmax.f32 %v2498_v46, 0.0 }
 0x287   : > { %v7368_v59 = vpop.f32.mrf.mxu1  ;;  %7853 = vmatprep.subr.bf16.mxu0 %v12516_v37  ;;  %v2429_v41 = vadd.f32 %v9477_v10, %v9611_v31  ;;  %v4887_v29 = vpack.c.bf16 %v4391_v13, %v4390_v45  ;;  %v1591_v46 = vmax.f32 %v1079_v17, 0.0  ;;  %v2426_v31 = vadd.f32 %v9477_v10, %v9602_v2 }
 0x288   : > { %v2501_v40 = vadd.f32 %v7368_v59, %v9477_v10  ;;  %v4404_v63 = vmax.f32 %v2490_v1, 0.0  ;;  %v1592_v59 = vmax.f32 %v1080_v61, 0.0  ;;  %v1082_v17 = vadd.f32 %v9745_v19, %v9235_v54  ;;  %v9752_v61 = vld [vmem:[%s9106_s22 + $0x58] sm:$0xff] }
 0x289   : > { %v2492_v48 = vpop.f32.mrf.mxu1 }
 0x28a   : > { %v4407_v30 = vmax.f32 %v2501_v40, 0.0  ;;  %v2493_v28 = vadd.f32 %v9477_v10, %v2492_v48  ;;  %v1593_v40 = vmax.f32 %v1081_v58, 0.0  ;;  %v1083_v58 = vadd.f32 %v9752_v61, %v9235_v54 }
 0x28b   : > { %v7371_v33 = vpop.f32.mrf.mxu1  ;;  %7466 = vmatmul.mubr.bf16.gmra.mxu1 %v2025_v26  ;;  %v4389_v26 = vmax.f32 %v2429_v41, 0.0  ;;  %v1594_v9 = vmax.f32 %v1082_v17, 0.0 }
 0x28c   : > { %v9733_v4 = vpack.c.bf16 %v4407_v30, %v4406_v32  ;;  %v4405_v47 = vmax.f32 %v2493_v28, 0.0  ;;  %7469 = vmatprep.mubr.bf16.mxu1 %v2026_v18  ;;  %v2514_v13 = vadd.f32 %v7371_v33, %v9477_v10  ;;  %v2027_v32 = vpack.c.bf16 %v1591_v46, %v1590_v49  ;;  %v9757_v28 = vld [vmem:[%s9106_s22 + $0x60] sm:$0xff] }
 0x28d   : > { %v2505_v34 = vpop.f32.mrf.mxu1  ;;  %7850 = vmatmul.mubr.bf16.vlgmr.msra.gmra.mxu0 %v9729_v39  ;;  %v2028_v30 = vpack.c.bf16 %v1593_v40, %v1592_v59  ;;  %v1084_v33 = vadd.f32 %v9757_v28, %v9235_v54  ;;  %v1595_v56 = vmax.f32 %v1083_v58, 0.0 }
 0x28e   : > { %v9738_v48 = vpack.c.bf16 %v4405_v47, %v4404_v63  ;;  %7854 = vmatpush3.bf16.xpose.msra.mxu0 %v4887_v29  ;;  %7869 = vmatprep.mubr.msk.bf16.mxu0 %vm8894_vm0, %v12516_v37  ;;  %v2506_v2 = vadd.f32 %v9477_v10, %v2505_v34  ;;  %v9762_v29 = vld [vmem:[%s9106_s22 + $0x68] sm:$0xff]  ;;  %v4388_v63 = vmax.f32 %v2426_v31, 0.0  ;;  %v4410_v47 = vmax.f32 %v2514_v13, 0.0 }
 0x28f   : > { %v7372_v1 = vpop.f32.mrf.mxu1  ;;  %7855 = vmatprep.subr.bf16.mxu0 %v12516_v37  ;;  %v1085_v41 = vadd.f32 %v9762_v29, %v9235_v54  ;;  %v1596_v21 = vmax.f32 %v1084_v33, 0.0  ;;  %v2418_v13 = vadd.f32 %v9575_v8, %v9477_v10  ;;  %v1088_v33 = vadd.f32 %v9566_v7, %v9241_v60 }
 0x290   : > { %v2517_v18 = vadd.f32 %v7372_v1, %v9477_v10  ;;  %v4886_v46 = vpack.c.bf16 %v4389_v26, %v4388_v63  ;;  %v4408_v59 = vmax.f32 %v2506_v2, 0.0  ;;  %v1086_v26 = vadd.f32 %v9645_v53, %v9235_v54 }
 0x291   : > { %v2508_v45 = vpop.f32.mrf.mxu1  ;;  %v1597_v31 = vmax.f32 %v1085_v41, 0.0  ;;  %v4387_v2 = vmax.f32 %v2421_v50, 0.0  ;;  %v1089_v41 = vadd.f32 %v9657_v36, %v9241_v60  ;;  %v4386_v63 = vmax.f32 %v2418_v13, 0.0 }
 0x292   : > { %v4411_v34 = vmax.f32 %v2517_v18, 0.0  ;;  %v2509_v1 = vadd.f32 %v9477_v10, %v2508_v45 }
 0x293   : > { %v7375_v49 = vpop.f32.mrf.mxu1  ;;  %7470 = vmatmul.mubr.bf16.gmra.mxu1 %v2027_v32  ;;  %v1087_v32 = vadd.f32 %v9650_v23, %v9235_v54  ;;  %v4885_v54 = vpack.c.bf16 %v4387_v2, %v4386_v63  ;;  %v1601_v13 = vmax.f32 %v1089_v41, 0.0  ;;  %v1090_v2 = vadd.f32 %v9672_v51, %v9241_v60 }
 0x294   : > { %v9769_v40 = vpack.c.bf16 %v4411_v34, %v4410_v47  ;;  %v4409_v44 = vmax.f32 %v2509_v1, 0.0  ;;  %7473 = vmatprep.mubr.bf16.mxu1 %v2028_v30  ;;  %v2530_v57 = vadd.f32 %v7375_v49, %v9477_v10  ;;  %v2030_v30 = vpack.c.bf16 %v1597_v31, %v1596_v21 }
 0x295   : > { %v2521_v14 = vpop.f32.mrf.mxu1  ;;  %v1600_v31 = vmax.f32 %v1088_v33, 0.0  ;;  %v1092_v33 = vadd.f32 %v9682_v15, %v9241_v60  ;;  %v1093_v41 = vadd.f32 %v9687_v24, %v9241_v60 }
 0x296   : > { %v9773_v18 = vpack.c.bf16 %v4409_v44, %v4408_v59  ;;  %7856 = vmatpush3.bf16.xpose.msra.mxu0 %v4886_v46  ;;  %v2522_v17 = vadd.f32 %v9477_v10, %v2521_v14  ;;  %v2029_v44 = vpack.c.bf16 %v1595_v56, %v1594_v9  ;;  %v4414_v47 = vmax.f32 %v2530_v57, 0.0 }
 0x297   : > { %v7376_v45 = vpop.f32.mrf.mxu1  ;;  %7857 = vmatprep.subr.bf16.mxu0 %v12516_v37  ;;  %v2413_v14 = vadd.f32 %v9477_v10, %v9588_v62  ;;  %v1598_v46 = vmax.f32 %v1086_v26, 0.0  ;;  %v1599_v59 = vmax.f32 %v1087_v32, 0.0  ;;  %v2410_v57 = vadd.f32 %v9477_v10, %v9579_v27 }
 0x298   : > { %v2533_v58 = vadd.f32 %v7376_v45, %v9477_v10  ;;  %v4412_v49 = vmax.f32 %v2522_v17, 0.0 }
 0x299   : > { %v2524_v8 = vpop.f32.mrf.mxu1  ;;  %v4385_v17 = vmax.f32 %v2413_v14, 0.0  ;;  %v4384_v63 = vmax.f32 %v2410_v57, 0.0  ;;  %v1604_v57 = vmax.f32 %v1092_v33, 0.0 }
 0x29a   : > { %v4415_v34 = vmax.f32 %v2533_v58, 0.0  ;;  %v2525_v50 = vadd.f32 %v9477_v10, %v2524_v8  ;;  %v1091_v8 = vadd.f32 %v9677_v38, %v9241_v60 }
 0x29b   : > { %v7379_v1 = vpop.f32.mrf.mxu1  ;;  %7474 = vmatmul.mubr.bf16.gmra.mxu1 %v2029_v44  ;;  %v2031_v44 = vpack.c.bf16 %v1599_v59, %v1598_v46  ;;  %v1602_v46 = vmax.f32 %v1090_v2, 0.0 }
 0x29c   : > { %v9790_v9 = vpack.c.bf16 %v4415_v34, %v4414_v47  ;;  %v4413_v21 = vmax.f32 %v2525_v50, 0.0  ;;  %7477 = vmatprep.mubr.bf16.mxu1 %v2030_v30  ;;  %v2546_v62 = vadd.f32 %v7379_v1, %v9477_v10  ;;  %v2032_v30 = vpack.c.bf16 %v1601_v13, %v1600_v31 }
 0x29d   : > { %v2537_v56 = vpop.f32.mrf.mxu1  ;;  %v4884_v1 = vpack.c.bf16 %v4385_v17, %v4384_v63  ;;  %v1603_v59 = vmax.f32 %v1091_v8, 0.0  ;;  %v1095_v8 = vadd.f32 %v9711_v52, %v9241_v60 }
 0x29e   : > { %v9794_v45 = vpack.c.bf16 %v4413_v21, %v4412_v49  ;;  %7858 = vmatpush3.bf16.xpose.msra.mxu0 %v4885_v54  ;;  %v2538_v26 = vadd.f32 %v9477_v10, %v2537_v56  ;;  %v4418_v47 = vmax.f32 %v2546_v62, 0.0  ;;  %v1605_v62 = vmax.f32 %v1093_v41, 0.0 }
 0x29f   : > { %v7380_v58 = vpop.f32.mrf.mxu1  ;;  %7859 = vmatprep.subr.bf16.mxu0 %v12516_v37  ;;  %v2033_v2 = vpack.c.bf16 %v1603_v59, %v1602_v46 }
 0x2a0   : > { %v2549_v32 = vadd.f32 %v7380_v58, %v9477_v10  ;;  %v4416_v54 = vmax.f32 %v2538_v26, 0.0 }
 0x2a1   : > { %v2540_v27 = vpop.f32.mrf.mxu1 }
 0x2a2   : > { %v4419_v34 = vmax.f32 %v2549_v32, 0.0  ;;  %v2541_v50 = vadd.f32 %v9477_v10, %v2540_v27  ;;  %v1094_v32 = vadd.f32 %v9704_v12, %v9241_v60 }
 0x2a3   : > { %v7383_v14 = vpop.f32.mrf.mxu1  ;;  %7478 = vmatmul.mubr.bf16.gmra.mxu1 %v2031_v44  ;;  %v1096_v44 = vadd.f32 %v9716_v11, %v9241_v60 }
 0x2a4   : > { %v9809_v49 = vpack.c.bf16 %v4419_v34, %v4418_v47  ;;  %v4417_v21 = vmax.f32 %v2541_v50, 0.0  ;;  %7481 = vmatprep.mubr.bf16.mxu1 %v2032_v30  ;;  %v2562_v13 = vadd.f32 %v7383_v14, %v9477_v10  ;;  %v1097_v30 = vadd.f32 %v9721_v22, %v9241_v60 }
 0x2a5   : > { %v2553_v56 = vpop.f32.mrf.mxu1  ;;  %v2034_v47 = vpack.c.bf16 %v1605_v62, %v1604_v57 }
 0x2a6   : > { %v9811_v31 = vpack.c.bf16 %v4417_v21, %v4416_v54  ;;  %7860 = vmatpush3.bf16.xpose.msra.mxu0 %v4884_v1  ;;  %v2554_v17 = vadd.f32 %v9477_v10, %v2553_v56  ;;  %v4422_v33 = vmax.f32 %v2562_v13, 0.0  ;;  %v1606_v21 = vmax.f32 %v1094_v32, 0.0 }
 0x2a7   : > { %v7384_v58 = vpop.f32.mrf.mxu1  ;;  %7861 = vmatprep.subr.bf16.mxu0 %v12516_v37  ;;  %v1607_v56 = vmax.f32 %v1095_v8, 0.0  ;;  %v1608_v13 = vmax.f32 %v1096_v44, 0.0  ;;  %v1101_v8 = vadd.f32 %v9762_v29, %v9241_v60 }
 0x2a8   : > { %v2565_v26 = vadd.f32 %v7384_v58, %v9477_v10  ;;  %v4420_v50 = vmax.f32 %v2554_v17, 0.0  ;;  %v1609_v58 = vmax.f32 %v1097_v30, 0.0  ;;  %v1098_v17 = vadd.f32 %v9745_v19, %v9241_v60 }
 0x2a9   : > { %v2556_v27 = vpop.f32.mrf.mxu1 }
 0x2aa   : > { %v4423_v41 = vmax.f32 %v2565_v26, 0.0  ;;  %v2557_v63 = vadd.f32 %v9477_v10, %v2556_v27  ;;  %v2035_v27 = vpack.c.bf16 %v1607_v56, %v1606_v21 }
 0x2ab   : > { %v7387_v34 = vpop.f32.mrf.mxu1  ;;  %7482 = vmatmul.mubr.bf16.gmra.mxu1 %v2033_v2  ;;  %v1099_v2 = vadd.f32 %v9752_v61, %v9241_v60 }
 0x2ac   : > { %v9826_v14 = vpack.c.bf16 %v4423_v41, %v4422_v33  ;;  %v4421_v1 = vmax.f32 %v2557_v63, 0.0  ;;  %7485 = vmatprep.mubr.bf16.mxu1 %v2034_v47  ;;  %v2578_v59 = vadd.f32 %v7387_v34, %v9477_v10  ;;  %v2036_v41 = vpack.c.bf16 %v1609_v58, %v1608_v13 }
 0x2ad   : > { %v2569_v54 = vpop.f32.mrf.mxu1  ;;  %v1611_v21 = vmax.f32 %v1099_v2, 0.0  ;;  %v1103_v2 = vadd.f32 %v9650_v23, %v9241_v60 }
 0x2ae   : > { %v9828_v46 = vpack.c.bf16 %v4421_v1, %v4420_v50  ;;  %7862 = vmatpush3.bf16.xpose.msra.mxu0 %v9577_v25  ;;  %v2570_v57 = vadd.f32 %v9477_v10, %v2569_v54  ;;  %v1100_v25 = vadd.f32 %v9757_v28, %v9241_v60  ;;  %v4426_v44 = vmax.f32 %v2578_v59, 0.0 }
 0x2af   : > { %v7388_v26 = vpop.f32.mrf.mxu1  ;;  %7863 = vmatprep.subr.bf16.mxu0 %v12516_v37  ;;  %v1610_v54 = vmax.f32 %v1098_v17, 0.0 }
 0x2b0   : > { %v2581_v62 = vadd.f32 %v7388_v26, %v9477_v10  ;;  %v4424_v47 = vmax.f32 %v2570_v57, 0.0  ;;  %v1612_v59 = vmax.f32 %v1100_v25, 0.0  ;;  %v1102_v57 = vadd.f32 %v9645_v53, %v9241_v60 }
 0x2b1   : > { %v2572_v32 = vpop.f32.mrf.mxu1  ;;  %v1105_v25 = vadd.f32 %v9657_v36, %v9253_v6 }
 0x2b2   : > { %v4427_v30 = vmax.f32 %v2581_v62, 0.0  ;;  %v2573_v33 = vadd.f32 %v9477_v10, %v2572_v32  ;;  %v1613_v62 = vmax.f32 %v1101_v8, 0.0  ;;  %v1614_v60 = vmax.f32 %v1102_v57, 0.0 }
 0x2b3   : > { %v7391_v63 = vpop.f32.mrf.mxu1  ;;  %7486 = vmatmul.mubr.bf16.gmra.mxu1 %v2035_v27  ;;  %v2037_v27 = vpack.c.bf16 %v1611_v21, %v1610_v54  ;;  %v1615_v54 = vmax.f32 %v1103_v2, 0.0  ;;  %v1106_v57 = vadd.f32 %v9672_v51, %v9253_v6  ;;  %v1108_v2 = vadd.f32 %v9682_v15, %v9253_v6 }
 0x2b4   : > { %v9844_v34 = vpack.c.bf16 %v4427_v30, %v4426_v44  ;;  %v4425_v50 = vmax.f32 %v2573_v33, 0.0  ;;  %7489 = vmatprep.mubr.bf16.mxu1 %v2036_v41  ;;  %v2594_v26 = vadd.f32 %v7391_v63, %v9477_v10  ;;  %v2038_v33 = vpack.c.bf16 %v1613_v62, %v1612_v59  ;;  %v9872_v59 = vld [vmem:[%s12446_s5] ss:$0 sm:$0xff] }
 0x2b5   : > { %v2585_v1 = vpop.f32.mrf.mxu1 }
 0x2b6   : > { %12519 = vst [vmem:[#allocation43_spill] sm:$0xff] %v9844_v34  ;;  %v9846_v56 = vpack.c.bf16 %v4425_v50, %v4424_v47  ;;  %7864 = vmatpush3.bf16.xpose.msra.mxu0 %v9583_v3  ;;  %v2586_v13 = vadd.f32 %v9477_v10, %v2585_v1  ;;  %v1104_v3 = vadd.f32 %v9566_v7, %v9253_v6  ;;  %v4430_v8 = vmax.f32 %v2594_v26, 0.0 }
 0x2b7   : > { %v7392_v32 = vpop.f32.mrf.mxu1  ;;  %7865 = vmatprep.subr.bf16.mxu0 %v12516_v37 }
 0x2b8   : > { %12520 = vst [vmem:[#allocation44_spill] sm:$0xff] %v9846_v56  ;;  %v2597_v58 = vadd.f32 %v7392_v32, %v9477_v10  ;;  %v4428_v63 = vmax.f32 %v2586_v13, 0.0  ;;  %v1616_v26 = vmax.f32 %v1104_v3, 0.0  ;;  %v1109_v3 = vadd.f32 %v9687_v24, %v9253_v6 }
 0x2b9   : > { %v2588_v17 = vpop.f32.mrf.mxu1 }
 0x2ba   : > { %v4431_v44 = vmax.f32 %v2597_v58, 0.0  ;;  %v2589_v30 = vadd.f32 %v9477_v10, %v2588_v17  ;;  %v1617_v58 = vmax.f32 %v1105_v25, 0.0 }
 0x2bb   : > { %v7395_v41 = vpop.f32.mrf.mxu1  ;;  %7490 = vmatmul.mubr.bf16.gmra.mxu1 %v2037_v27  ;;  %v2039_v27 = vpack.c.bf16 %v1615_v54, %v1614_v60  ;;  %v1618_v60 = vmax.f32 %v1106_v57, 0.0 }
 0x2bc   : > { %v9862_v47 = vpack.c.bf16 %v4431_v44, %v4430_v8  ;;  %v4429_v50 = vmax.f32 %v2589_v30, 0.0  ;;  %7493 = vmatprep.mubr.bf16.mxu1 %v2038_v33  ;;  %v2610_v32 = vadd.f32 %v7395_v41, %v9477_v10  ;;  %v2040_v30 = vpack.c.bf16 %v1617_v58, %v1616_v26 }
 0x2bd   : > { %v2601_v1 = vpop.f32.mrf.mxu1 }
 0x2be   : > { %v9864_v21 = vpack.c.bf16 %v4429_v50, %v4428_v63  ;;  %7866 = vmatpush3.bf16.xpose.msra.mxu0 %v9551_v43  ;;  %v2602_v62 = vadd.f32 %v9872_v59, %v2601_v1  ;;  %v1107_v43 = vadd.f32 %v9677_v38, %v9253_v6  ;;  %v4434_v25 = vmax.f32 %v2610_v32, 0.0 }
 0x2bf   : > { %v7396_v17 = vpop.f32.mrf.mxu1  ;;  %7867 = vmatprep.subr.bf16.mxu0 %v12516_v37  ;;  %v1620_v32 = vmax.f32 %v1108_v2, 0.0  ;;  %v1113_v2 = vadd.f32 %v9721_v22, %v9253_v6 }
 0x2c0   : > { %12521 = vst [vmem:[#allocation45_spill] sm:$0xff] %v9864_v21  ;;  %v2613_v13 = vadd.f32 %v9872_v59, %v7396_v17  ;;  %v4432_v41 = vmax.f32 %v2602_v62, 0.0  ;;  %v1619_v54 = vmax.f32 %v1107_v43, 0.0  ;;  %v1110_v62 = vadd.f32 %v9704_v12, %v9253_v6 }
 0x2c1   : > { %v2604_v10 = vpop.f32.mrf.mxu1  ;;  %v1111_v43 = vadd.f32 %v9711_v52, %v9253_v6 }
 0x2c2   : > { %v4435_v8 = vmax.f32 %v2613_v13, 0.0  ;;  %v2605_v44 = vadd.f32 %v9872_v59, %v2604_v10  ;;  %v1621_v13 = vmax.f32 %v1109_v3, 0.0 }
 0x2c3   : > { %v7399_v33 = vpop.f32.mrf.mxu1  ;;  %7494 = vmatmul.mubr.bf16.gmra.mxu1 %v2039_v27  ;;  %v2041_v27 = vpack.c.bf16 %v1619_v54, %v1618_v60  ;;  %v1622_v60 = vmax.f32 %v1110_v62, 0.0  ;;  %v1623_v54 = vmax.f32 %v1111_v43, 0.0  ;;  %v1114_v62 = vadd.f32 %v9745_v19, %v9253_v6 }
 0x2c4   : > { %v9885_v63 = vpack.c.bf16 %v4435_v8, %v4434_v25  ;;  %v4433_v50 = vmax.f32 %v2605_v44, 0.0  ;;  %7497 = vmatprep.mubr.bf16.mxu1 %v2040_v30  ;;  %v2626_v56 = vadd.f32 %v9872_v59, %v7399_v33  ;;  %v2042_v44 = vpack.c.bf16 %v1621_v13, %v1620_v32 }
 0x2c5   : > { %v2617_v1 = vpop.f32.mrf.mxu1  ;;  %v1625_v32 = vmax.f32 %v1113_v2, 0.0  ;;  %v2043_v43 = vpack.c.bf16 %v1623_v54, %v1622_v60  ;;  %v1117_v2 = vadd.f32 %v9762_v29, %v9253_v6  ;;  %v1626_v54 = vmax.f32 %v1114_v62, 0.0 }
 0x2c6   : > { %v9887_v17 = vpack.c.bf16 %v4433_v50, %v4432_v41  ;;  %7868 = vmatpush3.bf16.xpose.msra.mxu0 %v9555_v16  ;;  %v2618_v26 = vadd.f32 %v9872_v59, %v2617_v1  ;;  %v1112_v16 = vadd.f32 %v9716_v11, %v9253_v6  ;;  %v4438_v3 = vmax.f32 %v2626_v56, 0.0 }
 0x2c7   : > { %v7400_v10 = vpop.f32.mrf.mxu1  ;;  %7873 = vmatprep.subr.bf16.mxu0 %v12516_v37 }
 0x2c8   : > { %v2629_v58 = vadd.f32 %v9872_v59, %v7400_v10  ;;  %v4436_v33 = vmax.f32 %v2618_v26, 0.0 }
 0x2c9   : > { %v2620_v57 = vpop.f32.mrf.mxu1 }
 0x2ca   : > { %v4439_v25 = vmax.f32 %v2629_v58, 0.0  ;;  %v2621_v8 = vadd.f32 %v9872_v59, %v2620_v57  ;;  %v1624_v58 = vmax.f32 %v1112_v16, 0.0  ;;  %v1116_v16 = vadd.f32 %v9757_v28, %v9253_v6 }
 0x2cb   : > { %v7403_v30 = vpop.f32.mrf.mxu1  ;;  %7498 = vmatmul.mubr.bf16.gmra.mxu1 %v2041_v27 }
 0x2cc   : > { %v9903_v41 = vpack.c.bf16 %v4439_v25, %v4438_v3  ;;  %v4437_v50 = vmax.f32 %v2621_v8, 0.0  ;;  %7501 = vmatprep.mubr.bf16.mxu1 %v2042_v44  ;;  %v2642_v56 = vadd.f32 %v9872_v59, %v7403_v30  ;;  %v2044_v44 = vpack.c.bf16 %v1625_v32, %v1624_v58 }
 0x2cd   : > { %v2633_v1 = vpop.f32.mrf.mxu1  ;;  %7870 = vmatmul.mubr.bf16.vlgmr.msra.gmra.mxu0 %v9729_v39 }
 0x2ce   : > { %v9906_v10 = vpack.c.bf16 %v4437_v50, %v4436_v33  ;;  %7874 = vmatpush3.bf16.xpose.msra.mxu0 %v9733_v4  ;;  %7889 = vmatprep.mubr.msk.bf16.mxu0 %vm8894_vm0, %v12516_v37  ;;  %v2634_v26 = vadd.f32 %v9872_v59, %v2633_v1  ;;  %v1115_v4 = vadd.f32 %v9752_v61, %v9253_v6  ;;  %v4442_v3 = vmax.f32 %v2642_v56, 0.0 }
 0x2cf   : > { %v7404_v13 = vpop.f32.mrf.mxu1  ;;  %7875 = vmatprep.subr.bf16.mxu0 %v12516_v37  ;;  %v1628_v56 = vmax.f32 %v1116_v16, 0.0  ;;  %v1121_v16 = vadd.f32 %v9657_v36, %v9238_v55 }
 0x2d0   : > { %v2645_v57 = vadd.f32 %v9872_v59, %v7404_v13  ;;  %v4440_v33 = vmax.f32 %v2634_v26, 0.0  ;;  %v1627_v13 = vmax.f32 %v1115_v4, 0.0  ;;  %v1118_v26 = vadd.f32 %v9645_v53, %v9253_v6 }
 0x2d1   : > { %v2636_v27 = vpop.f32.mrf.mxu1  ;;  %v1119_v4 = vadd.f32 %v9650_v23, %v9253_v6 }
 0x2d2   : > { %v4443_v25 = vmax.f32 %v2645_v57, 0.0  ;;  %v2637_v8 = vadd.f32 %v9872_v59, %v2636_v27  ;;  %v1629_v57 = vmax.f32 %v1117_v2, 0.0  ;;  %v1630_v6 = vmax.f32 %v1118_v26, 0.0 }
 0x2d3   : > { %v7407_v30 = vpop.f32.mrf.mxu1  ;;  %7502 = vmatmul.mubr.bf16.gmra.mxu1 %v2043_v43  ;;  %v2045_v43 = vpack.c.bf16 %v1627_v13, %v1626_v54  ;;  %v1631_v54 = vmax.f32 %v1119_v4, 0.0  ;;  %v1125_v4 = vadd.f32 %v9687_v24, %v9238_v55 }
 0x2d4   : > { %v9924_v50 = vpack.c.bf16 %v4443_v25, %v4442_v3  ;;  %v4441_v1 = vmax.f32 %v2637_v8, 0.0  ;;  %7505 = vmatprep.mubr.bf16.mxu1 %v2044_v44  ;;  %v2658_v21 = vadd.f32 %v9872_v59, %v7407_v30  ;;  %v2046_v8 = vpack.c.bf16 %v1629_v57, %v1628_v56 }
 0x2d5   : > { %v2649_v60 = vpop.f32.mrf.mxu1 }
 0x2d6   : > { %12522 = vst [vmem:[#allocation46_spill] sm:$0xff] %v9924_v50  ;;  %v9926_v34 = vpack.c.bf16 %v4441_v1, %v4440_v33  ;;  %7876 = vmatpush3.bf16.xpose.msra.mxu0 %v9738_v48  ;;  %v2650_v58 = vadd.f32 %v9872_v59, %v2649_v60  ;;  %v1120_v48 = vadd.f32 %v9566_v7, %v9238_v55  ;;  %v4446_v2 = vmax.f32 %v2658_v21, 0.0 }
 0x2d7   : > { %v7408_v27 = vpop.f32.mrf.mxu1  ;;  %7877 = vmatprep.subr.bf16.mxu0 %v12516_v37 }
 0x2d8   : > { %12523 = vst [vmem:[#allocation47_spill] sm:$0xff] %v9926_v34  ;;  %v2661_v32 = vadd.f32 %v9872_v59, %v7408_v27  ;;  %v4444_v30 = vmax.f32 %v2650_v58, 0.0  ;;  %v1632_v21 = vmax.f32 %v1120_v48, 0.0  ;;  %v1633_v27 = vmax.f32 %v1121_v16, 0.0 }
 0x2d9   : > { %v2652_v62 = vpop.f32.mrf.mxu1  ;;  %v1122_v58 = vadd.f32 %v9672_v51, %v9238_v55 }
 0x2da   : > { %v4447_v3 = vmax.f32 %v2661_v32, 0.0  ;;  %v2653_v25 = vadd.f32 %v9872_v59, %v2652_v62  ;;  %v2047_v62 = vpack.c.bf16 %v1631_v54, %v1630_v6 }
 0x2db   : > { %v7411_v44 = vpop.f32.mrf.mxu1  ;;  %7506 = vmatmul.mubr.bf16.gmra.mxu1 %v2045_v43  ;;  %v1123_v43 = vadd.f32 %v9677_v38, %v9238_v55 }
 0x2dc   : > { %v9942_v33 = vpack.c.bf16 %v4447_v3, %v4446_v2  ;;  %v4445_v1 = vmax.f32 %v2653_v25, 0.0  ;;  %7509 = vmatprep.mubr.bf16.mxu1 %v2046_v8  ;;  %v2674_v7 = vadd.f32 %v9872_v59, %v7411_v44  ;;  %v2048_v3 = vpack.c.bf16 %v1633_v27, %v1632_v21 }
 0x2dd   : > { %v2665_v60 = vpop.f32.mrf.mxu1  ;;  %v1635_v6 = vmax.f32 %v1123_v43, 0.0  ;;  %v1127_v43 = vadd.f32 %v9711_v52, %v9238_v55 }
 0x2de   : > { %v9944_v13 = vpack.c.bf16 %v4445_v1, %v4444_v30  ;;  %7878 = vmatpush3.bf16.xpose.msra.mxu0 %v9694_v35  ;;  %v2666_v56 = vadd.f32 %v9872_v59, %v2665_v60  ;;  %v1124_v35 = vadd.f32 %v9682_v15, %v9238_v55  ;;  %v4450_v48 = vmax.f32 %v2674_v7, 0.0 }
 0x2df   : > { %v7412_v32 = vpop.f32.mrf.mxu1  ;;  %7879 = vmatprep.subr.bf16.mxu0 %v12516_v37  ;;  %v1634_v60 = vmax.f32 %v1122_v58, 0.0 }
 0x2e0   : > { %v2677_v57 = vadd.f32 %v9872_v59, %v7412_v32  ;;  %v4448_v8 = vmax.f32 %v2666_v56, 0.0  ;;  %v1636_v7 = vmax.f32 %v1124_v35, 0.0  ;;  %v1126_v56 = vadd.f32 %v9704_v12, %v9238_v55 }
 0x2e1   : > { %v2668_v26 = vpop.f32.mrf.mxu1  ;;  %v1129_v35 = vadd.f32 %v9721_v22, %v9238_v55 }
 0x2e2   : > { %v4451_v16 = vmax.f32 %v2677_v57, 0.0  ;;  %v2669_v2 = vadd.f32 %v9872_v59, %v2668_v26  ;;  %v1637_v57 = vmax.f32 %v1125_v4, 0.0 }
 0x2e3   : > { %v7415_v25 = vpop.f32.mrf.mxu1  ;;  %7510 = vmatmul.mubr.bf16.gmra.mxu1 %v2047_v62  ;;  %v2049_v62 = vpack.c.bf16 %v1635_v6, %v1634_v60  ;;  %v1638_v60 = vmax.f32 %v1126_v56, 0.0  ;;  %v1639_v6 = vmax.f32 %v1127_v43, 0.0  ;;  %v1131_v43 = vadd.f32 %v9752_v61, %v9238_v55 }
 0x2e4   : > { %v9960_v44 = vpack.c.bf16 %v4451_v16, %v4450_v48  ;;  %v4449_v30 = vmax.f32 %v2669_v2, 0.0  ;;  %7513 = vmatprep.mubr.bf16.mxu1 %v2048_v3  ;;  %v2690_v32 = vadd.f32 %v9872_v59, %v7415_v25  ;;  %v2050_v2 = vpack.c.bf16 %v1637_v57, %v1636_v7 }
 0x2e5   : > { %v2681_v1 = vpop.f32.mrf.mxu1 }
 0x2e6   : > { %v9962_v54 = vpack.c.bf16 %v4449_v30, %v4448_v8  ;;  %7880 = vmatpush3.bf16.xpose.msra.mxu0 %v9698_v5  ;;  %v2682_v21 = vadd.f32 %v9872_v59, %v2681_v1  ;;  %v1128_v5 = vadd.f32 %v9716_v11, %v9238_v55  ;;  %v4454_v4 = vmax.f32 %v2690_v32, 0.0 }
 0x2e7   : > { %v7416_v26 = vpop.f32.mrf.mxu1  ;;  %7881 = vmatprep.subr.bf16.mxu0 %v12516_v37 }
 0x2e8   : > { %v2693_v27 = vadd.f32 %v9872_v59, %v7416_v26  ;;  %v4452_v25 = vmax.f32 %v2682_v21, 0.0  ;;  %v1640_v32 = vmax.f32 %v1128_v5, 0.0  ;;  %v1130_v21 = vadd.f32 %v9745_v19, %v9238_v55 }
 0x2e9   : > { %v2684_v58 = vpop.f32.mrf.mxu1  ;;  %v1133_v5 = vadd.f32 %v9762_v29, %v9238_v55 }
 0x2ea   : > { %v4455_v48 = vmax.f32 %v2693_v27, 0.0  ;;  %v2685_v16 = vadd.f32 %v9872_v59, %v2684_v58  ;;  %v1641_v27 = vmax.f32 %v1129_v35, 0.0 }
 0x2eb   : > { %v7419_v3 = vpop.f32.mrf.mxu1  ;;  %7514 = vmatmul.mubr.bf16.gmra.mxu1 %v2049_v62  ;;  %v2051_v62 = vpack.c.bf16 %v1639_v6, %v1638_v60  ;;  %v1642_v60 = vmax.f32 %v1130_v21, 0.0  ;;  %v1643_v6 = vmax.f32 %v1131_v43, 0.0  ;;  %v1135_v43 = vadd.f32 %v9650_v23, %v9238_v55 }
 0x2ec   : > { %v9978_v8 = vpack.c.bf16 %v4455_v48, %v4454_v4  ;;  %v4453_v30 = vmax.f32 %v2685_v16, 0.0  ;;  %7517 = vmatprep.mubr.bf16.mxu1 %v2050_v2  ;;  %v2706_v34 = vadd.f32 %v9872_v59, %v7419_v3  ;;  %v2052_v16 = vpack.c.bf16 %v1641_v27, %v1640_v32 }
 0x2ed   : > { %v2697_v1 = vpop.f32.mrf.mxu1 }
 0x2ee   : > { %v9980_v26 = vpack.c.bf16 %v4453_v30, %v4452_v25  ;;  %7882 = vmatpush3.bf16.xpose.msra.mxu0 %v9662_v20  ;;  %v2698_v7 = vadd.f32 %v9872_v59, %v2697_v1  ;;  %v1132_v20 = vadd.f32 %v9757_v28, %v9238_v55  ;;  %v4458_v35 = vmax.f32 %v2706_v34, 0.0 }
 0x2ef   : > { %v7420_v58 = vpop.f32.mrf.mxu1  ;;  %7883 = vmatprep.subr.bf16.mxu0 %v12516_v37 }
 0x2f0   : > { %v2709_v57 = vadd.f32 %v9872_v59, %v7420_v58  ;;  %v4456_v3 = vmax.f32 %v2698_v7, 0.0  ;;  %v1644_v34 = vmax.f32 %v1132_v20, 0.0  ;;  %v1137_v20 = vadd.f32 %v9657_v36, %v9244_v0  ;;  %v12525_v36 = vld [vmem:[#allocation41_spill] sm:$0xff] }
 0x2f1   : > { %v2700_v56 = vpop.f32.mrf.mxu1 }
 0x2f2   : > { %v4459_v4 = vmax.f32 %v2709_v57, 0.0  ;;  %v2701_v48 = vadd.f32 %v9872_v59, %v2700_v56  ;;  %v1645_v57 = vmax.f32 %v1133_v5, 0.0  ;;  %v1134_v56 = vadd.f32 %v9645_v53, %v9238_v55 }
 0x2f3   : > { %v7423_v2 = vpop.f32.mrf.mxu1  ;;  %7518 = vmatmul.mubr.bf16.gmra.mxu1 %v2051_v62  ;;  %v2053_v62 = vpack.c.bf16 %v1643_v6, %v1642_v60 }
 0x2f4   : > { %v9996_v25 = vpack.c.bf16 %v4459_v4, %v4458_v35  ;;  %v4457_v30 = vmax.f32 %v2701_v48, 0.0  ;;  %7521 = vmatprep.mubr.bf16.mxu1 %v2052_v16  ;;  %v2722_v50 = vadd.f32 %v9872_v59, %v7423_v2  ;;  %v10010_v35 = vld [vmem:[%s9106_s22] sm:$0xff]  ;;  %v2054_v16 = vpack.c.bf16 %v1645_v57, %v1644_v34 }
 0x2f5   : > { %v2713_v1 = vpop.f32.mrf.mxu1  ;;  %v1646_v23 = vmax.f32 %v1134_v56, 0.0 }
 0x2f6   : > { %v9998_v58 = vpack.c.bf16 %v4457_v30, %v4456_v3  ;;  %7884 = vmatpush3.bf16.xpose.msra.mxu0 %v9664_v42  ;;  %v2714_v27 = vadd.f32 %v9872_v59, %v2713_v1  ;;  %v1136_v42 = vadd.f32 %v10010_v35, %v9244_v0  ;;  %v4462_v5 = vmax.f32 %v2722_v50, 0.0 }
 0x2f7   : > { %v7424_v32 = vpop.f32.mrf.mxu1  ;;  %7885 = vmatprep.subr.bf16.mxu0 %v12516_v37  ;;  %v1647_v1 = vmax.f32 %v1135_v43, 0.0  ;;  %v1140_v43 = vadd.f32 %v9682_v15, %v9244_v0 }
 0x2f8   : > { %12524 = vst [vmem:[#allocation48_spill] sm:$0xff] %v9998_v58  ;;  %v2725_v7 = vadd.f32 %v9872_v59, %v7424_v32  ;;  %v4460_v53 = vmax.f32 %v2714_v27, 0.0  ;;  %v1648_v50 = vmax.f32 %v1136_v42, 0.0  ;;  %v1649_v32 = vmax.f32 %v1137_v20, 0.0 }
 0x2f9   : > { %v2716_v21 = vpop.f32.mrf.mxu1  ;;  %v1138_v27 = vadd.f32 %v9672_v51, %v9244_v0  ;;  %v1141_v42 = vadd.f32 %v9687_v24, %v9244_v0  ;;  %v12526_v24 = vld [vmem:[#allocation42_spill] sm:$0xff] }
 0x2fa   : > { %v4463_v4 = vmax.f32 %v2725_v7, 0.0  ;;  %v2717_v48 = vadd.f32 %v9872_v59, %v2716_v21  ;;  %v2055_v21 = vpack.c.bf16 %v1647_v1, %v1646_v23  ;;  %v1652_v1 = vmax.f32 %v1140_v43, 0.0 }
 0x2fb   : > { %v7427_v2 = vpop.f32.mrf.mxu1  ;;  %7522 = vmatmul.mubr.bf16.gmra.mxu1 %v2053_v62  ;;  %v1139_v62 = vadd.f32 %v9677_v38, %v9244_v0  ;;  %v1650_v38 = vmax.f32 %v1138_v27, 0.0  ;;  %v1143_v27 = vadd.f32 %v9711_v52, %v9244_v0 }
 0x2fc   : > { %v10017_v3 = vpack.c.bf16 %v4463_v4, %v4462_v5  ;;  %v4461_v30 = vmax.f32 %v2717_v48, 0.0  ;;  %7525 = vmatprep.mubr.bf16.mxu1 %v2054_v16  ;;  %v2738_v6 = vadd.f32 %v9872_v59, %v7427_v2  ;;  %v2056_v48 = vpack.c.bf16 %v1649_v32, %v1648_v50 }
 0x2fd   : > { %v2729_v55 = vpop.f32.mrf.mxu1 }
 0x2fe   : > { %v10019_v60 = vpack.c.bf16 %v4461_v30, %v4460_v53  ;;  %7886 = vmatpush3.bf16.xpose.msra.mxu0 %v12525_v36  ;;  %v2730_v34 = vadd.f32 %v9872_v59, %v2729_v55  ;;  %v4466_v20 = vmax.f32 %v2738_v6, 0.0  ;;  %v1651_v55 = vmax.f32 %v1139_v62, 0.0 }
 0x2ff   : > { %v7428_v7 = vpop.f32.mrf.mxu1  ;;  %7887 = vmatprep.subr.bf16.mxu0 %v12516_v37  ;;  %v1653_v6 = vmax.f32 %v1141_v42, 0.0 }
 0x300   : > { %v2741_v57 = vadd.f32 %v9872_v59, %v7428_v7  ;;  %v4464_v2 = vmax.f32 %v2730_v34, 0.0  ;;  %v1142_v7 = vadd.f32 %v9704_v12, %v9244_v0 }
 0x301   : > { %v2732_v56 = vpop.f32.mrf.mxu1 }
 0x302   : > { %v4467_v5 = vmax.f32 %v2741_v57, 0.0  ;;  %v2733_v4 = vadd.f32 %v9872_v59, %v2732_v56  ;;  %v2057_v57 = vpack.c.bf16 %v1651_v55, %v1650_v38  ;;  %v1144_v56 = vadd.f32 %v9716_v11, %v9244_v0 }
 0x303   : > { %v7431_v16 = vpop.f32.mrf.mxu1  ;;  %7526 = vmatmul.mubr.bf16.gmra.mxu1 %v2055_v21  ;;  %v1145_v21 = vadd.f32 %v9721_v22, %v9244_v0  ;;  %v1654_v52 = vmax.f32 %v1142_v7, 0.0  ;;  %v1655_v11 = vmax.f32 %v1143_v27, 0.0 }
 0x304   : > { %v10035_v51 = vpack.c.bf16 %v4467_v5, %v4466_v20  ;;  %v4465_v53 = vmax.f32 %v2733_v4, 0.0  ;;  %7529 = vmatprep.mubr.bf16.mxu1 %v2056_v48  ;;  %v2754_v15 = vadd.f32 %v9872_v59, %v7431_v16  ;;  %v2058_v20 = vpack.c.bf16 %v1653_v6, %v1652_v1 }
 0x305   : > { %v2745_v30 = vpop.f32.mrf.mxu1  ;;  %v2059_v1 = vpack.c.bf16 %v1655_v11, %v1654_v52  ;;  %v1148_v6 = vadd.f32 %v9757_v28, %v9244_v0 }
 0x306   : > { %v10037_v23 = vpack.c.bf16 %v4465_v53, %v4464_v2  ;;  %7888 = vmatpush3.bf16.xpose.msra.mxu0 %v12526_v24  ;;  %v2746_v50 = vadd.f32 %v9872_v59, %v2745_v30  ;;  %v4470_v62 = vmax.f32 %v2754_v15, 0.0  ;;  %v1656_v53 = vmax.f32 %v1144_v56, 0.0 }
 0x307   : > { %v7432_v36 = vpop.f32.mrf.mxu1  ;;  %7893 = vmatprep.subr.bf16.mxu0 %v12516_v37  ;;  %v1657_v30 = vmax.f32 %v1145_v21, 0.0  ;;  %v1146_v15 = vadd.f32 %v9745_v19, %v9244_v0 }
 0x308   : > { %v2757_v32 = vadd.f32 %v9872_v59, %v7432_v36  ;;  %v4468_v4 = vmax.f32 %v2746_v50, 0.0  ;;  %v1149_v36 = vadd.f32 %v9762_v29, %v9244_v0 }
 0x309   : > { %v2748_v34 = vpop.f32.mrf.mxu1  ;;  %v1658_v21 = vmax.f32 %v1146_v15, 0.0 }
 0x30a   : > { %v4471_v43 = vmax.f32 %v2757_v32, 0.0  ;;  %v2749_v42 = vadd.f32 %v9872_v59, %v2748_v34  ;;  %v2060_v34 = vpack.c.bf16 %v1657_v30, %v1656_v53  ;;  %v12529_v53 = vld [vmem:[#allocation39_spill] sm:$0xff] }
 0x30b   : > { %v7435_v5 = vpop.f32.mrf.mxu1  ;;  %7530 = vmatmul.mubr.bf16.gmra.mxu1 %v2057_v57  ;;  %v1152_v30 = vadd.f32 %v10010_v35, %v12529_v53 }
 0x30c   : > { %v10053_v12 = vpack.c.bf16 %v4471_v43, %v4470_v62  ;;  %v4469_v48 = vmax.f32 %v2749_v42, 0.0  ;;  %7533 = vmatprep.mubr.bf16.mxu1 %v2058_v20  ;;  %v2770_v22 = vadd.f32 %v9872_v59, %v7435_v5  ;;  %v1660_v43 = vmax.f32 %v1148_v6, 0.0 }
 0x30d   : > { %v2761_v16 = vpop.f32.mrf.mxu1  ;;  %7890 = vmatmul.mubr.bf16.vlgmr.msra.gmra.mxu0 %v9729_v39  ;;  %v1661_v42 = vmax.f32 %v1149_v36, 0.0 }
 0x30e   : > { %v10056_v2 = vpack.c.bf16 %v4469_v48, %v4468_v4  ;;  %7894 = vmatpush3.bf16.xpose.msra.mxu0 %v9826_v14  ;;  %7909 = vmatprep.mubr.msk.bf16.mxu0 %vm8894_vm0, %v12516_v37  ;;  %v2762_v55 = vadd.f32 %v9872_v59, %v2761_v16  ;;  %v1147_v14 = vadd.f32 %v9752_v61, %v9244_v0  ;;  %v4474_v50 = vmax.f32 %v2770_v22, 0.0  ;;  %v10084_v48 = vld [vmem:[%s9106_s22 + $0x70] sm:$0xff]  ;;  %v10089_v22 = vld [vmem:[%s9106_s22 + $0x78] sm:$0xff] }
 0x30f   : > { %v7436_v38 = vpop.f32.mrf.mxu1  ;;  %7895 = vmatprep.subr.bf16.mxu0 %v12516_v37  ;;  %v1150_v16 = vadd.f32 %v10084_v48, %v9244_v0 }
 0x310   : > { %v2773_v39 = vadd.f32 %v9872_v59, %v7436_v38  ;;  %v4472_v27 = vmax.f32 %v2762_v55, 0.0  ;;  %v1659_v28 = vmax.f32 %v1147_v14, 0.0  ;;  %v10096_v38 = vld [vmem:[%s9106_s22 + $0x8] sm:$0xff] }
 0x311   : > { %v2764_v24 = vpop.f32.mrf.mxu1  ;;  %v1153_v55 = vadd.f32 %v10096_v38, %v12529_v53 }
 0x312   : > { %v4475_v32 = vmax.f32 %v2773_v39, 0.0  ;;  %v2765_v7 = vadd.f32 %v9872_v59, %v2764_v24  ;;  %v2061_v11 = vpack.c.bf16 %v1659_v28, %v1658_v21 }
 0x313   : > { %v7439_v57 = vpop.f32.mrf.mxu1  ;;  %7534 = vmatmul.mubr.bf16.gmra.mxu1 %v2059_v1  ;;  %v2062_v1 = vpack.c.bf16 %v1661_v42, %v1660_v43 }
 0x314   : > { %v10074_v19 = vpack.c.bf16 %v4475_v32, %v4474_v50  ;;  %v4473_v56 = vmax.f32 %v2765_v7, 0.0  ;;  %7537 = vmatprep.mubr.bf16.mxu1 %v2060_v34  ;;  %v2786_v29 = vadd.f32 %v9872_v59, %v7439_v57  ;;  %v1662_v32 = vmax.f32 %v1150_v16, 0.0 }
 0x315   : > { %v2777_v61 = vpop.f32.mrf.mxu1 }
 0x316   : > { %12527 = vst [vmem:[#allocation41_spill] sm:$0xff] %v10074_v19  ;;  %v10076_v62 = vpack.c.bf16 %v4473_v56, %v4472_v27  ;;  %7896 = vmatpush3.bf16.xpose.msra.mxu0 %v9828_v46  ;;  %v2778_v5 = vadd.f32 %v9872_v59, %v2777_v61  ;;  %v1151_v46 = vadd.f32 %v10089_v22, %v9244_v0  ;;  %v4478_v39 = vmax.f32 %v2786_v29, 0.0  ;;  %v10111_v29 = vld [vmem:[%s9106_s22 + $0x10] sm:$0xff] }
 0x317   : > { %v7440_v20 = vpop.f32.mrf.mxu1  ;;  %7897 = vmatprep.subr.bf16.mxu0 %v12516_v37  ;;  %v1664_v27 = vmax.f32 %v1152_v30, 0.0  ;;  %v1665_v56 = vmax.f32 %v1153_v55, 0.0  ;;  %v1154_v43 = vadd.f32 %v10111_v29, %v12529_v53 }
 0x318   : > { %12528 = vst [vmem:[#allocation42_spill] sm:$0xff] %v10076_v62  ;;  %v2789_v4 = vadd.f32 %v9872_v59, %v7440_v20  ;;  %v4476_v6 = vmax.f32 %v2778_v5, 0.0  ;;  %v1663_v7 = vmax.f32 %v1151_v46, 0.0  ;;  %v10116_v5 = vld [vmem:[%s9106_s22 + $0x18] sm:$0xff] }
 0x319   : > { %v2780_v52 = vpop.f32.mrf.mxu1 }
 0x31a   : > { %v4479_v15 = vmax.f32 %v2789_v4, 0.0  ;;  %v2781_v24 = vadd.f32 %v9872_v59, %v2780_v52  ;;  %v2063_v20 = vpack.c.bf16 %v1663_v7, %v1662_v32  ;;  %v10121_v4 = vld [vmem:[%s9106_s22 + $0x20] sm:$0xff]  ;;  %v10126_v52 = vld [vmem:[%s9106_s22 + $0x28] sm:$0xff] }
 0x31b   : > { %v7443_v14 = vpop.f32.mrf.mxu1  ;;  %7538 = vmatmul.mubr.bf16.gmra.mxu1 %v2061_v11  ;;  %v1156_v16 = vadd.f32 %v10121_v4, %v12529_v53  ;;  %v1157_v11 = vadd.f32 %v10126_v52, %v12529_v53 }
 0x31c   : > { %v10101_v36 = vpack.c.bf16 %v4479_v15, %v4478_v39  ;;  %v4477_v0 = vmax.f32 %v2781_v24, 0.0  ;;  %7541 = vmatprep.mubr.bf16.mxu1 %v2062_v1  ;;  %v2802_v57 = vadd.f32 %v9872_v59, %v7443_v14  ;;  %v2064_v39 = vpack.c.bf16 %v1665_v56, %v1664_v27 }
 0x31d   : > { %v2793_v50 = vpop.f32.mrf.mxu1  ;;  %v1669_v27 = vmax.f32 %v1157_v11, 0.0 }
 0x31e   : > { %12530 = vst [vmem:[#allocation39_spill] sm:$0xff] %v10101_v36  ;;  %v10103_v34 = vpack.c.bf16 %v4477_v0, %v4476_v6  ;;  %7898 = vmatpush3.bf16.xpose.msra.mxu0 %v9809_v49  ;;  %v2794_v21 = vadd.f32 %v9872_v59, %v2793_v50  ;;  %v1155_v49 = vadd.f32 %v10116_v5, %v12529_v53  ;;  %v4482_v46 = vmax.f32 %v2802_v57, 0.0 }
 0x31f   : > { %v7444_v61 = vpop.f32.mrf.mxu1  ;;  %7899 = vmatprep.subr.bf16.mxu0 %v12516_v37  ;;  %v1666_v0 = vmax.f32 %v1154_v43, 0.0  ;;  %v1668_v57 = vmax.f32 %v1156_v16, 0.0  ;;  %v10151_v16 = vld [vmem:[%s9106_s22 + $0x40] sm:$0xff] }
 0x320   : > { %12531 = vst [vmem:[#allocation49_spill] sm:$0xff] %v10103_v34  ;;  %v2805_v28 = vadd.f32 %v9872_v59, %v7444_v61  ;;  %v4480_v24 = vmax.f32 %v2794_v21, 0.0  ;;  %v1667_v50 = vmax.f32 %v1155_v49, 0.0  ;;  %v10146_v49 = vld [vmem:[%s9106_s22 + $0x38] sm:$0xff]  ;;  %v1160_v11 = vadd.f32 %v10151_v16, %v12529_v53 }
 0x321   : > { %v2796_v42 = vpop.f32.mrf.mxu1 }
 0x322   : > { %v4483_v30 = vmax.f32 %v2805_v28, 0.0  ;;  %v2797_v55 = vadd.f32 %v9872_v59, %v2796_v42  ;;  %v10141_v28 = vld [vmem:[%s9106_s22 + $0x30] sm:$0xff] }
 0x323   : > { %v7447_v15 = vpop.f32.mrf.mxu1  ;;  %7542 = vmatmul.mubr.bf16.gmra.mxu1 %v2063_v20  ;;  %v1158_v43 = vadd.f32 %v10141_v28, %v12529_v53  ;;  %v2065_v20 = vpack.c.bf16 %v1667_v50, %v1666_v0 }
 0x324   : > { %v10131_v1 = vpack.c.bf16 %v4483_v30, %v4482_v46  ;;  %v4481_v14 = vmax.f32 %v2797_v55, 0.0  ;;  %7545 = vmatprep.mubr.bf16.mxu1 %v2064_v39  ;;  %v2818_v7 = vadd.f32 %v9872_v59, %v7447_v15  ;;  %v10156_v46 = vld [vmem:[%s9106_s22 + $0x48] sm:$0xff] }
 0x325   : > { %v2809_v6 = vpop.f32.mrf.mxu1  ;;  %v1161_v30 = vadd.f32 %v10156_v46, %v12529_v53  ;;  %v1670_v62 = vmax.f32 %v1158_v43, 0.0 }
 0x326   : > { %12532 = vst [vmem:[#allocation50_spill] sm:$0xff] %v10131_v1  ;;  %v10133_v32 = vpack.c.bf16 %v4481_v14, %v4480_v24  ;;  %7900 = vmatpush3.bf16.xpose.msra.mxu0 %v9811_v31  ;;  %v2810_v61 = vadd.f32 %v9872_v59, %v2809_v6  ;;  %v1159_v31 = vadd.f32 %v10146_v49, %v12529_v53  ;;  %v4486_v55 = vmax.f32 %v2818_v7, 0.0 }
 0x327   : > { %v7448_v56 = vpop.f32.mrf.mxu1  ;;  %7901 = vmatprep.subr.bf16.mxu0 %v12516_v37  ;;  %v2066_v24 = vpack.c.bf16 %v1669_v27, %v1668_v57  ;;  %v1672_v57 = vmax.f32 %v1160_v11, 0.0  ;;  %v1673_v27 = vmax.f32 %v1161_v30, 0.0  ;;  %v10181_v11 = vld [vmem:[%s9106_s22 + $0x60] sm:$0xff] }
 0x328   : > { %12533 = vst [vmem:[#allocation51_spill] sm:$0xff] %v10133_v32  ;;  %v2821_v21 = vadd.f32 %v9872_v59, %v7448_v56  ;;  %v4484_v6 = vmax.f32 %v2810_v61, 0.0  ;;  %v1671_v19 = vmax.f32 %v1159_v31, 0.0  ;;  %v1164_v30 = vadd.f32 %v10181_v11, %v12529_v53 }
 0x329   : > { %v2812_v42 = vpop.f32.mrf.mxu1 }
 0x32a   : > { %v4487_v39 = vmax.f32 %v2821_v21, 0.0  ;;  %v2813_v15 = vadd.f32 %v9872_v59, %v2812_v42 }
 0x32b   : > { %v7451_v14 = vpop.f32.mrf.mxu1  ;;  %7546 = vmatmul.mubr.bf16.gmra.mxu1 %v2065_v20  ;;  %v10171_v20 = vld [vmem:[%s9106_s22 + $0x50] sm:$0xff] }
 0x32c   : > { %v10161_v0 = vpack.c.bf16 %v4487_v39, %v4486_v55  ;;  %v4485_v50 = vmax.f32 %v2813_v15, 0.0  ;;  %7549 = vmatprep.mubr.bf16.mxu1 %v2066_v24  ;;  %v2834_v7 = vadd.f32 %v9872_v59, %v7451_v14  ;;  %v1162_v43 = vadd.f32 %v10171_v20, %v12529_v53  ;;  %v10176_v39 = vld [vmem:[%s9106_s22 + $0x58] sm:$0xff]  ;;  %v10186_v15 = vld [vmem:[%s9106_s22 + $0x68] sm:$0xff] }
 0x32d   : > { %v2825_v56 = vpop.f32.mrf.mxu1  ;;  %v2067_v55 = vpack.c.bf16 %v1671_v19, %v1670_v62  ;;  %v1165_v24 = vadd.f32 %v10186_v15, %v12529_v53  ;;  %v2068_v19 = vpack.c.bf16 %v1673_v27, %v1672_v57 }
 0x32e   : > { %12534 = vst [vmem:[#allocation52_spill] sm:$0xff] %v10161_v0  ;;  %v10163_v34 = vpack.c.bf16 %v4485_v50, %v4484_v6  ;;  %7902 = vmatpush3.bf16.xpose.msra.mxu0 %v9790_v9  ;;  %v2826_v21 = vadd.f32 %v9872_v59, %v2825_v56  ;;  %v1163_v9 = vadd.f32 %v10176_v39, %v12529_v53  ;;  %v4490_v14 = vmax.f32 %v2834_v7, 0.0 }
 0x32f   : > { %v7452_v61 = vpop.f32.mrf.mxu1  ;;  %7903 = vmatprep.subr.bf16.mxu0 %v12516_v37  ;;  %v1674_v1 = vmax.f32 %v1162_v43, 0.0  ;;  %v1676_v7 = vmax.f32 %v1164_v30, 0.0 }
 0x330   : > { %12535 = vst [vmem:[#allocation53_spill] sm:$0xff] %v10163_v34  ;;  %v2837_v42 = vadd.f32 %v9872_v59, %v7452_v61  ;;  %v4488_v56 = vmax.f32 %v2826_v21, 0.0  ;;  %v1675_v34 = vmax.f32 %v1163_v9, 0.0  ;;  %v1166_v21 = vadd.f32 %v10084_v48, %v12529_v53  ;;  %v12538_v9 = vld [vmem:[#allocation40_spill] sm:$0xff] }
 0x331   : > { %v2828_v31 = vpop.f32.mrf.mxu1  ;;  %v1169_v30 = vadd.f32 %v10096_v38, %v12538_v9 }
 0x332   : > { %v4491_v6 = vmax.f32 %v2837_v42, 0.0  ;;  %v2829_v50 = vadd.f32 %v9872_v59, %v2828_v31  ;;  %v1677_v42 = vmax.f32 %v1165_v24, 0.0 }
 0x333   : > { %v7455_v62 = vpop.f32.mrf.mxu1  ;;  %7550 = vmatmul.mubr.bf16.gmra.mxu1 %v2067_v55  ;;  %v2069_v55 = vpack.c.bf16 %v1675_v34, %v1674_v1 }
 0x334   : > { %v10191_v61 = vpack.c.bf16 %v4491_v6, %v4490_v14  ;;  %v4489_v36 = vmax.f32 %v2829_v50, 0.0  ;;  %7553 = vmatprep.mubr.bf16.mxu1 %v2068_v19  ;;  %v2850_v58 = vadd.f32 %v9872_v59, %v7455_v62  ;;  %v2070_v6 = vpack.c.bf16 %v1677_v42, %v1676_v7 }
 0x335   : > { %v2841_v32 = vpop.f32.mrf.mxu1 }
 0x336   : > { %12536 = vst [vmem:[#allocation54_spill] sm:$0xff] %v10191_v61  ;;  %v10193_v0 = vpack.c.bf16 %v4489_v36, %v4488_v56  ;;  %7904 = vmatpush3.bf16.xpose.msra.mxu0 %v9794_v45  ;;  %v2842_v57 = vadd.f32 %v9872_v59, %v2841_v32  ;;  %v1167_v36 = vadd.f32 %v10089_v22, %v12529_v53  ;;  %v4494_v24 = vmax.f32 %v2850_v58, 0.0 }
 0x337   : > { %v7456_v31 = vpop.f32.mrf.mxu1  ;;  %7905 = vmatprep.subr.bf16.mxu0 %v12516_v37  ;;  %v1168_v45 = vadd.f32 %v10010_v35, %v12538_v9  ;;  %v1678_v53 = vmax.f32 %v1166_v21, 0.0 }
 0x338   : > { %12537 = vst [vmem:[#allocation55_spill] sm:$0xff] %v10193_v0  ;;  %v2853_v27 = vadd.f32 %v9872_v59, %v7456_v31  ;;  %v4492_v19 = vmax.f32 %v2842_v57, 0.0  ;;  %v1679_v56 = vmax.f32 %v1167_v36, 0.0  ;;  %v1170_v57 = vadd.f32 %v10111_v29, %v12538_v9 }
 0x339   : > { %v2844_v43 = vpop.f32.mrf.mxu1  ;;  %v1680_v58 = vmax.f32 %v1168_v45, 0.0  ;;  %v1171_v36 = vadd.f32 %v10116_v5, %v12538_v9  ;;  %v1173_v45 = vadd.f32 %v10126_v52, %v12538_v9 }
 0x33a   : > { %v4495_v14 = vmax.f32 %v2853_v27, 0.0  ;;  %v2845_v32 = vadd.f32 %v9872_v59, %v2844_v43  ;;  %v1681_v27 = vmax.f32 %v1169_v30, 0.0 }
 0x33b   : > { %v7459_v50 = vpop.f32.mrf.mxu1  ;;  %7554 = vmatmul.mubr.bf16.gmra.mxu1 %v2069_v55  ;;  %v2071_v55 = vpack.c.bf16 %v1679_v56, %v1678_v53  ;;  %v1682_v53 = vmax.f32 %v1170_v57, 0.0  ;;  %v1683_v56 = vmax.f32 %v1171_v36, 0.0  ;;  %v1175_v36 = vadd.f32 %v10146_v49, %v12538_v9 }
 0x33c   : > { %v10209_v62 = vpack.c.bf16 %v4495_v14, %v4494_v24  ;;  %v4493_v34 = vmax.f32 %v2845_v32, 0.0  ;;  %7557 = vmatprep.mubr.bf16.mxu1 %v2070_v6  ;;  %v2866_v0 = vadd.f32 %v9872_v59, %v7459_v50  ;;  %v2072_v32 = vpack.c.bf16 %v1681_v27, %v1680_v58 }
 0x33d   : > { %v2857_v1 = vpop.f32.mrf.mxu1 }
 0x33e   : > { %12539 = vst [vmem:[#allocation40_spill] sm:$0xff] %v10209_v62  ;;  %v10211_v31 = vpack.c.bf16 %v4493_v34, %v4492_v19  ;;  %7906 = vmatpush3.bf16.xpose.msra.mxu0 %v9769_v40  ;;  %v2858_v7 = vadd.f32 %v9872_v59, %v2857_v1  ;;  %v1172_v40 = vadd.f32 %v10121_v4, %v12538_v9  ;;  %v4498_v30 = vmax.f32 %v2866_v0, 0.0 }
 0x33f   : > { %v7460_v43 = vpop.f32.mrf.mxu1  ;;  %7907 = vmatprep.subr.bf16.mxu0 %v12516_v37 }
 0x340   : > { %12540 = vst [vmem:[#allocation56_spill] sm:$0xff] %v10211_v31  ;;  %v2869_v42 = vadd.f32 %v9872_v59, %v7460_v43  ;;  %v4496_v50 = vmax.f32 %v2858_v7, 0.0  ;;  %v1684_v0 = vmax.f32 %v1172_v40, 0.0  ;;  %v1174_v7 = vadd.f32 %v10141_v28, %v12538_v9 }
 0x341   : > { %v2860_v21 = vpop.f32.mrf.mxu1  ;;  %v1177_v40 = vadd.f32 %v10156_v46, %v12538_v9 }
 0x342   : > { %v4499_v24 = vmax.f32 %v2869_v42, 0.0  ;;  %v2861_v14 = vadd.f32 %v9872_v59, %v2860_v21  ;;  %v1685_v42 = vmax.f32 %v1173_v45, 0.0 }
 0x343   : > { %v7463_v6 = vpop.f32.mrf.mxu1  ;;  %7558 = vmatmul.mubr.bf16.gmra.mxu1 %v2071_v55  ;;  %v2073_v55 = vpack.c.bf16 %v1683_v56, %v1682_v53  ;;  %v10250_v53 = vld [vmem:[%s12447_s6] sm:$0x3]  ;;  %v1687_v56 = vmax.f32 %v1175_v36, 0.0 }
 0x344   : > { %v10227_v19 = vpack.c.bf16 %v4499_v24, %v4498_v30  ;;  %v4497_v34 = vmax.f32 %v2861_v14, 0.0  ;;  %7561 = vmatprep.mubr.bf16.mxu1 %v2072_v32  ;;  %v2882_v61 = vadd.f32 %v9872_v59, %v7463_v6  ;;  %v2074_v14 = vpack.c.bf16 %v1685_v42, %v1684_v0 }
 0x345   : > { %v2873_v1 = vpop.f32.mrf.mxu1 }
 0x346   : > { %v10229_v43 = vpack.c.bf16 %v4497_v34, %v4496_v50  ;;  %7908 = vmatpush3.bf16.xpose.msra.mxu0 %v9773_v18  ;;  %v2874_v58 = vadd.f32 %v9872_v59, %v2873_v1  ;;  %v1176_v18 = vadd.f32 %v10151_v16, %v12538_v9  ;;  %v4502_v45 = vmax.f32 %v2882_v61, 0.0 }
 0x347   : > { %v7464_v21 = vpop.f32.mrf.mxu1  ;;  %7913 = vmatprep.subr.bf16.mxu0 %v12516_v37  ;;  %v1686_v61 = vmax.f32 %v1174_v7, 0.0  ;;  %v1178_v7 = vadd.f32 %v10171_v20, %v12538_v9 }
 0x348   : > { %12541 = vst [vmem:[#allocation57_spill] sm:$0xff] %v10229_v43  ;;  %v2885_v27 = vadd.f32 %v9872_v59, %v7464_v21  ;;  %v4500_v6 = vmax.f32 %v2874_v58, 0.0  ;;  %v1688_v42 = vmax.f32 %v1176_v18, 0.0  ;;  %v1689_v58 = vmax.f32 %v1177_v40, 0.0 }
 0x349   : > { %v2876_v57 = vpop.f32.mrf.mxu1  ;;  %v1180_v18 = vadd.f32 %v10181_v11, %v12538_v9  ;;  %v1181_v40 = vadd.f32 %v10186_v15, %v12538_v9 }
 0x34a   : > { %v4503_v30 = vmax.f32 %v2885_v27, 0.0  ;;  %v2877_v24 = vadd.f32 %v9872_v59, %v2876_v57 }
 0x34b   : > { %v7467_v32 = vpop.f32.mrf.mxu1  ;;  %7562 = vmatmul.mubr.bf16.gmra.mxu1 %v2073_v55  ;;  %v1692_v62 = vmax.f32 %v1180_v18, 0.0  ;;  %v1693_v43 = vmax.f32 %v1181_v40, 0.0 }
 0x34c   : > { %v10245_v50 = vpack.c.bf16 %v4503_v30, %v4502_v45  ;;  %v4501_v34 = vmax.f32 %v2877_v24, 0.0  ;;  %7565 = vmatprep.mubr.bf16.mxu1 %v2074_v14  ;;  %v2898_v0 = vadd.f32 %v9872_v59, %v7467_v32  ;;  %v2075_v45 = vpack.c.bf16 %v1687_v56, %v1686_v61 }
 0x34d   : > { %v2889_v1 = vpop.f32.mrf.mxu1  ;;  %7910 = vmatmul.mubr.bf16.vlgmr.msra.gmra.mxu0 %v10250_v53  ;;  %v2076_v32 = vpack.c.bf16 %v1689_v58, %v1688_v42 }
 0x34e   : > { %v10253_v21 = vpack.c.bf16 %v4501_v34, %v4500_v6  ;;  %7914 = vmatpush3.bf16.xpose.msra.mxu0 %v9903_v41  ;;  %7929 = vmatprep.mubr.msk.bf16.mxu0 %vm8894_vm0, %v12516_v37  ;;  %v2890_v57 = vadd.f32 %v9872_v59, %v2889_v1  ;;  %v1179_v41 = vadd.f32 %v10176_v39, %v12538_v9  ;;  %v4506_v30 = vmax.f32 %v2898_v0, 0.0 }
 0x34f   : > { %v7468_v27 = vpop.f32.mrf.mxu1  ;;  %7915 = vmatprep.subr.bf16.mxu0 %v12516_v37 }
 0x350   : > { %v2901_v55 = vadd.f32 %v9872_v59, %v7468_v27  ;;  %v10273_v59 = vld [vmem:[%s12446_s5] ss:$0 sm:$0xff]  ;;  %v4504_v34 = vmax.f32 %v2890_v57, 0.0  ;;  %v1690_v27 = vmax.f32 %v1178_v7, 0.0  ;;  %v1691_v31 = vmax.f32 %v1179_v41, 0.0 }
 0x351   : > { %v2892_v36 = vpop.f32.mrf.mxu1  ;;  %v1182_v57 = vadd.f32 %v10084_v48, %v12538_v9  ;;  %v1183_v41 = vadd.f32 %v10089_v22, %v12538_v9 }
 0x352   : > { %v4507_v24 = vmax.f32 %v2901_v55, 0.0  ;;  %v2893_v14 = vadd.f32 %v10273_v59, %v2892_v36 }
 0x353   : > { %v7471_v6 = vpop.f32.mrf.mxu1  ;;  %7566 = vmatmul.mubr.bf16.gmra.mxu1 %v2075_v45  ;;  %v2077_v45 = vpack.c.bf16 %v1691_v31, %v1690_v27  ;;  %v1694_v9 = vmax.f32 %v1182_v57, 0.0  ;;  %v1695_v27 = vmax.f32 %v1183_v41, 0.0 }
 0x354   : > { %v10276_v1 = vpack.c.bf16 %v4507_v24, %v4506_v30  ;;  %v4505_v61 = vmax.f32 %v2893_v14, 0.0  ;;  %7569 = vmatprep.mubr.bf16.mxu1 %v2076_v32  ;;  %v2914_v55 = vadd.f32 %v10273_v59, %v7471_v6  ;;  %v12544_v30 = vld [vmem:[#allocation23_spill] sm:$0xff]  ;;  %v2078_v32 = vpack.c.bf16 %v1693_v43, %v1692_v62 }
 0x355   : > { %v2905_v56 = vpop.f32.mrf.mxu1  ;;  %v1185_v18 = vadd.f32 %v10096_v38, %v12544_v30  ;;  %v1187_v57 = vadd.f32 %v10116_v5, %v12544_v30  ;;  %v2079_v41 = vpack.c.bf16 %v1695_v27, %v1694_v9 }
 0x356   : > { %12542 = vst [vmem:[#allocation58_spill] sm:$0xff] %v10276_v1  ;;  %v10278_v0 = vpack.c.bf16 %v4505_v61, %v4504_v34  ;;  %7916 = vmatpush3.bf16.xpose.msra.mxu0 %v9906_v10  ;;  %v2906_v42 = vadd.f32 %v10273_v59, %v2905_v56  ;;  %v1184_v10 = vadd.f32 %v10010_v35, %v12544_v30  ;;  %v4510_v40 = vmax.f32 %v2914_v55, 0.0 }
 0x357   : > { %v7472_v36 = vpop.f32.mrf.mxu1  ;;  %7917 = vmatprep.subr.bf16.mxu0 %v12516_v37  ;;  %v1699_v1 = vmax.f32 %v1187_v57, 0.0 }
 0x358   : > { %12543 = vst [vmem:[#allocation59_spill] sm:$0xff] %v10278_v0  ;;  %v2917_v58 = vadd.f32 %v10273_v59, %v7472_v36  ;;  %v4508_v34 = vmax.f32 %v2906_v42, 0.0  ;;  %v1696_v55 = vmax.f32 %v1184_v10, 0.0  ;;  %v1186_v42 = vadd.f32 %v10111_v29, %v12544_v30 }
 0x359   : > { %v2908_v7 = vpop.f32.mrf.mxu1  ;;  %v1189_v10 = vadd.f32 %v10126_v52, %v12544_v30 }
 0x35a   : > { %v4511_v24 = vmax.f32 %v2917_v58, 0.0  ;;  %v2909_v14 = vadd.f32 %v10273_v59, %v2908_v7  ;;  %v1697_v58 = vmax.f32 %v1185_v18, 0.0 }
 0x35b   : > { %v7475_v6 = vpop.f32.mrf.mxu1  ;;  %7570 = vmatmul.mubr.bf16.gmra.mxu1 %v2077_v45 }
 0x35c   : > { %v10294_v61 = vpack.c.bf16 %v4511_v24, %v4510_v40  ;;  %v4509_v31 = vmax.f32 %v2909_v14, 0.0  ;;  %7573 = vmatprep.mubr.bf16.mxu1 %v2078_v32  ;;  %v2930_v0 = vadd.f32 %v10273_v59, %v7475_v6  ;;  %v2080_v14 = vpack.c.bf16 %v1697_v58, %v1696_v55  ;;  %v6714_v6 = vld [vmem:[#allocation2] ss:$0 sm:$0xff] }
 0x35d   : > { %v2921_v56 = vpop.f32.mrf.mxu1  ;;  %v8895_v32 = vmov 0   ;;  %v1701_v58 = vmax.f32 %v1189_v10, 0.0 }
 0x35e   : > { %12545 = vst [vmem:[#allocation23_spill] sm:$0xff] %v10294_v61  ;;  %v10296_v36 = vpack.c.bf16 %v4509_v31, %v4508_v34  ;;  %7918 = vmatpush3.bf16.xpose.msra.mxu0 %v9885_v63  ;;  %v2922_v62 = vadd.f32 %v10273_v59, %v2921_v56  ;;  %v1188_v63 = vadd.f32 %v10121_v4, %v12544_v30  ;;  %v4514_v18 = vmax.f32 %v2930_v0, 0.0 }
 0x35f   : > { %v7476_v7 = vpop.f32.mrf.mxu1  ;;  %7919 = vmatprep.subr.bf16.mxu0 %v12516_v37  ;;  %8571 = vset.pattern.permute.xlu0 %v8895_v32 }
 0x360   : > { %12546 = vst [vmem:[#allocation60_spill] sm:$0xff] %v10296_v36  ;;  %v2933_v43 = vadd.f32 %v10273_v59, %v7476_v7  ;;  %6416 = vperm.xlu0 %8571, %v6714_v6   ;;  %v4512_v31 = vmax.f32 %v2922_v62, 0.0  ;;  %v1698_v7 = vmax.f32 %v1186_v42, 0.0  ;;  %v1700_v55 = vmax.f32 %v1188_v63, 0.0 }
 0x361   : > { %v2924_v45 = vpop.f32.mrf.mxu1  ;;  %v1193_v63 = vadd.f32 %v10156_v46, %v12544_v30 }
 0x362   : > { %v4515_v40 = vmax.f32 %v2933_v43, 0.0  ;;  %v2925_v24 = vadd.f32 %v10273_v59, %v2924_v45  ;;  %v2081_v57 = vpack.c.bf16 %v1699_v1, %v1698_v7 }
 0x363   : > { %v7479_v34 = vpop.f32.mrf.mxu1  ;;  %7574 = vmatmul.mubr.bf16.gmra.mxu1 %v2079_v41  ;;  %v1190_v41 = vadd.f32 %v10141_v28, %v12544_v30 }
 0x364   : > { %v10312_v56 = vpack.c.bf16 %v4515_v40, %v4514_v18  ;;  %v4513_v9 = vmax.f32 %v2925_v24, 0.0  ;;  %7577 = vmatprep.mubr.bf16.mxu1 %v2080_v14  ;;  %v2946_v0 = vadd.f32 %v10273_v59, %v7479_v34  ;;  %v1191_v18 = vadd.f32 %v10146_v49, %v12544_v30 }
 0x365   : > { %v2937_v27 = vpop.f32.mrf.mxu1  ;;  %v2082_v14 = vpack.c.bf16 %v1701_v58, %v1700_v55 }
 0x366   : > { %v10314_v36 = vpack.c.bf16 %v4513_v9, %v4512_v31  ;;  %7920 = vmatpush3.bf16.xpose.msra.mxu0 %v9887_v17  ;;  %v2938_v62 = vadd.f32 %v10273_v59, %v2937_v27  ;;  %v1192_v17 = vadd.f32 %v10151_v16, %v12544_v30  ;;  %v4518_v10 = vmax.f32 %v2946_v0, 0.0 }
 0x367   : > { %v7480_v43 = vpop.f32.mrf.mxu1  ;;  %7921 = vmatprep.subr.bf16.mxu0 %v12516_v37  ;;  %v1702_v9 = vmax.f32 %v1190_v41, 0.0  ;;  %v1703_v27 = vmax.f32 %v1191_v18, 0.0  ;;  %v1195_v18 = vadd.f32 %v10176_v39, %v12544_v30 }
 0x368   : > { %12547 = vst [vmem:[#allocation61_spill] sm:$0xff] %v10314_v36  ;;  %v2949_v45 = vadd.f32 %v10273_v59, %v7480_v43  ;;  %v4516_v6 = vmax.f32 %v2938_v62, 0.0  ;;  %v1704_v0 = vmax.f32 %v1192_v17, 0.0  ;;  %v1194_v62 = vadd.f32 %v10171_v20, %v12544_v30  ;;  %v12550_v36 = vld [vmem:[#allocation45_spill] sm:$0xff] }
 0x369   : > { %v2940_v42 = vpop.f32.mrf.mxu1  ;;  %v1197_v17 = vadd.f32 %v10186_v15, %v12544_v30 }
 0x36a   : > { %v4519_v40 = vmax.f32 %v2949_v45, 0.0  ;;  %v2941_v24 = vadd.f32 %v10273_v59, %v2940_v42  ;;  %v1705_v45 = vmax.f32 %v1193_v63, 0.0 }
 0x36b   : > { %v7483_v32 = vpop.f32.mrf.mxu1  ;;  %7578 = vmatmul.mubr.bf16.gmra.mxu1 %v2081_v57  ;;  %v2083_v57 = vpack.c.bf16 %v1703_v27, %v1702_v9  ;;  %v1706_v9 = vmax.f32 %v1194_v62, 0.0  ;;  %v1707_v27 = vmax.f32 %v1195_v18, 0.0  ;;  %v1199_v18 = vadd.f32 %v10089_v22, %v12544_v30 }
 0x36c   : > { %v10330_v34 = vpack.c.bf16 %v4519_v40, %v4518_v10  ;;  %v4517_v1 = vmax.f32 %v2941_v24, 0.0  ;;  %7581 = vmatprep.mubr.bf16.mxu1 %v2082_v14  ;;  %v2962_v43 = vadd.f32 %v10273_v59, %v7483_v32  ;;  %v2084_v24 = vpack.c.bf16 %v1705_v45, %v1704_v0 }
 0x36d   : > { %v2953_v31 = vpop.f32.mrf.mxu1 }
 0x36e   : > { %v10332_v7 = vpack.c.bf16 %v4517_v1, %v4516_v6  ;;  %7922 = vmatpush3.bf16.xpose.msra.mxu0 %v9862_v47  ;;  %v2954_v55 = vadd.f32 %v10273_v59, %v2953_v31  ;;  %v1196_v47 = vadd.f32 %v10181_v11, %v12544_v30  ;;  %v4522_v63 = vmax.f32 %v2962_v43, 0.0 }
 0x36f   : > { %v7484_v42 = vpop.f32.mrf.mxu1  ;;  %7923 = vmatprep.subr.bf16.mxu0 %v12516_v37 }
 0x370   : > { %v2965_v58 = vadd.f32 %v10273_v59, %v7484_v42  ;;  %v4520_v32 = vmax.f32 %v2954_v55, 0.0  ;;  %v1708_v43 = vmax.f32 %v1196_v47, 0.0  ;;  %v1198_v55 = vadd.f32 %v10084_v48, %v12544_v30 }
 0x371   : > { %v2956_v41 = vpop.f32.mrf.mxu1 }
 0x372   : > { %v4523_v10 = vmax.f32 %v2965_v58, 0.0  ;;  %v2957_v40 = vadd.f32 %v10273_v59, %v2956_v41  ;;  %v1709_v58 = vmax.f32 %v1197_v17, 0.0  ;;  %v1710_v30 = vmax.f32 %v1198_v55, 0.0 }
 0x373   : > { %v7487_v14 = vpop.f32.mrf.mxu1  ;;  %7582 = vmatmul.mubr.bf16.gmra.mxu1 %v2083_v57  ;;  %v2085_v57 = vpack.c.bf16 %v1707_v27, %v1706_v9  ;;  %v1711_v27 = vmax.f32 %v1199_v18, 0.0 }
 0x374   : > { %v10348_v6 = vpack.c.bf16 %v4523_v10, %v4522_v63  ;;  %v4521_v1 = vmax.f32 %v2957_v40, 0.0  ;;  %7585 = vmatprep.mubr.bf16.mxu1 %v2084_v24  ;;  %v2978_v61 = vadd.f32 %v10273_v59, %v7487_v14  ;;  %v12551_v63 = vld [vmem:[#allocation24_spill] sm:$0xff]  ;;  %v2086_v24 = vpack.c.bf16 %v1709_v58, %v1708_v43 }
 0x375   : > { %v2969_v31 = vpop.f32.mrf.mxu1  ;;  %v1201_v47 = vadd.f32 %v10096_v38, %v12551_v63 }
 0x376   : > { %12548 = vst [vmem:[#allocation62_spill] sm:$0xff] %v10348_v6  ;;  %v10350_v42 = vpack.c.bf16 %v4521_v1, %v4520_v32  ;;  %7924 = vmatpush3.bf16.xpose.msra.mxu0 %v12550_v36  ;;  %v2970_v0 = vadd.f32 %v10273_v59, %v2969_v31  ;;  %v1200_v36 = vadd.f32 %v10010_v35, %v12551_v63  ;;  %v4526_v17 = vmax.f32 %v2978_v61, 0.0 }
 0x377   : > { %v7488_v41 = vpop.f32.mrf.mxu1  ;;  %7925 = vmatprep.subr.bf16.mxu0 %v12516_v37  ;;  %v1713_v35 = vmax.f32 %v1201_v47, 0.0  ;;  %v1204_v47 = vadd.f32 %v10121_v4, %v12551_v63 }
 0x378   : > { %12549 = vst [vmem:[#allocation63_spill] sm:$0xff] %v10350_v42  ;;  %v2981_v45 = vadd.f32 %v10273_v59, %v7488_v41  ;;  %v4524_v32 = vmax.f32 %v2970_v0, 0.0  ;;  %v1712_v41 = vmax.f32 %v1200_v36, 0.0  ;;  %v1202_v0 = vadd.f32 %v10111_v29, %v12551_v63 }
 0x379   : > { %v2972_v62 = vpop.f32.mrf.mxu1  ;;  %v1203_v36 = vadd.f32 %v10116_v5, %v12551_v63 }
 0x37a   : > { %v4527_v10 = vmax.f32 %v2981_v45, 0.0  ;;  %v2973_v40 = vadd.f32 %v10273_v59, %v2972_v62  ;;  %v12554_v45 = vld [vmem:[#allocation43_spill] sm:$0xff]  ;;  %v2088_v18 = vpack.c.bf16 %v1713_v35, %v1712_v41 }
 0x37b   : > { %v7491_v14 = vpop.f32.mrf.mxu1  ;;  %7586 = vmatmul.mubr.bf16.gmra.mxu1 %v2085_v57  ;;  %v2087_v57 = vpack.c.bf16 %v1711_v27, %v1710_v30  ;;  %v1714_v27 = vmax.f32 %v1202_v0, 0.0  ;;  %v1715_v41 = vmax.f32 %v1203_v36, 0.0 }
 0x37c   : > { %v10366_v1 = vpack.c.bf16 %v4527_v10, %v4526_v17  ;;  %v4525_v31 = vmax.f32 %v2973_v40, 0.0  ;;  %7589 = vmatprep.mubr.bf16.mxu1 %v2086_v24  ;;  %v2994_v61 = vadd.f32 %v10273_v59, %v7491_v14  ;;  %v1205_v24 = vadd.f32 %v10126_v52, %v12551_v63 }
 0x37d   : > { %v2985_v9 = vpop.f32.mrf.mxu1  ;;  %v2089_v36 = vpack.c.bf16 %v1715_v41, %v1714_v27 }
 0x37e   : > { %12552 = vst [vmem:[#allocation45_spill] sm:$0xff] %v10366_v1  ;;  %v10368_v42 = vpack.c.bf16 %v4525_v31, %v4524_v32  ;;  %7926 = vmatpush3.bf16.xpose.msra.mxu0 %v12554_v45  ;;  %v2986_v43 = vadd.f32 %v10273_v59, %v2985_v9  ;;  %v4530_v17 = vmax.f32 %v2994_v61, 0.0  ;;  %v12556_v45 = vld [vmem:[#allocation44_spill] sm:$0xff] }
 0x37f   : > { %v7492_v62 = vpop.f32.mrf.mxu1  ;;  %7927 = vmatprep.subr.bf16.mxu0 %v12516_v37 }
 0x380   : > { %12553 = vst [vmem:[#allocation24_spill] sm:$0xff] %v10368_v42  ;;  %v2997_v58 = vadd.f32 %v10273_v59, %v7492_v62  ;;  %v4528_v32 = vmax.f32 %v2986_v43, 0.0  ;;  %v1716_v62 = vmax.f32 %v1204_v47, 0.0  ;;  %v1209_v47 = vadd.f32 %v10156_v46, %v12551_v63 }
 0x381   : > { %v2988_v55 = vpop.f32.mrf.mxu1 }
 0x382   : > { %v4531_v10 = vmax.f32 %v2997_v58, 0.0  ;;  %v2989_v40 = vadd.f32 %v10273_v59, %v2988_v55  ;;  %v1717_v58 = vmax.f32 %v1205_v24, 0.0 }
 0x383   : > { %v7495_v14 = vpop.f32.mrf.mxu1  ;;  %7590 = vmatmul.mubr.bf16.gmra.mxu1 %v2087_v57 }
 0x384   : > { %v10384_v31 = vpack.c.bf16 %v4531_v10, %v4530_v17  ;;  %v4529_v9 = vmax.f32 %v2989_v40, 0.0  ;;  %7593 = vmatprep.mubr.bf16.mxu1 %v2088_v18  ;;  %v3010_v61 = vadd.f32 %v10273_v59, %v7495_v14  ;;  %v1206_v18 = vadd.f32 %v10141_v28, %v12551_v63 }
 0x385   : > { %v3001_v30 = vpop.f32.mrf.mxu1  ;;  %v1207_v17 = vadd.f32 %v10146_v49, %v12551_v63  ;;  %v1208_v10 = vadd.f32 %v10151_v16, %v12551_v63 }
 0x386   : > { %v10386_v35 = vpack.c.bf16 %v4529_v9, %v4528_v32  ;;  %7928 = vmatpush3.bf16.xpose.msra.mxu0 %v12556_v45  ;;  %v3002_v43 = vadd.f32 %v10273_v59, %v3001_v30  ;;  %v4534_v40 = vmax.f32 %v3010_v61, 0.0  ;;  %v2090_v32 = vpack.c.bf16 %v1717_v58, %v1716_v62 }
 0x387   : > { %v7496_v55 = vpop.f32.mrf.mxu1  ;;  %7933 = vmatprep.subr.bf16.mxu0 %v12516_v37  ;;  %v1719_v6 = vmax.f32 %v1207_v17, 0.0  ;;  %v1721_v62 = vmax.f32 %v1209_v47, 0.0  ;;  %v1213_v47 = vadd.f32 %v10186_v15, %v12551_v63 }
 0x388   : > { %12555 = vst [vmem:[#allocation43_spill] sm:$0xff] %v10386_v35  ;;  %v3013_v57 = vadd.f32 %v10273_v59, %v7496_v55  ;;  %v4532_v30 = vmax.f32 %v3002_v43, 0.0  ;;  %v1718_v55 = vmax.f32 %v1206_v18, 0.0  ;;  %v1210_v18 = vadd.f32 %v10171_v20, %v12551_v63 }
 0x389   : > { %v3004_v0 = vpop.f32.mrf.mxu1 }
 0x38a   : > { %v4535_v24 = vmax.f32 %v3013_v57, 0.0  ;;  %v3005_v14 = vadd.f32 %v10273_v59, %v3004_v0  ;;  %v1720_v57 = vmax.f32 %v1208_v10, 0.0  ;;  %v2091_v17 = vpack.c.bf16 %v1719_v6, %v1718_v55 }
 0x38b   : > { %v7499_v9 = vpop.f32.mrf.mxu1  ;;  %7594 = vmatmul.mubr.bf16.gmra.mxu1 %v2089_v36  ;;  %v1212_v10 = vadd.f32 %v10181_v11, %v12551_v63  ;;  %v1722_v55 = vmax.f32 %v1210_v18, 0.0 }
 0x38c   : > { %v10402_v45 = vpack.c.bf16 %v4535_v24, %v4534_v40  ;;  %v4533_v27 = vmax.f32 %v3005_v14, 0.0  ;;  %7597 = vmatprep.mubr.bf16.mxu1 %v2090_v32  ;;  %v3026_v61 = vadd.f32 %v10273_v59, %v7499_v9  ;;  %v2092_v32 = vpack.c.bf16 %v1721_v62, %v1720_v57 }
 0x38d   : > { %v3017_v41 = vpop.f32.mrf.mxu1  ;;  %7930 = vmatmul.mubr.bf16.vlgmr.msra.gmra.mxu0 %v10250_v53 }
 0x38e   : > { %v10405_v42 = vpack.c.bf16 %v4533_v27, %v4532_v30  ;;  %7934 = vmatpush3.bf16.xpose.msra.mxu0 %v9978_v8  ;;  %7949 = vmatprep.mubr.msk.bf16.mxu0 %vm8894_vm0, %v12516_v37  ;;  %v3018_v43 = vadd.f32 %v10273_v59, %v3017_v41  ;;  %v1211_v8 = vadd.f32 %v10176_v39, %v12551_v63  ;;  %v4538_v40 = vmax.f32 %v3026_v61, 0.0 }
 0x38f   : > { %v7500_v58 = vpop.f32.mrf.mxu1  ;;  %7935 = vmatprep.subr.bf16.mxu0 %v12516_v37  ;;  %v1724_v61 = vmax.f32 %v1212_v10, 0.0 }
 0x390   : > { %v3029_v0 = vadd.f32 %v10273_v59, %v7500_v58  ;;  %v4536_v30 = vmax.f32 %v3018_v43, 0.0  ;;  %v1723_v58 = vmax.f32 %v1211_v8, 0.0  ;;  %v1215_v8 = vadd.f32 %v10089_v22, %v12551_v63 }
 0x391   : > { %v3020_v36 = vpop.f32.mrf.mxu1 }
 0x392   : > { %v4539_v24 = vmax.f32 %v3029_v0, 0.0  ;;  %v3021_v14 = vadd.f32 %v10273_v59, %v3020_v36  ;;  %v1725_v0 = vmax.f32 %v1213_v47, 0.0  ;;  %v1214_v36 = vadd.f32 %v10084_v48, %v12551_v63 }
 0x393   : > { %v7503_v9 = vpop.f32.mrf.mxu1  ;;  %7598 = vmatmul.mubr.bf16.gmra.mxu1 %v2091_v17  ;;  %v2093_v17 = vpack.c.bf16 %v1723_v58, %v1722_v55  ;;  %v1727_v55 = vmax.f32 %v1215_v8, 0.0 }
 0x394   : > { %v10423_v27 = vpack.c.bf16 %v4539_v24, %v4538_v40  ;;  %v4537_v6 = vmax.f32 %v3021_v14, 0.0  ;;  %7601 = vmatprep.mubr.bf16.mxu1 %v2092_v32  ;;  %v3042_v35 = vadd.f32 %v10273_v59, %v7503_v9  ;;  %v10437_v40 = vld [vmem:[%s9106_s22] sm:$0xff]  ;;  %v2094_v9 = vpack.c.bf16 %v1725_v0, %v1724_v61 }
 0x395   : > { %v3033_v41 = vpop.f32.mrf.mxu1  ;;  %v1726_v63 = vmax.f32 %v1214_v36, 0.0 }
 0x396   : > { %12557 = vst [vmem:[#allocation44_spill] sm:$0xff] %v10423_v27  ;;  %v10425_v1 = vpack.c.bf16 %v4537_v6, %v4536_v30  ;;  %7936 = vmatpush3.bf16.xpose.msra.mxu0 %v9980_v26  ;;  %v3034_v62 = vadd.f32 %v10273_v59, %v3033_v41  ;;  %v12559_v26 = vld [vmem:[#allocation25_spill] sm:$0xff]  ;;  %v4542_v24 = vmax.f32 %v3042_v35, 0.0 }
 0x397   : > { %v7504_v57 = vpop.f32.mrf.mxu1  ;;  %7937 = vmatprep.subr.bf16.mxu0 %v12516_v37  ;;  %v1216_v10 = vadd.f32 %v10437_v40, %v12559_v26  ;;  %v1217_v47 = vadd.f32 %v10096_v38, %v12559_v26  ;;  %v1221_v8 = vadd.f32 %v10126_v52, %v12559_v26 }
 0x398   : > { %12558 = vst [vmem:[#allocation64_spill] sm:$0xff] %v10425_v1  ;;  %v3045_v43 = vadd.f32 %v10273_v59, %v7504_v57  ;;  %v4540_v48 = vmax.f32 %v3034_v62, 0.0  ;;  %v1218_v62 = vadd.f32 %v10111_v29, %v12559_v26 }
 0x399   : > { %v3036_v18 = vpop.f32.mrf.mxu1  ;;  %v1728_v38 = vmax.f32 %v1216_v10, 0.0  ;;  %v1729_v35 = vmax.f32 %v1217_v47, 0.0 }
 0x39a   : > { %v4543_v14 = vmax.f32 %v3045_v43, 0.0  ;;  %v3037_v32 = vadd.f32 %v10273_v59, %v3036_v18  ;;  %v2095_v18 = vpack.c.bf16 %v1727_v55, %v1726_v63  ;;  %v1733_v63 = vmax.f32 %v1221_v8, 0.0 }
 0x39b   : > { %v7507_v30 = vpop.f32.mrf.mxu1  ;;  %7602 = vmatmul.mubr.bf16.gmra.mxu1 %v2093_v17  ;;  %v1219_v17 = vadd.f32 %v10116_v5, %v12559_v26  ;;  %v1730_v5 = vmax.f32 %v1218_v62, 0.0  ;;  %v1225_v62 = vadd.f32 %v10156_v46, %v12559_v26 }
 0x39c   : > { %v10444_v6 = vpack.c.bf16 %v4543_v14, %v4542_v24  ;;  %v4541_v41 = vmax.f32 %v3037_v32, 0.0  ;;  %7605 = vmatprep.mubr.bf16.mxu1 %v2094_v9  ;;  %v3058_v57 = vadd.f32 %v10273_v59, %v7507_v30  ;;  %v2096_v14 = vpack.c.bf16 %v1729_v35, %v1728_v38 }
 0x39d   : > { %v3049_v22 = vpop.f32.mrf.mxu1  ;;  %v1222_v35 = vadd.f32 %v10141_v28, %v12559_v26 }
 0x39e   : > { %v10446_v58 = vpack.c.bf16 %v4541_v41, %v4540_v48  ;;  %7938 = vmatpush3.bf16.xpose.msra.mxu0 %v9960_v44  ;;  %v3050_v61 = vadd.f32 %v10273_v59, %v3049_v22  ;;  %v1220_v44 = vadd.f32 %v10121_v4, %v12559_v26  ;;  %v4546_v10 = vmax.f32 %v3058_v57, 0.0 }
 0x39f   : > { %v7508_v43 = vpop.f32.mrf.mxu1  ;;  %7939 = vmatprep.subr.bf16.mxu0 %v12516_v37  ;;  %v1731_v41 = vmax.f32 %v1219_v17, 0.0 }
 0x3a0   : > { %12560 = vst [vmem:[#allocation25_spill] sm:$0xff] %v10446_v58  ;;  %v3061_v0 = vadd.f32 %v10273_v59, %v7508_v43  ;;  %v4544_v9 = vmax.f32 %v3050_v61, 0.0  ;;  %v1732_v52 = vmax.f32 %v1220_v44, 0.0 }
 0x3a1   : > { %v3052_v36 = vpop.f32.mrf.mxu1  ;;  %v2097_v61 = vpack.c.bf16 %v1731_v41, %v1730_v5  ;;  %v1226_v41 = vadd.f32 %v10171_v20, %v12559_v26 }
 0x3a2   : > { %v4547_v47 = vmax.f32 %v3061_v0, 0.0  ;;  %v3053_v24 = vadd.f32 %v10273_v59, %v3052_v36  ;;  %v1223_v0 = vadd.f32 %v10146_v49, %v12559_v26  ;;  %v2098_v44 = vpack.c.bf16 %v1733_v63, %v1732_v52 }
 0x3a3   : > { %v7511_v32 = vpop.f32.mrf.mxu1  ;;  %7606 = vmatmul.mubr.bf16.gmra.mxu1 %v2095_v18  ;;  %v1734_v49 = vmax.f32 %v1222_v35, 0.0  ;;  %v1227_v63 = vadd.f32 %v10176_v39, %v12559_v26 }
 0x3a4   : > { %v10462_v29 = vpack.c.bf16 %v4547_v47, %v4546_v10  ;;  %v4545_v30 = vmax.f32 %v3053_v24, 0.0  ;;  %7609 = vmatprep.mubr.bf16.mxu1 %v2096_v14  ;;  %v3074_v4 = vadd.f32 %v10273_v59, %v7511_v32  ;;  %v1735_v14 = vmax.f32 %v1223_v0, 0.0 }
 0x3a5   : > { %v3065_v48 = vpop.f32.mrf.mxu1 }
 0x3a6   : > { %v10464_v22 = vpack.c.bf16 %v4545_v30, %v4544_v9  ;;  %7940 = vmatpush3.bf16.xpose.msra.mxu0 %v9962_v54  ;;  %v3066_v57 = vadd.f32 %v10273_v59, %v3065_v48  ;;  %v1224_v54 = vadd.f32 %v10151_v16, %v12559_v26  ;;  %v4550_v36 = vmax.f32 %v3074_v4, 0.0 }
 0x3a7   : > { %v7512_v55 = vpop.f32.mrf.mxu1  ;;  %7941 = vmatprep.subr.bf16.mxu0 %v12516_v37  ;;  %v1737_v9 = vmax.f32 %v1225_v62, 0.0  ;;  %v2099_v52 = vpack.c.bf16 %v1735_v14, %v1734_v49  ;;  %v1738_v62 = vmax.f32 %v1226_v41, 0.0 }
 0x3a8   : > { %v3077_v38 = vadd.f32 %v10273_v59, %v7512_v55  ;;  %v4548_v10 = vmax.f32 %v3066_v57, 0.0  ;;  %v1736_v46 = vmax.f32 %v1224_v54, 0.0  ;;  %v1229_v55 = vadd.f32 %v10186_v15, %v12559_v26 }
 0x3a9   : > { %v3068_v43 = vpop.f32.mrf.mxu1 }
 0x3aa   : > { %v4551_v18 = vmax.f32 %v3077_v38, 0.0  ;;  %v3069_v17 = vadd.f32 %v10273_v59, %v3068_v43  ;;  %v2100_v43 = vpack.c.bf16 %v1737_v9, %v1736_v46  ;;  %v12563_v46 = vld [vmem:[#allocation27_spill] sm:$0xff] }
 0x3ab   : > { %v7515_v8 = vpop.f32.mrf.mxu1  ;;  %7610 = vmatmul.mubr.bf16.gmra.mxu1 %v2097_v61  ;;  %v1232_v9 = vadd.f32 %v10437_v40, %v12563_v46 }
 0x3ac   : > { %v10480_v28 = vpack.c.bf16 %v4551_v18, %v4550_v36  ;;  %v4549_v47 = vmax.f32 %v3069_v17, 0.0  ;;  %7613 = vmatprep.mubr.bf16.mxu1 %v2098_v44  ;;  %v3090_v16 = vadd.f32 %v10273_v59, %v7515_v8  ;;  %v1741_v17 = vmax.f32 %v1229_v55, 0.0 }
 0x3ad   : > { %v3081_v24 = vpop.f32.mrf.mxu1 }
 0x3ae   : > { %v10482_v32 = vpack.c.bf16 %v4549_v47, %v4548_v10  ;;  %7942 = vmatpush3.bf16.xpose.msra.mxu0 %v9942_v33  ;;  %v3082_v48 = vadd.f32 %v10273_v59, %v3081_v24  ;;  %v1228_v33 = vadd.f32 %v10181_v11, %v12559_v26  ;;  %v4554_v57 = vmax.f32 %v3090_v16, 0.0  ;;  %v10508_v47 = vld [vmem:[%s9106_s22 + $0x70] sm:$0xff]  ;;  %v10513_v16 = vld [vmem:[%s9106_s22 + $0x78] sm:$0xff] }
 0x3af   : > { %v7516_v30 = vpop.f32.mrf.mxu1  ;;  %7943 = vmatprep.subr.bf16.mxu0 %v12516_v37  ;;  %v1739_v11 = vmax.f32 %v1227_v63, 0.0  ;;  %v1230_v24 = vadd.f32 %v10508_v47, %v12559_v26 }
 0x3b0   : > { %v3093_v5 = vadd.f32 %v10273_v59, %v7516_v30  ;;  %v4552_v0 = vmax.f32 %v3082_v48, 0.0  ;;  %v1740_v18 = vmax.f32 %v1228_v33, 0.0  ;;  %v10520_v30 = vld [vmem:[%s9106_s22 + $0x8] sm:$0xff] }
 0x3b1   : > { %v3084_v4 = vpop.f32.mrf.mxu1  ;;  %v2101_v14 = vpack.c.bf16 %v1739_v11, %v1738_v62  ;;  %v1233_v48 = vadd.f32 %v10520_v30, %v12563_v46 }
 0x3b2   : > { %v4555_v38 = vmax.f32 %v3093_v5, 0.0  ;;  %v3085_v35 = vadd.f32 %v10273_v59, %v3084_v4 }
 0x3b3   : > { %v7519_v61 = vpop.f32.mrf.mxu1  ;;  %7614 = vmatmul.mubr.bf16.gmra.mxu1 %v2099_v52  ;;  %v2102_v52 = vpack.c.bf16 %v1741_v17, %v1740_v18  ;;  %v10535_v18 = vld [vmem:[%s9106_s22 + $0x10] sm:$0xff] }
 0x3b4   : > { %v10498_v20 = vpack.c.bf16 %v4555_v38, %v4554_v57  ;;  %v4553_v54 = vmax.f32 %v3085_v35, 0.0  ;;  %7617 = vmatprep.mubr.bf16.mxu1 %v2100_v43  ;;  %v3106_v15 = vadd.f32 %v10273_v59, %v7519_v61  ;;  %v1742_v38 = vmax.f32 %v1230_v24, 0.0 }
 0x3b5   : > { %v3097_v39 = vpop.f32.mrf.mxu1  ;;  %v1234_v17 = vadd.f32 %v10535_v18, %v12563_v46 }
 0x3b6   : > { %12561 = vst [vmem:[#allocation65_spill] sm:$0xff] %v10498_v20  ;;  %v10500_v36 = vpack.c.bf16 %v4553_v54, %v4552_v0  ;;  %7944 = vmatpush3.bf16.xpose.msra.mxu0 %v9944_v13  ;;  %v3098_v8 = vadd.f32 %v10273_v59, %v3097_v39  ;;  %v1231_v13 = vadd.f32 %v10513_v16, %v12559_v26  ;;  %v4558_v5 = vmax.f32 %v3106_v15, 0.0  ;;  %v12566_v0 = vld [vmem:[#allocation46_spill] sm:$0xff] }
 0x3b7   : > { %v7520_v44 = vpop.f32.mrf.mxu1  ;;  %7945 = vmatprep.subr.bf16.mxu0 %v12516_v37  ;;  %v1744_v54 = vmax.f32 %v1232_v9, 0.0  ;;  %v1745_v39 = vmax.f32 %v1233_v48, 0.0 }
 0x3b8   : > { %12562 = vst [vmem:[#allocation66_spill] sm:$0xff] %v10500_v36  ;;  %v3109_v10 = vadd.f32 %v10273_v59, %v7520_v44  ;;  %v4556_v33 = vmax.f32 %v3098_v8, 0.0  ;;  %v1743_v35 = vmax.f32 %v1231_v13, 0.0  ;;  %v10550_v13 = vld [vmem:[%s9106_s22 + $0x28] sm:$0xff] }
 0x3b9   : > { %v3100_v49 = vpop.f32.mrf.mxu1  ;;  %v1237_v9 = vadd.f32 %v10550_v13, %v12563_v46 }
 0x3ba   : > { %v4559_v41 = vmax.f32 %v3109_v10, 0.0  ;;  %v3101_v4 = vadd.f32 %v10273_v59, %v3100_v49  ;;  %v2103_v8 = vpack.c.bf16 %v1743_v35, %v1742_v38  ;;  %v10540_v10 = vld [vmem:[%s9106_s22 + $0x18] sm:$0xff]  ;;  %v10545_v49 = vld [vmem:[%s9106_s22 + $0x20] sm:$0xff]  ;;  %v1746_v38 = vmax.f32 %v1234_v17, 0.0 }
 0x3bb   : > { %v7523_v63 = vpop.f32.mrf.mxu1  ;;  %7618 = vmatmul.mubr.bf16.gmra.mxu1 %v2101_v14  ;;  %v1235_v24 = vadd.f32 %v10540_v10, %v12563_v46  ;;  %v1236_v14 = vadd.f32 %v10545_v49, %v12563_v46 }
 0x3bc   : > { %v10525_v55 = vpack.c.bf16 %v4559_v41, %v4558_v5  ;;  %v4557_v26 = vmax.f32 %v3101_v4, 0.0  ;;  %7621 = vmatprep.mubr.bf16.mxu1 %v2102_v52  ;;  %v3122_v61 = vadd.f32 %v10273_v59, %v7523_v63  ;;  %v2104_v4 = vpack.c.bf16 %v1745_v39, %v1744_v54 }
 0x3bd   : > { %v3113_v57 = vpop.f32.mrf.mxu1  ;;  %v1747_v35 = vmax.f32 %v1235_v24, 0.0  ;;  %v1748_v54 = vmax.f32 %v1236_v14, 0.0  ;;  %v1749_v39 = vmax.f32 %v1237_v9, 0.0  ;;  %v10575_v9 = vld [vmem:[%s9106_s22 + $0x40] sm:$0xff] }
 0x3be   : > { %12564 = vst [vmem:[#allocation27_spill] sm:$0xff] %v10525_v55  ;;  %v10527_v43 = vpack.c.bf16 %v4557_v26, %v4556_v33  ;;  %7946 = vmatpush3.bf16.xpose.msra.mxu0 %v12566_v0  ;;  %v3114_v11 = vadd.f32 %v10273_v59, %v3113_v57  ;;  %v4562_v48 = vmax.f32 %v3122_v61, 0.0 }
 0x3bf   : > { %v7524_v62 = vpop.f32.mrf.mxu1  ;;  %7947 = vmatprep.subr.bf16.mxu0 %v12516_v37 }
 0x3c0   : > { %12565 = vst [vmem:[#allocation67_spill] sm:$0xff] %v10527_v43  ;;  %v3125_v15 = vadd.f32 %v10273_v59, %v7524_v62  ;;  %v4560_v63 = vmax.f32 %v3114_v11, 0.0  ;;  %v12569_v62 = vld [vmem:[#allocation47_spill] sm:$0xff] }
 0x3c1   : > { %v3116_v44 = vpop.f32.mrf.mxu1 }
 0x3c2   : > { %v4563_v5 = vmax.f32 %v3125_v15, 0.0  ;;  %v3117_v41 = vadd.f32 %v10273_v59, %v3116_v44 }
 0x3c3   : > { %v7527_v52 = vpop.f32.mrf.mxu1  ;;  %7622 = vmatmul.mubr.bf16.gmra.mxu1 %v2103_v8  ;;  %v10565_v8 = vld [vmem:[%s9106_s22 + $0x30] sm:$0xff] }
 0x3c4   : > { %v10555_v33 = vpack.c.bf16 %v4563_v5, %v4562_v48  ;;  %v4561_v26 = vmax.f32 %v3117_v41, 0.0  ;;  %7625 = vmatprep.mubr.bf16.mxu1 %v2104_v4  ;;  %v3138_v61 = vadd.f32 %v10273_v59, %v7527_v52  ;;  %v1238_v17 = vadd.f32 %v10565_v8, %v12563_v46  ;;  %v10570_v5 = vld [vmem:[%s9106_s22 + $0x38] sm:$0xff]  ;;  %v10580_v4 = vld [vmem:[%s9106_s22 + $0x48] sm:$0xff] }
 0x3c5   : > { %v3129_v57 = vpop.f32.mrf.mxu1  ;;  %v2105_v48 = vpack.c.bf16 %v1747_v35, %v1746_v38  ;;  %v1239_v14 = vadd.f32 %v10570_v5, %v12563_v46  ;;  %v1240_v41 = vadd.f32 %v10575_v9, %v12563_v46  ;;  %v1241_v52 = vadd.f32 %v10580_v4, %v12563_v46 }
 0x3c6   : > { %12567 = vst [vmem:[#allocation46_spill] sm:$0xff] %v10555_v33  ;;  %v10557_v0 = vpack.c.bf16 %v4561_v26, %v4560_v63  ;;  %7948 = vmatpush3.bf16.xpose.msra.mxu0 %v12569_v62  ;;  %v3130_v15 = vadd.f32 %v10273_v59, %v3129_v57  ;;  %v4566_v63 = vmax.f32 %v3138_v61, 0.0  ;;  %v2106_v38 = vpack.c.bf16 %v1749_v39, %v1748_v54 }
 0x3c7   : > { %v7528_v11 = vpop.f32.mrf.mxu1  ;;  %7953 = vmatprep.subr.bf16.mxu0 %v12516_v37  ;;  %v1750_v43 = vmax.f32 %v1238_v17, 0.0  ;;  %v1751_v55 = vmax.f32 %v1239_v14, 0.0  ;;  %v1752_v54 = vmax.f32 %v1240_v41, 0.0  ;;  %v1753_v39 = vmax.f32 %v1241_v52, 0.0  ;;  %v10608_v41 = vld [vmem:[%s9106_s22 + $0x60] sm:$0xff] }
 0x3c8   : > { %12568 = vst [vmem:[#allocation68_spill] sm:$0xff] %v10557_v0  ;;  %v3141_v44 = vadd.f32 %v10273_v59, %v7528_v11  ;;  %v4564_v62 = vmax.f32 %v3130_v15, 0.0  ;;  %v1244_v52 = vadd.f32 %v10608_v41, %v12563_v46 }
 0x3c9   : > { %v3132_v24 = vpop.f32.mrf.mxu1 }
 0x3ca   : > { %v4567_v26 = vmax.f32 %v3141_v44, 0.0  ;;  %v3133_v57 = vadd.f32 %v10273_v59, %v3132_v24  ;;  %v1756_v1 = vmax.f32 %v1244_v52, 0.0  ;;  %v12574_v52 = vld [vmem:[#allocation26_spill] sm:$0xff] }
 0x3cb   : > { %v7531_v35 = vpop.f32.mrf.mxu1  ;;  %7626 = vmatmul.mubr.bf16.gmra.mxu1 %v2105_v48  ;;  %v10603_v48 = vld [vmem:[%s9106_s22 + $0x58] sm:$0xff] }
 0x3cc   : > { %v10585_v11 = vpack.c.bf16 %v4567_v26, %v4566_v63  ;;  %v4565_v36 = vmax.f32 %v3133_v57, 0.0  ;;  %7629 = vmatprep.mubr.bf16.mxu1 %v2106_v38  ;;  %v3154_v61 = vadd.f32 %v10273_v59, %v7531_v35  ;;  %v1243_v14 = vadd.f32 %v10603_v48, %v12563_v46 }
 0x3cd   : > { %v3145_v20 = vpop.f32.mrf.mxu1  ;;  %7950 = vmatmul.mubr.bf16.vlgmr.msra.gmra.mxu0 %v10250_v53 }
 0x3ce   : > { %12570 = vst [vmem:[#allocation47_spill] sm:$0xff] %v10585_v11  ;;  %v10588_v0 = vpack.c.bf16 %v4565_v36, %v4564_v62  ;;  %7954 = vmatpush3.bf16.xpose.msra.mxu0 %v10053_v12  ;;  %7969 = vmatprep.mubr.msk.bf16.mxu0 %vm8894_vm0, %v12516_v37  ;;  %v3146_v53 = vadd.f32 %v10273_v59, %v3145_v20  ;;  %v10598_v36 = vld [vmem:[%s9106_s22 + $0x50] sm:$0xff]  ;;  %v10613_v20 = vld [vmem:[%s9106_s22 + $0x68] sm:$0xff]  ;;  %v4570_v26 = vmax.f32 %v3154_v61, 0.0  ;;  %v1755_v11 = vmax.f32 %v1243_v14, 0.0 }
 0x3cf   : > { %v7532_v15 = vpop.f32.mrf.mxu1  ;;  %7955 = vmatprep.subr.bf16.mxu0 %v12516_v37  ;;  %v1242_v17 = vadd.f32 %v10598_v36, %v12563_v46  ;;  %v2107_v12 = vpack.c.bf16 %v1751_v55, %v1750_v43  ;;  %v1245_v63 = vadd.f32 %v10613_v20, %v12563_v46  ;;  %v2108_v55 = vpack.c.bf16 %v1753_v39, %v1752_v54 }
 0x3d0   : > { %12571 = vst [vmem:[#allocation69_spill] sm:$0xff] %v10588_v0  ;;  %v3157_v44 = vadd.f32 %v10273_v59, %v7532_v15  ;;  %v4568_v35 = vmax.f32 %v3146_v53, 0.0  ;;  %v1246_v53 = vadd.f32 %v10508_v47, %v12563_v46  ;;  %v1247_v14 = vadd.f32 %v10513_v16, %v12563_v46 }
 0x3d1   : > { %v3148_v24 = vpop.f32.mrf.mxu1  ;;  %v1754_v0 = vmax.f32 %v1242_v17, 0.0  ;;  %v1757_v27 = vmax.f32 %v1245_v63, 0.0  ;;  %v1248_v63 = vadd.f32 %v10437_v40, %v12574_v52 }
 0x3d2   : > { %v4571_v57 = vmax.f32 %v3157_v44, 0.0  ;;  %v3149_v38 = vadd.f32 %v10273_v59, %v3148_v24  ;;  %v1759_v46 = vmax.f32 %v1247_v14, 0.0  ;;  %v1253_v14 = vadd.f32 %v10550_v13, %v12574_v52 }
 0x3d3   : > { %v7535_v43 = vpop.f32.mrf.mxu1  ;;  %7630 = vmatmul.mubr.bf16.gmra.mxu1 %v2107_v12  ;;  %v2109_v24 = vpack.c.bf16 %v1755_v11, %v1754_v0  ;;  %v2110_v12 = vpack.c.bf16 %v1757_v27, %v1756_v1  ;;  %v1758_v27 = vmax.f32 %v1246_v53, 0.0 }
 0x3d4   : > { %v10618_v62 = vpack.c.bf16 %v4571_v57, %v4570_v26  ;;  %v4569_v15 = vmax.f32 %v3149_v38, 0.0  ;;  %7633 = vmatprep.mubr.bf16.mxu1 %v2108_v55  ;;  %v3170_v61 = vadd.f32 %v10273_v59, %v7535_v43 }
 0x3d5   : > { %v3161_v33 = vpop.f32.mrf.mxu1 }
 0x3d6   : > { %12572 = vst [vmem:[#allocation70_spill] sm:$0xff] %v10618_v62  ;;  %v10620_v58 = vpack.c.bf16 %v4569_v15, %v4568_v35  ;;  %7956 = vmatpush3.bf16.xpose.msra.mxu0 %v10056_v2  ;;  %v3162_v54 = vadd.f32 %v10273_v59, %v3161_v33  ;;  %v4574_v2 = vmax.f32 %v3170_v61, 0.0  ;;  %v1249_v33 = vadd.f32 %v10520_v30, %v12574_v52 }
 0x3d7   : > { %v7536_v44 = vpop.f32.mrf.mxu1  ;;  %7957 = vmatprep.subr.bf16.mxu0 %v12516_v37  ;;  %v1760_v15 = vmax.f32 %v1248_v63, 0.0 }
 0x3d8   : > { %12573 = vst [vmem:[#allocation71_spill] sm:$0xff] %v10620_v58  ;;  %v3173_v39 = vadd.f32 %v10273_v59, %v7536_v44  ;;  %v4572_v55 = vmax.f32 %v3162_v54, 0.0  ;;  %v1761_v61 = vmax.f32 %v1249_v33, 0.0 }
 0x3d9   : > { %v3164_v17 = vpop.f32.mrf.mxu1 }
 0x3da   : > { %v4575_v26 = vmax.f32 %v3173_v39, 0.0  ;;  %v3165_v57 = vadd.f32 %v10273_v59, %v3164_v17  ;;  %v1250_v17 = vadd.f32 %v10535_v18, %v12574_v52 }
 0x3db   : > { %v7539_v38 = vpop.f32.mrf.mxu1  ;;  %7634 = vmatmul.mubr.bf16.gmra.mxu1 %v2109_v24  ;;  %v2111_v24 = vpack.c.bf16 %v1759_v46, %v1758_v27 }
 0x3dc   : > { %v10636_v43 = vpack.c.bf16 %v4575_v26, %v4574_v2  ;;  %v4573_v0 = vmax.f32 %v3165_v57, 0.0  ;;  %7637 = vmatprep.mubr.bf16.mxu1 %v2110_v12  ;;  %v3186_v35 = vadd.f32 %v10273_v59, %v7539_v38  ;;  %v1251_v12 = vadd.f32 %v10540_v10, %v12574_v52 }
 0x3dd   : > { %v3177_v1 = vpop.f32.mrf.mxu1  ;;  %v2112_v57 = vpack.c.bf16 %v1761_v61, %v1760_v15  ;;  %v1762_v27 = vmax.f32 %v1250_v17, 0.0 }
 0x3de   : > { %12575 = vst [vmem:[#allocation26_spill] sm:$0xff] %v10636_v43  ;;  %v10638_v11 = vpack.c.bf16 %v4573_v0, %v4572_v55  ;;  %7958 = vmatpush3.bf16.xpose.msra.mxu0 %v10035_v51  ;;  %v3178_v54 = vadd.f32 %v10273_v59, %v3177_v1  ;;  %v1252_v51 = vadd.f32 %v10545_v49, %v12574_v52  ;;  %v4578_v63 = vmax.f32 %v3186_v35, 0.0 }
 0x3df   : > { %v7540_v44 = vpop.f32.mrf.mxu1  ;;  %7959 = vmatprep.subr.bf16.mxu0 %v12516_v37  ;;  %v1763_v46 = vmax.f32 %v1251_v12, 0.0 }
 0x3e0   : > { %12576 = vst [vmem:[#allocation72_spill] sm:$0xff] %v10638_v11  ;;  %v3189_v39 = vadd.f32 %v10273_v59, %v7540_v44  ;;  %v10656_v59 = vld [vmem:[%s12446_s5] ss:$0 sm:$0xff]  ;;  %v4576_v38 = vmax.f32 %v3178_v54, 0.0  ;;  %v1764_v35 = vmax.f32 %v1252_v51, 0.0  ;;  %v1765_v44 = vmax.f32 %v1253_v14, 0.0 }
 0x3e1   : > { %v3180_v53 = vpop.f32.mrf.mxu1  ;;  %v1254_v54 = vadd.f32 %v10565_v8, %v12574_v52  ;;  %v1255_v51 = vadd.f32 %v10570_v5, %v12574_v52  ;;  %v1256_v14 = vadd.f32 %v10575_v9, %v12574_v52 }
 0x3e2   : > { %v4579_v2 = vmax.f32 %v3189_v39, 0.0  ;;  %v3181_v26 = vadd.f32 %v10656_v59, %v3180_v53  ;;  %v2114_v12 = vpack.c.bf16 %v1765_v44, %v1764_v35 }
 0x3e3   : > { %v7543_v33 = vpop.f32.mrf.mxu1  ;;  %7638 = vmatmul.mubr.bf16.gmra.mxu1 %v2111_v24  ;;  %v2113_v24 = vpack.c.bf16 %v1763_v46, %v1762_v27  ;;  %v1766_v27 = vmax.f32 %v1254_v54, 0.0  ;;  %v1767_v46 = vmax.f32 %v1255_v51, 0.0  ;;  %v1768_v44 = vmax.f32 %v1256_v14, 0.0 }
 0x3e4   : > { %v10659_v55 = vpack.c.bf16 %v4579_v2, %v4578_v63  ;;  %v4577_v0 = vmax.f32 %v3181_v26, 0.0  ;;  %7641 = vmatprep.mubr.bf16.mxu1 %v2112_v57  ;;  %v3202_v58 = vadd.f32 %v10656_v59, %v7543_v33  ;;  %v1257_v26 = vadd.f32 %v10580_v4, %v12574_v52 }
 0x3e5   : > { %v3193_v1 = vpop.f32.mrf.mxu1  ;;  %v1259_v51 = vadd.f32 %v10603_v48, %v12574_v52  ;;  %v1261_v14 = vadd.f32 %v10613_v20, %v12574_v52 }
 0x3e6   : > { %12577 = vst [vmem:[#allocation73_spill] sm:$0xff] %v10659_v55  ;;  %v10661_v39 = vpack.c.bf16 %v4577_v0, %v4576_v38  ;;  %7960 = vmatpush3.bf16.xpose.msra.mxu0 %v10037_v23  ;;  %v3194_v15 = vadd.f32 %v10656_v59, %v3193_v1  ;;  %v4582_v23 = vmax.f32 %v3202_v58, 0.0 }
 0x3e7   : > { %v7544_v53 = vpop.f32.mrf.mxu1  ;;  %7961 = vmatprep.subr.bf16.mxu0 %v12516_v37  ;;  %v1773_v11 = vmax.f32 %v1261_v14, 0.0 }
 0x3e8   : > { %12578 = vst [vmem:[#allocation74_spill] sm:$0xff] %v10661_v39  ;;  %v3205_v61 = vadd.f32 %v10656_v59, %v7544_v53  ;;  %v4580_v33 = vmax.f32 %v3194_v15, 0.0  ;;  %v1769_v53 = vmax.f32 %v1257_v26, 0.0 }
 0x3e9   : > { %v3196_v17 = vpop.f32.mrf.mxu1 }
 0x3ea   : > { %v4583_v63 = vmax.f32 %v3205_v61, 0.0  ;;  %v3197_v2 = vadd.f32 %v10656_v59, %v3196_v17  ;;  %v2116_v26 = vpack.c.bf16 %v1769_v53, %v1768_v44 }
 0x3eb   : > { %v7547_v57 = vpop.f32.mrf.mxu1  ;;  %7642 = vmatmul.mubr.bf16.gmra.mxu1 %v2113_v24  ;;  %v1258_v24 = vadd.f32 %v10598_v36, %v12574_v52 }
 0x3ec   : > { %v10677_v38 = vpack.c.bf16 %v4583_v63, %v4582_v23  ;;  %v4581_v0 = vmax.f32 %v3197_v2, 0.0  ;;  %7645 = vmatprep.mubr.bf16.mxu1 %v2114_v12  ;;  %v3218_v58 = vadd.f32 %v10656_v59, %v7547_v57  ;;  %v2115_v12 = vpack.c.bf16 %v1767_v46, %v1766_v27 }
 0x3ed   : > { %v3209_v1 = vpop.f32.mrf.mxu1  ;;  %v1770_v46 = vmax.f32 %v1258_v24, 0.0 }
 0x3ee   : > { %v10679_v35 = vpack.c.bf16 %v4581_v0, %v4580_v33  ;;  %7962 = vmatpush3.bf16.xpose.msra.mxu0 %v10017_v3  ;;  %v3210_v15 = vadd.f32 %v10656_v59, %v3209_v1  ;;  %v1260_v3 = vadd.f32 %v10608_v41, %v12574_v52  ;;  %v4586_v23 = vmax.f32 %v3218_v58, 0.0 }
 0x3ef   : > { %v7548_v61 = vpop.f32.mrf.mxu1  ;;  %7963 = vmatprep.subr.bf16.mxu0 %v12516_v37 }
 0x3f0   : > { %v3221_v17 = vadd.f32 %v10656_v59, %v7548_v61  ;;  %v4584_v33 = vmax.f32 %v3210_v15, 0.0  ;;  %v1771_v61 = vmax.f32 %v1259_v51, 0.0  ;;  %v1772_v62 = vmax.f32 %v1260_v3, 0.0  ;;  %v12581_v3 = vld [vmem:[#allocation28_spill] sm:$0xff] }
 0x3f1   : > { %v3212_v54 = vpop.f32.mrf.mxu1  ;;  %v1262_v15 = vadd.f32 %v10508_v47, %v12574_v52  ;;  %v1263_v51 = vadd.f32 %v10513_v16, %v12574_v52  ;;  %v1264_v14 = vadd.f32 %v10437_v40, %v12581_v3 }
 0x3f2   : > { %v4587_v63 = vmax.f32 %v3221_v17, 0.0  ;;  %v3213_v2 = vadd.f32 %v10656_v59, %v3212_v54  ;;  %v2117_v54 = vpack.c.bf16 %v1771_v61, %v1770_v46 }
 0x3f3   : > { %v7551_v57 = vpop.f32.mrf.mxu1  ;;  %7646 = vmatmul.mubr.bf16.gmra.mxu1 %v2115_v12  ;;  %v2118_v12 = vpack.c.bf16 %v1773_v11, %v1772_v62  ;;  %v1774_v11 = vmax.f32 %v1262_v15, 0.0  ;;  %v1775_v52 = vmax.f32 %v1263_v51, 0.0  ;;  %v1776_v61 = vmax.f32 %v1264_v14, 0.0 }
 0x3f4   : > { %v10695_v0 = vpack.c.bf16 %v4587_v63, %v4586_v23  ;;  %v4585_v1 = vmax.f32 %v3213_v2, 0.0  ;;  %7649 = vmatprep.mubr.bf16.mxu1 %v2116_v26  ;;  %v3234_v58 = vadd.f32 %v10656_v59, %v7551_v57  ;;  %v1265_v2 = vadd.f32 %v10520_v30, %v12581_v3 }
 0x3f5   : > { %v3225_v27 = vpop.f32.mrf.mxu1  ;;  %v1269_v51 = vadd.f32 %v10550_v13, %v12581_v3 }
 0x3f6   : > { %12579 = vst [vmem:[#allocation75_spill] sm:$0xff] %v10695_v0  ;;  %v10697_v43 = vpack.c.bf16 %v4585_v1, %v4584_v33  ;;  %7964 = vmatpush3.bf16.xpose.msra.mxu0 %v10019_v60  ;;  %v3226_v44 = vadd.f32 %v10656_v59, %v3225_v27  ;;  %v4590_v60 = vmax.f32 %v3234_v58, 0.0  ;;  %v1777_v58 = vmax.f32 %v1265_v2, 0.0  ;;  %v12586_v0 = vld [vmem:[#allocation48_spill] sm:$0xff] }
 0x3f7   : > { %v7552_v17 = vpop.f32.mrf.mxu1  ;;  %7965 = vmatprep.subr.bf16.mxu0 %v12516_v37 }
 0x3f8   : > { %12580 = vst [vmem:[#allocation76_spill] sm:$0xff] %v10697_v43  ;;  %v3237_v53 = vadd.f32 %v10656_v59, %v7552_v17  ;;  %v4588_v57 = vmax.f32 %v3226_v44, 0.0 }
 0x3f9   : > { %v3228_v24 = vpop.f32.mrf.mxu1 }
 0x3fa   : > { %v4591_v23 = vmax.f32 %v3237_v53, 0.0  ;;  %v3229_v63 = vadd.f32 %v10656_v59, %v3228_v24  ;;  %v1266_v24 = vadd.f32 %v10535_v18, %v12581_v3 }
 0x3fb   : > { %v7555_v26 = vpop.f32.mrf.mxu1  ;;  %7650 = vmatmul.mubr.bf16.gmra.mxu1 %v2117_v54  ;;  %v2119_v54 = vpack.c.bf16 %v1775_v52, %v1774_v11 }
 0x3fc   : > { %v10713_v33 = vpack.c.bf16 %v4591_v23, %v4590_v60  ;;  %v4589_v1 = vmax.f32 %v3229_v63, 0.0  ;;  %7653 = vmatprep.mubr.bf16.mxu1 %v2118_v12  ;;  %v3250_v46 = vadd.f32 %v10656_v59, %v7555_v26  ;;  %v1267_v12 = vadd.f32 %v10540_v10, %v12581_v3 }
 0x3fd   : > { %v3241_v62 = vpop.f32.mrf.mxu1  ;;  %v2120_v63 = vpack.c.bf16 %v1777_v58, %v1776_v61  ;;  %v1778_v11 = vmax.f32 %v1266_v24, 0.0 }
 0x3fe   : > { %12582 = vst [vmem:[#allocation28_spill] sm:$0xff] %v10713_v33  ;;  %v10715_v27 = vpack.c.bf16 %v4589_v1, %v4588_v57  ;;  %7966 = vmatpush3.bf16.xpose.msra.mxu0 %v9996_v25  ;;  %v3242_v44 = vadd.f32 %v10656_v59, %v3241_v62  ;;  %v1268_v25 = vadd.f32 %v10545_v49, %v12581_v3  ;;  %v4594_v14 = vmax.f32 %v3250_v46, 0.0 }
 0x3ff   : > { %v7556_v17 = vpop.f32.mrf.mxu1  ;;  %7967 = vmatprep.subr.bf16.mxu0 %v12516_v37  ;;  %v1779_v52 = vmax.f32 %v1267_v12, 0.0  ;;  %v1271_v12 = vadd.f32 %v10570_v5, %v12581_v3 }
 0x400   : > { %12583 = vst [vmem:[#allocation77_spill] sm:$0xff] %v10715_v27  ;;  %v3253_v53 = vadd.f32 %v10656_v59, %v7556_v17  ;;  %v4592_v26 = vmax.f32 %v3242_v44, 0.0  ;;  %v1780_v46 = vmax.f32 %v1268_v25, 0.0  ;;  %v1270_v44 = vadd.f32 %v10565_v8, %v12581_v3 }
 0x401   : > { %v3244_v15 = vpop.f32.mrf.mxu1  ;;  %v1273_v25 = vadd.f32 %v10580_v4, %v12581_v3 }
 0x402   : > { %v4595_v60 = vmax.f32 %v3253_v53, 0.0  ;;  %v3245_v23 = vadd.f32 %v10656_v59, %v3244_v15  ;;  %v1781_v53 = vmax.f32 %v1269_v51, 0.0 }
 0x403   : > { %v7559_v2 = vpop.f32.mrf.mxu1  ;;  %7654 = vmatmul.mubr.bf16.gmra.mxu1 %v2119_v54  ;;  %v2121_v54 = vpack.c.bf16 %v1779_v52, %v1778_v11  ;;  %v10754_v11 = vld [vmem:[%s12447_s6] sm:$0x3]  ;;  %v1783_v52 = vmax.f32 %v1271_v12, 0.0 }
 0x404   : > { %v10731_v57 = vpack.c.bf16 %v4595_v60, %v4594_v14  ;;  %v4593_v1 = vmax.f32 %v3245_v23, 0.0  ;;  %7657 = vmatprep.mubr.bf16.mxu1 %v2120_v63  ;;  %v3266_v43 = vadd.f32 %v10656_v59, %v7559_v2  ;;  %v2122_v23 = vpack.c.bf16 %v1781_v53, %v1780_v46 }
 0x405   : > { %v3257_v62 = vpop.f32.mrf.mxu1 }
 0x406   : > { %12584 = vst [vmem:[#allocation78_spill] sm:$0xff] %v10731_v57  ;;  %v10733_v17 = vpack.c.bf16 %v4593_v1, %v4592_v26  ;;  %7968 = vmatpush3.bf16.xpose.msra.mxu0 %v12586_v0  ;;  %v3258_v61 = vadd.f32 %v10656_v59, %v3257_v62  ;;  %v1272_v0 = vadd.f32 %v10575_v9, %v12581_v3  ;;  %v4598_v51 = vmax.f32 %v3266_v43, 0.0 }
 0x407   : > { %v7560_v15 = vpop.f32.mrf.mxu1  ;;  %7973 = vmatprep.subr.bf16.mxu0 %v12516_v37  ;;  %v1782_v43 = vmax.f32 %v1270_v44, 0.0 }
 0x408   : > { %12585 = vst [vmem:[#allocation79_spill] sm:$0xff] %v10733_v17  ;;  %v3269_v58 = vadd.f32 %v10656_v59, %v7560_v15  ;;  %v4596_v2 = vmax.f32 %v3258_v61, 0.0  ;;  %v1784_v15 = vmax.f32 %v1272_v0, 0.0  ;;  %v12589_v61 = vld [vmem:[#allocation52_spill] sm:$0xff]  ;;  %v1275_v0 = vadd.f32 %v10603_v48, %v12581_v3 }
 0x409   : > { %v3260_v24 = vpop.f32.mrf.mxu1 }
 0x40a   : > { %v4599_v14 = vmax.f32 %v3269_v58, 0.0  ;;  %v3261_v60 = vadd.f32 %v10656_v59, %v3260_v24  ;;  %v1785_v58 = vmax.f32 %v1273_v25, 0.0 }
 0x40b   : > { %v7563_v63 = vpop.f32.mrf.mxu1  ;;  %7658 = vmatmul.mubr.bf16.gmra.mxu1 %v2121_v54  ;;  %v1274_v54 = vadd.f32 %v10598_v36, %v12581_v3 }
 0x40c   : > { %v10749_v26 = vpack.c.bf16 %v4599_v14, %v4598_v51  ;;  %v4597_v1 = vmax.f32 %v3261_v60, 0.0  ;;  %7661 = vmatprep.mubr.bf16.mxu1 %v2122_v23  ;;  %v3282_v53 = vadd.f32 %v10656_v59, %v7563_v63  ;;  %v2123_v51 = vpack.c.bf16 %v1783_v52, %v1782_v43 }
 0x40d   : > { %v3273_v62 = vpop.f32.mrf.mxu1  ;;  %7970 = vmatmul.mubr.bf16.vlgmr.msra.gmra.mxu0 %v10754_v11  ;;  %v2124_v14 = vpack.c.bf16 %v1785_v58, %v1784_v15  ;;  %v1276_v60 = vadd.f32 %v10608_v41, %v12581_v3  ;;  %v1787_v52 = vmax.f32 %v1275_v0, 0.0 }
 0x40e   : > { %12587 = vst [vmem:[#allocation48_spill] sm:$0xff] %v10749_v26  ;;  %v10757_v46 = vpack.c.bf16 %v4597_v1, %v4596_v2  ;;  %7974 = vmatpush3.bf16.xpose.msra.mxu0 %v12589_v61  ;;  %7989 = vmatprep.mubr.msk.bf16.mxu0 %vm8894_vm0, %v12516_v37  ;;  %v3274_v44 = vadd.f32 %v10656_v59, %v3273_v62  ;;  %v4602_v23 = vmax.f32 %v3282_v53, 0.0  ;;  %v10775_v61 = vpop.f32.mrf.mxu0 }
 0x40f   : > { %v7564_v24 = vpop.f32.mrf.mxu1  ;;  %7975 = vmatprep.subr.bf16.mxu0 %v12516_v37  ;;  %v1277_v1 = vadd.f32 %v10613_v20, %v12581_v3  ;;  %v1788_v17 = vmax.f32 %v1276_v60, 0.0 }
 0x410   : > { %12588 = vst [vmem:[#allocation80_spill] sm:$0xff] %v10757_v46  ;;  %v3285_v12 = vadd.f32 %v10656_v59, %v7564_v24  ;;  %v1786_v24 = vmax.f32 %v1274_v54, 0.0  ;;  %v4600_v27 = vmax.f32 %v3274_v44, 0.0  ;;  %v7851_v15 = vpop.f32.mrf.mxu0 }
 0x411   : > { %v3276_v25 = vpop.f32.mrf.mxu1  ;;  %v1789_v57 = vmax.f32 %v1277_v1, 0.0 }
 0x412   : > { %v4603_v63 = vmax.f32 %v3285_v12, 0.0  ;;  %v3277_v2 = vadd.f32 %v10656_v59, %v3276_v25  ;;  %v12592_v25 = vld [vmem:[#allocation53_spill] sm:$0xff]  ;;  %v5166_v46 = vpop.f32.mrf.mxu0 }
 0x413   : > { %v7567_v62 = vpop.f32.mrf.mxu1  ;;  %7662 = vmatmul.mubr.bf16.gmra.mxu1 %v2123_v51  ;;  %v2125_v51 = vpack.c.bf16 %v1787_v52, %v1786_v24 }
 0x414   : > { %v10777_v33 = vpack.c.bf16 %v4603_v63, %v4602_v23  ;;  %v4601_v43 = vmax.f32 %v3277_v2, 0.0  ;;  %7665 = vmatprep.mubr.bf16.mxu1 %v2124_v14  ;;  %v3298_v12 = vadd.f32 %v10656_v59, %v7567_v62  ;;  %v7852_v0 = vpop.f32.mrf.mxu0  ;;  %v1279_v23 = vadd.f32 %v10513_v16, %v12581_v3  ;;  %v12593_v63 = vld [vmem:[#allocation29_spill] sm:$0xff] }
 0x415   : > { %v3289_v58 = vpop.f32.mrf.mxu1  ;;  %v1280_v60 = vadd.f32 %v10437_v40, %v12593_v63  ;;  %v1281_v46 = vadd.f32 %v10520_v30, %v12593_v63 }
 0x416   : > { %12590 = vst [vmem:[#allocation52_spill] sm:$0xff] %v10777_v33  ;;  %v10779_v53 = vpack.c.bf16 %v4601_v43, %v4600_v27  ;;  %7976 = vmatpush3.bf16.xpose.msra.mxu0 %v12592_v25  ;;  %v3290_v54 = vadd.f32 %v10656_v59, %v3289_v58  ;;  %v1278_v27 = vadd.f32 %v10508_v47, %v12581_v3  ;;  %v4606_v2 = vmax.f32 %v3298_v12, 0.0 }
 0x417   : > { %v7568_v26 = vpop.f32.mrf.mxu1  ;;  %7977 = vmatprep.subr.bf16.mxu0 %v12516_v37  ;;  %v1791_v25 = vmax.f32 %v1279_v23, 0.0  ;;  %v1792_v0 = vmax.f32 %v1280_v60, 0.0  ;;  %v1793_v40 = vmax.f32 %v1281_v46, 0.0  ;;  %v1283_v60 = vadd.f32 %v10540_v10, %v12593_v63 }
 0x418   : > { %12591 = vst [vmem:[#allocation81_spill] sm:$0xff] %v10779_v53  ;;  %v3301_v44 = vadd.f32 %v10656_v59, %v7568_v26  ;;  %v2126_v26 = vpack.c.bf16 %v1789_v57, %v1788_v17  ;;  %v4604_v43 = vmax.f32 %v3290_v54, 0.0  ;;  %v1790_v3 = vmax.f32 %v1278_v27, 0.0 }
 0x419   : > { %v3292_v14 = vpop.f32.mrf.mxu1  ;;  %v1282_v54 = vadd.f32 %v10535_v18, %v12593_v63  ;;  %v2128_v23 = vpack.c.bf16 %v1793_v40, %v1792_v0  ;;  %v1284_v46 = vadd.f32 %v10545_v49, %v12593_v63  ;;  %v1795_v0 = vmax.f32 %v1283_v60, 0.0 }
 0x41a   : > { %v4607_v1 = vmax.f32 %v3301_v44, 0.0  ;;  %v3293_v62 = vadd.f32 %v10656_v59, %v3292_v14  ;;  %v12596_v44 = vld [vmem:[#allocation50_spill] sm:$0xff]  ;;  %v2127_v27 = vpack.c.bf16 %v1791_v25, %v1790_v3 }
 0x41b   : > { %v7571_v24 = vpop.f32.mrf.mxu1  ;;  %7666 = vmatmul.mubr.bf16.gmra.mxu1 %v2125_v51  ;;  %v1794_v25 = vmax.f32 %v1282_v54, 0.0 }
 0x41c   : > { %v10795_v52 = vpack.c.bf16 %v4607_v1, %v4606_v2  ;;  %v4605_v15 = vmax.f32 %v3293_v62, 0.0  ;;  %7669 = vmatprep.mubr.bf16.mxu1 %v2126_v26  ;;  %v3314_v12 = vadd.f32 %v10656_v59, %v7571_v24  ;;  %v1285_v26 = vadd.f32 %v10550_v13, %v12593_v63 }
 0x41d   : > { %v3305_v58 = vpop.f32.mrf.mxu1  ;;  %v2129_v60 = vpack.c.bf16 %v1795_v0, %v1794_v25 }
 0x41e   : > { %12594 = vst [vmem:[#allocation53_spill] sm:$0xff] %v10795_v52  ;;  %v10797_v53 = vpack.c.bf16 %v4605_v15, %v4604_v43  ;;  %7978 = vmatpush3.bf16.xpose.msra.mxu0 %v12596_v44  ;;  %v3306_v57 = vadd.f32 %v10656_v59, %v3305_v58  ;;  %v4610_v2 = vmax.f32 %v3314_v12, 0.0  ;;  %v12599_v44 = vld [vmem:[#allocation51_spill] sm:$0xff] }
 0x41f   : > { %v7572_v14 = vpop.f32.mrf.mxu1  ;;  %7979 = vmatprep.subr.bf16.mxu0 %v12516_v37 }
 0x420   : > { %12595 = vst [vmem:[#allocation29_spill] sm:$0xff] %v10797_v53  ;;  %v3317_v17 = vadd.f32 %v10656_v59, %v7572_v14  ;;  %v4608_v43 = vmax.f32 %v3306_v57, 0.0  ;;  %v1796_v14 = vmax.f32 %v1284_v46, 0.0  ;;  %v1289_v46 = vadd.f32 %v10580_v4, %v12593_v63 }
 0x421   : > { %v3308_v51 = vpop.f32.mrf.mxu1 }
 0x422   : > { %v4611_v1 = vmax.f32 %v3317_v17, 0.0  ;;  %v3309_v62 = vadd.f32 %v10656_v59, %v3308_v51  ;;  %v1797_v17 = vmax.f32 %v1285_v26, 0.0  ;;  %v1801_v52 = vmax.f32 %v1289_v46, 0.0 }
 0x423   : > { %v7575_v24 = vpop.f32.mrf.mxu1  ;;  %7670 = vmatmul.mubr.bf16.gmra.mxu1 %v2127_v27  ;;  %v1292_v46 = vadd.f32 %v10608_v41, %v12593_v63 }
 0x424   : > { %v10813_v15 = vpack.c.bf16 %v4611_v1, %v4610_v2  ;;  %v4609_v58 = vmax.f32 %v3309_v62, 0.0  ;;  %7673 = vmatprep.mubr.bf16.mxu1 %v2128_v23  ;;  %v3330_v12 = vadd.f32 %v10656_v59, %v7575_v24  ;;  %v1286_v23 = vadd.f32 %v10565_v8, %v12593_v63 }
 0x425   : > { %v3321_v3 = vpop.f32.mrf.mxu1  ;;  %v1287_v2 = vadd.f32 %v10570_v5, %v12593_v63  ;;  %v1288_v1 = vadd.f32 %v10575_v9, %v12593_v63 }
 0x426   : > { %12597 = vst [vmem:[#allocation50_spill] sm:$0xff] %v10813_v15  ;;  %v10815_v40 = vpack.c.bf16 %v4609_v58, %v4608_v43  ;;  %7980 = vmatpush3.bf16.xpose.msra.mxu0 %v12599_v44  ;;  %v3322_v57 = vadd.f32 %v10656_v59, %v3321_v3  ;;  %v4614_v62 = vmax.f32 %v3330_v12, 0.0  ;;  %v2130_v43 = vpack.c.bf16 %v1797_v17, %v1796_v14 }
 0x427   : > { %v7576_v51 = vpop.f32.mrf.mxu1  ;;  %7981 = vmatprep.subr.bf16.mxu0 %v12516_v37  ;;  %v1799_v33 = vmax.f32 %v1287_v2, 0.0  ;;  %v1800_v53 = vmax.f32 %v1288_v1, 0.0  ;;  %v1291_v1 = vadd.f32 %v10603_v48, %v12593_v63 }
 0x428   : > { %12598 = vst [vmem:[#allocation82_spill] sm:$0xff] %v10815_v40  ;;  %v3333_v27 = vadd.f32 %v10656_v59, %v7576_v51  ;;  %v4612_v3 = vmax.f32 %v3322_v57, 0.0  ;;  %v1798_v51 = vmax.f32 %v1286_v23, 0.0  ;;  %v1290_v57 = vadd.f32 %v10598_v36, %v12593_v63 }
 0x429   : > { %v3324_v54 = vpop.f32.mrf.mxu1  ;;  %v2132_v2 = vpack.c.bf16 %v1801_v52, %v1800_v53 }
 0x42a   : > { %v4615_v26 = vmax.f32 %v3333_v27, 0.0  ;;  %v3325_v24 = vadd.f32 %v10656_v59, %v3324_v54  ;;  %v12602_v27 = vld [vmem:[#allocation39_spill] sm:$0xff]  ;;  %v1802_v52 = vmax.f32 %v1290_v57, 0.0  ;;  %v1295_v57 = vadd.f32 %v10513_v16, %v12593_v63 }
 0x42b   : > { %v7579_v58 = vpop.f32.mrf.mxu1  ;;  %7674 = vmatmul.mubr.bf16.gmra.mxu1 %v2129_v60  ;;  %v2131_v60 = vpack.c.bf16 %v1799_v33, %v1798_v51 }
 0x42c   : > { %v10831_v44 = vpack.c.bf16 %v4615_v26, %v4614_v62  ;;  %v4613_v25 = vmax.f32 %v3325_v24, 0.0  ;;  %7677 = vmatprep.mubr.bf16.mxu1 %v2130_v43  ;;  %v3346_v12 = vadd.f32 %v10656_v59, %v7579_v58  ;;  %v1293_v43 = vadd.f32 %v10613_v20, %v12593_v63 }
 0x42d   : > { %v3337_v0 = vpop.f32.mrf.mxu1 }
 0x42e   : > { %12600 = vst [vmem:[#allocation51_spill] sm:$0xff] %v10831_v44  ;;  %v10833_v40 = vpack.c.bf16 %v4613_v25, %v4612_v3  ;;  %7982 = vmatpush3.bf16.xpose.msra.mxu0 %v12602_v27  ;;  %v3338_v14 = vadd.f32 %v10656_v59, %v3337_v0  ;;  %v4618_v62 = vmax.f32 %v3346_v12, 0.0  ;;  %v1803_v0 = vmax.f32 %v1291_v1, 0.0  ;;  %v12603_v12 = vld [vmem:[#allocation49_spill] sm:$0xff]  ;;  %v10868_v1 = vld [vmem:[%s9106_s22] sm:$0xff] }
 0x42f   : > { %v7580_v54 = vpop.f32.mrf.mxu1  ;;  %7983 = vmatprep.subr.bf16.mxu0 %v12516_v37  ;;  %v1804_v27 = vmax.f32 %v1292_v46, 0.0 }
 0x430   : > { %12601 = vst [vmem:[#allocation83_spill] sm:$0xff] %v10833_v40  ;;  %v3349_v17 = vadd.f32 %v10656_v59, %v7580_v54  ;;  %v4616_v3 = vmax.f32 %v3338_v14, 0.0  ;;  %v1805_v54 = vmax.f32 %v1293_v43, 0.0 }
 0x431   : > { %v3340_v23 = vpop.f32.mrf.mxu1 }
 0x432   : > { %v4619_v26 = vmax.f32 %v3349_v17, 0.0  ;;  %v3341_v24 = vadd.f32 %v10656_v59, %v3340_v23  ;;  %v2133_v23 = vpack.c.bf16 %v1803_v0, %v1802_v52 }
 0x433   : > { %v10849_v58 = vpop.f32.mrf.mxu1  ;;  %7678 = vmatmul.mubr.bf16.gmra.mxu1 %v2131_v60  ;;  %v1294_v60 = vadd.f32 %v10508_v47, %v12593_v63  ;;  %v1807_v47 = vmax.f32 %v1295_v57, 0.0 }
 0x434   : > { %v10851_v25 = vpack.c.bf16 %v4619_v26, %v4618_v62  ;;  %v4617_v33 = vmax.f32 %v3341_v24, 0.0  ;;  %7681 = vmatprep.mubr.bf16.mxu1 %v2132_v2  ;;  %v2134_v2 = vpack.c.bf16 %v1805_v54, %v1804_v27  ;;  %v12604_v62 = vld [vmem:[#allocation30_spill] sm:$0xff] }
 0x435   : > { %v10853_v53 = vpop.f32.mrf.mxu1  ;;  %v1296_v46 = vadd.f32 %v10868_v1, %v12604_v62  ;;  %v1297_v26 = vadd.f32 %v10520_v30, %v12604_v62  ;;  %v1298_v30 = vadd.f32 %v10535_v18, %v12604_v62  ;;  %v1299_v27 = vadd.f32 %v10540_v10, %v12604_v62 }
 0x436   : > { %v10855_v51 = vpack.c.bf16 %v4617_v33, %v4616_v3  ;;  %7984 = vmatpush3.bf16.xpose.msra.mxu0 %v12603_v12  ;;  %v1806_v3 = vmax.f32 %v1294_v60, 0.0  ;;  %v12605_v33 = vld [vmem:[#allocation41_spill] sm:$0xff]  ;;  %v1301_v60 = vadd.f32 %v10550_v13, %v12604_v62  ;;  %v1302_v13 = vadd.f32 %v10565_v8, %v12604_v62 }
 0x437   : > { %v10858_v17 = vpop.f32.mrf.mxu1  ;;  %7985 = vmatprep.subr.bf16.mxu0 %v12516_v37  ;;  %v1808_v16 = vmax.f32 %v1296_v46, 0.0  ;;  %v1809_v63 = vmax.f32 %v1297_v26, 0.0  ;;  %v1810_v46 = vmax.f32 %v1298_v30, 0.0  ;;  %v1811_v26 = vmax.f32 %v1299_v27, 0.0 }
 0x438   : > { %v2135_v12 = vpack.c.bf16 %v1807_v47, %v1806_v3  ;;  %v12606_v47 = vld [vmem:[#allocation42_spill] sm:$0xff]  ;;  %v1304_v30 = vadd.f32 %v10575_v9, %v12604_v62  ;;  %v1305_v27 = vadd.f32 %v10580_v4, %v12604_v62 }
 0x439   : > { %v10861_v14 = vpop.f32.mrf.mxu1  ;;  %v2136_v54 = vpack.c.bf16 %v1809_v63, %v1808_v16  ;;  %v2137_v63 = vpack.c.bf16 %v1811_v26, %v1810_v46  ;;  %v1814_v46 = vmax.f32 %v1302_v13, 0.0 }
 0x43a   : > { %v1816_v26 = vmax.f32 %v1304_v30, 0.0  ;;  %v1817_v15 = vmax.f32 %v1305_v27, 0.0 }
 0x43b   : > { %v10874_v24 = vpop.f32.mrf.mxu1  ;;  %7682 = vmatmul.mubr.bf16.gmra.mxu1 %v2133_v23  ;;  %v1300_v23 = vadd.f32 %v10545_v49, %v12604_v62 }
 0x43c   : > { %7685 = vmatprep.mubr.bf16.mxu1 %v2134_v2 }
 0x43d   : > { %v10876_v43 = vpop.f32.mrf.mxu1  ;;  %v1812_v18 = vmax.f32 %v1300_v23, 0.0 }
 0x43e   : > { %7986 = vmatpush3.bf16.xpose.msra.mxu0 %v12605_v33  ;;  %v1813_v33 = vmax.f32 %v1301_v60, 0.0 }
 0x43f   : > { %v10879_v52 = vpop.f32.mrf.mxu1  ;;  %7987 = vmatprep.subr.bf16.mxu0 %v12516_v37 }
 0x440   : > { %v2138_v60 = vpack.c.bf16 %v1813_v33, %v1812_v18  ;;  %v1306_v18 = vadd.f32 %v10598_v36, %v12604_v62  ;;  %v1307_v33 = vadd.f32 %v10603_v48, %v12604_v62  ;;  %v1309_v36 = vadd.f32 %v10613_v20, %v12604_v62  ;;  %v10928_v20 = vpop.permute.xlu0 %6416 }
 0x441   : > { %v10882_v0 = vpop.f32.mrf.mxu1 }
 0x443   : > { %v7591_v57 = vpop.f32.mrf.mxu1  ;;  %7686 = vmatmul.mubr.bf16.gmra.mxu1 %v2135_v12  ;;  %v1303_v12 = vadd.f32 %v10570_v5, %v12604_v62 }
 0x444   : > { %7689 = vmatprep.mubr.bf16.mxu1 %v2136_v54  ;;  %v3394_v3 = vadd.f32 %v10656_v59, %v7591_v57 }
 0x445   : > { %v3385_v2 = vpop.f32.mrf.mxu1  ;;  %v1815_v5 = vmax.f32 %v1303_v12, 0.0  ;;  %v1308_v12 = vadd.f32 %v10608_v41, %v12604_v62 }
 0x446   : > { %7988 = vmatpush3.bf16.xpose.msra.mxu0 %v12606_v47  ;;  %v4630_v54 = vmax.f32 %v3394_v3, 0.0  ;;  %v3386_v9 = vadd.f32 %v10656_v59, %v3385_v2 }
 0x447   : > { %v7592_v10 = vpop.f32.mrf.mxu1  ;;  %7993 = vmatprep.subr.bf16.mxu0 %v12516_v37 }
 0x448   : > { %v3397_v49 = vadd.f32 %v10656_v59, %v7592_v10  ;;  %v4628_v30 = vmax.f32 %v3386_v9, 0.0  ;;  %v10931_v9 = vld [vmem:[%s9106_s22 + $0x70] sm:$0xff] }
 0x449   : > { %v3388_v16 = vpop.f32.mrf.mxu1 }
 0x44a   : > { %v4631_v23 = vmax.f32 %v3397_v49, 0.0  ;;  %v3389_v10 = vadd.f32 %v10656_v59, %v3388_v16  ;;  %v2139_v16 = vpack.c.bf16 %v1815_v5, %v1814_v46  ;;  %v1820_v5 = vmax.f32 %v1308_v12, 0.0 }
 0x44b   : > { %v7595_v57 = vpop.f32.mrf.mxu1  ;;  %7690 = vmatmul.mubr.bf16.gmra.mxu1 %v2137_v63  ;;  %v2140_v63 = vpack.c.bf16 %v1817_v15, %v1816_v26  ;;  %v1821_v26 = vmax.f32 %v1309_v36, 0.0 }
 0x44c   : > { %v5007_v47 = vpack.c.bf16 %v4631_v23, %v4630_v54  ;;  %7693 = vmatprep.mubr.bf16.mxu1 %v2138_v60  ;;  %v3410_v4 = vadd.f32 %v10656_v59, %v7595_v57  ;;  %v4629_v49 = vmax.f32 %v3389_v10, 0.0  ;;  %v3381_v23 = vadd.f32 %v10656_v59, %v10879_v52 }
 0x44d   : > { %v3401_v8 = vpop.f32.mrf.mxu1  ;;  %7990 = vmatmul.mubr.bf16.vlgmr.msra.gmra.mxu0 %v10754_v11  ;;  %v1818_v57 = vmax.f32 %v1306_v18, 0.0  ;;  %v10935_v52 = vadd.f32 %v10931_v9, %v12604_v62 }
 0x44e   : > { %7994 = vmatpush3.bf16.xpose.msra.mxu0 %v10245_v50  ;;  %8154 = vmatpush3.bf16.xpose.msra.mxu1 %v5007_v47  ;;  %v3402_v13 = vadd.f32 %v10656_v59, %v3401_v8  ;;  %v4634_v27 = vmax.f32 %v3410_v4, 0.0  ;;  %v1819_v47 = vmax.f32 %v1307_v33, 0.0  ;;  %v5006_v15 = vpack.c.bf16 %v4629_v49, %v4628_v30  ;;  %v5203_v33 = vpop.f32.mrf.mxu0 }
 0x44f   : > { %v7596_v3 = vpop.f32.mrf.mxu1  ;;  %7995 = vmatprep.subr.bf16.mxu0 %v12516_v37  ;;  %8155 = vmatprep.subr.bf16.mxu1 %v12516_v37  ;;  %v3378_v4 = vadd.f32 %v10656_v59, %v10874_v24  ;;  %v6420_v24 = vadd.f32 %v10928_v20, %v5203_v33 }
 0x450   : > { %v3413_v2 = vadd.f32 %v10656_v59, %v7596_v3  ;;  %8009 = vmatprep.mubr.msk.bf16.mxu0 %vm8894_vm0, %v12516_v37  ;;  %v4632_v10 = vmax.f32 %v3402_v13, 0.0  ;;  %v2141_v13 = vpack.c.bf16 %v1819_v47, %v1818_v57  ;;  %v7871_v36 = vpop.f32.mrf.mxu0 }
 0x451   : > { %v3404_v50 = vpop.f32.mrf.mxu1  ;;  %v4626_v57 = vmax.f32 %v3378_v4, 0.0 }
 0x452   : > { %v4635_v48 = vmax.f32 %v3413_v2, 0.0  ;;  %v3405_v54 = vadd.f32 %v10656_v59, %v3404_v50  ;;  %v6419_v2 = vadd.f32 %v10928_v20, %v10775_v61  ;;  %v4627_v50 = vmax.f32 %v3381_v23, 0.0  ;;  %v10958_v61 = vld [vmem:[%s9106_s22 + $0x8] sm:$0xff] }
 0x453   : > { %v7599_v60 = vpop.f32.mrf.mxu1  ;;  %7694 = vmatmul.mubr.bf16.gmra.mxu1 %v2139_v16 }
 0x454   : > { %v10926_v8 = vpack.c.bf16 %v4635_v48, %v4634_v27  ;;  %v4633_v41 = vmax.f32 %v3405_v54, 0.0  ;;  %7697 = vmatprep.mubr.bf16.mxu1 %v2140_v63  ;;  %v3426_v18 = vadd.f32 %v10656_v59, %v7599_v60  ;;  %v2142_v27 = vpack.c.bf16 %v1821_v26, %v1820_v5  ;;  %v12609_v48 = vld [vmem:[#allocation31_spill] sm:$0xff] }
 0x455   : > { %v3417_v46 = vpop.f32.mrf.mxu1  ;;  %v1312_v54 = vadd.f32 %v10868_v1, %v12609_v48  ;;  %v1313_v23 = vadd.f32 %v10958_v61, %v12609_v48  ;;  %v6483_v60 = vcombine.low %v6419_v2, %v6420_v24  ;;  %v5005_v5 = vpack.c.bf16 %v4627_v50, %v4626_v57 }
 0x456   : > { %12607 = vst [vmem:[#allocation39_spill] sm:$0xff] %v10926_v8  ;;  %v10939_v3 = vpack.c.bf16 %v4633_v41, %v4632_v10  ;;  %7996 = vmatpush3.bf16.xpose.msra.mxu0 %v10253_v21  ;;  %8156 = vmatpush3.bf16.xpose.msra.mxu1 %v5006_v15  ;;  %v3418_v16 = vadd.f32 %v10656_v59, %v3417_v46  ;;  %v10951_v21 = vld [vmem:[%s9106_s22 + $0x78] sm:$0xff]  ;;  %v4638_v47 = vmax.f32 %v3426_v18, 0.0  ;;  %v5206_v41 = vpop.f32.mrf.mxu0  ;;  %v1822_v2 = vmax.f32 %v10935_v52, 0.0  ;;  %v10982_v52 = vld [vmem:[%s9106_s22 + $0x10] sm:$0xff] }
 0x457   : > { %v7600_v49 = vpop.f32.mrf.mxu1  ;;  %7997 = vmatprep.subr.bf16.mxu0 %v12516_v37  ;;  %8157 = vmatprep.subr.bf16.mxu1 %v12516_v37  ;;  %v1311_v12 = vadd.f32 %v10951_v21, %v12604_v62  ;;  %v3373_v62 = vadd.f32 %v10656_v59, %v10882_v0  ;;  %6515 = vst [vmem:[%s10967_s12] sm:$0xff] %v6483_v60  ;;  %v1824_v0 = vmax.f32 %v1312_v54, 0.0  ;;  %v10989_v54 = vld [vmem:[%s9106_s22 + $0x18] sm:$0xff] }
 0x458   : > { %12608 = vst [vmem:[#allocation49_spill] sm:$0xff] %v10939_v3  ;;  %v3429_v63 = vadd.f32 %v10656_v59, %v7600_v49  ;;  %v4636_v26 = vmax.f32 %v3418_v16, 0.0  ;;  %v7872_v18 = vpop.f32.mrf.mxu0 }
 0x459   : > { %v3420_v30 = vpop.f32.mrf.mxu1  ;;  %v1823_v24 = vmax.f32 %v1311_v12, 0.0  ;;  %v1314_v12 = vadd.f32 %v10982_v52, %v12609_v48 }
 0x45a   : > { %v4639_v15 = vmax.f32 %v3429_v63, 0.0  ;;  %v3421_v10 = vadd.f32 %v10656_v59, %v3420_v30  ;;  %v3370_v63 = vadd.f32 %v10656_v59, %v10876_v43  ;;  %v4625_v43 = vmax.f32 %v3373_v62, 0.0 }
 0x45b   : > { %v7603_v46 = vpop.f32.mrf.mxu1  ;;  %7698 = vmatmul.mubr.bf16.gmra.mxu1 %v2141_v13  ;;  %v1825_v13 = vmax.f32 %v1313_v23, 0.0  ;;  %v2143_v60 = vpack.c.bf16 %v1823_v24, %v1822_v2 }
 0x45c   : > { %v10970_v33 = vpack.c.bf16 %v4639_v15, %v4638_v47  ;;  %v4637_v4 = vmax.f32 %v3421_v10, 0.0  ;;  %7701 = vmatprep.mubr.bf16.mxu1 %v2142_v27  ;;  %v3442_v50 = vadd.f32 %v10656_v59, %v7603_v46  ;;  %v10994_v47 = vld [vmem:[%s9106_s22 + $0x20] sm:$0xff]  ;;  %v10999_v10 = vld [vmem:[%s9106_s22 + $0x28] sm:$0xff]  ;;  %v4624_v62 = vmax.f32 %v3370_v63, 0.0 }
 0x45d   : > { %v3433_v49 = vpop.f32.mrf.mxu1  ;;  %v2144_v57 = vpack.c.bf16 %v1825_v13, %v1824_v0  ;;  %v1316_v15 = vadd.f32 %v10994_v47, %v12609_v48  ;;  %v1317_v41 = vadd.f32 %v10999_v10, %v12609_v48 }
 0x45e   : > { %12610 = vst [vmem:[#allocation30_spill] sm:$0xff] %v10970_v33  ;;  %v10975_v36 = vpack.c.bf16 %v4637_v4, %v4636_v26  ;;  %7998 = vmatpush3.bf16.xpose.msra.mxu0 %v10227_v19  ;;  %8158 = vmatpush3.bf16.xpose.msra.mxu1 %v5005_v5  ;;  %v3434_v30 = vadd.f32 %v10656_v59, %v3433_v49  ;;  %v4642_v46 = vmax.f32 %v3442_v50, 0.0 }
 0x45f   : > { %v7604_v16 = vpop.f32.mrf.mxu1  ;;  %7999 = vmatprep.subr.bf16.mxu0 %v12516_v37  ;;  %8159 = vmatprep.subr.bf16.mxu1 %v12516_v37  ;;  %v1315_v19 = vadd.f32 %v10989_v54, %v12609_v48  ;;  %v3365_v4 = vadd.f32 %v10656_v59, %v10858_v17  ;;  %v5004_v49 = vpack.c.bf16 %v4625_v43, %v4624_v62  ;;  %v1828_v50 = vmax.f32 %v1316_v15, 0.0  ;;  %v12614_v43 = vld [vmem:[#allocation57_spill] sm:$0xff] }
 0x460   : > { %12611 = vst [vmem:[#allocation41_spill] sm:$0xff] %v10975_v36  ;;  %v3445_v27 = vadd.f32 %v10656_v59, %v7604_v16  ;;  %v4640_v2 = vmax.f32 %v3434_v30, 0.0  ;;  %v1826_v16 = vmax.f32 %v1314_v12, 0.0  ;;  %v11017_v12 = vld [vmem:[%s9106_s22 + $0x30] sm:$0xff] }
 0x461   : > { %v3436_v23 = vpop.f32.mrf.mxu1  ;;  %v1827_v63 = vmax.f32 %v1315_v19, 0.0  ;;  %v1318_v19 = vadd.f32 %v11017_v12, %v12609_v48 }
 0x462   : > { %v4643_v5 = vmax.f32 %v3445_v27, 0.0  ;;  %v3437_v26 = vadd.f32 %v10656_v59, %v3436_v23  ;;  %v1829_v27 = vmax.f32 %v1317_v41, 0.0  ;;  %v3362_v23 = vadd.f32 %v10656_v59, %v10849_v58  ;;  %v11022_v58 = vld [vmem:[%s9106_s22 + $0x38] sm:$0xff] }
 0x463   : > { %v7607_v18 = vpop.f32.mrf.mxu1  ;;  %7702 = vmatmul.mubr.bf16.gmra.mxu1 %v2143_v60  ;;  %v1319_v60 = vadd.f32 %v11022_v58, %v12609_v48 }
 0x464   : > { %v11006_v24 = vpack.c.bf16 %v4643_v5, %v4642_v46  ;;  %v4641_v0 = vmax.f32 %v3437_v26, 0.0  ;;  %7705 = vmatprep.mubr.bf16.mxu1 %v2144_v57  ;;  %v3458_v17 = vadd.f32 %v10656_v59, %v7607_v18  ;;  %v4623_v57 = vmax.f32 %v3365_v4, 0.0  ;;  %v11029_v26 = vld [vmem:[%s9106_s22 + $0x40] sm:$0xff] }
 0x465   : > { %v3449_v13 = vpop.f32.mrf.mxu1  ;;  %v2145_v46 = vpack.c.bf16 %v1827_v63, %v1826_v16  ;;  %v2146_v5 = vpack.c.bf16 %v1829_v27, %v1828_v50  ;;  %v1320_v18 = vadd.f32 %v11029_v26, %v12609_v48  ;;  %v1830_v63 = vmax.f32 %v1318_v19, 0.0 }
 0x466   : > { %12612 = vst [vmem:[#allocation42_spill] sm:$0xff] %v11006_v24  ;;  %v11010_v3 = vpack.c.bf16 %v4641_v0, %v4640_v2  ;;  %8000 = vmatpush3.bf16.xpose.msra.mxu0 %v12614_v43  ;;  %8160 = vmatpush3.bf16.xpose.msra.mxu1 %v5004_v49  ;;  %v3450_v15 = vadd.f32 %v10656_v59, %v3449_v13  ;;  %v11034_v49 = vld [vmem:[%s9106_s22 + $0x48] sm:$0xff]  ;;  %v4622_v0 = vmax.f32 %v3362_v23, 0.0  ;;  %v4646_v43 = vmax.f32 %v3458_v17, 0.0 }
 0x467   : > { %v7608_v30 = vpop.f32.mrf.mxu1  ;;  %8001 = vmatprep.subr.bf16.mxu0 %v12516_v37  ;;  %8161 = vmatprep.subr.bf16.mxu1 %v12516_v37  ;;  %v1321_v2 = vadd.f32 %v11034_v49, %v12609_v48  ;;  %v1831_v50 = vmax.f32 %v1319_v60, 0.0  ;;  %v1832_v23 = vmax.f32 %v1320_v18, 0.0  ;;  %v12617_v60 = vld [vmem:[#allocation40_spill] sm:$0xff] }
 0x468   : > { %12613 = vst [vmem:[#allocation31_spill] sm:$0xff] %v11010_v3  ;;  %v3461_v41 = vadd.f32 %v10656_v59, %v7608_v30  ;;  %v3357_v30 = vadd.f32 %v10656_v59, %v10861_v14  ;;  %v5003_v27 = vpack.c.bf16 %v4623_v57, %v4622_v0  ;;  %v4644_v8 = vmax.f32 %v3450_v15, 0.0  ;;  %v11050_v14 = vld [vmem:[%s12446_s5] ss:$0 sm:$0xff] }
 0x469   : > { %v3452_v62 = vpop.f32.mrf.mxu1  ;;  %v1833_v17 = vmax.f32 %v1321_v2, 0.0  ;;  %v2147_v15 = vpack.c.bf16 %v1831_v50, %v1830_v63  ;;  %v11064_v2 = vld [vmem:[%s9106_s22 + $0x58] sm:$0xff] }
 0x46a   : > { %v4647_v4 = vmax.f32 %v3461_v41, 0.0  ;;  %v3453_v13 = vadd.f32 %v10656_v59, %v3452_v62  ;;  %v3354_v41 = vadd.f32 %v10656_v59, %v10853_v53  ;;  %v4621_v59 = vmax.f32 %v3357_v30, 0.0 }
 0x46b   : > { %v7611_v16 = vpop.f32.mrf.mxu1  ;;  %7706 = vmatmul.mubr.bf16.gmra.mxu1 %v2145_v46  ;;  %v2148_v18 = vpack.c.bf16 %v1833_v17, %v1832_v23  ;;  %v1323_v0 = vadd.f32 %v11064_v2, %v12609_v48 }
 0x46c   : > { %v11041_v36 = vpack.c.bf16 %v4647_v4, %v4646_v43  ;;  %v4645_v33 = vmax.f32 %v3453_v13, 0.0  ;;  %7709 = vmatprep.mubr.bf16.mxu1 %v2146_v5  ;;  %v3474_v19 = vadd.f32 %v11050_v14, %v7611_v16  ;;  %v11069_v43 = vld [vmem:[%s9106_s22 + $0x60] sm:$0xff]  ;;  %v4620_v30 = vmax.f32 %v3354_v41, 0.0 }
 0x46d   : > { %v3465_v3 = vpop.f32.mrf.mxu1  ;;  %v1324_v4 = vadd.f32 %v11069_v43, %v12609_v48 }
 0x46e   : > { %12615 = vst [vmem:[#allocation57_spill] sm:$0xff] %v11041_v36  ;;  %v11045_v62 = vpack.c.bf16 %v4645_v33, %v4644_v8  ;;  %8002 = vmatpush3.bf16.xpose.msra.mxu0 %v12617_v60  ;;  %8162 = vmatpush3.bf16.xpose.msra.mxu1 %v5003_v27  ;;  %v3466_v53 = vadd.f32 %v11050_v14, %v3465_v3  ;;  %v11059_v33 = vld [vmem:[%s9106_s22 + $0x50] sm:$0xff]  ;;  %v11074_v3 = vld [vmem:[%s9106_s22 + $0x68] sm:$0xff]  ;;  %v4650_v16 = vmax.f32 %v3474_v19, 0.0  ;;  %v1835_v36 = vmax.f32 %v1323_v0, 0.0 }
 0x46f   : > { %v7612_v57 = vpop.f32.mrf.mxu1  ;;  %8003 = vmatprep.subr.bf16.mxu0 %v12516_v37  ;;  %8163 = vmatprep.subr.bf16.mxu1 %v12516_v37  ;;  %v1322_v46 = vadd.f32 %v11059_v33, %v12609_v48  ;;  %v1325_v13 = vadd.f32 %v11074_v3, %v12609_v48  ;;  %v5002_v23 = vpack.c.bf16 %v4621_v59, %v4620_v30  ;;  %v1836_v40 = vmax.f32 %v1324_v4, 0.0  ;;  %v12619_v19 = vld [vmem:[#allocation56_spill] sm:$0xff]  ;;  %v12620_v4 = vld [vmem:[#allocation33_spill] sm:$0xff] }
 0x470   : > { %12616 = vst [vmem:[#allocation84_spill] sm:$0xff] %v11045_v62  ;;  %v3477_v8 = vadd.f32 %v11050_v14, %v7612_v57  ;;  %v4648_v17 = vmax.f32 %v3466_v53, 0.0  ;;  %v1326_v53 = vadd.f32 %v10931_v9, %v12609_v48  ;;  %v1327_v0 = vadd.f32 %v10951_v21, %v12609_v48 }
 0x471   : > { %v3468_v5 = vpop.f32.mrf.mxu1  ;;  %v1834_v62 = vmax.f32 %v1322_v46, 0.0  ;;  %v1837_v44 = vmax.f32 %v1325_v13, 0.0  ;;  %v1328_v13 = vadd.f32 %v10868_v1, %v12620_v4 }
 0x472   : > { %v4651_v63 = vmax.f32 %v3477_v8, 0.0  ;;  %v3469_v50 = vadd.f32 %v11050_v14, %v3468_v5  ;;  %v1839_v48 = vmax.f32 %v1327_v0, 0.0  ;;  %v1333_v0 = vadd.f32 %v10999_v10, %v12620_v4 }
 0x473   : > { %v7615_v27 = vpop.f32.mrf.mxu1  ;;  %7710 = vmatmul.mubr.bf16.gmra.mxu1 %v2147_v15  ;;  %v2149_v5 = vpack.c.bf16 %v1835_v36, %v1834_v62 }
 0x474   : > { %v11079_v60 = vpack.c.bf16 %v4651_v63, %v4650_v16  ;;  %v4649_v57 = vmax.f32 %v3469_v50, 0.0  ;;  %7713 = vmatprep.mubr.bf16.mxu1 %v2148_v18  ;;  %v3490_v41 = vadd.f32 %v11050_v14, %v7615_v27  ;;  %v2150_v18 = vpack.c.bf16 %v1837_v44, %v1836_v40 }
 0x475   : > { %v3481_v24 = vpop.f32.mrf.mxu1  ;;  %v1838_v44 = vmax.f32 %v1326_v53, 0.0  ;;  %v1330_v53 = vadd.f32 %v10982_v52, %v12620_v4 }
 0x476   : > { %v11081_v39 = vpack.c.bf16 %v4649_v57, %v4648_v17  ;;  %8004 = vmatpush3.bf16.xpose.msra.mxu0 %v12619_v19  ;;  %8164 = vmatpush3.bf16.xpose.msra.mxu1 %v5002_v23  ;;  %v3482_v15 = vadd.f32 %v11050_v14, %v3481_v24  ;;  %v4654_v30 = vmax.f32 %v3490_v41, 0.0  ;;  %v1329_v24 = vadd.f32 %v10958_v61, %v12620_v4  ;;  %v12621_v57 = vld [vmem:[#allocation54_spill] sm:$0xff] }
 0x477   : > { %v7616_v8 = vpop.f32.mrf.mxu1  ;;  %8005 = vmatprep.subr.bf16.mxu0 %v12516_v37  ;;  %8165 = vmatprep.subr.bf16.mxu1 %v12516_v37  ;;  %v1840_v41 = vmax.f32 %v1328_v13, 0.0 }
 0x478   : > { %12618 = vst [vmem:[#allocation40_spill] sm:$0xff] %v11081_v39  ;;  %v3493_v59 = vadd.f32 %v11050_v14, %v7616_v8  ;;  %v4652_v27 = vmax.f32 %v3482_v15, 0.0  ;;  %v1841_v19 = vmax.f32 %v1329_v24, 0.0 }
 0x479   : > { %v3484_v46 = vpop.f32.mrf.mxu1 }
 0x47a   : > { %v4655_v16 = vmax.f32 %v3493_v59, 0.0  ;;  %v3485_v63 = vadd.f32 %v11050_v14, %v3484_v46 }
 0x47b   : > { %v7619_v50 = vpop.f32.mrf.mxu1  ;;  %7714 = vmatmul.mubr.bf16.gmra.mxu1 %v2149_v5  ;;  %v2151_v5 = vpack.c.bf16 %v1839_v48, %v1838_v44  ;;  %v1842_v44 = vmax.f32 %v1330_v53, 0.0 }
 0x47c   : > { %v11098_v23 = vpack.c.bf16 %v4655_v16, %v4654_v30  ;;  %v4653_v36 = vmax.f32 %v3485_v63, 0.0  ;;  %7717 = vmatprep.mubr.bf16.mxu1 %v2150_v18  ;;  %v3506_v17 = vadd.f32 %v11050_v14, %v7619_v50  ;;  %v1331_v18 = vadd.f32 %v10989_v54, %v12620_v4 }
 0x47d   : > { %v3497_v40 = vpop.f32.mrf.mxu1  ;;  %v2152_v63 = vpack.c.bf16 %v1841_v19, %v1840_v41  ;;  %v1334_v19 = vadd.f32 %v11017_v12, %v12620_v4 }
 0x47e   : > { %v11100_v62 = vpack.c.bf16 %v4653_v36, %v4652_v27  ;;  %8006 = vmatpush3.bf16.xpose.msra.mxu0 %v12621_v57  ;;  %8166 = vmatpush3.bf16.xpose.msra.mxu1 %v10851_v25  ;;  %v3498_v15 = vadd.f32 %v11050_v14, %v3497_v40  ;;  %v1332_v25 = vadd.f32 %v10994_v47, %v12620_v4  ;;  %v4658_v13 = vmax.f32 %v3506_v17, 0.0 }
 0x47f   : > { %v7620_v8 = vpop.f32.mrf.mxu1  ;;  %8007 = vmatprep.subr.bf16.mxu0 %v12516_v37  ;;  %8167 = vmatprep.subr.bf16.mxu1 %v12516_v37  ;;  %v1843_v48 = vmax.f32 %v1331_v18, 0.0 }
 0x480   : > { %v3509_v59 = vadd.f32 %v11050_v14, %v7620_v8  ;;  %v4656_v50 = vmax.f32 %v3498_v15, 0.0  ;;  %v1844_v57 = vmax.f32 %v1332_v25, 0.0  ;;  %v1845_v8 = vmax.f32 %v1333_v0, 0.0 }
 0x481   : > { %v3500_v46 = vpop.f32.mrf.mxu1  ;;  %v2153_v18 = vpack.c.bf16 %v1843_v48, %v1842_v44 }
 0x482   : > { %v4659_v30 = vmax.f32 %v3509_v59, 0.0  ;;  %v3501_v16 = vadd.f32 %v11050_v14, %v3500_v46  ;;  %v12622_v59 = vld [vmem:[#allocation55_spill] sm:$0xff]  ;;  %v1335_v46 = vadd.f32 %v11022_v58, %v12620_v4  ;;  %v2154_v25 = vpack.c.bf16 %v1845_v8, %v1844_v57 }
 0x483   : > { %v7623_v24 = vpop.f32.mrf.mxu1  ;;  %7718 = vmatmul.mubr.bf16.gmra.mxu1 %v2151_v5 }
 0x484   : > { %v11118_v27 = vpack.c.bf16 %v4659_v30, %v4658_v13  ;;  %v4657_v36 = vmax.f32 %v3501_v16, 0.0  ;;  %7721 = vmatprep.mubr.bf16.mxu1 %v2152_v63  ;;  %v3522_v17 = vadd.f32 %v11050_v14, %v7623_v24  ;;  %v1337_v16 = vadd.f32 %v11034_v49, %v12620_v4 }
 0x485   : > { %v3513_v40 = vpop.f32.mrf.mxu1  ;;  %v1846_v24 = vmax.f32 %v1334_v19, 0.0  ;;  %v1847_v44 = vmax.f32 %v1335_v46, 0.0  ;;  %v1338_v46 = vadd.f32 %v11059_v33, %v12620_v4 }
 0x486   : > { %v11120_v39 = vpack.c.bf16 %v4657_v36, %v4656_v50  ;;  %8008 = vmatpush3.bf16.xpose.msra.mxu0 %v12622_v59  ;;  %8168 = vmatpush3.bf16.xpose.msra.mxu1 %v10855_v51  ;;  %v3514_v15 = vadd.f32 %v11050_v14, %v3513_v40  ;;  %v1336_v51 = vadd.f32 %v11029_v26, %v12620_v4  ;;  %v4662_v0 = vmax.f32 %v3522_v17, 0.0 }
 0x487   : > { %v7624_v41 = vpop.f32.mrf.mxu1  ;;  %8013 = vmatprep.subr.bf16.mxu0 %v12516_v37  ;;  %8193 = vmatprep.subr.bf16.mxu1 %v12516_v37  ;;  %v1849_v59 = vmax.f32 %v1337_v16, 0.0 }
 0x488   : > { %v3525_v53 = vadd.f32 %v11050_v14, %v7624_v41  ;;  %v4660_v50 = vmax.f32 %v3514_v15, 0.0  ;;  %v1848_v17 = vmax.f32 %v1336_v51, 0.0 }
 0x489   : > { %v3516_v5 = vpop.f32.mrf.mxu1 }
 0x48a   : > { %v4663_v13 = vmax.f32 %v3525_v53, 0.0  ;;  %v3517_v30 = vadd.f32 %v11050_v14, %v3516_v5  ;;  %v2155_v53 = vpack.c.bf16 %v1847_v44, %v1846_v24  ;;  %v1340_v5 = vadd.f32 %v11069_v43, %v12620_v4 }
 0x48b   : > { %v7627_v63 = vpop.f32.mrf.mxu1  ;;  %7722 = vmatmul.mubr.bf16.gmra.mxu1 %v2153_v18  ;;  %v1341_v18 = vadd.f32 %v11074_v3, %v12620_v4 }
 0x48c   : > { %v11138_v36 = vpack.c.bf16 %v4663_v13, %v4662_v0  ;;  %v4661_v40 = vmax.f32 %v3517_v30, 0.0  ;;  %7725 = vmatprep.mubr.bf16.mxu1 %v2154_v25  ;;  %v3538_v8 = vadd.f32 %v11050_v14, %v7627_v63  ;;  %v2156_v13 = vpack.c.bf16 %v1849_v59, %v1848_v17 }
 0x48d   : > { %v3529_v48 = vpop.f32.mrf.mxu1  ;;  %8010 = vmatmul.mubr.bf16.vlgmr.msra.gmra.mxu0 %v10754_v11 }
 0x48e   : > { %v11141_v57 = vpack.c.bf16 %v4661_v40, %v4660_v50  ;;  %8014 = vmatpush3.bf16.xpose.msra.mxu0 %v10330_v34  ;;  %8029 = vmatprep.mubr.msk.bf16.mxu0 %vm8894_vm0, %v12516_v37  ;;  %v3530_v19 = vadd.f32 %v11050_v14, %v3529_v48  ;;  %v1339_v34 = vadd.f32 %v11064_v2, %v12620_v4  ;;  %v4666_v25 = vmax.f32 %v3538_v8, 0.0 }
 0x48f   : > { %v7628_v41 = vpop.f32.mrf.mxu1  ;;  %8015 = vmatprep.subr.bf16.mxu0 %v12516_v37  ;;  %v1850_v40 = vmax.f32 %v1338_v46, 0.0  ;;  %v1852_v48 = vmax.f32 %v1340_v5, 0.0  ;;  %v12625_v5 = vld [vmem:[#allocation34_spill] sm:$0xff] }
 0x490   : > { %v3541_v15 = vadd.f32 %v11050_v14, %v7628_v41  ;;  %v4664_v16 = vmax.f32 %v3530_v19, 0.0  ;;  %v1851_v44 = vmax.f32 %v1339_v34, 0.0  ;;  %v1853_v41 = vmax.f32 %v1341_v18, 0.0 }
 0x491   : > { %v3532_v11 = vpop.f32.mrf.mxu1  ;;  %v1342_v19 = vadd.f32 %v10931_v9, %v12620_v4  ;;  %v1343_v34 = vadd.f32 %v10951_v21, %v12620_v4  ;;  %v1344_v18 = vadd.f32 %v10868_v1, %v12625_v5 }
 0x492   : > { %v4667_v51 = vmax.f32 %v3541_v15, 0.0  ;;  %v3533_v0 = vadd.f32 %v11050_v14, %v3532_v11  ;;  %v2157_v11 = vpack.c.bf16 %v1851_v44, %v1850_v40  ;;  %v2158_v46 = vpack.c.bf16 %v1853_v41, %v1852_v48 }
 0x493   : > { %v7631_v30 = vpop.f32.mrf.mxu1  ;;  %7726 = vmatmul.mubr.bf16.gmra.mxu1 %v2155_v53  ;;  %v1854_v40 = vmax.f32 %v1342_v19, 0.0  ;;  %v1855_v4 = vmax.f32 %v1343_v34, 0.0  ;;  %v1856_v41 = vmax.f32 %v1344_v18, 0.0  ;;  %v1349_v34 = vadd.f32 %v10999_v10, %v12625_v5 }
 0x494   : > { %v11159_v63 = vpack.c.bf16 %v4667_v51, %v4666_v25  ;;  %v4665_v24 = vmax.f32 %v3533_v0, 0.0  ;;  %7729 = vmatprep.mubr.bf16.mxu1 %v2156_v13  ;;  %v3554_v8 = vadd.f32 %v11050_v14, %v7631_v30  ;;  %v1345_v0 = vadd.f32 %v10958_v61, %v12625_v5 }
 0x495   : > { %v3545_v50 = vpop.f32.mrf.mxu1 }
 0x496   : > { %12623 = vst [vmem:[#allocation56_spill] sm:$0xff] %v11159_v63  ;;  %v11161_v55 = vpack.c.bf16 %v4665_v24, %v4664_v16  ;;  %8016 = vmatpush3.bf16.xpose.msra.mxu0 %v10332_v7  ;;  %v3546_v17 = vadd.f32 %v11050_v14, %v3545_v50  ;;  %v4670_v7 = vmax.f32 %v3554_v8, 0.0  ;;  %v1857_v8 = vmax.f32 %v1345_v0, 0.0 }
 0x497   : > { %v7632_v15 = vpop.f32.mrf.mxu1  ;;  %8017 = vmatprep.subr.bf16.mxu0 %v12516_v37 }
 0x498   : > { %12624 = vst [vmem:[#allocation33_spill] sm:$0xff] %v11161_v55  ;;  %v3557_v59 = vadd.f32 %v11050_v14, %v7632_v15  ;;  %v4668_v30 = vmax.f32 %v3546_v17, 0.0  ;;  %v1861_v55 = vmax.f32 %v1349_v34, 0.0  ;;  %v1352_v34 = vadd.f32 %v11029_v26, %v12625_v5 }
 0x499   : > { %v3548_v53 = vpop.f32.mrf.mxu1 }
 0x49a   : > { %v4671_v25 = vmax.f32 %v3557_v59, 0.0  ;;  %v3549_v51 = vadd.f32 %v11050_v14, %v3548_v53  ;;  %v1346_v53 = vadd.f32 %v10982_v52, %v12625_v5 }
 0x49b   : > { %v7635_v13 = vpop.f32.mrf.mxu1  ;;  %7730 = vmatmul.mubr.bf16.gmra.mxu1 %v2157_v11  ;;  %v2159_v11 = vpack.c.bf16 %v1855_v4, %v1854_v40 }
 0x49c   : > { %v11177_v16 = vpack.c.bf16 %v4671_v25, %v4670_v7  ;;  %v4669_v24 = vmax.f32 %v3549_v51, 0.0  ;;  %7733 = vmatprep.mubr.bf16.mxu1 %v2158_v46  ;;  %v3570_v48 = vadd.f32 %v11050_v14, %v7635_v13  ;;  %v1347_v46 = vadd.f32 %v10989_v54, %v12625_v5 }
 0x49d   : > { %v3561_v50 = vpop.f32.mrf.mxu1  ;;  %v2160_v51 = vpack.c.bf16 %v1857_v8, %v1856_v41  ;;  %v1858_v40 = vmax.f32 %v1346_v53, 0.0 }
 0x49e   : > { %12626 = vst [vmem:[#allocation54_spill] sm:$0xff] %v11177_v16  ;;  %v11179_v44 = vpack.c.bf16 %v4669_v24, %v4668_v30  ;;  %8018 = vmatpush3.bf16.xpose.msra.mxu0 %v10312_v56  ;;  %v3562_v17 = vadd.f32 %v11050_v14, %v3561_v50  ;;  %v1348_v56 = vadd.f32 %v10994_v47, %v12625_v5  ;;  %v4674_v18 = vmax.f32 %v3570_v48, 0.0 }
 0x49f   : > { %v7636_v15 = vpop.f32.mrf.mxu1  ;;  %8019 = vmatprep.subr.bf16.mxu0 %v12516_v37  ;;  %v1859_v4 = vmax.f32 %v1347_v46, 0.0 }
 0x4a0   : > { %12627 = vst [vmem:[#allocation55_spill] sm:$0xff] %v11179_v44  ;;  %v3573_v59 = vadd.f32 %v11050_v14, %v7636_v15  ;;  %v4672_v13 = vmax.f32 %v3562_v17, 0.0  ;;  %v1860_v15 = vmax.f32 %v1348_v56, 0.0  ;;  %v1350_v17 = vadd.f32 %v11017_v12, %v12625_v5 }
 0x4a1   : > { %v3564_v19 = vpop.f32.mrf.mxu1  ;;  %v1351_v56 = vadd.f32 %v11022_v58, %v12625_v5 }
 0x4a2   : > { %v4675_v7 = vmax.f32 %v3573_v59, 0.0  ;;  %v3565_v25 = vadd.f32 %v11050_v14, %v3564_v19  ;;  %v12630_v59 = vld [vmem:[#allocation61_spill] sm:$0xff]  ;;  %v2162_v46 = vpack.c.bf16 %v1861_v55, %v1860_v15 }
 0x4a3   : > { %v7639_v0 = vpop.f32.mrf.mxu1  ;;  %7734 = vmatmul.mubr.bf16.gmra.mxu1 %v2159_v11  ;;  %v2161_v11 = vpack.c.bf16 %v1859_v4, %v1858_v40  ;;  %v1862_v40 = vmax.f32 %v1350_v17, 0.0  ;;  %v1863_v4 = vmax.f32 %v1351_v56, 0.0 }
 0x4a4   : > { %v11195_v30 = vpack.c.bf16 %v4675_v7, %v4674_v18  ;;  %v4673_v24 = vmax.f32 %v3565_v25, 0.0  ;;  %7737 = vmatprep.mubr.bf16.mxu1 %v2160_v51  ;;  %v3586_v48 = vadd.f32 %v11050_v14, %v7639_v0  ;;  %v1353_v51 = vadd.f32 %v11034_v49, %v12625_v5 }
 0x4a5   : > { %v3577_v50 = vpop.f32.mrf.mxu1  ;;  %v2163_v56 = vpack.c.bf16 %v1863_v4, %v1862_v40 }
 0x4a6   : > { %12628 = vst [vmem:[#allocation34_spill] sm:$0xff] %v11195_v30  ;;  %v11197_v63 = vpack.c.bf16 %v4673_v24, %v4672_v13  ;;  %8020 = vmatpush3.bf16.xpose.msra.mxu0 %v12630_v59  ;;  %v3578_v41 = vadd.f32 %v11050_v14, %v3577_v50  ;;  %v4678_v18 = vmax.f32 %v3586_v48, 0.0  ;;  %v12633_v59 = vld [vmem:[#allocation23_spill] sm:$0xff]  ;;  %v12636_v30 = vld [vmem:[#allocation60_spill] sm:$0xff] }
 0x4a7   : > { %v7640_v19 = vpop.f32.mrf.mxu1  ;;  %8021 = vmatprep.subr.bf16.mxu0 %v12516_v37 }
 0x4a8   : > { %12629 = vst [vmem:[#allocation85_spill] sm:$0xff] %v11197_v63  ;;  %v3589_v8 = vadd.f32 %v11050_v14, %v7640_v19  ;;  %v4676_v13 = vmax.f32 %v3578_v41, 0.0  ;;  %v1864_v19 = vmax.f32 %v1352_v34, 0.0  ;;  %v1357_v34 = vadd.f32 %v11074_v3, %v12625_v5 }
 0x4a9   : > { %v3580_v53 = vpop.f32.mrf.mxu1 }
 0x4aa   : > { %v4679_v7 = vmax.f32 %v3589_v8, 0.0  ;;  %v3581_v25 = vadd.f32 %v11050_v14, %v3580_v53  ;;  %v1865_v8 = vmax.f32 %v1353_v51, 0.0 }
 0x4ab   : > { %v7643_v0 = vpop.f32.mrf.mxu1  ;;  %7738 = vmatmul.mubr.bf16.gmra.mxu1 %v2161_v11 }
 0x4ac   : > { %v11213_v24 = vpack.c.bf16 %v4679_v7, %v4678_v18  ;;  %v4677_v50 = vmax.f32 %v3581_v25, 0.0  ;;  %7741 = vmatprep.mubr.bf16.mxu1 %v2162_v46  ;;  %v3602_v48 = vadd.f32 %v11050_v14, %v7643_v0  ;;  %v1354_v46 = vadd.f32 %v11059_v33, %v12625_v5 }
 0x4ad   : > { %v3593_v55 = vpop.f32.mrf.mxu1  ;;  %v1355_v18 = vadd.f32 %v11064_v2, %v12625_v5  ;;  %v1356_v7 = vadd.f32 %v11069_v43, %v12625_v5 }
 0x4ae   : > { %12631 = vst [vmem:[#allocation61_spill] sm:$0xff] %v11213_v24  ;;  %v11215_v15 = vpack.c.bf16 %v4677_v50, %v4676_v13  ;;  %8022 = vmatpush3.bf16.xpose.msra.mxu0 %v12633_v59  ;;  %v3594_v41 = vadd.f32 %v11050_v14, %v3593_v55  ;;  %v4682_v25 = vmax.f32 %v3602_v48, 0.0  ;;  %v2164_v13 = vpack.c.bf16 %v1865_v8, %v1864_v19 }
 0x4af   : > { %v7644_v53 = vpop.f32.mrf.mxu1  ;;  %8023 = vmatprep.subr.bf16.mxu0 %v12516_v37  ;;  %v1867_v44 = vmax.f32 %v1355_v18, 0.0  ;;  %v1868_v48 = vmax.f32 %v1356_v7, 0.0  ;;  %v1359_v18 = vadd.f32 %v10951_v21, %v12625_v5 }
 0x4b0   : > { %12632 = vst [vmem:[#allocation86_spill] sm:$0xff] %v11215_v15  ;;  %v3605_v11 = vadd.f32 %v11050_v14, %v7644_v53  ;;  %v4680_v55 = vmax.f32 %v3594_v41, 0.0  ;;  %v1866_v53 = vmax.f32 %v1354_v46, 0.0  ;;  %v1358_v41 = vadd.f32 %v10931_v9, %v12625_v5 }
 0x4b1   : > { %v3596_v17 = vpop.f32.mrf.mxu1 }
 0x4b2   : > { %v4683_v51 = vmax.f32 %v3605_v11, 0.0  ;;  %v3597_v0 = vadd.f32 %v11050_v14, %v3596_v17  ;;  %v1869_v11 = vmax.f32 %v1357_v34, 0.0  ;;  %v11248_v34 = vpop.f32.mrf.mxu0 }
 0x4b3   : > { %v7647_v50 = vpop.f32.mrf.mxu1  ;;  %7742 = vmatmul.mubr.bf16.gmra.mxu1 %v2163_v56  ;;  %v2165_v56 = vpack.c.bf16 %v1867_v44, %v1866_v53 }
 0x4b4   : > { %v11231_v59 = vpack.c.bf16 %v4683_v51, %v4682_v25  ;;  %v4681_v40 = vmax.f32 %v3597_v0, 0.0  ;;  %7745 = vmatprep.mubr.bf16.mxu1 %v2164_v13  ;;  %v3618_v63 = vadd.f32 %v11050_v14, %v7647_v50  ;;  %v12637_v25 = vld [vmem:[#allocation37_spill] sm:$0xff]  ;;  %v2166_v50 = vpack.c.bf16 %v1869_v11, %v1868_v48 }
 0x4b5   : > { %v3609_v4 = vpop.f32.mrf.mxu1  ;;  %v1361_v7 = vadd.f32 %v10958_v61, %v12637_v25  ;;  %v1362_v11 = vadd.f32 %v10982_v52, %v12637_v25 }
 0x4b6   : > { %12634 = vst [vmem:[#allocation23_spill] sm:$0xff] %v11231_v59  ;;  %v11233_v16 = vpack.c.bf16 %v4681_v40, %v4680_v55  ;;  %8024 = vmatpush3.bf16.xpose.msra.mxu0 %v12636_v30  ;;  %v3610_v19 = vadd.f32 %v11050_v14, %v3609_v4  ;;  %v1360_v30 = vadd.f32 %v10868_v1, %v12637_v25  ;;  %v4686_v51 = vmax.f32 %v3618_v63, 0.0  ;;  %v7891_v40 = vpop.f32.mrf.mxu0 }
 0x4b7   : > { %v7648_v17 = vpop.f32.mrf.mxu1  ;;  %8025 = vmatprep.subr.bf16.mxu0 %v12516_v37  ;;  %v1870_v1 = vmax.f32 %v1358_v41, 0.0  ;;  %v1873_v24 = vmax.f32 %v1361_v7, 0.0  ;;  %v1364_v7 = vadd.f32 %v10994_v47, %v12637_v25  ;;  %v1874_v40 = vmax.f32 %v1362_v11, 0.0 }
 0x4b8   : > { %12635 = vst [vmem:[#allocation87_spill] sm:$0xff] %v11233_v16  ;;  %v3621_v8 = vadd.f32 %v11050_v14, %v7648_v17  ;;  %v4684_v44 = vmax.f32 %v3610_v19, 0.0  ;;  %v1871_v17 = vmax.f32 %v1359_v18, 0.0  ;;  %v1872_v15 = vmax.f32 %v1360_v30, 0.0  ;;  %v5246_v16 = vpop.f32.mrf.mxu0 }
 0x4b9   : > { %v3612_v46 = vpop.f32.mrf.mxu1  ;;  %v1363_v16 = vadd.f32 %v10989_v54, %v12637_v25 }
 0x4ba   : > { %v4687_v0 = vmax.f32 %v3621_v8, 0.0  ;;  %v3613_v13 = vadd.f32 %v11050_v14, %v3612_v46  ;;  %v12640_v8 = vld [vmem:[#allocation58_spill] sm:$0xff]  ;;  %v7892_v19 = vpop.f32.mrf.mxu0  ;;  %v2167_v18 = vpack.c.bf16 %v1871_v17, %v1870_v1  ;;  %v2168_v30 = vpack.c.bf16 %v1873_v24, %v1872_v15 }
 0x4bb   : > { %v7651_v55 = vpop.f32.mrf.mxu1  ;;  %7746 = vmatmul.mubr.bf16.gmra.mxu1 %v2165_v56  ;;  %v1875_v1 = vmax.f32 %v1363_v16, 0.0  ;;  %v1366_v16 = vadd.f32 %v11017_v12, %v12637_v25 }
 0x4bc   : > { %v11251_v4 = vpack.c.bf16 %v4687_v0, %v4686_v51  ;;  %v4685_v5 = vmax.f32 %v3613_v13, 0.0  ;;  %7749 = vmatprep.mubr.bf16.mxu1 %v2166_v50  ;;  %v3634_v63 = vadd.f32 %v11050_v14, %v7651_v55  ;;  %v1365_v50 = vadd.f32 %v10999_v10, %v12637_v25 }
 0x4bd   : > { %v3625_v53 = vpop.f32.mrf.mxu1 }
 0x4be   : > { %12638 = vst [vmem:[#allocation60_spill] sm:$0xff] %v11251_v4  ;;  %v11253_v59 = vpack.c.bf16 %v4685_v5, %v4684_v44  ;;  %8026 = vmatpush3.bf16.xpose.msra.mxu0 %v12640_v8  ;;  %v3626_v46 = vadd.f32 %v11050_v14, %v3625_v53  ;;  %v4690_v51 = vmax.f32 %v3634_v63, 0.0  ;;  %v12641_v63 = vld [vmem:[#allocation59_spill] sm:$0xff]  ;;  %v1876_v8 = vmax.f32 %v1364_v7, 0.0 }
 0x4bf   : > { %v7652_v48 = vpop.f32.mrf.mxu1  ;;  %8027 = vmatprep.subr.bf16.mxu0 %v12516_v37  ;;  %v1369_v7 = vadd.f32 %v11034_v49, %v12637_v25 }
 0x4c0   : > { %12639 = vst [vmem:[#allocation37_spill] sm:$0xff] %v11253_v59  ;;  %v3637_v41 = vadd.f32 %v11050_v14, %v7652_v48  ;;  %v4688_v44 = vmax.f32 %v3626_v46, 0.0  ;;  %v1877_v48 = vmax.f32 %v1365_v50, 0.0 }
 0x4c1   : > { %v3628_v56 = vpop.f32.mrf.mxu1 }
 0x4c2   : > { %v4691_v0 = vmax.f32 %v3637_v41, 0.0  ;;  %v3629_v13 = vadd.f32 %v11050_v14, %v3628_v56  ;;  %v2169_v41 = vpack.c.bf16 %v1875_v1, %v1874_v40  ;;  %v2170_v50 = vpack.c.bf16 %v1877_v48, %v1876_v8 }
 0x4c3   : > { %v7655_v55 = vpop.f32.mrf.mxu1  ;;  %7750 = vmatmul.mubr.bf16.gmra.mxu1 %v2167_v18  ;;  %v1367_v18 = vadd.f32 %v11022_v58, %v12637_v25 }
 0x4c4   : > { %v11269_v5 = vpack.c.bf16 %v4691_v0, %v4690_v51  ;;  %v4689_v53 = vmax.f32 %v3629_v13, 0.0  ;;  %7753 = vmatprep.mubr.bf16.mxu1 %v2168_v30  ;;  %v3650_v17 = vadd.f32 %v11050_v14, %v7655_v55  ;;  %v1368_v30 = vadd.f32 %v11029_v26, %v12637_v25 }
 0x4c5   : > { %v3641_v24 = vpop.f32.mrf.mxu1 }
 0x4c6   : > { %v11271_v15 = vpack.c.bf16 %v4689_v53, %v4688_v44  ;;  %8028 = vmatpush3.bf16.xpose.msra.mxu0 %v12641_v63  ;;  %v3642_v11 = vadd.f32 %v11050_v14, %v3641_v24  ;;  %v4694_v51 = vmax.f32 %v3650_v17, 0.0  ;;  %v11292_v24 = vld [vmem:[%s12447_s6] sm:$0x3]  ;;  %v1878_v17 = vmax.f32 %v1366_v16, 0.0 }
 0x4c7   : > { %v7656_v19 = vpop.f32.mrf.mxu1  ;;  %8033 = vmatprep.subr.bf16.mxu0 %v12516_v37  ;;  %v1879_v63 = vmax.f32 %v1367_v18, 0.0  ;;  %v1370_v16 = vadd.f32 %v11059_v33, %v12637_v25 }
 0x4c8   : > { %v3653_v46 = vadd.f32 %v11050_v14, %v7656_v19  ;;  %v4692_v40 = vmax.f32 %v3642_v11, 0.0  ;;  %v1880_v19 = vmax.f32 %v1368_v30, 0.0 }
 0x4c9   : > { %v3644_v56 = vpop.f32.mrf.mxu1  ;;  %v2171_v30 = vpack.c.bf16 %v1879_v63, %v1878_v17 }
 0x4ca   : > { %v4695_v0 = vmax.f32 %v3653_v46, 0.0  ;;  %v3645_v13 = vadd.f32 %v11050_v14, %v3644_v56  ;;  %v1881_v46 = vmax.f32 %v1369_v7, 0.0 }
 0x4cb   : > { %v7659_v55 = vpop.f32.mrf.mxu1  ;;  %7754 = vmatmul.mubr.bf16.gmra.mxu1 %v2169_v41 }
 0x4cc   : > { %v11287_v44 = vpack.c.bf16 %v4695_v0, %v4694_v51  ;;  %v4693_v53 = vmax.f32 %v3645_v13, 0.0  ;;  %7757 = vmatprep.mubr.bf16.mxu1 %v2170_v50  ;;  %v3666_v48 = vadd.f32 %v11050_v14, %v7659_v55  ;;  %v2172_v7 = vpack.c.bf16 %v1881_v46, %v1880_v19 }
 0x4cd   : > { %v3657_v1 = vpop.f32.mrf.mxu1  ;;  %8030 = vmatmul.mubr.bf16.vlgmr.msra.gmra.mxu0 %v11292_v24  ;;  %v1371_v51 = vadd.f32 %v11064_v2, %v12637_v25  ;;  %v1373_v55 = vadd.f32 %v11074_v3, %v12637_v25  ;;  %v1882_v19 = vmax.f32 %v1370_v16, 0.0 }
 0x4ce   : > { %v11295_v8 = vpack.c.bf16 %v4693_v53, %v4692_v40  ;;  %8034 = vmatpush3.bf16.xpose.msra.mxu0 %v10402_v45  ;;  %8049 = vmatprep.mubr.msk.bf16.mxu0 %vm8894_vm0, %v12516_v37  ;;  %v3658_v41 = vadd.f32 %v11050_v14, %v3657_v1  ;;  %v1372_v45 = vadd.f32 %v11069_v43, %v12637_v25  ;;  %v4698_v0 = vmax.f32 %v3666_v48, 0.0 }
 0x4cf   : > { %v7660_v11 = vpop.f32.mrf.mxu1  ;;  %8035 = vmatprep.subr.bf16.mxu0 %v12516_v37  ;;  %v1883_v46 = vmax.f32 %v1371_v51, 0.0 }
 0x4d0   : > { %v3669_v56 = vadd.f32 %v11050_v14, %v7660_v11  ;;  %v4696_v53 = vmax.f32 %v3658_v41, 0.0 }
 0x4d1   : > { %v3660_v18 = vpop.f32.mrf.mxu1  ;;  %v2173_v51 = vpack.c.bf16 %v1883_v46, %v1882_v19 }
 0x4d2   : > { %v4699_v13 = vmax.f32 %v3669_v56, 0.0  ;;  %v3661_v50 = vadd.f32 %v11050_v14, %v3660_v18  ;;  %v1884_v56 = vmax.f32 %v1372_v45, 0.0  ;;  %v1885_v18 = vmax.f32 %v1373_v55, 0.0 }
 0x4d3   : > { %v7663_v40 = vpop.f32.mrf.mxu1  ;;  %7758 = vmatmul.mubr.bf16.gmra.mxu1 %v2171_v30 }
 0x4d4   : > { %v11313_v1 = vpack.c.bf16 %v4699_v13, %v4698_v0  ;;  %v4697_v17 = vmax.f32 %v3661_v50, 0.0  ;;  %7761 = vmatprep.mubr.bf16.mxu1 %v2172_v7  ;;  %v3682_v48 = vadd.f32 %v11050_v14, %v7663_v40  ;;  %v1374_v7 = vadd.f32 %v10931_v9, %v12637_v25  ;;  %v11327_v13 = vld [vmem:[%s9106_s22] sm:$0xff] }
 0x4d5   : > { %v3673_v63 = vpop.f32.mrf.mxu1  ;;  %v1375_v0 = vadd.f32 %v10951_v21, %v12637_v25 }
 0x4d6   : > { %12642 = vst [vmem:[#allocation58_spill] sm:$0xff] %v11313_v1  ;;  %v11315_v11 = vpack.c.bf16 %v4697_v17, %v4696_v53  ;;  %8036 = vmatpush3.bf16.xpose.msra.mxu0 %v10405_v42  ;;  %v3674_v41 = vadd.f32 %v11050_v14, %v3673_v63  ;;  %v12644_v42 = vld [vmem:[#allocation32_spill] sm:$0xff]  ;;  %v4702_v55 = vmax.f32 %v3682_v48, 0.0  ;;  %v2174_v53 = vpack.c.bf16 %v1885_v18, %v1884_v56 }
 0x4d7   : > { %v7664_v59 = vpop.f32.mrf.mxu1  ;;  %8037 = vmatprep.subr.bf16.mxu0 %v12516_v37  ;;  %v1376_v45 = vadd.f32 %v11327_v13, %v12644_v42  ;;  %v1377_v50 = vadd.f32 %v10958_v61, %v12644_v42  ;;  %v1886_v25 = vmax.f32 %v1374_v7, 0.0  ;;  %v1887_v46 = vmax.f32 %v1375_v0, 0.0 }
 0x4d8   : > { %12643 = vst [vmem:[#allocation59_spill] sm:$0xff] %v11315_v11  ;;  %v3685_v30 = vadd.f32 %v11050_v14, %v7664_v59  ;;  %v4700_v9 = vmax.f32 %v3674_v41, 0.0  ;;  %v1378_v56 = vadd.f32 %v10982_v52, %v12644_v42  ;;  %v1380_v0 = vadd.f32 %v10994_v47, %v12644_v42 }
 0x4d9   : > { %v3676_v16 = vpop.f32.mrf.mxu1  ;;  %v1888_v11 = vmax.f32 %v1376_v45, 0.0  ;;  %v1889_v1 = vmax.f32 %v1377_v50, 0.0  ;;  %v1381_v52 = vadd.f32 %v10999_v10, %v12644_v42 }
 0x4da   : > { %v4703_v40 = vmax.f32 %v3685_v30, 0.0  ;;  %v3677_v59 = vadd.f32 %v11050_v14, %v3676_v16  ;;  %v1379_v30 = vadd.f32 %v10989_v54, %v12644_v42  ;;  %v2175_v16 = vpack.c.bf16 %v1887_v46, %v1886_v25 }
 0x4db   : > { %v7667_v17 = vpop.f32.mrf.mxu1  ;;  %7762 = vmatmul.mubr.bf16.gmra.mxu1 %v2173_v51  ;;  %v2176_v51 = vpack.c.bf16 %v1889_v1, %v1888_v11 }
 0x4dc   : > { %v11334_v63 = vpack.c.bf16 %v4703_v40, %v4702_v55  ;;  %v4701_v19 = vmax.f32 %v3677_v59, 0.0  ;;  %7765 = vmatprep.mubr.bf16.mxu1 %v2174_v53  ;;  %v3698_v61 = vadd.f32 %v11050_v14, %v7667_v17  ;;  %v1890_v40 = vmax.f32 %v1378_v56, 0.0 }
 0x4dd   : > { %v3689_v21 = vpop.f32.mrf.mxu1  ;;  %v1891_v17 = vmax.f32 %v1379_v30, 0.0  ;;  %v1382_v56 = vadd.f32 %v11017_v12, %v12644_v42  ;;  %v1385_v30 = vadd.f32 %v11034_v49, %v12644_v42  ;;  %v12652_v49 = vld [vmem:[#allocation45_spill] sm:$0xff] }
 0x4de   : > { %12645 = vst [vmem:[#allocation32_spill] sm:$0xff] %v11334_v63  ;;  %v11336_v4 = vpack.c.bf16 %v4701_v19, %v4700_v9  ;;  %8038 = vmatpush3.bf16.xpose.msra.mxu0 %v10384_v31  ;;  %v3690_v18 = vadd.f32 %v11050_v14, %v3689_v21  ;;  %v4706_v31 = vmax.f32 %v3698_v61, 0.0  ;;  %v12649_v9 = vld [vmem:[#allocation43_spill] sm:$0xff]  ;;  %v1892_v19 = vmax.f32 %v1380_v0, 0.0 }
 0x4df   : > { %v7668_v48 = vpop.f32.mrf.mxu1  ;;  %8039 = vmatprep.subr.bf16.mxu0 %v12516_v37  ;;  %v1893_v21 = vmax.f32 %v1381_v52, 0.0  ;;  %v2177_v61 = vpack.c.bf16 %v1891_v17, %v1890_v40 }
 0x4e0   : > { %12646 = vst [vmem:[#allocation88_spill] sm:$0xff] %v11336_v4  ;;  %v3701_v41 = vadd.f32 %v11050_v14, %v7668_v48  ;;  %v4704_v59 = vmax.f32 %v3690_v18, 0.0  ;;  %v1383_v18 = vadd.f32 %v11022_v58, %v12644_v42  ;;  %v1894_v58 = vmax.f32 %v1382_v56, 0.0 }
 0x4e1   : > { %v3692_v7 = vpop.f32.mrf.mxu1  ;;  %v2178_v0 = vpack.c.bf16 %v1893_v21, %v1892_v19  ;;  %v1387_v19 = vadd.f32 %v11064_v2, %v12644_v42 }
 0x4e2   : > { %v4707_v45 = vmax.f32 %v3701_v41, 0.0  ;;  %v3693_v50 = vadd.f32 %v11050_v14, %v3692_v7  ;;  %v1384_v41 = vadd.f32 %v11029_v26, %v12644_v42 }
 0x4e3   : > { %v7671_v55 = vpop.f32.mrf.mxu1  ;;  %7766 = vmatmul.mubr.bf16.gmra.mxu1 %v2175_v16 }
 0x4e4   : > { %v11352_v53 = vpack.c.bf16 %v4707_v45, %v4706_v31  ;;  %v4705_v54 = vmax.f32 %v3693_v50, 0.0  ;;  %7769 = vmatprep.mubr.bf16.mxu1 %v2176_v51  ;;  %v3714_v47 = vadd.f32 %v11050_v14, %v7671_v55  ;;  %v1895_v55 = vmax.f32 %v1383_v18, 0.0 }
 0x4e5   : > { %v3705_v1 = vpop.f32.mrf.mxu1 }
 0x4e6   : > { %12647 = vst [vmem:[#allocation89_spill] sm:$0xff] %v11352_v53  ;;  %v11354_v11 = vpack.c.bf16 %v4705_v54, %v4704_v59  ;;  %8040 = vmatpush3.bf16.xpose.msra.mxu0 %v12649_v9  ;;  %v3706_v10 = vadd.f32 %v11050_v14, %v3705_v1  ;;  %v4710_v7 = vmax.f32 %v3714_v47, 0.0  ;;  %v1896_v59 = vmax.f32 %v1384_v41, 0.0 }
 0x4e7   : > { %v7672_v25 = vpop.f32.mrf.mxu1  ;;  %8041 = vmatprep.subr.bf16.mxu0 %v12516_v37  ;;  %v1897_v54 = vmax.f32 %v1385_v30, 0.0  ;;  %v1386_v1 = vadd.f32 %v11059_v33, %v12644_v42 }
 0x4e8   : > { %12648 = vst [vmem:[#allocation90_spill] sm:$0xff] %v11354_v11  ;;  %v3717_v46 = vadd.f32 %v11050_v14, %v7672_v25  ;;  %v4708_v45 = vmax.f32 %v3706_v10, 0.0  ;;  %v2179_v25 = vpack.c.bf16 %v1895_v55, %v1894_v58  ;;  %v1388_v10 = vadd.f32 %v11069_v43, %v12644_v42 }
 0x4e9   : > { %v3708_v48 = vpop.f32.mrf.mxu1  ;;  %v2180_v33 = vpack.c.bf16 %v1897_v54, %v1896_v59  ;;  %v1898_v41 = vmax.f32 %v1386_v1, 0.0  ;;  %v11403_v59 = vld [vmem:[%s9106_s22 + $0x78] sm:$0xff] }
 0x4ea   : > { %v4711_v16 = vmax.f32 %v3717_v46, 0.0  ;;  %v3709_v51 = vadd.f32 %v11050_v14, %v3708_v48  ;;  %v1389_v46 = vadd.f32 %v11074_v3, %v12644_v42  ;;  %v1391_v54 = vadd.f32 %v11403_v59, %v12644_v42 }
 0x4eb   : > { %v7675_v31 = vpop.f32.mrf.mxu1  ;;  %7770 = vmatmul.mubr.bf16.gmra.mxu1 %v2177_v61 }
 0x4ec   : > { %v11370_v50 = vpack.c.bf16 %v4711_v16, %v4710_v7  ;;  %v4709_v12 = vmax.f32 %v3709_v51, 0.0  ;;  %7773 = vmatprep.mubr.bf16.mxu1 %v2178_v0  ;;  %v3730_v26 = vadd.f32 %v11050_v14, %v7675_v31  ;;  %v1899_v16 = vmax.f32 %v1387_v19, 0.0  ;;  %v11410_v19 = vld [vmem:[%s9106_s22 + $0x8] sm:$0xff] }
 0x4ed   : > { %v3721_v52 = vpop.f32.mrf.mxu1  ;;  %v1900_v51 = vmax.f32 %v1388_v10, 0.0  ;;  %v1901_v0 = vmax.f32 %v1389_v46, 0.0 }
 0x4ee   : > { %12650 = vst [vmem:[#allocation43_spill] sm:$0xff] %v11370_v50  ;;  %v11372_v40 = vpack.c.bf16 %v4709_v12, %v4708_v45  ;;  %8042 = vmatpush3.bf16.xpose.msra.mxu0 %v12652_v49  ;;  %v3722_v47 = vadd.f32 %v11050_v14, %v3721_v52  ;;  %v4714_v61 = vmax.f32 %v3730_v26, 0.0  ;;  %v12655_v45 = vld [vmem:[#allocation24_spill] sm:$0xff]  ;;  %v11396_v52 = vld [vmem:[%s9106_s22 + $0x70] sm:$0xff]  ;;  %v2181_v49 = vpack.c.bf16 %v1899_v16, %v1898_v41 }
 0x4ef   : > { %v7676_v17 = vpop.f32.mrf.mxu1  ;;  %8043 = vmatprep.subr.bf16.mxu0 %v12516_v37  ;;  %v1390_v58 = vadd.f32 %v11396_v52, %v12644_v42  ;;  %v2182_v1 = vpack.c.bf16 %v1901_v0, %v1900_v51  ;;  %v11419_v42 = vld [vmem:[%s12446_s5] ss:$0 sm:$0xff] }
 0x4f0   : > { %12651 = vst [vmem:[#allocation91_spill] sm:$0xff] %v11372_v40  ;;  %v3733_v9 = vadd.f32 %v11050_v14, %v7676_v17  ;;  %v4712_v30 = vmax.f32 %v3722_v47, 0.0  ;;  %v12656_v47 = vld [vmem:[#allocation35_spill] sm:$0xff] }
 0x4f1   : > { %v3724_v21 = vpop.f32.mrf.mxu1  ;;  %v1902_v16 = vmax.f32 %v1390_v58, 0.0 }
 0x4f2   : > { %v4715_v48 = vmax.f32 %v3733_v9, 0.0  ;;  %v3725_v56 = vadd.f32 %v11050_v14, %v3724_v21  ;;  %v1392_v9 = vadd.f32 %v11327_v13, %v12656_v47  ;;  %v1393_v21 = vadd.f32 %v11410_v19, %v12656_v47 }
 0x4f3   : > { %v7679_v18 = vpop.f32.mrf.mxu1  ;;  %7774 = vmatmul.mubr.bf16.gmra.mxu1 %v2179_v25  ;;  %v6421_v25 = vadd.f32 %v10928_v20, %v11248_v34 }
 0x4f4   : > { %v11388_v7 = vpack.c.bf16 %v4715_v48, %v4714_v61  ;;  %v4713_v2 = vmax.f32 %v3725_v56, 0.0  ;;  %7777 = vmatprep.mubr.bf16.mxu1 %v2180_v33  ;;  %v3746_v31 = vadd.f32 %v11050_v14, %v7679_v18  ;;  %v1904_v51 = vmax.f32 %v1392_v9, 0.0 }
 0x4f5   : > { %v3737_v43 = vpop.f32.mrf.mxu1  ;;  %v1905_v0 = vmax.f32 %v1393_v21, 0.0 }
 0x4f6   : > { %12653 = vst [vmem:[#allocation45_spill] sm:$0xff] %v11388_v7  ;;  %v11390_v3 = vpack.c.bf16 %v4713_v2, %v4712_v30  ;;  %8044 = vmatpush3.bf16.xpose.msra.mxu0 %v12655_v45  ;;  %v3738_v55 = vadd.f32 %v11050_v14, %v3737_v43  ;;  %v4718_v10 = vmax.f32 %v3746_v31, 0.0  ;;  %v1903_v43 = vmax.f32 %v1391_v54, 0.0 }
 0x4f7   : > { %v7680_v12 = vpop.f32.mrf.mxu1  ;;  %8045 = vmatprep.subr.bf16.mxu0 %v12516_v37 }
 0x4f8   : > { %12654 = vst [vmem:[#allocation92_spill] sm:$0xff] %v11390_v3  ;;  %v3749_v26 = vadd.f32 %v11050_v14, %v7680_v12  ;;  %v5283_v14 = vpop.f32.mrf.mxu0  ;;  %v4716_v18 = vmax.f32 %v3738_v55, 0.0  ;;  %v2183_v21 = vpack.c.bf16 %v1903_v43, %v1902_v16 }
 0x4f9   : > { %v3740_v17 = vpop.f32.mrf.mxu1  ;;  %v6422_v48 = vadd.f32 %v10928_v20, %v5283_v14  ;;  %v11439_v14 = vld [vmem:[%s9106_s22 + $0x18] sm:$0xff] }
 0x4fa   : > { %v4719_v46 = vmax.f32 %v3749_v26, 0.0  ;;  %v3741_v61 = vadd.f32 %v11419_v42, %v3740_v17  ;;  %v7911_v33 = vpop.f32.mrf.mxu0  ;;  %v12659_v26 = vld [vmem:[#allocation62_spill] sm:$0xff]  ;;  %v11434_v17 = vld [vmem:[%s9106_s22 + $0x10] sm:$0xff] }
 0x4fb   : > { %v7683_v56 = vpop.f32.mrf.mxu1  ;;  %7778 = vmatmul.mubr.bf16.gmra.mxu1 %v2181_v49  ;;  %v6484_v30 = vcombine.low %v6421_v25, %v6422_v48  ;;  %v2184_v25 = vpack.c.bf16 %v1905_v0, %v1904_v51 }
 0x4fc   : > { %v11423_v41 = vpack.c.bf16 %v4719_v46, %v4718_v10  ;;  %v4717_v34 = vmax.f32 %v3741_v61, 0.0  ;;  %7781 = vmatprep.mubr.bf16.mxu1 %v2182_v1  ;;  %v5286_v31 = vpop.f32.mrf.mxu0  ;;  %v3762_v12 = vadd.f32 %v11419_v42, %v7683_v56  ;;  %v1394_v1 = vadd.f32 %v11434_v17, %v12656_v47  ;;  %v11444_v46 = vld [vmem:[%s9106_s22 + $0x20] sm:$0xff] }
 0x4fd   : > { %v3753_v2 = vpop.f32.mrf.mxu1  ;;  %6516 = vst [vmem:[%s10967_s12 + $0x8] sm:$0xff] %v6484_v30  ;;  %v1395_v10 = vadd.f32 %v11439_v14, %v12656_v47  ;;  %v1396_v61 = vadd.f32 %v11444_v46, %v12656_v47 }
 0x4fe   : > { %12657 = vst [vmem:[#allocation24_spill] sm:$0xff] %v11423_v41  ;;  %v11425_v45 = vpack.c.bf16 %v4717_v34, %v4716_v18  ;;  %8046 = vmatpush3.bf16.xpose.msra.mxu0 %v12659_v26  ;;  %v7912_v49 = vpop.f32.mrf.mxu0  ;;  %v3754_v58 = vadd.f32 %v11419_v42, %v3753_v2  ;;  %v4722_v48 = vmax.f32 %v3762_v12, 0.0  ;;  %v11450_v18 = vld [vmem:[%s9106_s22 + $0x28] sm:$0xff]  ;;  %v1906_v0 = vmax.f32 %v1394_v1, 0.0 }
 0x4ff   : > { %v7684_v55 = vpop.f32.mrf.mxu1  ;;  %8047 = vmatprep.subr.bf16.mxu0 %v12516_v37  ;;  %v1397_v34 = vadd.f32 %v11450_v18, %v12656_v47  ;;  %v1907_v31 = vmax.f32 %v1395_v10, 0.0  ;;  %v1908_v49 = vmax.f32 %v1396_v61, 0.0 }
 0x500   : > { %12658 = vst [vmem:[#allocation35_spill] sm:$0xff] %v11425_v45  ;;  %v3765_v54 = vadd.f32 %v11419_v42, %v7684_v55  ;;  %v4720_v2 = vmax.f32 %v3754_v58, 0.0  ;;  %v12662_v55 = vld [vmem:[#allocation63_spill] sm:$0xff] }
 0x501   : > { %v3756_v9 = vpop.f32.mrf.mxu1 }
 0x502   : > { %v4723_v56 = vmax.f32 %v3765_v54, 0.0  ;;  %v3757_v33 = vadd.f32 %v11419_v42, %v3756_v9  ;;  %v1909_v54 = vmax.f32 %v1397_v34, 0.0 }
 0x503   : > { %v7687_v30 = vpop.f32.mrf.mxu1  ;;  %7782 = vmatmul.mubr.bf16.gmra.mxu1 %v2183_v21 }
 0x504   : > { %v11454_v16 = vpack.c.bf16 %v4723_v56, %v4722_v48  ;;  %v4721_v43 = vmax.f32 %v3757_v33, 0.0  ;;  %7785 = vmatprep.mubr.bf16.mxu1 %v2184_v25  ;;  %v3778_v26 = vadd.f32 %v11419_v42, %v7687_v30  ;;  %v11464_v25 = vld [vmem:[%s9106_s22 + $0x30] sm:$0xff]  ;;  %v2185_v48 = vpack.c.bf16 %v1907_v31, %v1906_v0  ;;  %v11469_v56 = vld [vmem:[%s9106_s22 + $0x38] sm:$0xff]  ;;  %v11474_v33 = vld [vmem:[%s9106_s22 + $0x40] sm:$0xff] }
 0x505   : > { %v3769_v51 = vpop.f32.mrf.mxu1  ;;  %v1398_v1 = vadd.f32 %v11464_v25, %v12656_v47  ;;  %v1399_v61 = vadd.f32 %v11469_v56, %v12656_v47  ;;  %v1400_v34 = vadd.f32 %v11474_v33, %v12656_v47  ;;  %v11479_v30 = vld [vmem:[%s9106_s22 + $0x48] sm:$0xff]  ;;  %v2186_v0 = vpack.c.bf16 %v1909_v54, %v1908_v49 }
 0x506   : > { %12660 = vst [vmem:[#allocation62_spill] sm:$0xff] %v11454_v16  ;;  %v11456_v12 = vpack.c.bf16 %v4721_v43, %v4720_v2  ;;  %8048 = vmatpush3.bf16.xpose.msra.mxu0 %v12662_v55  ;;  %v3770_v9 = vadd.f32 %v11419_v42, %v3769_v51  ;;  %v1401_v2 = vadd.f32 %v11479_v30, %v12656_v47  ;;  %v4726_v43 = vmax.f32 %v3778_v26, 0.0 }
 0x507   : > { %v7688_v58 = vpop.f32.mrf.mxu1  ;;  %8053 = vmatprep.subr.bf16.mxu0 %v12516_v37  ;;  %v1910_v53 = vmax.f32 %v1398_v1, 0.0  ;;  %v1911_v40 = vmax.f32 %v1399_v61, 0.0  ;;  %v1912_v49 = vmax.f32 %v1400_v34, 0.0  ;;  %v11502_v61 = vld [vmem:[%s9106_s22 + $0x58] sm:$0xff] }
 0x508   : > { %12661 = vst [vmem:[#allocation93_spill] sm:$0xff] %v11456_v12  ;;  %v3781_v21 = vadd.f32 %v11419_v42, %v7688_v58  ;;  %v4724_v58 = vmax.f32 %v3770_v9, 0.0  ;;  %v1913_v54 = vmax.f32 %v1401_v2, 0.0  ;;  %v1403_v34 = vadd.f32 %v11502_v61, %v12656_v47  ;;  %v11507_v2 = vld [vmem:[%s9106_s22 + $0x60] sm:$0xff] }
 0x509   : > { %v3772_v10 = vpop.f32.mrf.mxu1 }
 0x50a   : > { %v4727_v51 = vmax.f32 %v3781_v21, 0.0  ;;  %v3773_v55 = vadd.f32 %v11419_v42, %v3772_v10  ;;  %v1915_v41 = vmax.f32 %v1403_v34, 0.0  ;;  %v12666_v34 = vld [vmem:[#allocation36_spill] sm:$0xff] }
 0x50b   : > { %v7691_v31 = vpop.f32.mrf.mxu1  ;;  %7786 = vmatmul.mubr.bf16.gmra.mxu1 %v2185_v48 }
 0x50c   : > { %v11484_v4 = vpack.c.bf16 %v4727_v51, %v4726_v43  ;;  %v4725_v63 = vmax.f32 %v3773_v55, 0.0  ;;  %7789 = vmatprep.mubr.bf16.mxu1 %v2186_v0  ;;  %v3794_v26 = vadd.f32 %v11419_v42, %v7691_v31  ;;  %v1404_v43 = vadd.f32 %v11507_v2, %v12656_v47 }
 0x50d   : > { %v3785_v11 = vpop.f32.mrf.mxu1  ;;  %8050 = vmatmul.mubr.bf16.vlgmr.msra.gmra.mxu0 %v11292_v24 }
 0x50e   : > { %v11487_v50 = vpack.c.bf16 %v4725_v63, %v4724_v58  ;;  %8054 = vmatpush3.bf16.xpose.msra.mxu0 %v10480_v28  ;;  %8069 = vmatprep.mubr.msk.bf16.mxu0 %vm8894_vm0, %v12516_v37  ;;  %v3786_v21 = vadd.f32 %v11419_v42, %v3785_v11  ;;  %v11497_v63 = vld [vmem:[%s9106_s22 + $0x50] sm:$0xff]  ;;  %v2187_v28 = vpack.c.bf16 %v1911_v40, %v1910_v53  ;;  %v11512_v11 = vld [vmem:[%s9106_s22 + $0x68] sm:$0xff]  ;;  %v4730_v55 = vmax.f32 %v3794_v26, 0.0 }
 0x50f   : > { %v7692_v9 = vpop.f32.mrf.mxu1  ;;  %8055 = vmatprep.subr.bf16.mxu0 %v12516_v37  ;;  %v1402_v10 = vadd.f32 %v11497_v63, %v12656_v47  ;;  %v1405_v51 = vadd.f32 %v11512_v11, %v12656_v47  ;;  %v2188_v53 = vpack.c.bf16 %v1913_v54, %v1912_v49  ;;  %v1916_v12 = vmax.f32 %v1404_v43, 0.0 }
 0x510   : > { %12663 = vst [vmem:[#allocation63_spill] sm:$0xff] %v11487_v50  ;;  %v3797_v1 = vadd.f32 %v11419_v42, %v7692_v9  ;;  %v4728_v58 = vmax.f32 %v3786_v21, 0.0  ;;  %v1406_v49 = vadd.f32 %v11396_v52, %v12656_v47  ;;  %v1408_v43 = vadd.f32 %v11327_v13, %v12666_v34 }
 0x511   : > { %v3788_v48 = vpop.f32.mrf.mxu1  ;;  %v1914_v45 = vmax.f32 %v1402_v10, 0.0  ;;  %v1917_v16 = vmax.f32 %v1405_v51, 0.0  ;;  %v1407_v10 = vadd.f32 %v11403_v59, %v12656_v47 }
 0x512   : > { %v4731_v0 = vmax.f32 %v3797_v1, 0.0  ;;  %v3789_v31 = vadd.f32 %v11419_v42, %v3788_v48 }
 0x513   : > { %v7695_v40 = vpop.f32.mrf.mxu1  ;;  %7790 = vmatmul.mubr.bf16.gmra.mxu1 %v2187_v28  ;;  %v2190_v28 = vpack.c.bf16 %v1917_v16, %v1916_v12 }
 0x514   : > { %v11517_v9 = vpack.c.bf16 %v4731_v0, %v4730_v55  ;;  %v4729_v3 = vmax.f32 %v3789_v31, 0.0  ;;  %7793 = vmatprep.mubr.bf16.mxu1 %v2188_v53  ;;  %v3810_v26 = vadd.f32 %v11419_v42, %v7695_v40  ;;  %v1409_v0 = vadd.f32 %v11410_v19, %v12666_v34 }
 0x515   : > { %v3801_v7 = vpop.f32.mrf.mxu1 }
 0x516   : > { %12664 = vst [vmem:[#allocation94_spill] sm:$0xff] %v11517_v9  ;;  %v11519_v50 = vpack.c.bf16 %v4729_v3, %v4728_v58  ;;  %8056 = vmatpush3.bf16.xpose.msra.mxu0 %v10482_v32  ;;  %v3802_v54 = vadd.f32 %v11419_v42, %v3801_v7  ;;  %v2189_v3 = vpack.c.bf16 %v1915_v41, %v1914_v45  ;;  %v4734_v32 = vmax.f32 %v3810_v26, 0.0 }
 0x517   : > { %v7696_v1 = vpop.f32.mrf.mxu1  ;;  %8057 = vmatprep.subr.bf16.mxu0 %v12516_v37  ;;  %v1918_v7 = vmax.f32 %v1406_v49, 0.0  ;;  %v1919_v41 = vmax.f32 %v1407_v10, 0.0  ;;  %v1920_v58 = vmax.f32 %v1408_v43, 0.0  ;;  %v1921_v26 = vmax.f32 %v1409_v0, 0.0 }
 0x518   : > { %12665 = vst [vmem:[#allocation95_spill] sm:$0xff] %v11519_v50  ;;  %v3813_v21 = vadd.f32 %v11419_v42, %v7696_v1  ;;  %v4732_v53 = vmax.f32 %v3802_v54, 0.0  ;;  %v1410_v10 = vadd.f32 %v11434_v17, %v12666_v34 }
 0x519   : > { %v3804_v48 = vpop.f32.mrf.mxu1 }
 0x51a   : > { %v4735_v51 = vmax.f32 %v3813_v21, 0.0  ;;  %v3805_v55 = vadd.f32 %v11419_v42, %v3804_v48  ;;  %v2191_v21 = vpack.c.bf16 %v1919_v41, %v1918_v7  ;;  %v1922_v41 = vmax.f32 %v1410_v10, 0.0 }
 0x51b   : > { %v7699_v31 = vpop.f32.mrf.mxu1  ;;  %7794 = vmatmul.mubr.bf16.gmra.mxu1 %v2189_v3  ;;  %v1411_v3 = vadd.f32 %v11439_v14, %v12666_v34 }
 0x51c   : > { %v11535_v40 = vpack.c.bf16 %v4735_v51, %v4734_v32  ;;  %v4733_v47 = vmax.f32 %v3805_v55, 0.0  ;;  %7797 = vmatprep.mubr.bf16.mxu1 %v2190_v28  ;;  %v3826_v12 = vadd.f32 %v11419_v42, %v7699_v31  ;;  %v1413_v28 = vadd.f32 %v11450_v18, %v12666_v34 }
 0x51d   : > { %v3817_v45 = vpop.f32.mrf.mxu1  ;;  %v2192_v55 = vpack.c.bf16 %v1921_v26, %v1920_v58 }
 0x51e   : > { %12667 = vst [vmem:[#allocation36_spill] sm:$0xff] %v11535_v40  ;;  %v11537_v16 = vpack.c.bf16 %v4733_v47, %v4732_v53  ;;  %8058 = vmatpush3.bf16.xpose.msra.mxu0 %v10462_v29  ;;  %v3818_v49 = vadd.f32 %v11419_v42, %v3817_v45  ;;  %v1412_v29 = vadd.f32 %v11444_v46, %v12666_v34  ;;  %v4738_v43 = vmax.f32 %v3826_v12, 0.0 }
 0x51f   : > { %v7700_v1 = vpop.f32.mrf.mxu1  ;;  %8059 = vmatprep.subr.bf16.mxu0 %v12516_v37  ;;  %v1923_v45 = vmax.f32 %v1411_v3, 0.0  ;;  %v1925_v50 = vmax.f32 %v1413_v28, 0.0  ;;  %v1415_v3 = vadd.f32 %v11469_v56, %v12666_v34 }
 0x520   : > { %12668 = vst [vmem:[#allocation96_spill] sm:$0xff] %v11537_v16  ;;  %v3829_v54 = vadd.f32 %v11419_v42, %v7700_v1  ;;  %v4736_v31 = vmax.f32 %v3818_v49, 0.0  ;;  %v1924_v1 = vmax.f32 %v1412_v29, 0.0  ;;  %v1414_v49 = vadd.f32 %v11464_v25, %v12666_v34 }
 0x521   : > { %v3820_v48 = vpop.f32.mrf.mxu1  ;;  %v1416_v29 = vadd.f32 %v11474_v33, %v12666_v34 }
 0x522   : > { %v4739_v32 = vmax.f32 %v3829_v54, 0.0  ;;  %v3821_v51 = vadd.f32 %v11419_v42, %v3820_v48  ;;  %v2193_v48 = vpack.c.bf16 %v1923_v45, %v1922_v41  ;;  %v2194_v10 = vpack.c.bf16 %v1925_v50, %v1924_v1 }
 0x523   : > { %v7703_v0 = vpop.f32.mrf.mxu1  ;;  %7798 = vmatmul.mubr.bf16.gmra.mxu1 %v2191_v21  ;;  %v1928_v1 = vmax.f32 %v1416_v29, 0.0 }
 0x524   : > { %v11553_v7 = vpack.c.bf16 %v4739_v32, %v4738_v43  ;;  %v4737_v53 = vmax.f32 %v3821_v51, 0.0  ;;  %7801 = vmatprep.mubr.bf16.mxu1 %v2192_v55  ;;  %v3842_v12 = vadd.f32 %v11419_v42, %v7703_v0  ;;  %v1417_v32 = vadd.f32 %v11479_v30, %v12666_v34 }
 0x525   : > { %v3833_v47 = vpop.f32.mrf.mxu1 }
 0x526   : > { %12669 = vst [vmem:[#allocation97_spill] sm:$0xff] %v11553_v7  ;;  %v11555_v9 = vpack.c.bf16 %v4737_v53, %v4736_v31  ;;  %8060 = vmatpush3.bf16.xpose.msra.mxu0 %v10464_v22  ;;  %v3834_v58 = vadd.f32 %v11419_v42, %v3833_v47  ;;  %v4742_v22 = vmax.f32 %v3842_v12, 0.0  ;;  %v1926_v53 = vmax.f32 %v1414_v49, 0.0 }
 0x527   : > { %v7704_v54 = vpop.f32.mrf.mxu1  ;;  %8061 = vmatprep.subr.bf16.mxu0 %v12516_v37  ;;  %v1927_v47 = vmax.f32 %v1415_v3, 0.0  ;;  %v1929_v12 = vmax.f32 %v1417_v32, 0.0  ;;  %v1421_v3 = vadd.f32 %v11512_v11, %v12666_v34 }
 0x528   : > { %12670 = vst [vmem:[#allocation98_spill] sm:$0xff] %v11555_v9  ;;  %v3845_v26 = vadd.f32 %v11419_v42, %v7704_v54  ;;  %v4740_v55 = vmax.f32 %v3834_v58, 0.0 }
 0x529   : > { %v3836_v21 = vpop.f32.mrf.mxu1  ;;  %v1933_v16 = vmax.f32 %v1421_v3, 0.0  ;;  %v12674_v3 = vld [vmem:[#allocation38_spill] sm:$0xff] }
 0x52a   : > { %v4743_v28 = vmax.f32 %v3845_v26, 0.0  ;;  %v3837_v43 = vadd.f32 %v11419_v42, %v3836_v21  ;;  %v1418_v21 = vadd.f32 %v11497_v63, %v12666_v34 }
 0x52b   : > { %v7707_v51 = vpop.f32.mrf.mxu1  ;;  %7802 = vmatmul.mubr.bf16.gmra.mxu1 %v2193_v48  ;;  %v2195_v48 = vpack.c.bf16 %v1927_v47, %v1926_v53 }
 0x52c   : > { %v11571_v0 = vpack.c.bf16 %v4743_v28, %v4742_v22  ;;  %v4741_v31 = vmax.f32 %v3837_v43, 0.0  ;;  %7805 = vmatprep.mubr.bf16.mxu1 %v2194_v10  ;;  %v3858_v45 = vadd.f32 %v11419_v42, %v7707_v51  ;;  %v1419_v10 = vadd.f32 %v11502_v61, %v12666_v34 }
 0x52d   : > { %v3849_v50 = vpop.f32.mrf.mxu1  ;;  %v2196_v43 = vpack.c.bf16 %v1929_v12, %v1928_v1  ;;  %v1930_v53 = vmax.f32 %v1418_v21, 0.0  ;;  %v1422_v1 = vadd.f32 %v11396_v52, %v12666_v34  ;;  %v1423_v21 = vadd.f32 %v11403_v59, %v12666_v34 }
 0x52e   : > { %12671 = vst [vmem:[#allocation99_spill] sm:$0xff] %v11571_v0  ;;  %v11573_v41 = vpack.c.bf16 %v4741_v31, %v4740_v55  ;;  %8062 = vmatpush3.bf16.xpose.msra.mxu0 %v10444_v6  ;;  %v3850_v58 = vadd.f32 %v11419_v42, %v3849_v50  ;;  %v1420_v6 = vadd.f32 %v11507_v2, %v12666_v34  ;;  %v4746_v29 = vmax.f32 %v3858_v45, 0.0 }
 0x52f   : > { %v7708_v54 = vpop.f32.mrf.mxu1  ;;  %8063 = vmatprep.subr.bf16.mxu0 %v12516_v37  ;;  %v1931_v47 = vmax.f32 %v1419_v10, 0.0 }
 0x530   : > { %12672 = vst [vmem:[#allocation100_spill] sm:$0xff] %v11573_v41  ;;  %v3861_v26 = vadd.f32 %v11419_v42, %v7708_v54  ;;  %v4744_v51 = vmax.f32 %v3850_v58, 0.0  ;;  %v1932_v54 = vmax.f32 %v1420_v6, 0.0 }
 0x531   : > { %v3852_v49 = vpop.f32.mrf.mxu1  ;;  %v2197_v10 = vpack.c.bf16 %v1931_v47, %v1930_v53  ;;  %v1935_v53 = vmax.f32 %v1423_v21, 0.0 }
 0x532   : > { %v4747_v22 = vmax.f32 %v3861_v26, 0.0  ;;  %v3853_v28 = vadd.f32 %v11419_v42, %v3852_v49  ;;  %v12673_v26 = vld [vmem:[#allocation25_spill] sm:$0xff]  ;;  %v2198_v6 = vpack.c.bf16 %v1933_v16, %v1932_v54 }
 0x533   : > { %v7711_v32 = vpop.f32.mrf.mxu1  ;;  %7806 = vmatmul.mubr.bf16.gmra.mxu1 %v2195_v48 }
 0x534   : > { %v11589_v55 = vpack.c.bf16 %v4747_v22, %v4746_v29  ;;  %v4745_v31 = vmax.f32 %v3853_v28, 0.0  ;;  %7809 = vmatprep.mubr.bf16.mxu1 %v2196_v43  ;;  %v3874_v45 = vadd.f32 %v11419_v42, %v7711_v32  ;;  %v1424_v29 = vadd.f32 %v11327_v13, %v12674_v3  ;;  %v11604_v22 = vpop.f32.mrf.mxu0 }
 0x535   : > { %v3865_v50 = vpop.f32.mrf.mxu1 }
 0x536   : > { %v11591_v40 = vpack.c.bf16 %v4745_v31, %v4744_v51  ;;  %8064 = vmatpush3.bf16.xpose.msra.mxu0 %v12673_v26  ;;  %v3866_v12 = vadd.f32 %v11419_v42, %v3865_v50  ;;  %v4750_v28 = vmax.f32 %v3874_v45, 0.0  ;;  %v1425_v51 = vadd.f32 %v11410_v19, %v12674_v3  ;;  %v7931_v26 = vpop.f32.mrf.mxu0 }
 0x537   : > { %v7712_v49 = vpop.f32.mrf.mxu1  ;;  %8065 = vmatprep.subr.bf16.mxu0 %v12516_v37  ;;  %v1934_v50 = vmax.f32 %v1422_v1, 0.0 }
 0x538   : > { %v3877_v58 = vadd.f32 %v11419_v42, %v7712_v49  ;;  %v4748_v34 = vmax.f32 %v3866_v12, 0.0  ;;  %v5326_v47 = vpop.f32.mrf.mxu0  ;;  %v1937_v19 = vmax.f32 %v1425_v51, 0.0 }
 0x539   : > { %v3868_v48 = vpop.f32.mrf.mxu1 }
 0x53a   : > { %v4751_v43 = vmax.f32 %v3877_v58, 0.0  ;;  %v3869_v32 = vadd.f32 %v11419_v42, %v3868_v48  ;;  %v12675_v58 = vld [vmem:[#allocation44_spill] sm:$0xff]  ;;  %v1936_v48 = vmax.f32 %v1424_v29, 0.0  ;;  %v7932_v1 = vpop.f32.mrf.mxu0  ;;  %v1428_v29 = vadd.f32 %v11444_v46, %v12674_v3 }
 0x53b   : > { %v7715_v31 = vpop.f32.mrf.mxu1  ;;  %7810 = vmatmul.mubr.bf16.gmra.mxu1 %v2197_v10 }
 0x53c   : > { %v11609_v49 = vpack.c.bf16 %v4751_v43, %v4750_v28  ;;  %v4749_v16 = vmax.f32 %v3869_v32, 0.0  ;;  %7813 = vmatprep.mubr.bf16.mxu1 %v2198_v6  ;;  %v3890_v45 = vadd.f32 %v11419_v42, %v7715_v31  ;;  %v2199_v6 = vpack.c.bf16 %v1935_v53, %v1934_v50 }
 0x53d   : > { %v3881_v13 = vpop.f32.mrf.mxu1  ;;  %v1426_v28 = vadd.f32 %v11434_v17, %v12674_v3  ;;  %v1427_v43 = vadd.f32 %v11439_v14, %v12674_v3  ;;  %v1429_v32 = vadd.f32 %v11450_v18, %v12674_v3  ;;  %v12676_v18 = vld [vmem:[#allocation64_spill] sm:$0xff] }
 0x53e   : > { %v11611_v54 = vpack.c.bf16 %v4749_v16, %v4748_v34  ;;  %8066 = vmatpush3.bf16.xpose.msra.mxu0 %v12675_v58  ;;  %v3882_v12 = vadd.f32 %v11419_v42, %v3881_v13  ;;  %v4754_v51 = vmax.f32 %v3890_v45, 0.0  ;;  %v2200_v34 = vpack.c.bf16 %v1937_v19, %v1936_v48 }
 0x53f   : > { %v7716_v9 = vpop.f32.mrf.mxu1  ;;  %8067 = vmatprep.subr.bf16.mxu0 %v12516_v37  ;;  %v1938_v14 = vmax.f32 %v1426_v28, 0.0  ;;  %v1939_v13 = vmax.f32 %v1427_v43, 0.0  ;;  %v1940_v45 = vmax.f32 %v1428_v29, 0.0  ;;  %v1941_v58 = vmax.f32 %v1429_v32, 0.0 }
 0x540   : > { %v3893_v10 = vadd.f32 %v11419_v42, %v7716_v9  ;;  %v4752_v50 = vmax.f32 %v3882_v12, 0.0  ;;  %v1430_v12 = vadd.f32 %v11464_v25, %v12674_v3  ;;  %v1432_v28 = vadd.f32 %v11474_v33, %v12674_v3 }
 0x541   : > { %v3884_v21 = vpop.f32.mrf.mxu1  ;;  %v1433_v43 = vadd.f32 %v11479_v30, %v12674_v3 }
 0x542   : > { %v4755_v31 = vmax.f32 %v3893_v10, 0.0  ;;  %v3885_v26 = vadd.f32 %v11419_v42, %v3884_v21  ;;  %v1431_v21 = vadd.f32 %v11469_v56, %v12674_v3  ;;  %v1942_v56 = vmax.f32 %v1430_v12, 0.0 }
 0x543   : > { %v7719_v9 = vpop.f32.mrf.mxu1  ;;  %7814 = vmatmul.mubr.bf16.gmra.mxu1 %v2199_v6  ;;  %v2201_v6 = vpack.c.bf16 %v1939_v13, %v1938_v14  ;;  %v12677_v13 = vld [vmem:[#allocation47_spill] sm:$0xff]  ;;  %v1436_v12 = vadd.f32 %v11507_v2, %v12674_v3 }
 0x544   : > { %v11627_v16 = vpack.c.bf16 %v4755_v31, %v4754_v51  ;;  %v4753_v17 = vmax.f32 %v3885_v26, 0.0  ;;  %7817 = vmatprep.mubr.bf16.mxu1 %v2200_v34  ;;  %v3906_v46 = vadd.f32 %v11419_v42, %v7719_v9  ;;  %v2202_v31 = vpack.c.bf16 %v1941_v58, %v1940_v45 }
 0x545   : > { %v3897_v53 = vpop.f32.mrf.mxu1  ;;  %v1943_v33 = vmax.f32 %v1431_v21, 0.0  ;;  %v1434_v45 = vadd.f32 %v11497_v63, %v12674_v3 }
 0x546   : > { %v11629_v47 = vpack.c.bf16 %v4753_v17, %v4752_v50  ;;  %8068 = vmatpush3.bf16.xpose.msra.mxu0 %v12676_v18  ;;  %v3898_v48 = vadd.f32 %v11419_v42, %v3897_v53  ;;  %v4758_v29 = vmax.f32 %v3906_v46, 0.0  ;;  %v1944_v17 = vmax.f32 %v1432_v28, 0.0 }
 0x547   : > { %v7720_v1 = vpop.f32.mrf.mxu1  ;;  %8073 = vmatprep.subr.bf16.mxu0 %v12516_v37  ;;  %v1945_v53 = vmax.f32 %v1433_v43, 0.0  ;;  %v1437_v28 = vadd.f32 %v11512_v11, %v12674_v3 }
 0x548   : > { %v3909_v19 = vadd.f32 %v11419_v42, %v7720_v1  ;;  %v4756_v34 = vmax.f32 %v3898_v48, 0.0  ;;  %v2203_v1 = vpack.c.bf16 %v1943_v33, %v1942_v56 }
 0x549   : > { %v3900_v10 = vpop.f32.mrf.mxu1  ;;  %v2204_v48 = vpack.c.bf16 %v1945_v53, %v1944_v17  ;;  %v1438_v53 = vadd.f32 %v11396_v52, %v12674_v3 }
 0x54a   : > { %v4759_v32 = vmax.f32 %v3909_v19, 0.0  ;;  %v3901_v51 = vadd.f32 %v11419_v42, %v3900_v10  ;;  %v1435_v19 = vadd.f32 %v11502_v61, %v12674_v3  ;;  %v1946_v61 = vmax.f32 %v1434_v45, 0.0 }
 0x54b   : > { %v7723_v26 = vpop.f32.mrf.mxu1  ;;  %7818 = vmatmul.mubr.bf16.gmra.mxu1 %v2201_v6 }
 0x54c   : > { %v11645_v25 = vpack.c.bf16 %v4759_v32, %v4758_v29  ;;  %v4757_v9 = vmax.f32 %v3901_v51, 0.0  ;;  %7821 = vmatprep.mubr.bf16.mxu1 %v2202_v31  ;;  %v3922_v14 = vadd.f32 %v11419_v42, %v7723_v26  ;;  %v1947_v31 = vmax.f32 %v1435_v19, 0.0 }
 0x54d   : > { %v3913_v50 = vpop.f32.mrf.mxu1  ;;  %8070 = vmatmul.mubr.bf16.vlgmr.msra.gmra.mxu0 %v11292_v24 }
 0x54e   : > { %v11648_v30 = vpack.c.bf16 %v4757_v9, %v4756_v34  ;;  %8074 = vmatpush3.bf16.xpose.msra.mxu0 %v12677_v13  ;;  %8089 = vmatprep.mubr.msk.bf16.mxu0 %vm8894_vm0, %v12516_v37  ;;  %v3914_v18 = vadd.f32 %v11419_v42, %v3913_v50  ;;  %v4762_v10 = vmax.f32 %v3922_v14, 0.0  ;;  %v12681_v34 = vld [vmem:[#allocation69_spill] sm:$0xff]  ;;  %v1948_v9 = vmax.f32 %v1436_v12, 0.0  ;;  %v12685_v12 = vld [vmem:[#allocation46_spill] sm:$0xff] }
 0x54f   : > { %v7724_v46 = vpop.f32.mrf.mxu1  ;;  %8075 = vmatprep.subr.bf16.mxu0 %v12516_v37  ;;  %v1949_v50 = vmax.f32 %v1437_v28, 0.0  ;;  %v2205_v17 = vpack.c.bf16 %v1947_v31, %v1946_v61  ;;  %v1439_v14 = vadd.f32 %v11403_v59, %v12674_v3  ;;  %v12689_v61 = vld [vmem:[#allocation68_spill] sm:$0xff] }
 0x550   : > { %v3925_v24 = vadd.f32 %v11419_v42, %v7724_v46  ;;  %v4760_v29 = vmax.f32 %v3914_v18, 0.0 }
 0x551   : > { %v3916_v58 = vpop.f32.mrf.mxu1  ;;  %v2206_v18 = vpack.c.bf16 %v1949_v50, %v1948_v9 }
 0x552   : > { %v4763_v6 = vmax.f32 %v3925_v24, 0.0  ;;  %v3917_v21 = vadd.f32 %v11419_v42, %v3916_v58 }
 0x553   : > { %v7727_v43 = vpop.f32.mrf.mxu1  ;;  %7822 = vmatmul.mubr.bf16.gmra.mxu1 %v2203_v1  ;;  %v1950_v1 = vmax.f32 %v1438_v53, 0.0 }
 0x554   : > { %v11666_v63 = vpack.c.bf16 %v4763_v6, %v4762_v10  ;;  %v4761_v32 = vmax.f32 %v3917_v21, 0.0  ;;  %7825 = vmatprep.mubr.bf16.mxu1 %v2204_v48  ;;  %v3938_v2 = vadd.f32 %v11419_v42, %v7727_v43  ;;  %v1951_v48 = vmax.f32 %v1439_v14, 0.0 }
 0x555   : > { %v11668_v51 = vpop.f32.mrf.mxu1 }
 0x556   : > { %12678 = vst [vmem:[#allocation25_spill] sm:$0xff] %v11666_v63  ;;  %12679 = vst [vmem:[#allocation38_spill] sm:$0xff] %v11668_v51  ;;  %v11670_v26 = vpack.c.bf16 %v4761_v32, %v4760_v29  ;;  %8076 = vmatpush3.bf16.xpose.msra.mxu0 %v12681_v34  ;;  %v4766_v13 = vmax.f32 %v3938_v2, 0.0  ;;  %v2207_v10 = vpack.c.bf16 %v1951_v48, %v1950_v1 }
 0x557   : > { %v7728_v11 = vpop.f32.mrf.mxu1  ;;  %8077 = vmatprep.subr.bf16.mxu0 %v12516_v37 }
 0x558   : > { %12680 = vst [vmem:[#allocation44_spill] sm:$0xff] %v11670_v26  ;;  %v3941_v56 = vadd.f32 %v11419_v42, %v7728_v11 }
 0x559   : > { %v11676_v33 = vpop.f32.mrf.mxu1 }
 0x55a   : > { %12682 = vst [vmem:[#allocation64_spill] sm:$0xff] %v11676_v33  ;;  %v4767_v46 = vmax.f32 %v3941_v56, 0.0  ;;  %v11707_v56 = vld [vmem:[%s12447_s6] sm:$0x3] }
 0x55b   : > { %v7731_v24 = vpop.f32.mrf.mxu1  ;;  %7826 = vmatmul.mubr.bf16.gmra.mxu1 %v2205_v17 }
 0x55c   : > { %v11682_v45 = vpack.c.bf16 %v4767_v46, %v4766_v13  ;;  %7829 = vmatprep.mubr.bf16.mxu1 %v2206_v18  ;;  %v3954_v19 = vadd.f32 %v11419_v42, %v7731_v24  ;;  %v12692_v13 = vld [vmem:[#allocation27_spill] sm:$0xff] }
 0x55d   : > { %v11684_v58 = vpop.f32.mrf.mxu1 }
 0x55e   : > { %12683 = vst [vmem:[#allocation47_spill] sm:$0xff] %v11682_v45  ;;  %12684 = vst [vmem:[#allocation69_spill] sm:$0xff] %v11684_v58  ;;  %8078 = vmatpush3.bf16.xpose.msra.mxu0 %v12685_v12  ;;  %v4770_v6 = vmax.f32 %v3954_v19, 0.0  ;;  %v12714_v58 = vld [vmem:[#allocation37_spill] sm:$0xff] }
 0x55f   : > { %v7732_v52 = vpop.f32.mrf.mxu1  ;;  %8079 = vmatprep.subr.bf16.mxu0 %v12516_v37 }
 0x560   : > { %v3957_v59 = vadd.f32 %v11419_v42, %v7732_v52  ;;  %v12693_v52 = vld [vmem:[#allocation67_spill] sm:$0xff] }
 0x561   : > { %v11690_v3 = vpop.f32.mrf.mxu1 }
 0x562   : > { %12686 = vst [vmem:[#allocation46_spill] sm:$0xff] %v11690_v3  ;;  %v4771_v21 = vmax.f32 %v3957_v59, 0.0 }
 0x563   : > { %v7735_v28 = vpop.f32.mrf.mxu1  ;;  %7830 = vmatmul.mubr.bf16.gmra.mxu1 %v2207_v10 }
 0x564   : > { %v11692_v43 = vpack.c.bf16 %v4771_v21, %v4770_v6  ;;  %8169 = vmatprep.mubr.msk.bf16.mxu1 %vm8894_vm0, %v12516_v37  ;;  %v3970_v32 = vadd.f32 %v11419_v42, %v7735_v28  ;;  %v5363_v6 = vpop.f32.mrf.mxu0  ;;  %v6423_v21 = vadd.f32 %v10928_v20, %v11604_v22 }
 0x565   : > { %v11696_v29 = vpop.f32.mrf.mxu1  ;;  %v6424_v28 = vadd.f32 %v10928_v20, %v5363_v6 }
 0x566   : > { %12687 = vst [vmem:[#allocation101_spill] sm:$0xff] %v11692_v43  ;;  %12688 = vst [vmem:[#allocation102_spill] sm:$0xff] %v11696_v29  ;;  %8080 = vmatpush3.bf16.xpose.msra.mxu0 %v12689_v61  ;;  %v4774_v9 = vmax.f32 %v3970_v32, 0.0  ;;  %v7951_v32 = vpop.f32.mrf.mxu0 }
 0x567   : > { %v7736_v31 = vpop.f32.mrf.mxu1  ;;  %8081 = vmatprep.subr.bf16.mxu0 %v12516_v37  ;;  %v6485_v61 = vcombine.low %v6423_v21, %v6424_v28 }
 0x568   : > { %v3973_v2 = vadd.f32 %v11419_v42, %v7736_v31 }
 0x569   : > { %v11702_v34 = vpop.f32.mrf.mxu1  ;;  %6517 = vst [vmem:[%s10967_s12 + $0x10] sm:$0xff] %v6485_v61 }
 0x56a   : > { %12690 = vst [vmem:[#allocation68_spill] sm:$0xff] %v11702_v34  ;;  %v4775_v50 = vmax.f32 %v3973_v2, 0.0  ;;  %v5366_v2 = vpop.f32.mrf.mxu0  ;;  %v12742_v34 = vld [vmem:[#allocation51_spill] sm:$0xff] }
 0x56b   : > { %v7739_v11 = vpop.f32.mrf.mxu1  ;;  %8170 = vmatmul.mubr.bf16.vlgmr.msra.gmra.mxu1 %v11707_v56 }
 0x56c   : > { %v11710_v17 = vpack.c.bf16 %v4775_v50, %v4774_v9  ;;  %8194 = vmatpush3.bf16.xpose.msra.mxu1 %v11138_v36  ;;  %8209 = vmatprep.mubr.msk.bf16.mxu1 %vm8894_vm0, %v12516_v37  ;;  %v3986_v14 = vadd.f32 %v11419_v42, %v7739_v11  ;;  %v12694_v9 = vld [vmem:[#allocation65_spill] sm:$0xff]  ;;  %v7952_v22 = vpop.f32.mrf.mxu0 }
 0x56d   : > { %v11715_v53 = vpop.f32.mrf.mxu1  ;;  %8195 = vmatprep.subr.bf16.mxu1 %v12516_v37 }
 0x56e   : > { %12691 = vst [vmem:[#allocation103_spill] sm:$0xff] %v11710_v17  ;;  %8082 = vmatpush3.bf16.xpose.msra.mxu0 %v12692_v13  ;;  %v4778_v1 = vmax.f32 %v3986_v14, 0.0  ;;  %v12695_v13 = vld [vmem:[#allocation66_spill] sm:$0xff] }
 0x56f   : > { %v7740_v46 = vpop.f32.mrf.mxu1  ;;  %8083 = vmatprep.subr.bf16.mxu0 %v12516_v37 }
 0x570   : > { %v3989_v18 = vadd.f32 %v11419_v42, %v7740_v46 }
 0x571   : > { %v11722_v24 = vpop.f32.mrf.mxu1 }
 0x572   : > { %v4779_v36 = vmax.f32 %v3989_v18, 0.0 }
 0x573   : > { %v11724_v48 = vpop.f32.mrf.mxu1 }
 0x574   : > { %v11726_v19 = vpack.c.bf16 %v4779_v36, %v4778_v1  ;;  %8196 = vmatpush3.bf16.xpose.msra.mxu1 %v11141_v57 }
 0x575   : > { %v11729_v12 = vpop.f32.mrf.mxu1  ;;  %8197 = vmatprep.subr.bf16.mxu1 %v12516_v37 }
 0x576   : > { %8084 = vmatpush3.bf16.xpose.msra.mxu0 %v12693_v52 }
 0x577   : > { %v11733_v59 = vpop.f32.mrf.mxu1  ;;  %8085 = vmatprep.subr.bf16.mxu0 %v12516_v37 }
 0x579   : > { %v11736_v10 = vpop.f32.mrf.mxu1 }
 0x57b   : > { %v11741_v57 = vpop.f32.mrf.mxu1 }
 0x57c   : > { %8198 = vmatpush3.bf16.xpose.msra.mxu1 %v11118_v27 }
 0x57d   : > { %v11744_v31 = vpop.f32.mrf.mxu1  ;;  %8199 = vmatprep.subr.bf16.mxu1 %v12516_v37 }
 0x57e   : > { %8086 = vmatpush3.bf16.xpose.msra.mxu0 %v12694_v9 }
 0x57f   : > { %v11749_v50 = vpop.f32.mrf.mxu1  ;;  %8087 = vmatprep.subr.bf16.mxu0 %v12516_v37 }
 0x581   : > { %v11752_v11 = vpop.f32.mrf.mxu1 }
 0x583   : > { %v11754_v14 = vpop.f32.mrf.mxu1 }
 0x584   : > { %8200 = vmatpush3.bf16.xpose.msra.mxu1 %v11120_v39 }
 0x585   : > { %v11757_v27 = vpop.f32.mrf.mxu1  ;;  %8201 = vmatprep.subr.bf16.mxu1 %v12516_v37 }
 0x586   : > { %8088 = vmatpush3.bf16.xpose.msra.mxu0 %v12695_v13 }
 0x587   : > { %v11761_v46 = vpop.f32.mrf.mxu1  ;;  %8093 = vmatprep.subr.bf16.mxu0 %v12516_v37 }
 0x589   : > { %v11764_v18 = vpop.f32.mrf.mxu1 }
 0x58b   : > { %v7755_v1 = vpop.f32.mrf.mxu1 }
 0x58c   : > { %8202 = vmatpush3.bf16.xpose.msra.mxu1 %v11098_v23  ;;  %v4050_v39 = vadd.f32 %v11419_v42, %v7755_v1 }
 0x58d   : > { %v4041_v36 = vpop.f32.mrf.mxu1  ;;  %8090 = vmatmul.mubr.bf16.vlgmr.msra.gmra.mxu0 %v11707_v56  ;;  %8203 = vmatprep.subr.bf16.mxu1 %v12516_v37 }
 0x58e   : > { %8094 = vmatpush3.bf16.xpose.msra.mxu0 %v10677_v38  ;;  %8109 = vmatprep.mubr.msk.bf16.mxu0 %vm8894_vm0, %v12516_v37  ;;  %v4042_v6 = vadd.f32 %v11419_v42, %v4041_v36  ;;  %v4794_v28 = vmax.f32 %v4050_v39, 0.0 }
 0x58f   : > { %v7756_v52 = vpop.f32.mrf.mxu1  ;;  %8095 = vmatprep.subr.bf16.mxu0 %v12516_v37 }
 0x590   : > { %v4053_v21 = vadd.f32 %v11419_v42, %v7756_v52  ;;  %v4792_v9 = vmax.f32 %v4042_v6, 0.0 }
 0x591   : > { %v4044_v23 = vpop.f32.mrf.mxu1 }
 0x592   : > { %v4795_v32 = vmax.f32 %v4053_v21, 0.0  ;;  %v4045_v61 = vadd.f32 %v11419_v42, %v4044_v23 }
 0x593   : > { %v7759_v2 = vpop.f32.mrf.mxu1 }
 0x594   : > { %v11777_v22 = vpack.c.bf16 %v4795_v32, %v4794_v28  ;;  %v4793_v38 = vmax.f32 %v4045_v61, 0.0  ;;  %8204 = vmatpush3.bf16.xpose.msra.mxu1 %v11100_v62  ;;  %v4066_v36 = vadd.f32 %v11419_v42, %v7759_v2 }
 0x595   : > { %v4057_v13 = vpop.f32.mrf.mxu1  ;;  %8205 = vmatprep.subr.bf16.mxu1 %v12516_v37 }
 0x596   : > { %12696 = vst [vmem:[#allocation27_spill] sm:$0xff] %v11777_v22  ;;  %v11781_v1 = vpack.c.bf16 %v4793_v38, %v4792_v9  ;;  %8096 = vmatpush3.bf16.xpose.msra.mxu0 %v10679_v35  ;;  %v4058_v52 = vadd.f32 %v11419_v42, %v4057_v13  ;;  %v4798_v23 = vmax.f32 %v4066_v36, 0.0 }
 0x597   : > { %v7760_v39 = vpop.f32.mrf.mxu1  ;;  %8097 = vmatprep.subr.bf16.mxu0 %v12516_v37 }
 0x598   : > { %12697 = vst [vmem:[#allocation67_spill] sm:$0xff] %v11781_v1  ;;  %v4069_v6 = vadd.f32 %v11419_v42, %v7760_v39  ;;  %v4796_v61 = vmax.f32 %v4058_v52, 0.0  ;;  %v12700_v39 = vld [vmem:[#allocation73_spill] sm:$0xff] }
 0x599   : > { %v4060_v21 = vpop.f32.mrf.mxu1 }
 0x59a   : > { %v4799_v28 = vmax.f32 %v4069_v6, 0.0  ;;  %v4061_v62 = vadd.f32 %v11419_v42, %v4060_v21 }
 0x59b   : > { %v7763_v32 = vpop.f32.mrf.mxu1 }
 0x59c   : > { %v11789_v9 = vpack.c.bf16 %v4799_v28, %v4798_v23  ;;  %v4797_v38 = vmax.f32 %v4061_v62, 0.0  ;;  %8206 = vmatpush3.bf16.xpose.msra.mxu1 %v11079_v60  ;;  %v4082_v13 = vadd.f32 %v11419_v42, %v7763_v32  ;;  %v12702_v32 = vld [vmem:[#allocation40_spill] sm:$0xff] }
 0x59d   : > { %v4073_v35 = vpop.f32.mrf.mxu1  ;;  %8207 = vmatprep.subr.bf16.mxu1 %v12516_v37 }
 0x59e   : > { %12698 = vst [vmem:[#allocation65_spill] sm:$0xff] %v11789_v9  ;;  %v11793_v2 = vpack.c.bf16 %v4797_v38, %v4796_v61  ;;  %8098 = vmatpush3.bf16.xpose.msra.mxu0 %v12700_v39  ;;  %v4074_v6 = vadd.f32 %v11419_v42, %v4073_v35  ;;  %v4802_v23 = vmax.f32 %v4082_v13, 0.0 }
 0x59f   : > { %v7764_v36 = vpop.f32.mrf.mxu1  ;;  %8099 = vmatprep.subr.bf16.mxu0 %v12516_v37 }
 0x5a0   : > { %12699 = vst [vmem:[#allocation66_spill] sm:$0xff] %v11793_v2  ;;  %v4085_v52 = vadd.f32 %v11419_v42, %v7764_v36  ;;  %v4800_v1 = vmax.f32 %v4074_v6, 0.0  ;;  %v12704_v36 = vld [vmem:[#allocation74_spill] sm:$0xff] }
 0x5a1   : > { %v4076_v21 = vpop.f32.mrf.mxu1 }
 0x5a2   : > { %v4803_v28 = vmax.f32 %v4085_v52, 0.0  ;;  %v4077_v60 = vadd.f32 %v11419_v42, %v4076_v21 }
 0x5a3   : > { %v7767_v62 = vpop.f32.mrf.mxu1 }
 0x5a4   : > { %v11801_v61 = vpack.c.bf16 %v4803_v28, %v4802_v23  ;;  %v4801_v38 = vmax.f32 %v4077_v60, 0.0  ;;  %8208 = vmatpush3.bf16.xpose.msra.mxu1 %v12702_v32  ;;  %v4098_v35 = vadd.f32 %v11419_v42, %v7767_v62 }
 0x5a5   : > { %v4089_v39 = vpop.f32.mrf.mxu1  ;;  %8233 = vmatprep.subr.bf16.mxu1 %v12516_v37 }
 0x5a6   : > { %12701 = vst [vmem:[#allocation73_spill] sm:$0xff] %v11801_v61  ;;  %v11805_v22 = vpack.c.bf16 %v4801_v38, %v4800_v1  ;;  %8100 = vmatpush3.bf16.xpose.msra.mxu0 %v12704_v36  ;;  %v4090_v52 = vadd.f32 %v11419_v42, %v4089_v39  ;;  %v4806_v23 = vmax.f32 %v4098_v35, 0.0 }
 0x5a7   : > { %v7768_v13 = vpop.f32.mrf.mxu1  ;;  %8101 = vmatprep.subr.bf16.mxu0 %v12516_v37 }
 0x5a8   : > { %12703 = vst [vmem:[#allocation40_spill] sm:$0xff] %v11805_v22  ;;  %v4101_v6 = vadd.f32 %v11419_v42, %v7768_v13  ;;  %v4804_v1 = vmax.f32 %v4090_v52, 0.0  ;;  %v12707_v13 = vld [vmem:[#allocation26_spill] sm:$0xff] }
 0x5a9   : > { %v4092_v21 = vpop.f32.mrf.mxu1 }
 0x5aa   : > { %v4807_v28 = vmax.f32 %v4101_v6, 0.0  ;;  %v4093_v60 = vadd.f32 %v11419_v42, %v4092_v21 }
 0x5ab   : > { %v7771_v32 = vpop.f32.mrf.mxu1  ;;  %8210 = vmatmul.mubr.bf16.vlgmr.msra.gmra.mxu1 %v11707_v56 }
 0x5ac   : > { %v11814_v38 = vpack.c.bf16 %v4807_v28, %v4806_v23  ;;  %v4805_v62 = vmax.f32 %v4093_v60, 0.0  ;;  %8234 = vmatpush3.bf16.xpose.msra.mxu1 %v11287_v44  ;;  %8249 = vmatprep.mubr.msk.bf16.mxu1 %vm8894_vm0, %v12516_v37  ;;  %v4114_v35 = vadd.f32 %v11419_v42, %v7771_v32  ;;  %v11830_v60 = vld [vmem:[%s12446_s5] ss:$0 sm:$0xff] }
 0x5ad   : > { %v4105_v39 = vpop.f32.mrf.mxu1  ;;  %8235 = vmatprep.subr.bf16.mxu1 %v12516_v37 }
 0x5ae   : > { %12705 = vst [vmem:[#allocation74_spill] sm:$0xff] %v11814_v38  ;;  %v11820_v36 = vpack.c.bf16 %v4805_v62, %v4804_v1  ;;  %8102 = vmatpush3.bf16.xpose.msra.mxu0 %v12707_v13  ;;  %v4106_v52 = vadd.f32 %v11419_v42, %v4105_v39  ;;  %v4810_v23 = vmax.f32 %v4114_v35, 0.0  ;;  %v12708_v35 = vld [vmem:[#allocation72_spill] sm:$0xff] }
 0x5af   : > { %v7772_v6 = vpop.f32.mrf.mxu1  ;;  %8103 = vmatprep.subr.bf16.mxu0 %v12516_v37 }
 0x5b0   : > { %12706 = vst [vmem:[#allocation104_spill] sm:$0xff] %v11820_v36  ;;  %v4117_v21 = vadd.f32 %v11419_v42, %v7772_v6  ;;  %v4808_v62 = vmax.f32 %v4106_v52, 0.0  ;;  %v11849_v52 = vpop.f32.mrf.mxu0  ;;  %v12712_v36 = vld [vmem:[#allocation48_spill] sm:$0xff] }
 0x5b1   : > { %v4108_v44 = vpop.f32.mrf.mxu1 }
 0x5b2   : > { %v4811_v28 = vmax.f32 %v4117_v21, 0.0  ;;  %v4109_v1 = vadd.f32 %v11830_v60, %v4108_v44 }
 0x5b3   : > { %v11833_v32 = vpop.f32.mrf.mxu1 }
 0x5b4   : > { %v11835_v13 = vpack.c.bf16 %v4811_v28, %v4810_v23  ;;  %v4809_v2 = vmax.f32 %v4109_v1, 0.0  ;;  %8236 = vmatpush3.bf16.xpose.msra.mxu1 %v11295_v8  ;;  %v7971_v23 = vpop.f32.mrf.mxu0  ;;  %v12709_v28 = vld [vmem:[#allocation70_spill] sm:$0xff] }
 0x5b5   : > { %v11838_v39 = vpop.f32.mrf.mxu1  ;;  %8237 = vmatprep.subr.bf16.mxu1 %v12516_v37 }
 0x5b6   : > { %v11841_v42 = vpack.c.bf16 %v4809_v2, %v4808_v62  ;;  %8104 = vmatpush3.bf16.xpose.msra.mxu0 %v12708_v35  ;;  %v5406_v2 = vpop.f32.mrf.mxu0 }
 0x5b7   : > { %v11844_v6 = vpop.f32.mrf.mxu1  ;;  %8105 = vmatprep.subr.bf16.mxu0 %v12516_v37 }
 0x5b8   : > { %v7972_v62 = vpop.f32.mrf.mxu0 }
 0x5b9   : > { %v11847_v21 = vpop.f32.mrf.mxu1  ;;  %v12711_v62 = vld [vmem:[#allocation60_spill] sm:$0xff] }
 0x5bb   : > { %v11851_v44 = vpop.f32.mrf.mxu1 }
 0x5bc   : > { %8238 = vmatpush3.bf16.xpose.msra.mxu1 %v11269_v5  ;;  %v12710_v5 = vld [vmem:[#allocation71_spill] sm:$0xff] }
 0x5bd   : > { %v11854_v8 = vpop.f32.mrf.mxu1  ;;  %8239 = vmatprep.subr.bf16.mxu1 %v12516_v37 }
 0x5be   : > { %8106 = vmatpush3.bf16.xpose.msra.mxu0 %v12709_v28 }
 0x5bf   : > { %v11858_v1 = vpop.f32.mrf.mxu1  ;;  %8107 = vmatprep.subr.bf16.mxu0 %v12516_v37 }
 0x5c1   : > { %v11861_v35 = vpop.f32.mrf.mxu1 }
 0x5c3   : > { %v11863_v9 = vpop.f32.mrf.mxu1 }
 0x5c4   : > { %8240 = vmatpush3.bf16.xpose.msra.mxu1 %v11271_v15 }
 0x5c5   : > { %v11866_v23 = vpop.f32.mrf.mxu1  ;;  %8241 = vmatprep.subr.bf16.mxu1 %v12516_v37 }
 0x5c6   : > { %8108 = vmatpush3.bf16.xpose.msra.mxu0 %v12710_v5 }
 0x5c7   : > { %v11870_v2 = vpop.f32.mrf.mxu1  ;;  %8113 = vmatprep.subr.bf16.mxu0 %v12516_v37 }
 0x5c9   : > { %v11873_v28 = vpop.f32.mrf.mxu1 }
 0x5cb   : > { %v7787_v22 = vpop.f32.mrf.mxu1 }
 0x5cc   : > { %8242 = vmatpush3.bf16.xpose.msra.mxu1 %v12711_v62  ;;  %v4178_v15 = vadd.f32 %v11830_v60, %v7787_v22 }
 0x5cd   : > { %v4169_v61 = vpop.f32.mrf.mxu1  ;;  %8110 = vmatmul.mubr.bf16.vlgmr.msra.gmra.mxu0 %v11707_v56  ;;  %8243 = vmatprep.subr.bf16.mxu1 %v12516_v37 }
 0x5ce   : > { %8114 = vmatpush3.bf16.xpose.msra.mxu0 %v12712_v36  ;;  %8129 = vmatprep.mubr.msk.bf16.mxu0 %vm8894_vm0, %v12516_v37  ;;  %v4170_v38 = vadd.f32 %v11830_v60, %v4169_v61  ;;  %v4826_v63 = vmax.f32 %v4178_v15, 0.0 }
 0x5cf   : > { %v7788_v5 = vpop.f32.mrf.mxu1  ;;  %8115 = vmatprep.subr.bf16.mxu0 %v12516_v37 }
 0x5d0   : > { %v4181_v26 = vadd.f32 %v11830_v60, %v7788_v5  ;;  %v4824_v43 = vmax.f32 %v4170_v38, 0.0  ;;  %v12716_v5 = vld [vmem:[#allocation80_spill] sm:$0xff] }
 0x5d1   : > { %v4172_v62 = vpop.f32.mrf.mxu1 }
 0x5d2   : > { %v4827_v45 = vmax.f32 %v4181_v26, 0.0  ;;  %v4173_v51 = vadd.f32 %v11830_v60, %v4172_v62 }
 0x5d3   : > { %v7791_v33 = vpop.f32.mrf.mxu1 }
 0x5d4   : > { %v11886_v22 = vpack.c.bf16 %v4827_v45, %v4826_v63  ;;  %v4825_v36 = vmax.f32 %v4173_v51, 0.0  ;;  %8244 = vmatpush3.bf16.xpose.msra.mxu1 %v12714_v58  ;;  %v4194_v61 = vadd.f32 %v11830_v60, %v7791_v33  ;;  %v12718_v33 = vld [vmem:[#allocation23_spill] sm:$0xff] }
 0x5d5   : > { %v4185_v3 = vpop.f32.mrf.mxu1  ;;  %8245 = vmatprep.subr.bf16.mxu1 %v12516_v37 }
 0x5d6   : > { %12713 = vst [vmem:[#allocation26_spill] sm:$0xff] %v11886_v22  ;;  %v11890_v17 = vpack.c.bf16 %v4825_v36, %v4824_v43  ;;  %8116 = vmatpush3.bf16.xpose.msra.mxu0 %v12716_v5  ;;  %v4186_v26 = vadd.f32 %v11830_v60, %v4185_v3  ;;  %v4830_v51 = vmax.f32 %v4194_v61, 0.0 }
 0x5d7   : > { %v7792_v15 = vpop.f32.mrf.mxu1  ;;  %8117 = vmatprep.subr.bf16.mxu0 %v12516_v37 }
 0x5d8   : > { %12715 = vst [vmem:[#allocation72_spill] sm:$0xff] %v11890_v17  ;;  %v4197_v63 = vadd.f32 %v11830_v60, %v7792_v15  ;;  %v4828_v22 = vmax.f32 %v4186_v26, 0.0  ;;  %v12720_v15 = vld [vmem:[#allocation78_spill] sm:$0xff] }
 0x5d9   : > { %v4188_v45 = vpop.f32.mrf.mxu1 }
 0x5da   : > { %v4831_v38 = vmax.f32 %v4197_v63, 0.0  ;;  %v4189_v58 = vadd.f32 %v11830_v60, %v4188_v45 }
 0x5db   : > { %v7795_v62 = vpop.f32.mrf.mxu1 }
 0x5dc   : > { %v11898_v43 = vpack.c.bf16 %v4831_v38, %v4830_v51  ;;  %v4829_v36 = vmax.f32 %v4189_v58, 0.0  ;;  %8246 = vmatpush3.bf16.xpose.msra.mxu1 %v12718_v33  ;;  %v4210_v3 = vadd.f32 %v11830_v60, %v7795_v62  ;;  %v12722_v62 = vld [vmem:[#allocation87_spill] sm:$0xff] }
 0x5dd   : > { %v4201_v5 = vpop.f32.mrf.mxu1  ;;  %8247 = vmatprep.subr.bf16.mxu1 %v12516_v37 }
 0x5de   : > { %12717 = vst [vmem:[#allocation70_spill] sm:$0xff] %v11898_v43  ;;  %v11902_v17 = vpack.c.bf16 %v4829_v36, %v4828_v22  ;;  %8118 = vmatpush3.bf16.xpose.msra.mxu0 %v12720_v15  ;;  %v4202_v63 = vadd.f32 %v11830_v60, %v4201_v5  ;;  %v4834_v51 = vmax.f32 %v4210_v3, 0.0 }
 0x5df   : > { %v7796_v61 = vpop.f32.mrf.mxu1  ;;  %8119 = vmatprep.subr.bf16.mxu0 %v12516_v37 }
 0x5e0   : > { %12719 = vst [vmem:[#allocation71_spill] sm:$0xff] %v11902_v17  ;;  %v4213_v26 = vadd.f32 %v11830_v60, %v7796_v61  ;;  %v4832_v43 = vmax.f32 %v4202_v63, 0.0  ;;  %v12724_v61 = vld [vmem:[#allocation79_spill] sm:$0xff] }
 0x5e1   : > { %v4204_v45 = vpop.f32.mrf.mxu1 }
 0x5e2   : > { %v4835_v38 = vmax.f32 %v4213_v26, 0.0  ;;  %v4205_v58 = vadd.f32 %v11830_v60, %v4204_v45 }
 0x5e3   : > { %v7799_v33 = vpop.f32.mrf.mxu1 }
 0x5e4   : > { %v11910_v22 = vpack.c.bf16 %v4835_v38, %v4834_v51  ;;  %v4833_v36 = vmax.f32 %v4205_v58, 0.0  ;;  %8248 = vmatpush3.bf16.xpose.msra.mxu1 %v12722_v62  ;;  %v4226_v5 = vadd.f32 %v11830_v60, %v7799_v33 }
 0x5e5   : > { %v4217_v15 = vpop.f32.mrf.mxu1  ;;  %8273 = vmatprep.subr.bf16.mxu1 %v12516_v37 }
 0x5e6   : > { %12721 = vst [vmem:[#allocation60_spill] sm:$0xff] %v11910_v22  ;;  %v11914_v17 = vpack.c.bf16 %v4833_v36, %v4832_v43  ;;  %8120 = vmatpush3.bf16.xpose.msra.mxu0 %v12724_v61  ;;  %v4218_v26 = vadd.f32 %v11830_v60, %v4217_v15  ;;  %v4838_v51 = vmax.f32 %v4226_v5, 0.0  ;;  %v12730_v22 = vld [vmem:[#allocation63_spill] sm:$0xff] }
 0x5e7   : > { %v7800_v3 = vpop.f32.mrf.mxu1  ;;  %8121 = vmatprep.subr.bf16.mxu0 %v12516_v37 }
 0x5e8   : > { %12723 = vst [vmem:[#allocation48_spill] sm:$0xff] %v11914_v17  ;;  %v4229_v63 = vadd.f32 %v11830_v60, %v7800_v3  ;;  %v4836_v43 = vmax.f32 %v4218_v26, 0.0  ;;  %v12727_v3 = vld [vmem:[#allocation28_spill] sm:$0xff] }
 0x5e9   : > { %v4220_v45 = vpop.f32.mrf.mxu1 }
 0x5ea   : > { %v4839_v38 = vmax.f32 %v4229_v63, 0.0  ;;  %v4221_v58 = vadd.f32 %v11830_v60, %v4220_v45 }
 0x5eb   : > { %v7803_v62 = vpop.f32.mrf.mxu1  ;;  %8250 = vmatmul.mubr.bf16.vlgmr.msra.gmra.mxu1 %v11707_v56 }
 0x5ec   : > { %v11923_v36 = vpack.c.bf16 %v4839_v38, %v4838_v51  ;;  %v4837_v33 = vmax.f32 %v4221_v58, 0.0  ;;  %8274 = vmatpush3.bf16.xpose.msra.mxu1 %v11484_v4  ;;  %8289 = vmatprep.mubr.msk.bf16.mxu1 %vm8894_vm0, %v12516_v37  ;;  %v4242_v5 = vadd.f32 %v11830_v60, %v7803_v62 }
 0x5ed   : > { %v4233_v15 = vpop.f32.mrf.mxu1  ;;  %8275 = vmatprep.subr.bf16.mxu1 %v12516_v37 }
 0x5ee   : > { %12725 = vst [vmem:[#allocation37_spill] sm:$0xff] %v11923_v36  ;;  %v11929_v61 = vpack.c.bf16 %v4837_v33, %v4836_v43  ;;  %8122 = vmatpush3.bf16.xpose.msra.mxu0 %v12727_v3  ;;  %v4234_v26 = vadd.f32 %v11830_v60, %v4233_v15  ;;  %v4842_v51 = vmax.f32 %v4242_v5, 0.0 }
 0x5ef   : > { %v7804_v63 = vpop.f32.mrf.mxu1  ;;  %8123 = vmatprep.subr.bf16.mxu0 %v12516_v37 }
 0x5f0   : > { %12726 = vst [vmem:[#allocation80_spill] sm:$0xff] %v11929_v61  ;;  %v4245_v45 = vadd.f32 %v11830_v60, %v7804_v63  ;;  %v4840_v43 = vmax.f32 %v4234_v26, 0.0  ;;  %v12733_v63 = vld [vmem:[#allocation77_spill] sm:$0xff]  ;;  %v5443_v26 = vpop.f32.mrf.mxu0  ;;  %v12738_v61 = vld [vmem:[#allocation75_spill] sm:$0xff] }
 0x5f1   : > { %v4236_v4 = vpop.f32.mrf.mxu1 }
 0x5f2   : > { %v4843_v38 = vmax.f32 %v4245_v45, 0.0  ;;  %v4237_v58 = vadd.f32 %v11830_v60, %v4236_v4  ;;  %v6425_v4 = vadd.f32 %v10928_v20, %v11849_v52 }
 0x5f3   : > { %v11937_v17 = vpop.f32.mrf.mxu1 }
 0x5f4   : > { %12728 = vst [vmem:[#allocation23_spill] sm:$0xff] %v11937_v17  ;;  %v11939_v33 = vpack.c.bf16 %v4843_v38, %v4842_v51  ;;  %v4841_v62 = vmax.f32 %v4237_v58, 0.0  ;;  %8276 = vmatpush3.bf16.xpose.msra.mxu1 %v12730_v22  ;;  %v6426_v22 = vadd.f32 %v10928_v20, %v5443_v26  ;;  %v7991_v38 = vpop.f32.mrf.mxu0  ;;  %v12736_v58 = vld [vmem:[#allocation62_spill] sm:$0xff]  ;;  %v12744_v17 = vld [vmem:[#allocation35_spill] sm:$0xff] }
 0x5f5   : > { %v11942_v3 = vpop.f32.mrf.mxu1  ;;  %8277 = vmatprep.subr.bf16.mxu1 %v12516_v37  ;;  %v12739_v38 = vld [vmem:[#allocation93_spill] sm:$0xff] }
 0x5f6   : > { %12729 = vst [vmem:[#allocation78_spill] sm:$0xff] %v11939_v33  ;;  %12731 = vst [vmem:[#allocation87_spill] sm:$0xff] %v11942_v3  ;;  %v11945_v15 = vpack.c.bf16 %v4841_v62, %v4840_v43  ;;  %8124 = vmatpush3.bf16.xpose.msra.mxu0 %v12733_v63  ;;  %v6486_v43 = vcombine.low %v6425_v4, %v6426_v22  ;;  %v5446_v63 = vpop.f32.mrf.mxu0  ;;  %v12740_v22 = vld [vmem:[#allocation76_spill] sm:$0xff] }
 0x5f7   : > { %v11948_v5 = vpop.f32.mrf.mxu1  ;;  %8125 = vmatprep.subr.bf16.mxu0 %v12516_v37  ;;  %v12741_v63 = vld [vmem:[#allocation24_spill] sm:$0xff] }
 0x5f8   : > { %12732 = vst [vmem:[#allocation79_spill] sm:$0xff] %v11945_v15  ;;  %12734 = vst [vmem:[#allocation28_spill] sm:$0xff] %v11948_v5  ;;  %v7992_v52 = vpop.f32.mrf.mxu0 }
 0x5f9   : > { %v11951_v45 = vpop.f32.mrf.mxu1  ;;  %6518 = vst [vmem:[%s10967_s12 + $0x18] sm:$0xff] %v6486_v43 }
 0x5fa   : > { %12735 = vst [vmem:[#allocation63_spill] sm:$0xff] %v11951_v45 }
 0x5fb   : > { %v11956_v51 = vpop.f32.mrf.mxu1 }
 0x5fc   : > { %8278 = vmatpush3.bf16.xpose.msra.mxu1 %v12736_v58 }
 0x5fd   : > { %v11959_v62 = vpop.f32.mrf.mxu1  ;;  %8279 = vmatprep.subr.bf16.mxu1 %v12516_v37 }
 0x5fe   : > { %12737 = vst [vmem:[#allocation77_spill] sm:$0xff] %v11959_v62  ;;  %8126 = vmatpush3.bf16.xpose.msra.mxu0 %v12738_v61 }
 0x5ff   : > { %v11964_v36 = vpop.f32.mrf.mxu1  ;;  %8127 = vmatprep.subr.bf16.mxu0 %v12516_v37 }
 0x601   : > { %v11967_v26 = vpop.f32.mrf.mxu1 }
 0x603   : > { %v11969_v29 = vpop.f32.mrf.mxu1 }
 0x604   : > { %8280 = vmatpush3.bf16.xpose.msra.mxu1 %v12739_v38 }
 0x605   : > { %v11972_v4 = vpop.f32.mrf.mxu1  ;;  %8281 = vmatprep.subr.bf16.mxu1 %v12516_v37 }
 0x606   : > { %8128 = vmatpush3.bf16.xpose.msra.mxu0 %v12740_v22 }
 0x607   : > { %v11976_v58 = vpop.f32.mrf.mxu1  ;;  %8133 = vmatprep.subr.bf16.mxu0 %v12516_v37 }
 0x609   : > { %v11979_v61 = vpop.f32.mrf.mxu1 }
 0x60b   : > { %v7819_v43 = vpop.f32.mrf.mxu1 }
 0x60c   : > { %8282 = vmatpush3.bf16.xpose.msra.mxu1 %v12741_v63  ;;  %v4306_v38 = vadd.f32 %v11830_v60, %v7819_v43 }
 0x60d   : > { %v4297_v52 = vpop.f32.mrf.mxu1  ;;  %8130 = vmatmul.mubr.bf16.vlgmr.msra.gmra.mxu0 %v11707_v56  ;;  %8283 = vmatprep.subr.bf16.mxu1 %v12516_v37 }
 0x60e   : > { %8134 = vmatpush3.bf16.xpose.msra.mxu0 %v12742_v34  ;;  %8149 = vmatprep.mubr.msk.bf16.mxu0 %vm8894_vm0, %v12516_v37  ;;  %v4298_v15 = vadd.f32 %v11830_v60, %v4297_v52  ;;  %v4858_v33 = vmax.f32 %v4306_v38, 0.0 }
 0x60f   : > { %v7820_v22 = vpop.f32.mrf.mxu1  ;;  %8135 = vmatprep.subr.bf16.mxu0 %v12516_v37 }
 0x610   : > { %v4309_v7 = vadd.f32 %v11830_v60, %v7820_v22  ;;  %v4856_v45 = vmax.f32 %v4298_v15, 0.0  ;;  %v12746_v22 = vld [vmem:[#allocation83_spill] sm:$0xff] }
 0x611   : > { %v4300_v63 = vpop.f32.mrf.mxu1 }
 0x612   : > { %v4859_v41 = vmax.f32 %v4309_v7, 0.0  ;;  %v4301_v0 = vadd.f32 %v11830_v60, %v4300_v63 }
 0x613   : > { %v7823_v3 = vpop.f32.mrf.mxu1 }
 0x614   : > { %v11992_v43 = vpack.c.bf16 %v4859_v41, %v4858_v33  ;;  %v4857_v34 = vmax.f32 %v4301_v0, 0.0  ;;  %8284 = vmatpush3.bf16.xpose.msra.mxu1 %v12744_v17  ;;  %v4322_v52 = vadd.f32 %v11830_v60, %v7823_v3  ;;  %v12748_v3 = vld [vmem:[#allocation45_spill] sm:$0xff] }
 0x615   : > { %v4313_v5 = vpop.f32.mrf.mxu1  ;;  %8285 = vmatprep.subr.bf16.mxu1 %v12516_v37 }
 0x616   : > { %12743 = vst [vmem:[#allocation62_spill] sm:$0xff] %v11992_v43  ;;  %v11996_v62 = vpack.c.bf16 %v4857_v34, %v4856_v45  ;;  %8136 = vmatpush3.bf16.xpose.msra.mxu0 %v12746_v22  ;;  %v4314_v7 = vadd.f32 %v11830_v60, %v4313_v5  ;;  %v4862_v0 = vmax.f32 %v4322_v52, 0.0 }
 0x617   : > { %v7824_v38 = vpop.f32.mrf.mxu1  ;;  %8137 = vmatprep.subr.bf16.mxu0 %v12516_v37 }
 0x618   : > { %12745 = vst [vmem:[#allocation75_spill] sm:$0xff] %v11996_v62  ;;  %v4325_v41 = vadd.f32 %v11830_v60, %v7824_v38  ;;  %v4860_v43 = vmax.f32 %v4314_v7, 0.0  ;;  %v12750_v38 = vld [vmem:[#allocation50_spill] sm:$0xff] }
 0x619   : > { %v4316_v33 = vpop.f32.mrf.mxu1 }
 0x61a   : > { %v4863_v15 = vmax.f32 %v4325_v41, 0.0  ;;  %v4317_v17 = vadd.f32 %v11830_v60, %v4316_v33 }
 0x61b   : > { %v7827_v63 = vpop.f32.mrf.mxu1 }
 0x61c   : > { %v12004_v45 = vpack.c.bf16 %v4863_v15, %v4862_v0  ;;  %v4861_v34 = vmax.f32 %v4317_v17, 0.0  ;;  %8286 = vmatpush3.bf16.xpose.msra.mxu1 %v12748_v3  ;;  %v4338_v5 = vadd.f32 %v11830_v60, %v7827_v63  ;;  %v12751_v63 = vld [vmem:[#allocation92_spill] sm:$0xff] }
 0x61d   : > { %v4329_v22 = vpop.f32.mrf.mxu1  ;;  %8287 = vmatprep.subr.bf16.mxu1 %v12516_v37 }
 0x61e   : > { %12747 = vst [vmem:[#allocation93_spill] sm:$0xff] %v12004_v45  ;;  %v12008_v62 = vpack.c.bf16 %v4861_v34, %v4860_v43  ;;  %8138 = vmatpush3.bf16.xpose.msra.mxu0 %v12750_v38  ;;  %v4330_v41 = vadd.f32 %v11830_v60, %v4329_v22  ;;  %v4866_v0 = vmax.f32 %v4338_v5, 0.0 }
 0x61f   : > { %v7828_v52 = vpop.f32.mrf.mxu1  ;;  %8139 = vmatprep.subr.bf16.mxu0 %v12516_v37 }
 0x620   : > { %12749 = vst [vmem:[#allocation76_spill] sm:$0xff] %v12008_v62  ;;  %v4341_v7 = vadd.f32 %v11830_v60, %v7828_v52  ;;  %v4864_v45 = vmax.f32 %v4330_v41, 0.0  ;;  %v12752_v52 = vld [vmem:[#allocation82_spill] sm:$0xff] }
 0x621   : > { %v4332_v33 = vpop.f32.mrf.mxu1 }
 0x622   : > { %v4867_v15 = vmax.f32 %v4341_v7, 0.0  ;;  %v4333_v17 = vadd.f32 %v11830_v60, %v4332_v33 }
 0x623   : > { %v7831_v3 = vpop.f32.mrf.mxu1 }
 0x624   : > { %v12016_v43 = vpack.c.bf16 %v4867_v15, %v4866_v0  ;;  %v4865_v34 = vmax.f32 %v4333_v17, 0.0  ;;  %8288 = vmatpush3.bf16.xpose.msra.mxu1 %v12751_v63  ;;  %v4354_v22 = vadd.f32 %v11830_v60, %v7831_v3  ;;  %v12754_v15 = vld [vmem:[#allocation29_spill] sm:$0xff]  ;;  %v5483_v17 = vpop.f32.mrf.mxu0 }
 0x625   : > { %v12019_v38 = vpop.f32.mrf.mxu1  ;;  %8313 = vmatprep.subr.bf16.mxu1 %v12516_v37 }
 0x626   : > { %v12022_v62 = vpack.c.bf16 %v4865_v34, %v4864_v45  ;;  %8140 = vmatpush3.bf16.xpose.msra.mxu0 %v12752_v52  ;;  %v4870_v7 = vmax.f32 %v4354_v22, 0.0  ;;  %v12753_v45 = vld [vmem:[#allocation53_spill] sm:$0xff]  ;;  %v8011_v3 = vpop.f32.mrf.mxu0  ;;  %v12755_v34 = vld [vmem:[#allocation52_spill] sm:$0xff]  ;;  %v4037_v22 = vadd.f32 %v11830_v60, %v11761_v46  ;;  %v4026_v46 = vadd.f32 %v11830_v60, %v11757_v27 }
 0x627   : > { %v7832_v5 = vpop.f32.mrf.mxu1  ;;  %8141 = vmatprep.subr.bf16.mxu0 %v12516_v37  ;;  %v12762_v3 = vld [vmem:[#allocation41_spill] sm:$0xff] }
 0x628   : > { %v4357_v41 = vadd.f32 %v11830_v60, %v7832_v5  ;;  %v4791_v52 = vmax.f32 %v4037_v22, 0.0  ;;  %v12760_v5 = vld [vmem:[#allocation31_spill] sm:$0xff] }
 0x62a   : > { %v4871_v33 = vmax.f32 %v4357_v41, 0.0 }
 0x62b   : > { %8290 = vmatmul.mubr.bf16.vlgmr.msra.gmra.mxu1 %v11707_v56 }
 0x62c   : > { %v12029_v0 = vpack.c.bf16 %v4871_v33, %v4870_v7  ;;  %8314 = vmatpush3.bf16.xpose.msra.mxu1 %v11645_v25  ;;  %8329 = vmatprep.mubr.msk.bf16.mxu1 %vm8894_vm0, %v12516_v37  ;;  %v5486_v25 = vpop.f32.mrf.mxu0  ;;  %v4029_v7 = vadd.f32 %v11830_v60, %v11764_v18  ;;  %v4788_v33 = vmax.f32 %v4026_v46, 0.0  ;;  %v4021_v18 = vadd.f32 %v11830_v60, %v11749_v50 }
 0x62d   : > { %8315 = vmatprep.subr.bf16.mxu1 %v12516_v37  ;;  %v6427_v50 = vadd.f32 %v10928_v20, %v5483_v17  ;;  %v4005_v17 = vadd.f32 %v11830_v60, %v11733_v59  ;;  %v3994_v59 = vadd.f32 %v11830_v60, %v11729_v12  ;;  %v3981_v12 = vadd.f32 %v11830_v60, %v11722_v24 }
 0x62e   : > { %8142 = vmatpush3.bf16.xpose.msra.mxu0 %v12753_v45  ;;  %v8012_v63 = vpop.f32.mrf.mxu0  ;;  %v4787_v27 = vmax.f32 %v4021_v18, 0.0  ;;  %v4162_v24 = vadd.f32 %v11830_v60, %v11863_v9 }
 0x62f   : > { %8143 = vmatprep.subr.bf16.mxu0 %v12516_v37  ;;  %v4780_v18 = vmax.f32 %v3994_v59, 0.0 }
 0x634   : > { %8316 = vmatpush3.bf16.xpose.msra.mxu1 %v11648_v30  ;;  %v12756_v30 = vld [vmem:[#allocation81_spill] sm:$0xff] }
 0x635   : > { %8317 = vmatprep.subr.bf16.mxu1 %v12516_v37 }
 0x636   : > { %8144 = vmatpush3.bf16.xpose.msra.mxu0 %v12754_v15  ;;  %v4018_v15 = vadd.f32 %v11830_v60, %v11741_v57 }
 0x637   : > { %8145 = vmatprep.subr.bf16.mxu0 %v12516_v37 }
 0x638   : > { %v4786_v25 = vmax.f32 %v4018_v15, 0.0  ;;  %v3978_v15 = vadd.f32 %v11830_v60, %v11715_v53 }
 0x63a   : > { %v5085_v63 = vpack.c.bf16 %v4787_v27, %v4786_v25  ;;  %v4777_v27 = vmax.f32 %v3981_v12, 0.0  ;;  %v4776_v25 = vmax.f32 %v3978_v15, 0.0  ;;  %v12775_v12 = vld [vmem:[#allocation89_spill] sm:$0xff]  ;;  %v4293_v15 = vadd.f32 %v11830_v60, %v11976_v58 }
 0x63b   : > { %v4282_v58 = vadd.f32 %v11830_v60, %v11972_v4 }
 0x63c   : > { %8318 = vmatpush3.bf16.xpose.msra.mxu1 %v11627_v16  ;;  %v12757_v16 = vld [vmem:[#allocation57_spill] sm:$0xff] }
 0x63d   : > { %8319 = vmatprep.subr.bf16.mxu1 %v12516_v37 }
 0x63e   : > { %8146 = vmatpush3.bf16.xpose.msra.mxu0 %v12755_v34  ;;  %v5523_v34 = vpop.f32.mrf.mxu0 }
 0x63f   : > { %8147 = vmatprep.subr.bf16.mxu0 %v12516_v37 }
 0x640   : > { %v8031_v57 = vpop.f32.mrf.mxu0 }
 0x641   : > { %v12769_v57 = vld [vmem:[#allocation54_spill] sm:$0xff] }
 0x642   : > { %v5526_v22 = vpop.f32.mrf.mxu0 }
 0x643   : > { %v12770_v22 = vld [vmem:[#allocation55_spill] sm:$0xff] }
 0x644   : > { %8320 = vmatpush3.bf16.xpose.msra.mxu1 %v11629_v47  ;;  %v12758_v47 = vld [vmem:[#allocation84_spill] sm:$0xff] }
 0x645   : > { %8321 = vmatprep.subr.bf16.mxu1 %v12516_v37 }
 0x646   : > { %8148 = vmatpush3.bf16.xpose.msra.mxu0 %v12756_v30  ;;  %v4013_v30 = vadd.f32 %v11830_v60, %v11752_v11  ;;  %v8032_v11 = vpop.f32.mrf.mxu0 }
 0x647   : > { %8173 = vmatprep.subr.bf16.mxu0 %v12516_v37 }
 0x64c   : > { %8322 = vmatpush3.bf16.xpose.msra.mxu1 %v11609_v49  ;;  %v12759_v49 = vld [vmem:[#allocation42_spill] sm:$0xff] }
 0x64d   : > { %8150 = vmatmul.mubr.bf16.vlgmr.msra.gmra.mxu0 %v11707_v56  ;;  %8323 = vmatprep.subr.bf16.mxu1 %v12516_v37 }
 0x64e   : > { %8174 = vmatpush3.bf16.xpose.msra.mxu0 %v12757_v16  ;;  %8189 = vmatprep.mubr.msk.bf16.mxu0 %vm8894_vm0, %v12516_v37  ;;  %v6428_v16 = vadd.f32 %v10928_v20, %v5523_v34  ;;  %v5080_v34 = vpack.c.bf16 %v4777_v27, %v4776_v25  ;;  %v4290_v27 = vadd.f32 %v11830_v60, %v11969_v29  ;;  %v12776_v25 = vld [vmem:[#allocation90_spill] sm:$0xff] }
 0x64f   : > { %8175 = vmatprep.subr.bf16.mxu0 %v12516_v37 }
 0x654   : > { %8324 = vmatpush3.bf16.xpose.msra.mxu1 %v11611_v54  ;;  %v4034_v54 = vadd.f32 %v11830_v60, %v11754_v14  ;;  %v12761_v14 = vld [vmem:[#allocation30_spill] sm:$0xff] }
 0x655   : > { %8325 = vmatprep.subr.bf16.mxu1 %v12516_v37 }
 0x656   : > { %8176 = vmatpush3.bf16.xpose.msra.mxu0 %v12758_v47  ;;  %v4010_v47 = vadd.f32 %v11830_v60, %v11744_v31  ;;  %v4002_v31 = vadd.f32 %v11830_v60, %v11724_v48 }
 0x657   : > { %8177 = vmatprep.subr.bf16.mxu0 %v12516_v37 }
 0x658   : > { %v4782_v46 = vmax.f32 %v4002_v31, 0.0  ;;  %v12771_v31 = vld [vmem:[#allocation56_spill] sm:$0xff] }
 0x65c   : > { %8326 = vmatpush3.bf16.xpose.msra.mxu1 %v11589_v55  ;;  %v4790_v55 = vmax.f32 %v4034_v54, 0.0  ;;  %v4785_v54 = vmax.f32 %v4013_v30, 0.0  ;;  %v4822_v30 = vmax.f32 %v4162_v24, 0.0  ;;  %v4852_v24 = vmax.f32 %v4282_v58, 0.0  ;;  %v12797_v58 = vld [vmem:[#allocation102_spill] sm:$0xff] }
 0x65d   : > { %8327 = vmatprep.subr.bf16.mxu1 %v12516_v37 }
 0x65e   : > { %8178 = vmatpush3.bf16.xpose.msra.mxu0 %v12759_v49  ;;  %v5087_v41 = vpack.c.bf16 %v4791_v52, %v4790_v55  ;;  %v6487_v49 = vcombine.low %v6427_v50, %v6428_v16  ;;  %v12763_v52 = vld [vmem:[#allocation39_spill] sm:$0xff]  ;;  %v4157_v16 = vadd.f32 %v11830_v60, %v11873_v28  ;;  %v4149_v28 = vadd.f32 %v11830_v60, %v11858_v1 }
 0x65f   : > { %8179 = vmatprep.subr.bf16.mxu0 %v12516_v37 }
 0x660   : > { %6519 = vst [vmem:[%s10967_s12 + $0x20] sm:$0xff] %v6487_v49  ;;  %v4821_v9 = vmax.f32 %v4157_v16, 0.0 }
 0x664   : > { %8328 = vmatpush3.bf16.xpose.msra.mxu1 %v11591_v40  ;;  %v4789_v40 = vmax.f32 %v4029_v7, 0.0  ;;  %v12764_v7 = vld [vmem:[#allocation49_spill] sm:$0xff] }
 0x665   : > { %8353 = vmatprep.subr.bf16.mxu1 %v12516_v37 }
 0x666   : > { %8180 = vmatpush3.bf16.xpose.msra.mxu0 %v12760_v5  ;;  %v5086_v45 = vpack.c.bf16 %v4789_v40, %v4788_v33  ;;  %v4784_v5 = vmax.f32 %v4010_v47, 0.0  ;;  %v12765_v33 = vld [vmem:[#allocation61_spill] sm:$0xff] }
 0x667   : > { %8181 = vmatprep.subr.bf16.mxu0 %v12516_v37 }
 0x668   : > { %v5084_v55 = vpack.c.bf16 %v4785_v54, %v4784_v5  ;;  %v4141_v5 = vadd.f32 %v11830_v60, %v11861_v35  ;;  %v4130_v35 = vadd.f32 %v11830_v60, %v11833_v32  ;;  %v12174_v32 = vld [vmem:[%s12447_s6] sm:$0x3] }
 0x66a   : > { %v4814_v59 = vmax.f32 %v4130_v35, 0.0 }
 0x66b   : > { %8330 = vmatmul.mubr.bf16.vlgmr.msra.gmra.mxu1 %v11707_v56 }
 0x66c   : > { %8354 = vmatpush3.bf16.xpose.msra.mxu1 %v5087_v41  ;;  %8369 = vmatprep.mubr.msk.bf16.mxu1 %vm8894_vm0, %v12516_v37  ;;  %v4783_v41 = vmax.f32 %v4005_v17, 0.0  ;;  %v4138_v17 = vadd.f32 %v11830_v60, %v11854_v8 }
 0x66d   : > { %8355 = vmatprep.subr.bf16.mxu1 %v12516_v37 }
 0x66e   : > { %8182 = vmatpush3.bf16.xpose.msra.mxu0 %v12761_v14  ;;  %v5083_v40 = vpack.c.bf16 %v4783_v41, %v4782_v46  ;;  %v3997_v14 = vadd.f32 %v11830_v60, %v11736_v10  ;;  %v12766_v10 = vld [vmem:[#allocation86_spill] sm:$0xff]  ;;  %v4133_v46 = vadd.f32 %v11830_v60, %v11844_v6  ;;  %v4122_v6 = vadd.f32 %v11830_v60, %v11838_v39 }
 0x66f   : > { %8183 = vmatprep.subr.bf16.mxu0 %v12516_v37 }
 0x670   : > { %v4781_v48 = vmax.f32 %v3997_v14, 0.0  ;;  %v4815_v8 = vmax.f32 %v4133_v46, 0.0  ;;  %v12772_v14 = vld [vmem:[#allocation33_spill] sm:$0xff] }
 0x674   : > { %8356 = vmatpush3.bf16.xpose.msra.mxu1 %v5086_v45  ;;  %v5082_v45 = vpack.c.bf16 %v4781_v48, %v4780_v18  ;;  %v5099_v48 = vpack.c.bf16 %v4815_v8, %v4814_v59 }
 0x675   : > { %8357 = vmatprep.subr.bf16.mxu1 %v12516_v37 }
 0x676   : > { %8184 = vmatpush3.bf16.xpose.msra.mxu0 %v12762_v3  ;;  %v12767_v3 = vld [vmem:[#allocation34_spill] sm:$0xff] }
 0x677   : > { %8185 = vmatprep.subr.bf16.mxu0 %v12516_v37 }
 0x67c   : > { %8358 = vmatpush3.bf16.xpose.msra.mxu1 %v5085_v63  ;;  %v4165_v63 = vadd.f32 %v11830_v60, %v11870_v2  ;;  %v4154_v2 = vadd.f32 %v11830_v60, %v11866_v23  ;;  %v4819_v23 = vmax.f32 %v4149_v28, 0.0 }
 0x67d   : > { %8359 = vmatprep.subr.bf16.mxu1 %v12516_v37 }
 0x67e   : > { %8186 = vmatpush3.bf16.xpose.msra.mxu0 %v12763_v52  ;;  %v4823_v53 = vmax.f32 %v4165_v63, 0.0  ;;  %v4820_v47 = vmax.f32 %v4154_v2, 0.0  ;;  %v12151_v52 = vpop.f32.mrf.mxu0  ;;  %v4285_v63 = vadd.f32 %v11830_v60, %v11979_v61  ;;  %v4277_v61 = vadd.f32 %v11830_v60, %v11964_v36 }
 0x67f   : > { %8187 = vmatprep.subr.bf16.mxu0 %v12516_v37  ;;  %v6429_v36 = vadd.f32 %v10928_v20, %v12151_v52  ;;  %v12781_v52 = vld [vmem:[#allocation28_spill] sm:$0xff] }
 0x680   : > { %v5103_v50 = vpack.c.bf16 %v4823_v53, %v4822_v30  ;;  %v5102_v49 = vpack.c.bf16 %v4821_v9, %v4820_v47  ;;  %v8051_v1 = vpop.f32.mrf.mxu0  ;;  %v4853_v29 = vmax.f32 %v4285_v63, 0.0  ;;  %v4851_v4 = vmax.f32 %v4277_v61, 0.0  ;;  %v12778_v30 = vld [vmem:[#allocation88_spill] sm:$0xff]  ;;  %v12779_v47 = vld [vmem:[#allocation77_spill] sm:$0xff] }
 0x681   : > { %v4269_v9 = vadd.f32 %v11830_v60, %v11967_v26  ;;  %v4266_v28 = vadd.f32 %v11830_v60, %v12779_v47  ;;  %v12782_v1 = vld [vmem:[#allocation23_spill] sm:$0xff]  ;;  %v12803_v47 = vld [vmem:[#allocation38_spill] sm:$0xff] }
 0x682   : > { %v5118_v53 = vpack.c.bf16 %v4853_v29, %v4852_v24  ;;  %v3962_v29 = vadd.f32 %v11830_v60, %v12797_v58  ;;  %v12815_v58 = vld [vmem:[#allocation37_spill] sm:$0xff] }
 0x684   : > { %8360 = vmatpush3.bf16.xpose.msra.mxu1 %v5084_v55  ;;  %v4817_v55 = vmax.f32 %v4141_v5, 0.0  ;;  %v4772_v61 = vmax.f32 %v3962_v29, 0.0 }
 0x685   : > { %8361 = vmatprep.subr.bf16.mxu1 %v12516_v37 }
 0x686   : > { %8188 = vmatpush3.bf16.xpose.msra.mxu0 %v12764_v7  ;;  %v4816_v7 = vmax.f32 %v4138_v17, 0.0  ;;  %v4258_v17 = vadd.f32 %v11830_v60, %v12782_v1 }
 0x687   : > { %8213 = vmatprep.subr.bf16.mxu0 %v12516_v37 }
 0x68c   : > { %8362 = vmatpush3.bf16.xpose.msra.mxu1 %v5083_v40  ;;  %v5100_v40 = vpack.c.bf16 %v4817_v55, %v4816_v7  ;;  %v12783_v55 = vld [vmem:[#allocation59_spill] sm:$0xff] }
 0x68d   : > { %8190 = vmatmul.mubr.bf16.vlgmr.msra.gmra.mxu0 %v11707_v56  ;;  %8363 = vmatprep.subr.bf16.mxu1 %v12516_v37  ;;  %v12784_v7 = vld [vmem:[#allocation63_spill] sm:$0xff] }
 0x68e   : > { %8214 = vmatpush3.bf16.xpose.msra.mxu0 %v12765_v33  ;;  %8229 = vmatprep.mubr.msk.bf16.mxu0 %vm8894_vm0, %v12516_v37  ;;  %v4125_v33 = vadd.f32 %v11830_v60, %v11847_v21  ;;  %v4812_v21 = vmax.f32 %v4122_v6, 0.0  ;;  %v4253_v46 = vadd.f32 %v11830_v60, %v12784_v7  ;;  %v12788_v6 = vld [vmem:[#allocation78_spill] sm:$0xff]  ;;  %v12809_v7 = vld [vmem:[#allocation73_spill] sm:$0xff] }
 0x68f   : > { %8215 = vmatprep.subr.bf16.mxu0 %v12516_v37 }
 0x690   : > { %v4813_v18 = vmax.f32 %v4125_v33, 0.0  ;;  %v4845_v8 = vmax.f32 %v4253_v46, 0.0  ;;  %v12787_v33 = vld [vmem:[#allocation100_spill] sm:$0xff] }
 0x691   : > { %v12810_v46 = vld [vmem:[#allocation40_spill] sm:$0xff] }
 0x692   : > { %v5098_v39 = vpack.c.bf16 %v4813_v18, %v4812_v21  ;;  %v12789_v18 = vld [vmem:[#allocation97_spill] sm:$0xff]  ;;  %v12791_v21 = vld [vmem:[#allocation98_spill] sm:$0xff] }
 0x694   : > { %8364 = vmatpush3.bf16.xpose.msra.mxu1 %v5082_v45  ;;  %v12773_v45 = vld [vmem:[#allocation43_spill] sm:$0xff] }
 0x695   : > { %8365 = vmatprep.subr.bf16.mxu1 %v12516_v37 }
 0x696   : > { %8216 = vmatpush3.bf16.xpose.msra.mxu0 %v12766_v10  ;;  %v12774_v10 = vld [vmem:[#allocation91_spill] sm:$0xff] }
 0x697   : > { %8217 = vmatprep.subr.bf16.mxu0 %v12516_v37 }
 0x69c   : > { %8366 = vmatpush3.bf16.xpose.msra.mxu1 %v11726_v19  ;;  %v12768_v19 = vld [vmem:[#allocation85_spill] sm:$0xff] }
 0x69d   : > { %8367 = vmatprep.subr.bf16.mxu1 %v12516_v37 }
 0x69e   : > { %8218 = vmatpush3.bf16.xpose.msra.mxu0 %v12767_v3  ;;  %v4855_v3 = vmax.f32 %v4293_v15, 0.0 }
 0x69f   : > { %8219 = vmatprep.subr.bf16.mxu0 %v12516_v37 }
 0x6a4   : > { %8368 = vmatpush3.bf16.xpose.msra.mxu1 %v5080_v34 }
 0x6a5   : > { %8393 = vmatprep.subr.bf16.mxu1 %v12516_v37 }
 0x6a6   : > { %8220 = vmatpush3.bf16.xpose.msra.mxu0 %v12768_v19  ;;  %v4274_v19 = vadd.f32 %v11830_v60, %v11956_v51 }
 0x6a7   : > { %8221 = vmatprep.subr.bf16.mxu0 %v12516_v37 }
 0x6ab   : > { %8370 = vmatmul.mubr.bf16.vlgmr.msra.gmra.mxu1 %v11707_v56  ;;  %v4146_v56 = vadd.f32 %v11830_v60, %v11851_v44  ;;  %v5566_v44 = vpop.f32.mrf.mxu0 }
 0x6ac   : > { %8394 = vmatpush3.bf16.xpose.msra.mxu1 %v5103_v50  ;;  %8409 = vmatprep.mubr.msk.bf16.mxu1 %vm8894_vm0, %v12516_v37  ;;  %v4850_v50 = vmax.f32 %v4274_v19, 0.0  ;;  %v12274_v19 = vld [vmem:[%s12446_s5] ss:$0 sm:$0xff] }
 0x6ad   : > { %8395 = vmatprep.subr.bf16.mxu1 %v12516_v37  ;;  %v4818_v54 = vmax.f32 %v4146_v56, 0.0  ;;  %v8052_v41 = vpop.f32.mrf.mxu0 }
 0x6ae   : > { %8222 = vmatpush3.bf16.xpose.msra.mxu0 %v12769_v57  ;;  %v5117_v2 = vpack.c.bf16 %v4851_v4, %v4850_v50  ;;  %v12799_v4 = vld [vmem:[#allocation46_spill] sm:$0xff] }
 0x6af   : > { %8223 = vmatprep.subr.bf16.mxu0 %v12516_v37  ;;  %v5101_v11 = vpack.c.bf16 %v4819_v23, %v4818_v54  ;;  %v5603_v16 = vpop.f32.mrf.mxu0  ;;  %v4849_v23 = vmax.f32 %v4269_v9, 0.0  ;;  %v4848_v54 = vmax.f32 %v4266_v28, 0.0  ;;  %v3930_v28 = vadd.f32 %v12274_v19, %v12803_v47 }
 0x6b0   : > { %v6430_v51 = vadd.f32 %v10928_v20, %v5603_v16  ;;  %v12801_v16 = vld [vmem:[#allocation101_spill] sm:$0xff] }
 0x6b1   : > { %v8071_v57 = vpop.f32.mrf.mxu0  ;;  %v5116_v5 = vpack.c.bf16 %v4849_v23, %v4848_v54  ;;  %v4764_v23 = vmax.f32 %v3930_v28, 0.0 }
 0x6b3   : > { %v5606_v56 = vpop.f32.mrf.mxu0 }
 0x6b4   : > { %8396 = vmatpush3.bf16.xpose.msra.mxu1 %v5102_v49  ;;  %v6488_v49 = vcombine.low %v6429_v36, %v6430_v51  ;;  %v12802_v51 = vld [vmem:[#allocation64_spill] sm:$0xff] }
 0x6b5   : > { %8397 = vmatprep.subr.bf16.mxu1 %v12516_v37  ;;  %v8072_v26 = vpop.f32.mrf.mxu0  ;;  %v3933_v57 = vadd.f32 %v12274_v19, %v12802_v51 }
 0x6b6   : > { %8224 = vmatpush3.bf16.xpose.msra.mxu0 %v12770_v22  ;;  %v12780_v22 = vld [vmem:[#allocation58_spill] sm:$0xff]  ;;  %6520 = vst [vmem:[%s10967_s12 + $0x28] sm:$0xff] %v6488_v49  ;;  %v12804_v49 = vld [vmem:[#allocation47_spill] sm:$0xff] }
 0x6b7   : > { %8225 = vmatprep.subr.bf16.mxu0 %v12516_v37  ;;  %v4765_v56 = vmax.f32 %v3933_v57, 0.0 }
 0x6bc   : > { %8398 = vmatpush3.bf16.xpose.msra.mxu1 %v5101_v11  ;;  %v4261_v11 = vadd.f32 %v11830_v60, %v12781_v52 }
 0x6bd   : > { %8399 = vmatprep.subr.bf16.mxu1 %v12516_v37 }
 0x6be   : > { %8226 = vmatpush3.bf16.xpose.msra.mxu0 %v12771_v31  ;;  %v4847_v44 = vmax.f32 %v4261_v11, 0.0  ;;  %v4846_v31 = vmax.f32 %v4258_v17, 0.0  ;;  %v12805_v17 = vld [vmem:[#allocation25_spill] sm:$0xff] }
 0x6bf   : > { %8227 = vmatprep.subr.bf16.mxu0 %v12516_v37 }
 0x6c0   : > { %v5115_v41 = vpack.c.bf16 %v4847_v44, %v4846_v31  ;;  %v12807_v31 = vld [vmem:[#allocation74_spill] sm:$0xff] }
 0x6c4   : > { %8400 = vmatpush3.bf16.xpose.msra.mxu1 %v5100_v40  ;;  %v12785_v40 = vld [vmem:[#allocation87_spill] sm:$0xff] }
 0x6c5   : > { %8401 = vmatprep.subr.bf16.mxu1 %v12516_v37  ;;  %v4250_v35 = vadd.f32 %v11830_v60, %v12785_v40  ;;  %v12811_v40 = vld [vmem:[#allocation65_spill] sm:$0xff] }
 0x6c6   : > { %8228 = vmatpush3.bf16.xpose.msra.mxu0 %v12772_v14  ;;  %v12786_v14 = vld [vmem:[#allocation99_spill] sm:$0xff] }
 0x6c7   : > { %8253 = vmatprep.subr.bf16.mxu0 %v12516_v37  ;;  %v4844_v59 = vmax.f32 %v4250_v35, 0.0  ;;  %v12812_v35 = vld [vmem:[#allocation66_spill] sm:$0xff] }
 0x6cc   : > { %8402 = vmatpush3.bf16.xpose.msra.mxu1 %v5099_v48  ;;  %v5114_v48 = vpack.c.bf16 %v4845_v8, %v4844_v59 }
 0x6cd   : > { %8230 = vmatmul.mubr.bf16.vlgmr.msra.gmra.mxu0 %v12174_v32  ;;  %8403 = vmatprep.subr.bf16.mxu1 %v12516_v37 }
 0x6ce   : > { %8254 = vmatpush3.bf16.xpose.msra.mxu0 %v12773_v45  ;;  %8269 = vmatprep.mubr.msk.bf16.mxu0 %vm8894_vm0, %v12516_v37  ;;  %v12790_v45 = vld [vmem:[#allocation79_spill] sm:$0xff] }
 0x6cf   : > { %8255 = vmatprep.subr.bf16.mxu0 %v12516_v37 }
 0x6d4   : > { %8404 = vmatpush3.bf16.xpose.msra.mxu1 %v5098_v39  ;;  %v12792_v39 = vld [vmem:[#allocation36_spill] sm:$0xff] }
 0x6d5   : > { %8405 = vmatprep.subr.bf16.mxu1 %v12516_v37 }
 0x6d6   : > { %8256 = vmatpush3.bf16.xpose.msra.mxu0 %v12774_v10  ;;  %v12793_v10 = vld [vmem:[#allocation96_spill] sm:$0xff] }
 0x6d7   : > { %8257 = vmatprep.subr.bf16.mxu0 %v12516_v37 }
 0x6dc   : > { %8406 = vmatpush3.bf16.xpose.msra.mxu1 %v11835_v13  ;;  %v4854_v13 = vmax.f32 %v4290_v27, 0.0 }
 0x6dd   : > { %8407 = vmatprep.subr.bf16.mxu1 %v12516_v37 }
 0x6de   : > { %8258 = vmatpush3.bf16.xpose.msra.mxu0 %v12775_v12  ;;  %v5119_v34 = vpack.c.bf16 %v4855_v3, %v4854_v13  ;;  %v5643_v12 = vpop.f32.mrf.mxu0  ;;  %v12794_v3 = vld [vmem:[#allocation94_spill] sm:$0xff]  ;;  %v12795_v13 = vld [vmem:[#allocation95_spill] sm:$0xff] }
 0x6df   : > { %8259 = vmatprep.subr.bf16.mxu0 %v12516_v37  ;;  %v6431_v54 = vadd.f32 %v10928_v20, %v5643_v12 }
 0x6e0   : > { %v8091_v15 = vpop.f32.mrf.mxu0 }
 0x6e2   : > { %v5646_v27 = vpop.f32.mrf.mxu0 }
 0x6e4   : > { %8408 = vmatpush3.bf16.xpose.msra.mxu1 %v11841_v42  ;;  %v12777_v42 = vld [vmem:[#allocation32_spill] sm:$0xff] }
 0x6e5   : > { %8433 = vmatprep.subr.bf16.mxu1 %v12516_v37 }
 0x6e6   : > { %8260 = vmatpush3.bf16.xpose.msra.mxu0 %v12776_v25  ;;  %v8092_v25 = vpop.f32.mrf.mxu0 }
 0x6e7   : > { %8261 = vmatprep.subr.bf16.mxu0 %v12516_v37 }
 0x6e8   : > { %v5683_v26 = vpop.f32.mrf.mxu0 }
 0x6e9   : > { %v6432_v52 = vadd.f32 %v10928_v20, %v5683_v26 }
 0x6ea   : > { %v8111_v11 = vpop.f32.mrf.mxu0 }
 0x6eb   : > { %8410 = vmatmul.mubr.bf16.vlgmr.msra.gmra.mxu1 %v12174_v32 }
 0x6ec   : > { %8434 = vmatpush3.bf16.xpose.msra.mxu1 %v5119_v34  ;;  %8449 = vmatprep.mubr.msk.bf16.mxu1 %vm8894_vm0, %v12516_v37  ;;  %v12796_v34 = vld [vmem:[#allocation68_spill] sm:$0xff]  ;;  %v5686_v1 = vpop.f32.mrf.mxu0 }
 0x6ed   : > { %8435 = vmatprep.subr.bf16.mxu1 %v12516_v37  ;;  %v3965_v63 = vadd.f32 %v11830_v60, %v12796_v34  ;;  %v3949_v60 = vadd.f32 %v12274_v19, %v12799_v4 }
 0x6ee   : > { %8262 = vmatpush3.bf16.xpose.msra.mxu0 %v12777_v42  ;;  %v12798_v42 = vld [vmem:[#allocation103_spill] sm:$0xff]  ;;  %v8112_v44 = vpop.f32.mrf.mxu0 }
 0x6ef   : > { %8263 = vmatprep.subr.bf16.mxu0 %v12516_v37  ;;  %v4773_v24 = vmax.f32 %v3965_v63, 0.0 }
 0x6f0   : > { %v5723_v8 = vpop.f32.mrf.mxu0 }
 0x6f4   : > { %8436 = vmatpush3.bf16.xpose.msra.mxu1 %v5118_v53  ;;  %v5078_v53 = vpack.c.bf16 %v4773_v24, %v4772_v61 }
 0x6f5   : > { %8437 = vmatprep.subr.bf16.mxu1 %v12516_v37 }
 0x6f6   : > { %8264 = vmatpush3.bf16.xpose.msra.mxu0 %v12778_v30  ;;  %v12800_v30 = vld [vmem:[#allocation69_spill] sm:$0xff] }
 0x6f7   : > { %8265 = vmatprep.subr.bf16.mxu0 %v12516_v37  ;;  %v3946_v50 = vadd.f32 %v12274_v19, %v12800_v30 }
 0x6f9   : > { %v4768_v9 = vmax.f32 %v3946_v50, 0.0 }
 0x6fc   : > { %8438 = vmatpush3.bf16.xpose.msra.mxu1 %v5117_v2  ;;  %v4769_v2 = vmax.f32 %v3949_v60, 0.0 }
 0x6fd   : > { %8439 = vmatprep.subr.bf16.mxu1 %v12516_v37 }
 0x6fe   : > { %8266 = vmatpush3.bf16.xpose.msra.mxu0 %v12780_v22  ;;  %v5076_v36 = vpack.c.bf16 %v4769_v2, %v4768_v9  ;;  %v5074_v22 = vpack.c.bf16 %v4765_v56, %v4764_v23  ;;  %v12816_v9 = vld [vmem:[#allocation80_spill] sm:$0xff] }
 0x6ff   : > { %8267 = vmatprep.subr.bf16.mxu0 %v12516_v37 }
 0x704   : > { %8440 = vmatpush3.bf16.xpose.msra.mxu1 %v5116_v5  ;;  %v6489_v5 = vcombine.low %v6431_v54, %v6432_v52  ;;  %v12817_v52 = vld [vmem:[#allocation60_spill] sm:$0xff] }
 0x705   : > { %8441 = vmatprep.subr.bf16.mxu1 %v12516_v37 }
 0x706   : > { %8268 = vmatpush3.bf16.xpose.msra.mxu0 %v12783_v55  ;;  %6521 = vst [vmem:[%s10967_s12 + $0x30] sm:$0xff] %v6489_v5  ;;  %v12806_v55 = vld [vmem:[#allocation44_spill] sm:$0xff] }
 0x707   : > { %8293 = vmatprep.subr.bf16.mxu0 %v12516_v37 }
 0x70c   : > { %8442 = vmatpush3.bf16.xpose.msra.mxu1 %v5115_v41  ;;  %v12808_v41 = vld [vmem:[#allocation104_spill] sm:$0xff] }
 0x70d   : > { %8270 = vmatmul.mubr.bf16.vlgmr.msra.gmra.mxu0 %v12174_v32  ;;  %8443 = vmatprep.subr.bf16.mxu1 %v12516_v37 }
 0x70e   : > { %8294 = vmatpush3.bf16.xpose.msra.mxu0 %v12786_v14  ;;  %8309 = vmatprep.mubr.msk.bf16.mxu0 %vm8894_vm0, %v12516_v37  ;;  %v8131_v14 = vpop.f32.mrf.mxu0 }
 0x70f   : > { %8295 = vmatprep.subr.bf16.mxu0 %v12516_v37 }
 0x710   : > { %v5726_v59 = vpop.f32.mrf.mxu0 }
 0x714   : > { %8444 = vmatpush3.bf16.xpose.msra.mxu1 %v5114_v48  ;;  %v12813_v48 = vld [vmem:[#allocation27_spill] sm:$0xff] }
 0x715   : > { %8445 = vmatprep.subr.bf16.mxu1 %v12516_v37 }
 0x716   : > { %8296 = vmatpush3.bf16.xpose.msra.mxu0 %v12787_v33  ;;  %v8132_v33 = vpop.f32.mrf.mxu0 }
 0x717   : > { %8297 = vmatprep.subr.bf16.mxu0 %v12516_v37 }
 0x71c   : > { %8446 = vmatpush3.bf16.xpose.msra.mxu1 %v12788_v6  ;;  %v12314_v6 = vpop.f32.mrf.mxu1 }
 0x71d   : > { %8447 = vmatprep.subr.bf16.mxu1 %v12516_v37 }
 0x71e   : > { %8298 = vmatpush3.bf16.xpose.msra.mxu0 %v12789_v18  ;;  %v12814_v18 = vld [vmem:[#allocation67_spill] sm:$0xff] }
 0x71f   : > { %8299 = vmatprep.subr.bf16.mxu0 %v12516_v37 }
 0x724   : > { %8448 = vmatpush3.bf16.xpose.msra.mxu1 %v12790_v45  ;;  %v5763_v45 = vpop.f32.mrf.mxu0 }
 0x726   : > { %8300 = vmatpush3.bf16.xpose.msra.mxu0 %v12791_v21  ;;  %v5803_v21 = vpop.f32.mrf.mxu1  ;;  %v8151_v12 = vpop.f32.mrf.mxu0 }
 0x727   : > { %8301 = vmatprep.subr.bf16.mxu0 %v12516_v37  ;;  %v6435_v63 = vadd.f32 %v10928_v20, %v5803_v21  ;;  %v12822_v12 = vld [vmem:[#allocation72_spill] sm:$0xff] }
 0x728   : > { %v8171_v15 = vpop.f32.mrf.mxu1 }
 0x729   : > { %v4349_v15 = vadd.f32 %v12274_v19, %v12314_v6 }
 0x72a   : > { %v5806_v25 = vpop.f32.mrf.mxu1 }
 0x72b   : > { %8450 = vmatmul.mubr.bf16.vlgmr.msra.gmra.mxu1 %v12174_v32  ;;  %v4346_v25 = vadd.f32 %v12274_v19, %v12019_v38  ;;  %v12823_v19 = vld [vmem:[#allocation93_spill] sm:$0xff] }
 0x72c   : > { %v8172_v34 = vpop.f32.mrf.mxu1 }
 0x72e   : > { %8302 = vmatpush3.bf16.xpose.msra.mxu0 %v12792_v39  ;;  %v6433_v39 = vadd.f32 %v10928_v20, %v5723_v8 }
 0x72f   : > { %8303 = vmatprep.subr.bf16.mxu0 %v12516_v37 }
 0x736   : > { %8304 = vmatpush3.bf16.xpose.msra.mxu0 %v12793_v10  ;;  %v6434_v10 = vadd.f32 %v10928_v20, %v5763_v45 }
 0x737   : > { %8305 = vmatprep.subr.bf16.mxu0 %v12516_v37 }
 0x738   : > { %v6490_v27 = vcombine.low %v6433_v39, %v6434_v10  ;;  %v12820_v39 = vld [vmem:[#allocation71_spill] sm:$0xff]  ;;  %v12821_v10 = vld [vmem:[#allocation26_spill] sm:$0xff] }
 0x73a   : > { %6522 = vst [vmem:[%s10967_s12 + $0x38] sm:$0xff] %v6490_v27 }
 0x73e   : > { %8306 = vmatpush3.bf16.xpose.msra.mxu0 %v12794_v3  ;;  %v5766_v3 = vpop.f32.mrf.mxu0 }
 0x73f   : > { %8307 = vmatprep.subr.bf16.mxu0 %v12516_v37 }
 0x746   : > { %8308 = vmatpush3.bf16.xpose.msra.mxu0 %v12795_v13  ;;  %v8152_v13 = vpop.f32.mrf.mxu0 }
 0x747   : > { %8333 = vmatprep.subr.bf16.mxu0 %v12516_v37 }
 0x74d   : > { %8310 = vmatmul.mubr.bf16.vlgmr.msra.gmra.mxu0 %v12174_v32  ;;  %v5843_v29 = vpop.f32.mrf.mxu0 }
 0x74e   : > { %8334 = vmatpush3.bf16.xpose.msra.mxu0 %v12798_v42  ;;  %8349 = vmatprep.mubr.msk.bf16.mxu0 %vm8894_vm0, %v12516_v37  ;;  %v5883_v42 = vpop.f32.mrf.mxu1  ;;  %v6436_v24 = vadd.f32 %v10928_v20, %v5843_v29  ;;  %v4868_v29 = vmax.f32 %v4346_v25, 0.0 }
 0x74f   : > { %8335 = vmatprep.subr.bf16.mxu0 %v12516_v37  ;;  %v8191_v61 = vpop.f32.mrf.mxu0  ;;  %v6437_v2 = vadd.f32 %v10928_v20, %v5883_v42 }
 0x750   : > { %v6491_v4 = vcombine.low %v6435_v63, %v6436_v24  ;;  %v4869_v63 = vmax.f32 %v4349_v15, 0.0 }
 0x751   : > { %v5846_v60 = vpop.f32.mrf.mxu0 }
 0x752   : > { %6523 = vst [vmem:[%s10967_s12 + $0x40] sm:$0xff] %v6491_v4  ;;  %v5126_v61 = vpack.c.bf16 %v4869_v63, %v4868_v29  ;;  %v12824_v4 = vld [vmem:[#allocation76_spill] sm:$0xff]  ;;  %v12825_v60 = vld [vmem:[#allocation62_spill] sm:$0xff] }
 0x753   : > { %v8192_v50 = vpop.f32.mrf.mxu0 }
 0x756   : > { %8336 = vmatpush3.bf16.xpose.msra.mxu0 %v5078_v53  ;;  %v8211_v53 = vpop.f32.mrf.mxu1 }
 0x757   : > { %8337 = vmatprep.subr.bf16.mxu0 %v12516_v37 }
 0x758   : > { %v5886_v30 = vpop.f32.mrf.mxu1 }
 0x75e   : > { %8338 = vmatpush3.bf16.xpose.msra.mxu0 %v12801_v16  ;;  %v8212_v16 = vpop.f32.mrf.mxu1 }
 0x75f   : > { %8339 = vmatprep.subr.bf16.mxu0 %v12516_v37 }
 0x760   : > { %v5963_v51 = vpop.f32.mrf.mxu1 }
 0x761   : > { %v6439_v54 = vadd.f32 %v10928_v20, %v5963_v51 }
 0x762   : > { %v8251_v28 = vpop.f32.mrf.mxu1 }
 0x764   : > { %v5966_v23 = vpop.f32.mrf.mxu1 }
 0x766   : > { %8340 = vmatpush3.bf16.xpose.msra.mxu0 %v5076_v36  ;;  %v8252_v26 = vpop.f32.mrf.mxu1 }
 0x767   : > { %8341 = vmatprep.subr.bf16.mxu0 %v12516_v37 }
 0x768   : > { %v6043_v5 = vpop.f32.mrf.mxu1 }
 0x769   : > { %v6441_v27 = vadd.f32 %v10928_v20, %v6043_v5 }
 0x76a   : > { %v8291_v44 = vpop.f32.mrf.mxu1 }
 0x76e   : > { %8342 = vmatpush3.bf16.xpose.msra.mxu0 %v12804_v49 }
 0x76f   : > { %8343 = vmatprep.subr.bf16.mxu0 %v12516_v37 }
 0x776   : > { %8344 = vmatpush3.bf16.xpose.msra.mxu0 %v5074_v22 }
 0x777   : > { %8345 = vmatprep.subr.bf16.mxu0 %v12516_v37 }
 0x77e   : > { %8346 = vmatpush3.bf16.xpose.msra.mxu0 %v12805_v17 }
 0x77f   : > { %8347 = vmatprep.subr.bf16.mxu0 %v12516_v37 }
 0x786   : > { %8348 = vmatpush3.bf16.xpose.msra.mxu0 %v12806_v55 }
 0x787   : > { %8373 = vmatprep.subr.bf16.mxu0 %v12516_v37 }
 0x78d   : > { %8350 = vmatmul.mubr.bf16.vlgmr.msra.gmra.mxu0 %v12174_v32  ;;  %v5923_v36 = vpop.f32.mrf.mxu0 }
 0x78e   : > { %8374 = vmatpush3.bf16.xpose.msra.mxu0 %v12807_v31  ;;  %8389 = vmatprep.mubr.msk.bf16.mxu0 %vm8894_vm0, %v12516_v37  ;;  %v6438_v57 = vadd.f32 %v10928_v20, %v5923_v36 }
 0x78f   : > { %8375 = vmatprep.subr.bf16.mxu0 %v12516_v37  ;;  %v8231_v47 = vpop.f32.mrf.mxu0 }
 0x790   : > { %v6492_v49 = vcombine.low %v6437_v2, %v6438_v57 }
 0x791   : > { %v5926_v56 = vpop.f32.mrf.mxu0 }
 0x792   : > { %6524 = vst [vmem:[%s10967_s12 + $0x48] sm:$0xff] %v6492_v49 }
 0x793   : > { %v8232_v22 = vpop.f32.mrf.mxu0 }
 0x796   : > { %8376 = vmatpush3.bf16.xpose.msra.mxu0 %v12808_v41  ;;  %v6046_v41 = vpop.f32.mrf.mxu1 }
 0x797   : > { %8377 = vmatprep.subr.bf16.mxu0 %v12516_v37 }
 0x79e   : > { %8378 = vmatpush3.bf16.xpose.msra.mxu0 %v12809_v7 }
 0x79f   : > { %8379 = vmatprep.subr.bf16.mxu0 %v12516_v37 }
 0x7a6   : > { %8380 = vmatpush3.bf16.xpose.msra.mxu0 %v12810_v46  ;;  %v8292_v46 = vpop.f32.mrf.mxu1 }
 0x7a7   : > { %8381 = vmatprep.subr.bf16.mxu0 %v12516_v37 }
 0x7ae   : > { %8382 = vmatpush3.bf16.xpose.msra.mxu0 %v12811_v40  ;;  %v12818_v40 = vld [vmem:[#allocation48_spill] sm:$0xff] }
 0x7af   : > { %8383 = vmatprep.subr.bf16.mxu0 %v12516_v37 }
 0x7b6   : > { %8384 = vmatpush3.bf16.xpose.msra.mxu0 %v12812_v35  ;;  %v6123_v35 = vpop.f32.mrf.mxu1 }
 0x7b7   : > { %8385 = vmatprep.subr.bf16.mxu0 %v12516_v37  ;;  %v6443_v30 = vadd.f32 %v10928_v20, %v6123_v35 }
 0x7b8   : > { %v8331_v8 = vpop.f32.mrf.mxu1 }
 0x7ba   : > { %v6126_v14 = vpop.f32.mrf.mxu1 }
 0x7bc   : > { %v8332_v59 = vpop.f32.mrf.mxu1 }
 0x7be   : > { %8386 = vmatpush3.bf16.xpose.msra.mxu0 %v12813_v48  ;;  %v12819_v48 = vld [vmem:[#allocation70_spill] sm:$0xff]  ;;  %v6203_v33 = vpop.f32.mrf.mxu1 }
 0x7bf   : > { %8387 = vmatprep.subr.bf16.mxu0 %v12516_v37  ;;  %v6445_v28 = vadd.f32 %v10928_v20, %v6203_v33 }
 0x7c6   : > { %8388 = vmatpush3.bf16.xpose.msra.mxu0 %v12814_v18  ;;  %v8371_v18 = vpop.f32.mrf.mxu1 }
 0x7c7   : > { %8413 = vmatprep.subr.bf16.mxu0 %v12516_v37 }
 0x7c8   : > { %v6206_v45 = vpop.f32.mrf.mxu1 }
 0x7ca   : > { %v8372_v21 = vpop.f32.mrf.mxu1 }
 0x7cc   : > { %v6283_v24 = vpop.f32.mrf.mxu1 }
 0x7cd   : > { %8390 = vmatmul.mubr.bf16.vlgmr.msra.gmra.mxu0 %v12174_v32  ;;  %v6003_v11 = vpop.f32.mrf.mxu0 }
 0x7ce   : > { %8414 = vmatpush3.bf16.xpose.msra.mxu0 %v12815_v58  ;;  %8429 = vmatprep.mubr.msk.bf16.mxu0 %vm8894_vm0, %v12516_v37  ;;  %v6440_v1 = vadd.f32 %v10928_v20, %v6003_v11  ;;  %v8411_v53 = vpop.f32.mrf.mxu1 }
 0x7cf   : > { %8415 = vmatprep.subr.bf16.mxu0 %v12516_v37  ;;  %v8271_v17 = vpop.f32.mrf.mxu0 }
 0x7d0   : > { %v6493_v55 = vcombine.low %v6439_v54, %v6440_v1  ;;  %v6286_v38 = vpop.f32.mrf.mxu1  ;;  %v6447_v54 = vadd.f32 %v10928_v20, %v6283_v24 }
 0x7d1   : > { %v6006_v31 = vpop.f32.mrf.mxu0 }
 0x7d2   : > { %6525 = vst [vmem:[%s10967_s12 + $0x50] sm:$0xff] %v6493_v55 }
 0x7d3   : > { %v8272_v7 = vpop.f32.mrf.mxu0 }
 0x7d6   : > { %8416 = vmatpush3.bf16.xpose.msra.mxu0 %v12816_v9 }
 0x7d7   : > { %8417 = vmatprep.subr.bf16.mxu0 %v12516_v37 }
 0x7de   : > { %8418 = vmatpush3.bf16.xpose.msra.mxu0 %v12817_v52 }
 0x7df   : > { %8419 = vmatprep.subr.bf16.mxu0 %v12516_v37 }
 0x7e6   : > { %8420 = vmatpush3.bf16.xpose.msra.mxu0 %v12818_v40 }
 0x7e7   : > { %8421 = vmatprep.subr.bf16.mxu0 %v12516_v37 }
 0x7ee   : > { %8422 = vmatpush3.bf16.xpose.msra.mxu0 %v12819_v48 }
 0x7ef   : > { %8423 = vmatprep.subr.bf16.mxu0 %v12516_v37 }
 0x7f6   : > { %8424 = vmatpush3.bf16.xpose.msra.mxu0 %v12820_v39 }
 0x7f7   : > { %8425 = vmatprep.subr.bf16.mxu0 %v12516_v37 }
 0x7fe   : > { %8426 = vmatpush3.bf16.xpose.msra.mxu0 %v12821_v10 }
 0x7ff   : > { %8427 = vmatprep.subr.bf16.mxu0 %v12516_v37 }
 0x806   : > { %8428 = vmatpush3.bf16.xpose.msra.mxu0 %v12822_v12 }
 0x807   : > { %8453 = vmatprep.subr.bf16.mxu0 %v12516_v37 }
 0x80d   : > { %8430 = vmatmul.mubr.bf16.vlgmr.msra.gmra.mxu0 %v12174_v32  ;;  %v6083_v3 = vpop.f32.mrf.mxu0 }
 0x80e   : > { %8454 = vmatpush3.bf16.xpose.msra.mxu0 %v12029_v0  ;;  %v6442_v13 = vadd.f32 %v10928_v20, %v6083_v3  ;;  %8469 = vmatprep.mubr.msk.bf16.mxu0 %vm8894_vm0, %v12516_v37  ;;  %v8412_v0 = vpop.f32.mrf.mxu1 }
 0x80f   : > { %8455 = vmatprep.subr.bf16.mxu0 %v12516_v37  ;;  %v8311_v34 = vpop.f32.mrf.mxu0 }
 0x810   : > { %v6494_v6 = vcombine.low %v6441_v27, %v6442_v13  ;;  %v6363_v51 = vpop.f32.mrf.mxu1 }
 0x811   : > { %v6086_v58 = vpop.f32.mrf.mxu0  ;;  %v6449_v55 = vadd.f32 %v10928_v20, %v6363_v51 }
 0x812   : > { %6526 = vst [vmem:[%s10967_s12 + $0x58] sm:$0xff] %v6494_v6  ;;  %v8451_v57 = vpop.f32.mrf.mxu1 }
 0x813   : > { %v8312_v42 = vpop.f32.mrf.mxu0 }
 0x814   : > { %v6366_v47 = vpop.f32.mrf.mxu1 }
 0x816   : > { %8456 = vmatpush3.bf16.xpose.msra.mxu0 %v5126_v61 }
 0x817   : > { %8457 = vmatprep.subr.bf16.mxu0 %v12516_v37 }
 0x81e   : > { %8458 = vmatpush3.bf16.xpose.msra.mxu0 %v12016_v43  ;;  %v12826_v43 = vld [vmem:[#allocation75_spill] sm:$0xff] }
 0x81f   : > { %8459 = vmatprep.subr.bf16.mxu0 %v12516_v37 }
 0x826   : > { %8460 = vmatpush3.bf16.xpose.msra.mxu0 %v12022_v62 }
 0x827   : > { %8461 = vmatprep.subr.bf16.mxu0 %v12516_v37 }
 0x82e   : > { %8462 = vmatpush3.bf16.xpose.msra.mxu0 %v12823_v19 }
 0x82f   : > { %8463 = vmatprep.subr.bf16.mxu0 %v12516_v37 }
 0x836   : > { %8464 = vmatpush3.bf16.xpose.msra.mxu0 %v12824_v4 }
 0x837   : > { %8465 = vmatprep.subr.bf16.mxu0 %v12516_v37 }
 0x83e   : > { %8466 = vmatpush3.bf16.xpose.msra.mxu0 %v12825_v60 }
 0x83f   : > { %8467 = vmatprep.subr.bf16.mxu0 %v12516_v37  ;;  %v8452_v37 = vpop.f32.mrf.mxu1 }
 0x846   : > { %8468 = vmatpush3.bf16.xpose.msra.mxu0 %v12826_v43 }
 0x84d   : > { %8470 = vmatmul.mubr.bf16.vlgmr.msra.gmra.mxu0 %v12174_v32  ;;  %v6163_v62 = vpop.f32.mrf.mxu0 }
 0x84e   : > { %v6444_v50 = vadd.f32 %v10928_v20, %v6163_v62 }
 0x84f   : > { %v8351_v16 = vpop.f32.mrf.mxu0 }
 0x850   : > { %v6495_v2 = vcombine.low %v6443_v30, %v6444_v50 }
 0x851   : > { %v6166_v9 = vpop.f32.mrf.mxu0 }
 0x852   : > { %6527 = vst [vmem:[%s10967_s12 + $0x60] sm:$0xff] %v6495_v2 }
 0x853   : > { %v8352_v36 = vpop.f32.mrf.mxu0 }
 0x88d   : > { %v6243_v49 = vpop.f32.mrf.mxu0 }
 0x88e   : > { %v6446_v32 = vadd.f32 %v10928_v20, %v6243_v49 }
 0x88f   : > { %v8391_v56 = vpop.f32.mrf.mxu0 }
 0x890   : > { %v6496_v23 = vcombine.low %v6445_v28, %v6446_v32 }
 0x891   : > { %v6246_v22 = vpop.f32.mrf.mxu0 }
 0x892   : > { %6528 = vst [vmem:[%s10967_s12 + $0x68] sm:$0xff] %v6496_v23 }
 0x893   : > { %v8392_v26 = vpop.f32.mrf.mxu0 }
 0x8cd   : > { %v6323_v52 = vpop.f32.mrf.mxu0 }
 0x8ce   : > { %v6448_v11 = vadd.f32 %v10928_v20, %v6323_v52 }
 0x8cf   : > { %v8431_v5 = vpop.f32.mrf.mxu0 }
 0x8d0   : > { %v6497_v1 = vcombine.low %v6447_v54, %v6448_v11 }
 0x8d1   : > { %v6326_v17 = vpop.f32.mrf.mxu0 }
 0x8d2   : > { %6529 = vst [vmem:[%s10967_s12 + $0x70] sm:$0xff] %v6497_v1 }
 0x8d3   : > { %v8432_v44 = vpop.f32.mrf.mxu0 }
 0x90d   : > { %v6403_v31 = vpop.f32.mrf.mxu0 }
 0x90e   : > { %v6450_v41 = vadd.f32 %v10928_v20, %v6403_v31 }
 0x90f   : > { %v8471_v7 = vpop.f32.mrf.mxu0 }
 0x910   : > { %v6498_v46 = vcombine.low %v6449_v55, %v6450_v41 }
 0x911   : > { %v6406_v40 = vpop.f32.mrf.mxu0 }
 0x912   : > { %6530 = vst [vmem:[%s10967_s12 + $0x78] sm:$0xff] %v6498_v46 }
 0x913   : > { %v8472_v35 = vpop.f32.mrf.mxu0 }
 0x914   : > { %8803 = shalt.err (!%p8800_p12)
}
 0x915   : > { %s8804_s12 = scalar_lea.hbm %s12390_s15, 2048  ;;  %s8808_s26 = scalar_lea.hbm %s12449_s8, 4096 }
 0x916   : > { %p8805_p13 = scmp.ne.s32.totalorder %s12390_s15, %s8804_s12  ;;  %p8809_p10 = scmp.lt.s32.totalorder %s12390_s15, %s12449_s8 }
 0x917   : > { %p8810_p11 = scmp.lt.s32.totalorder %s8808_s26, %s8804_s12 }
 0x918   : > { %p8806_p0 = pnand %p8805_p13, %p9044_p3 }
 0x919   : > { %p8811_p1 = por %p8810_p11, %p8809_p10 }
 0x91a   : > { %p8807_p5 = pneg %p8806_p0 }
 0x91c   : > { %p8812_p4 = pnand %p8811_p1, %p8807_p5 }
 0x91e   : > { %8815 = shalt.err (!%p8812_p4)
}
 0x91f   : > { %s8897_s20 = smov 128   ;;  %s8898_s27 = smov 8  }
 0x920   : > { %8485 = dma.vmem_to_hbm [thread:$0]  (%p9044_p3), %s12392_s24, 2048, %s12390_s15, %s6532_s10, %s8897_s20, %s8897_s20, %s8898_s27  }
 0x921 PF: > { %s12827_s28 = sld [smem:[#allocation17_spill]] }
 0x922   : > { %s12829_s23 = sld [smem:[#allocation19_spill]] }
 0x927   : > { %s6562_s18 = sand.u32 1, %s12827_s28  }
 0x928   : > { %p12830_p8 = scmp.ge.s32.totalorder %s12829_s23, 2  ;;  %s6563_s25 = scalar_lea.sflag [#allocation5], %s6562_s18 }
 0x92a   : > { %p8502_p2 = pnand %p12830_p8, %p8992_p6 }
 0x92c   : > { %p8503_p7 = pneg %p8502_p2 }
 0x92e   : > { %8857 = dma.done.wait (%p8503_p7), %s6563_s25, 2048  }
 0x92f   : > { %8859 = vsyncadd (%p8503_p7), %s6563_s25, 4294965248  ;;  %s30_s12 = sadd.s32 1, %s12829_s23   ;;  %s12831_s17 = sld [smem:[#allocation18_spill]] }
 0x930   : > { %p27_p9 = scmp.ge.s32.totalorder %s30_s12, 4   ;;  %s12832_s9 = sld [smem:[#allocation22_spill]] }
 0x931   : > { %s12833_s19 = sld [smem:[#allocation21_spill]]  ;;  %s12834_s29 = smov %s8866_s30 }
 0x932   : > { %s12836_s10 = smov %s8878_s11 }
 0x933   :  { %29 = sbr.rel (!%p27_p9) target bundleno = 13 (0xd), region = 118 }
 0x935   : > { %s12835_s30 = smov %s12831_s17 }
 0x937   : > { %s12837_s11 = smov %s12833_s19 }
 0x938   :  { %6568 = vsyncpa [#allocation4], 1 }
 0x939   :  { %6570 = vsyncpa [#allocation4 + $0x1], 1 }
 0x93a   :  { %6571 = vsyncpa [#allocation7], 1 }
 0x93b   :  { %6573 = vsyncpa [#allocation7 + $0x1], 1 }
 0x93c   :  { %6574 = vsyncpa [#allocation10], 1 }
 0x93d   :  { %6575 = vsyncpa [#allocation5], 1 }
 0x93e   :  { %6577 = vsyncpa [#allocation5 + $0x1], 1 }

</bundles_post_ra>
